<compile_context>
chip_gen: v6e
topology: v6e:2x2x1
jax: 0.10.0
libtpu: 0.0.40
codegen_flags: <defaults>
</compile_context>

<pallas_src>
import jax
import jax.numpy as jnp
from jax.experimental import pallas as pl
from jax.experimental.pallas import tpu as pltpu

KS = 3        # 3x3 conv, stride 1, pad 1
LANE = 128    # TPU lane width


def _conv3x3_padded_width(src_ref, w_ref, Wp, rows):
    """'Same' 3x3 conv computed over the padded width.

    src_ref: (R_SRC, Cp) zero-padded image, flattened row-major over (Hp, Wp)
             (plus >=2 trailing zero rows so the last taps stay in bounds).
    w_ref:   (KS, KS*Cp, Cp); w_ref[kh] rows are ordered (kw, cin).
    Returns a (rows, Cp) f32 accumulator where row r corresponds to output
    pixel (r // Wp, r % Wp); entries with (r % Wp) >= W are wrap garbage that
    the caller masks / strips.
    """
    acc = None
    for kh in range(KS):
        base = kh * Wp
        # Three contiguous row-offset views, lane-concatenated -> (rows, 3*Cp)
        lhs = jnp.concatenate(
            [src_ref[base + kw: base + kw + rows, :] for kw in range(KS)],
            axis=-1)
        p = jnp.dot(lhs, w_ref[kh], preferred_element_type=jnp.float32)
        acc = p if acc is None else acc + p
    return acc


def basic_block_kernel(x_ref, w1_ref, b1_ref, w2_ref, b2_ref, mask_ref,
                       out_ref, xpad_ref, h1pad_ref):
    """Fused conv1+bn1+relu -> conv2+bn2 -> +residual -> relu (one sample)."""
    _, H, W, Cp = x_ref.shape
    Wp = W + 2
    rows = H * Wp  # conv output rows in the padded-width scheme

    # ---- build the zero-padded, width-flattened input in VMEM -------------
    xpad_ref[...] = jnp.zeros_like(xpad_ref)
    for h in range(H):
        xpad_ref[pl.ds((h + 1) * Wp + 1, W), :] = x_ref[0, h, :, :]

    # ---- conv1 (bn1 scale folded into w1) + bias + relu --------------------
    h1 = _conv3x3_padded_width(xpad_ref, w1_ref, Wp, rows)
    # mask zeros the 2 wrap columns per row; they land exactly in the padding
    # columns of h1pad below, so the store fills the interior correctly.
    h1 = jnp.maximum(h1 + b1_ref[...], 0.0) * mask_ref[...]

    # ---- stage padded h1 for conv2 (stays in VMEM, never touches HBM) ------
    h1pad_ref[...] = jnp.zeros_like(h1pad_ref)
    h1pad_ref[pl.ds(Wp + 1, rows), :] = h1

    # ---- conv2 (bn2 scale folded into w2) + bias ---------------------------
    y = _conv3x3_padded_width(h1pad_ref, w2_ref, Wp, rows) + b2_ref[...]
    # Reuse xpad scratch as a staging buffer for the conv2 result so we read
    # it back row-wise (bounds register pressure; xpad is dead by now).
    xpad_ref[pl.ds(0, rows), :] = y

    # ---- strip wrap columns, add residual, relu, store ---------------------
    for h in range(H):
        row = xpad_ref[pl.ds(h * Wp, W), :]
        out_ref[0, h, :, :] = jnp.maximum(
            row + x_ref[0, h, :, :], 0.0).astype(out_ref.dtype)


def basic_block_forward(x_nchw, params, eps=1e-5):
    """Pallas implementation of BasicBlock.forward (stride=1, no downsample)."""
    N, C, H, W = x_nchw.shape
    Cp = ((C + LANE - 1) // LANE) * LANE          # lane-dense channel count
    Hp, Wp = H + 2, W + 2
    rows = H * Wp                                 # conv rows (padded width)
    # padded-image rows + 2 extra zero rows for the furthest tap, rounded to 8
    r_src = ((Hp * Wp + 2 + 7) // 8) * 8

    # NCHW -> NHWC, pad channels to the lane width (layout prep only).
    x = jnp.transpose(x_nchw, (0, 2, 3, 1))
    x = jnp.pad(x, ((0, 0), (0, 0), (0, 0), (0, Cp - C)))

    def fold(w_oihw, gamma, beta, mean, var):
        # BN (inference) folded: scale into the weights, bias kept separate.
        s = gamma / jnp.sqrt(var + eps)
        b = beta - mean * s
        w = jnp.transpose(w_oihw, (2, 3, 1, 0)) * s[None, None, None, :]
        w = jnp.pad(w, ((0, 0), (0, 0), (0, Cp - C), (0, Cp - C)))
        w = w.reshape(KS, KS * Cp, Cp)            # rows ordered (kw, cin)
        b = jnp.pad(b, (0, Cp - C)).reshape(1, Cp)
        return w, b

    w1, b1 = fold(params["w1"], params["g1"], params["be1"],
                  params["m1"], params["v1"])
    w2, b2 = fold(params["w2"], params["g2"], params["be2"],
                  params["m2"], params["v2"])

    # 1.0 for valid columns (w < W), 0.0 for the 2 wrap columns per row.
    mask = (jnp.arange(rows) % Wp < W).astype(jnp.float32).reshape(rows, 1)

    out = pl.pallas_call(
        basic_block_kernel,
        out_shape=jax.ShapeDtypeStruct((N, H, W, Cp), jnp.float32),
        grid_spec=pltpu.PrefetchScalarGridSpec(
            num_scalar_prefetch=0,
            grid=(N,),
            in_specs=[
                pl.BlockSpec((1, H, W, Cp), lambda n: (n, 0, 0, 0)),
                pl.BlockSpec((KS, KS * Cp, Cp), lambda n: (0, 0, 0)),
                pl.BlockSpec((1, Cp), lambda n: (0, 0)),
                pl.BlockSpec((KS, KS * Cp, Cp), lambda n: (0, 0, 0)),
                pl.BlockSpec((1, Cp), lambda n: (0, 0)),
                pl.BlockSpec((rows, 1), lambda n: (0, 0)),
            ],
            out_specs=pl.BlockSpec((1, H, W, Cp), lambda n: (n, 0, 0, 0)),
            scratch_shapes=[
                pltpu.VMEM((r_src, Cp), jnp.float32),   # padded x / staging
                pltpu.VMEM((r_src, Cp), jnp.float32),   # padded h1
            ],
        ),
        compiler_params=pltpu.CompilerParams(
            dimension_semantics=("parallel",)),
    )(x, w1, b1, w2, b2, mask)

    out = out[..., :C]                             # drop lane padding
    return jnp.transpose(out, (0, 3, 1, 2))        # back to NCHW


def reference_forward(x_nchw, params, eps=1e-5):
    """Pure-JAX reference (lax conv) for correctness check."""
    x = jnp.transpose(x_nchw, (0, 2, 3, 1))

    def conv(h, w_oihw):
        w = jnp.transpose(w_oihw, (2, 3, 1, 0))
        return jax.lax.conv_general_dilated(
            h, w, (1, 1), ((1, 1), (1, 1)),
            dimension_numbers=("NHWC", "HWIO", "NHWC"))

    def bn(h, g, be, m, v):
        return (h - m) / jnp.sqrt(v + eps) * g + be

    h = jax.nn.relu(bn(conv(x, params["w1"]), params["g1"], params["be1"],
                       params["m1"], params["v1"]))
    h = bn(conv(h, params["w2"]), params["g2"], params["be2"],
           params["m2"], params["v2"])
    h = jax.nn.relu(h + x)
    return jnp.transpose(h, (0, 3, 1, 2))


if __name__ == "__main__":
    # inplanes = planes = 4 (residual add requires equal dims), batch=2, 16x16.
    N, C, H, W = 2, 4, 16, 16

    key = jax.random.PRNGKey(0)
    keys = jax.random.split(key, 12)
    x = jax.random.normal(keys[0], (N, C, H, W), jnp.float32)

    params = {
        "w1": jax.random.normal(keys[1], (C, C, KS, KS), jnp.float32) * 0.1,
        "w2": jax.random.normal(keys[2], (C, C, KS, KS), jnp.float32) * 0.1,
        "g1": 1.0 + 0.1 * jax.random.normal(keys[3], (C,), jnp.float32),
        "be1": 0.1 * jax.random.normal(keys[4], (C,), jnp.float32),
        "m1": 0.1 * jax.random.normal(keys[5], (C,), jnp.float32),
        "v1": 1.0 + 0.1 * jax.random.uniform(keys[6], (C,), jnp.float32),
        "g2": 1.0 + 0.1 * jax.random.normal(keys[7], (C,), jnp.float32),
        "be2": 0.1 * jax.random.normal(keys[8], (C,), jnp.float32),
        "m2": 0.1 * jax.random.normal(keys[9], (C,), jnp.float32),
        "v2": 1.0 + 0.1 * jax.random.uniform(keys[10], (C,), jnp.float32),
    }

    out = jax.jit(basic_block_forward)(x, params)
    out = jax.block_until_ready(out)

    ref = reference_forward(x, params)
    assert out.shape == (N, C, H, W)
    assert jnp.allclose(out, ref, atol=1e-4, rtol=1e-4), (
        float(jnp.max(jnp.abs(out - ref))))

    print("KERNEL_OK")
</pallas_src>

<mosaic_0001>
module attributes {stable_mosaic.version = 11 : i64} {
  func.func @basic_block_kernel(%arg0: i32, %arg1: memref<1x16x16x128xf32, #tpu.memory_space<vmem>>, %arg2: memref<3x384x128xf32, #tpu.memory_space<vmem>>, %arg3: memref<1x128xf32, #tpu.memory_space<vmem>>, %arg4: memref<3x384x128xf32, #tpu.memory_space<vmem>>, %arg5: memref<1x128xf32, #tpu.memory_space<vmem>>, %arg6: memref<288x1xf32, #tpu.memory_space<vmem>>, %arg7: memref<1x16x16x128xf32, #tpu.memory_space<vmem>>, %arg8: memref<328x128xf32, #tpu.memory_space<vmem>>, %arg9: memref<328x128xf32, #tpu.memory_space<vmem>>) attributes {dimension_semantics = [#tpu.dimension_semantics<parallel>], iteration_bounds = array<i64: 2>, scalar_prefetch = 0 : i64, scratch_operands = 2 : i64, tpu.core_type = #tpu.core_type<tc>, window_params = [{transform_indices = @transform_0, window_bounds = array<i64: 1, 16, 16, 128>}, {pipeline_mode = #tpu.pipeline_mode<synchronous>, transform_indices = @transform_1, window_bounds = array<i64: 3, 384, 128>}, {pipeline_mode = #tpu.pipeline_mode<synchronous>, transform_indices = @transform_2, window_bounds = array<i64: 1, 128>}, {pipeline_mode = #tpu.pipeline_mode<synchronous>, transform_indices = @transform_3, window_bounds = array<i64: 3, 384, 128>}, {pipeline_mode = #tpu.pipeline_mode<synchronous>, transform_indices = @transform_4, window_bounds = array<i64: 1, 128>}, {pipeline_mode = #tpu.pipeline_mode<synchronous>, transform_indices = @transform_5, window_bounds = array<i64: 288, 1>}, {transform_indices = @transform_6, window_bounds = array<i64: 1, 16, 16, 128>}]} {
    %cst = arith.constant 0.000000e+00 : f32
    %0 = vector.broadcast %cst : f32 to vector<328x128xf32>
    %c0 = arith.constant 0 : index
    %c0_0 = arith.constant 0 : index
    %1 = vector.load %arg8[%c0, %c0_0] : memref<328x128xf32, #tpu.memory_space<vmem>>, vector<328x128xf32>
    tpu.vector_store %arg8[%c0, %c0_0], %0 {strides = array<i32>} : memref<328x128xf32, #tpu.memory_space<vmem>>, vector<328x128xf32>,
    %c0_1 = arith.constant 0 : index
    %c0_2 = arith.constant 0 : index
    %c0_3 = arith.constant 0 : index
    %c0_4 = arith.constant 0 : index
    %2 = vector.load %arg1[%c0_1, %c0_2, %c0_3, %c0_4] : memref<1x16x16x128xf32, #tpu.memory_space<vmem>>, vector<1x1x16x128xf32>
    %3 = vector.shape_cast %2 : vector<1x1x16x128xf32> to vector<16x128xf32>
    %c19 = arith.constant 19 : index
    %c0_5 = arith.constant 0 : index
    %4 = vector.load %arg8[%c19, %c0_5] : memref<328x128xf32, #tpu.memory_space<vmem>>, vector<16x128xf32>
    tpu.vector_store %arg8[%c19, %c0_5], %3 {strides = array<i32>} : memref<328x128xf32, #tpu.memory_space<vmem>>, vector<16x128xf32>,
    %c0_6 = arith.constant 0 : index
    %c1 = arith.constant 1 : index
    %c0_7 = arith.constant 0 : index
    %c0_8 = arith.constant 0 : index
    %5 = vector.load %arg1[%c0_6, %c1, %c0_7, %c0_8] : memref<1x16x16x128xf32, #tpu.memory_space<vmem>>, vector<1x1x16x128xf32>
    %6 = vector.shape_cast %5 : vector<1x1x16x128xf32> to vector<16x128xf32>
    %c37 = arith.constant 37 : index
    %c0_9 = arith.constant 0 : index
    %7 = vector.load %arg8[%c37, %c0_9] : memref<328x128xf32, #tpu.memory_space<vmem>>, vector<16x128xf32>
    tpu.vector_store %arg8[%c37, %c0_9], %6 {strides = array<i32>} : memref<328x128xf32, #tpu.memory_space<vmem>>, vector<16x128xf32>,
    %c0_10 = arith.constant 0 : index
    %c2 = arith.constant 2 : index
    %c0_11 = arith.constant 0 : index
    %c0_12 = arith.constant 0 : index
    %8 = vector.load %arg1[%c0_10, %c2, %c0_11, %c0_12] : memref<1x16x16x128xf32, #tpu.memory_space<vmem>>, vector<1x1x16x128xf32>
    %9 = vector.shape_cast %8 : vector<1x1x16x128xf32> to vector<16x128xf32>
    %c55 = arith.constant 55 : index
    %c0_13 = arith.constant 0 : index
    %10 = vector.load %arg8[%c55, %c0_13] : memref<328x128xf32, #tpu.memory_space<vmem>>, vector<16x128xf32>
    tpu.vector_store %arg8[%c55, %c0_13], %9 {strides = array<i32>} : memref<328x128xf32, #tpu.memory_space<vmem>>, vector<16x128xf32>,
    %c0_14 = arith.constant 0 : index
    %c3 = arith.constant 3 : index
    %c0_15 = arith.constant 0 : index
    %c0_16 = arith.constant 0 : index
    %11 = vector.load %arg1[%c0_14, %c3, %c0_15, %c0_16] : memref<1x16x16x128xf32, #tpu.memory_space<vmem>>, vector<1x1x16x128xf32>
    %12 = vector.shape_cast %11 : vector<1x1x16x128xf32> to vector<16x128xf32>
    %c73 = arith.constant 73 : index
    %c0_17 = arith.constant 0 : index
    %13 = vector.load %arg8[%c73, %c0_17] : memref<328x128xf32, #tpu.memory_space<vmem>>, vector<16x128xf32>
    tpu.vector_store %arg8[%c73, %c0_17], %12 {strides = array<i32>} : memref<328x128xf32, #tpu.memory_space<vmem>>, vector<16x128xf32>,
    %c0_18 = arith.constant 0 : index
    %c4 = arith.constant 4 : index
    %c0_19 = arith.constant 0 : index
    %c0_20 = arith.constant 0 : index
    %14 = vector.load %arg1[%c0_18, %c4, %c0_19, %c0_20] : memref<1x16x16x128xf32, #tpu.memory_space<vmem>>, vector<1x1x16x128xf32>
    %15 = vector.shape_cast %14 : vector<1x1x16x128xf32> to vector<16x128xf32>
    %c91 = arith.constant 91 : index
    %c0_21 = arith.constant 0 : index
    %16 = vector.load %arg8[%c91, %c0_21] : memref<328x128xf32, #tpu.memory_space<vmem>>, vector<16x128xf32>
    tpu.vector_store %arg8[%c91, %c0_21], %15 {strides = array<i32>} : memref<328x128xf32, #tpu.memory_space<vmem>>, vector<16x128xf32>,
    %c0_22 = arith.constant 0 : index
    %c5 = arith.constant 5 : index
    %c0_23 = arith.constant 0 : index
    %c0_24 = arith.constant 0 : index
    %17 = vector.load %arg1[%c0_22, %c5, %c0_23, %c0_24] : memref<1x16x16x128xf32, #tpu.memory_space<vmem>>, vector<1x1x16x128xf32>
    %18 = vector.shape_cast %17 : vector<1x1x16x128xf32> to vector<16x128xf32>
    %c109 = arith.constant 109 : index
    %c0_25 = arith.constant 0 : index
    %19 = vector.load %arg8[%c109, %c0_25] : memref<328x128xf32, #tpu.memory_space<vmem>>, vector<16x128xf32>
    tpu.vector_store %arg8[%c109, %c0_25], %18 {strides = array<i32>} : memref<328x128xf32, #tpu.memory_space<vmem>>, vector<16x128xf32>,
    %c0_26 = arith.constant 0 : index
    %c6 = arith.constant 6 : index
    %c0_27 = arith.constant 0 : index
    %c0_28 = arith.constant 0 : index
    %20 = vector.load %arg1[%c0_26, %c6, %c0_27, %c0_28] : memref<1x16x16x128xf32, #tpu.memory_space<vmem>>, vector<1x1x16x128xf32>
    %21 = vector.shape_cast %20 : vector<1x1x16x128xf32> to vector<16x128xf32>
    %c127 = arith.constant 127 : index
    %c0_29 = arith.constant 0 : index
    %22 = vector.load %arg8[%c127, %c0_29] : memref<328x128xf32, #tpu.memory_space<vmem>>, vector<16x128xf32>
    tpu.vector_store %arg8[%c127, %c0_29], %21 {strides = array<i32>} : memref<328x128xf32, #tpu.memory_space<vmem>>, vector<16x128xf32>,
    %c0_30 = arith.constant 0 : index
    %c7 = arith.constant 7 : index
    %c0_31 = arith.constant 0 : index
    %c0_32 = arith.constant 0 : index
    %23 = vector.load %arg1[%c0_30, %c7, %c0_31, %c0_32] : memref<1x16x16x128xf32, #tpu.memory_space<vmem>>, vector<1x1x16x128xf32>
    %24 = vector.shape_cast %23 : vector<1x1x16x128xf32> to vector<16x128xf32>
    %c145 = arith.constant 145 : index
    %c0_33 = arith.constant 0 : index
    %25 = vector.load %arg8[%c145, %c0_33] : memref<328x128xf32, #tpu.memory_space<vmem>>, vector<16x128xf32>
    tpu.vector_store %arg8[%c145, %c0_33], %24 {strides = array<i32>} : memref<328x128xf32, #tpu.memory_space<vmem>>, vector<16x128xf32>,
    %c0_34 = arith.constant 0 : index
    %c8 = arith.constant 8 : index
    %c0_35 = arith.constant 0 : index
    %c0_36 = arith.constant 0 : index
    %26 = vector.load %arg1[%c0_34, %c8, %c0_35, %c0_36] : memref<1x16x16x128xf32, #tpu.memory_space<vmem>>, vector<1x1x16x128xf32>
    %27 = vector.shape_cast %26 : vector<1x1x16x128xf32> to vector<16x128xf32>
    %c163 = arith.constant 163 : index
    %c0_37 = arith.constant 0 : index
    %28 = vector.load %arg8[%c163, %c0_37] : memref<328x128xf32, #tpu.memory_space<vmem>>, vector<16x128xf32>
    tpu.vector_store %arg8[%c163, %c0_37], %27 {strides = array<i32>} : memref<328x128xf32, #tpu.memory_space<vmem>>, vector<16x128xf32>,
    %c0_38 = arith.constant 0 : index
    %c9 = arith.constant 9 : index
    %c0_39 = arith.constant 0 : index
    %c0_40 = arith.constant 0 : index
    %29 = vector.load %arg1[%c0_38, %c9, %c0_39, %c0_40] : memref<1x16x16x128xf32, #tpu.memory_space<vmem>>, vector<1x1x16x128xf32>
    %30 = vector.shape_cast %29 : vector<1x1x16x128xf32> to vector<16x128xf32>
    %c181 = arith.constant 181 : index
    %c0_41 = arith.constant 0 : index
    %31 = vector.load %arg8[%c181, %c0_41] : memref<328x128xf32, #tpu.memory_space<vmem>>, vector<16x128xf32>
    tpu.vector_store %arg8[%c181, %c0_41], %30 {strides = array<i32>} : memref<328x128xf32, #tpu.memory_space<vmem>>, vector<16x128xf32>,
    %c0_42 = arith.constant 0 : index
    %c10 = arith.constant 10 : index
    %c0_43 = arith.constant 0 : index
    %c0_44 = arith.constant 0 : index
    %32 = vector.load %arg1[%c0_42, %c10, %c0_43, %c0_44] : memref<1x16x16x128xf32, #tpu.memory_space<vmem>>, vector<1x1x16x128xf32>
    %33 = vector.shape_cast %32 : vector<1x1x16x128xf32> to vector<16x128xf32>
    %c199 = arith.constant 199 : index
    %c0_45 = arith.constant 0 : index
    %34 = vector.load %arg8[%c199, %c0_45] : memref<328x128xf32, #tpu.memory_space<vmem>>, vector<16x128xf32>
    tpu.vector_store %arg8[%c199, %c0_45], %33 {strides = array<i32>} : memref<328x128xf32, #tpu.memory_space<vmem>>, vector<16x128xf32>,
    %c0_46 = arith.constant 0 : index
    %c11 = arith.constant 11 : index
    %c0_47 = arith.constant 0 : index
    %c0_48 = arith.constant 0 : index
    %35 = vector.load %arg1[%c0_46, %c11, %c0_47, %c0_48] : memref<1x16x16x128xf32, #tpu.memory_space<vmem>>, vector<1x1x16x128xf32>
    %36 = vector.shape_cast %35 : vector<1x1x16x128xf32> to vector<16x128xf32>
    %c217 = arith.constant 217 : index
    %c0_49 = arith.constant 0 : index
    %37 = vector.load %arg8[%c217, %c0_49] : memref<328x128xf32, #tpu.memory_space<vmem>>, vector<16x128xf32>
    tpu.vector_store %arg8[%c217, %c0_49], %36 {strides = array<i32>} : memref<328x128xf32, #tpu.memory_space<vmem>>, vector<16x128xf32>,
    %c0_50 = arith.constant 0 : index
    %c12 = arith.constant 12 : index
    %c0_51 = arith.constant 0 : index
    %c0_52 = arith.constant 0 : index
    %38 = vector.load %arg1[%c0_50, %c12, %c0_51, %c0_52] : memref<1x16x16x128xf32, #tpu.memory_space<vmem>>, vector<1x1x16x128xf32>
    %39 = vector.shape_cast %38 : vector<1x1x16x128xf32> to vector<16x128xf32>
    %c235 = arith.constant 235 : index
    %c0_53 = arith.constant 0 : index
    %40 = vector.load %arg8[%c235, %c0_53] : memref<328x128xf32, #tpu.memory_space<vmem>>, vector<16x128xf32>
    tpu.vector_store %arg8[%c235, %c0_53], %39 {strides = array<i32>} : memref<328x128xf32, #tpu.memory_space<vmem>>, vector<16x128xf32>,
    %c0_54 = arith.constant 0 : index
    %c13 = arith.constant 13 : index
    %c0_55 = arith.constant 0 : index
    %c0_56 = arith.constant 0 : index
    %41 = vector.load %arg1[%c0_54, %c13, %c0_55, %c0_56] : memref<1x16x16x128xf32, #tpu.memory_space<vmem>>, vector<1x1x16x128xf32>
    %42 = vector.shape_cast %41 : vector<1x1x16x128xf32> to vector<16x128xf32>
    %c253 = arith.constant 253 : index
    %c0_57 = arith.constant 0 : index
    %43 = vector.load %arg8[%c253, %c0_57] : memref<328x128xf32, #tpu.memory_space<vmem>>, vector<16x128xf32>
    tpu.vector_store %arg8[%c253, %c0_57], %42 {strides = array<i32>} : memref<328x128xf32, #tpu.memory_space<vmem>>, vector<16x128xf32>,
    %c0_58 = arith.constant 0 : index
    %c14 = arith.constant 14 : index
    %c0_59 = arith.constant 0 : index
    %c0_60 = arith.constant 0 : index
    %44 = vector.load %arg1[%c0_58, %c14, %c0_59, %c0_60] : memref<1x16x16x128xf32, #tpu.memory_space<vmem>>, vector<1x1x16x128xf32>
    %45 = vector.shape_cast %44 : vector<1x1x16x128xf32> to vector<16x128xf32>
    %c271 = arith.constant 271 : index
    %c0_61 = arith.constant 0 : index
    %46 = vector.load %arg8[%c271, %c0_61] : memref<328x128xf32, #tpu.memory_space<vmem>>, vector<16x128xf32>
    tpu.vector_store %arg8[%c271, %c0_61], %45 {strides = array<i32>} : memref<328x128xf32, #tpu.memory_space<vmem>>, vector<16x128xf32>,
    %c0_62 = arith.constant 0 : index
    %c15 = arith.constant 15 : index
    %c0_63 = arith.constant 0 : index
    %c0_64 = arith.constant 0 : index
    %47 = vector.load %arg1[%c0_62, %c15, %c0_63, %c0_64] : memref<1x16x16x128xf32, #tpu.memory_space<vmem>>, vector<1x1x16x128xf32>
    %48 = vector.shape_cast %47 : vector<1x1x16x128xf32> to vector<16x128xf32>
    %c289 = arith.constant 289 : index
    %c0_65 = arith.constant 0 : index
    %49 = vector.load %arg8[%c289, %c0_65] : memref<328x128xf32, #tpu.memory_space<vmem>>, vector<16x128xf32>
    tpu.vector_store %arg8[%c289, %c0_65], %48 {strides = array<i32>} : memref<328x128xf32, #tpu.memory_space<vmem>>, vector<16x128xf32>,
    %c0_66 = arith.constant 0 : index
    %c0_67 = arith.constant 0 : index
    %50 = vector.load %arg8[%c0_66, %c0_67] : memref<328x128xf32, #tpu.memory_space<vmem>>, vector<288x128xf32>
    %c1_68 = arith.constant 1 : index
    %c0_69 = arith.constant 0 : index
    %51 = vector.load %arg8[%c1_68, %c0_69] : memref<328x128xf32, #tpu.memory_space<vmem>>, vector<288x128xf32>
    %c2_70 = arith.constant 2 : index
    %c0_71 = arith.constant 0 : index
    %52 = vector.load %arg8[%c2_70, %c0_71] : memref<328x128xf32, #tpu.memory_space<vmem>>, vector<288x128xf32>
    %53 = tpu.concatenate %50, %51, %52 in 1 : vector<288x128xf32>, vector<288x128xf32>, vector<288x128xf32> -> vector<288x384xf32>
    %c0_72 = arith.constant 0 : index
    %c0_73 = arith.constant 0 : index
    %c0_74 = arith.constant 0 : index
    %54 = vector.load %arg2[%c0_72, %c0_73, %c0_74] : memref<3x384x128xf32, #tpu.memory_space<vmem>>, vector<1x384x128xf32>
    %55 = vector.shape_cast %54 : vector<1x384x128xf32> to vector<384x128xf32>
    %cst_75 = arith.constant dense<0.000000e+00> : vector<288x128xf32>
    %56 = tpu.matmul %53, %55, %cst_75 {dimension_numbers = #tpu.dot_dimension_numbers<[1], [0], [0], [1], [0, 0, 1, 1], [], []>} : vector<288x384xf32>, vector<384x128xf32>, vector<288x128xf32> -> vector<288x128xf32>
    %c18 = arith.constant 18 : index
    %c0_76 = arith.constant 0 : index
    %57 = vector.load %arg8[%c18, %c0_76] : memref<328x128xf32, #tpu.memory_space<vmem>>, vector<288x128xf32>
    %c19_77 = arith.constant 19 : index
    %c0_78 = arith.constant 0 : index
    %58 = vector.load %arg8[%c19_77, %c0_78] : memref<328x128xf32, #tpu.memory_space<vmem>>, vector<288x128xf32>
    %c20 = arith.constant 20 : index
    %c0_79 = arith.constant 0 : index
    %59 = vector.load %arg8[%c20, %c0_79] : memref<328x128xf32, #tpu.memory_space<vmem>>, vector<288x128xf32>
    %60 = tpu.concatenate %57, %58, %59 in 1 : vector<288x128xf32>, vector<288x128xf32>, vector<288x128xf32> -> vector<288x384xf32>
    %c1_80 = arith.constant 1 : index
    %c0_81 = arith.constant 0 : index
    %c0_82 = arith.constant 0 : index
    %61 = vector.load %arg2[%c1_80, %c0_81, %c0_82] : memref<3x384x128xf32, #tpu.memory_space<vmem>>, vector<1x384x128xf32>
    %62 = vector.shape_cast %61 : vector<1x384x128xf32> to vector<384x128xf32>
    %cst_83 = arith.constant dense<0.000000e+00> : vector<288x128xf32>
    %63 = tpu.matmul %60, %62, %cst_83 {dimension_numbers = #tpu.dot_dimension_numbers<[1], [0], [0], [1], [0, 0, 1, 1], [], []>} : vector<288x384xf32>, vector<384x128xf32>, vector<288x128xf32> -> vector<288x128xf32>
    %64 = arith.addf %56, %63 : vector<288x128xf32>
    %c36 = arith.constant 36 : index
    %c0_84 = arith.constant 0 : index
    %65 = vector.load %arg8[%c36, %c0_84] : memref<328x128xf32, #tpu.memory_space<vmem>>, vector<288x128xf32>
    %c37_85 = arith.constant 37 : index
    %c0_86 = arith.constant 0 : index
    %66 = vector.load %arg8[%c37_85, %c0_86] : memref<328x128xf32, #tpu.memory_space<vmem>>, vector<288x128xf32>
    %c38 = arith.constant 38 : index
    %c0_87 = arith.constant 0 : index
    %67 = vector.load %arg8[%c38, %c0_87] : memref<328x128xf32, #tpu.memory_space<vmem>>, vector<288x128xf32>
    %68 = tpu.concatenate %65, %66, %67 in 1 : vector<288x128xf32>, vector<288x128xf32>, vector<288x128xf32> -> vector<288x384xf32>
    %c2_88 = arith.constant 2 : index
    %c0_89 = arith.constant 0 : index
    %c0_90 = arith.constant 0 : index
    %69 = vector.load %arg2[%c2_88, %c0_89, %c0_90] : memref<3x384x128xf32, #tpu.memory_space<vmem>>, vector<1x384x128xf32>
    %70 = vector.shape_cast %69 : vector<1x384x128xf32> to vector<384x128xf32>
    %cst_91 = arith.constant dense<0.000000e+00> : vector<288x128xf32>
    %71 = tpu.matmul %68, %70, %cst_91 {dimension_numbers = #tpu.dot_dimension_numbers<[1], [0], [0], [1], [0, 0, 1, 1], [], []>} : vector<288x384xf32>, vector<384x128xf32>, vector<288x128xf32> -> vector<288x128xf32>
    %72 = arith.addf %64, %71 : vector<288x128xf32>
    %c0_92 = arith.constant 0 : index
    %c0_93 = arith.constant 0 : index
    %73 = vector.load %arg3[%c0_92, %c0_93] : memref<1x128xf32, #tpu.memory_space<vmem>>, vector<1x128xf32>
    %74 = vector.broadcast %73 : vector<1x128xf32> to vector<288x128xf32>
    %75 = arith.addf %72, %74 : vector<288x128xf32>
    %cst_94 = arith.constant 0.000000e+00 : f32
    %76 = vector.broadcast %cst_94 : f32 to vector<288x128xf32>
    %77 = arith.maximumf %75, %76 : vector<288x128xf32>
    %c0_95 = arith.constant 0 : index
    %c0_96 = arith.constant 0 : index
    %78 = vector.load %arg6[%c0_95, %c0_96] : memref<288x1xf32, #tpu.memory_space<vmem>>, vector<288x1xf32>
    %79 = vector.broadcast %78 : vector<288x1xf32> to vector<288x128xf32>
    %80 = arith.mulf %77, %79 : vector<288x128xf32>
    %cst_97 = arith.constant 0.000000e+00 : f32
    %81 = vector.broadcast %cst_97 : f32 to vector<328x128xf32>
    %c0_98 = arith.constant 0 : index
    %c0_99 = arith.constant 0 : index
    %82 = vector.load %arg9[%c0_98, %c0_99] : memref<328x128xf32, #tpu.memory_space<vmem>>, vector<328x128xf32>
    tpu.vector_store %arg9[%c0_98, %c0_99], %81 {strides = array<i32>} : memref<328x128xf32, #tpu.memory_space<vmem>>, vector<328x128xf32>,
    %c19_100 = arith.constant 19 : index
    %c0_101 = arith.constant 0 : index
    %83 = vector.load %arg9[%c19_100, %c0_101] : memref<328x128xf32, #tpu.memory_space<vmem>>, vector<288x128xf32>
    tpu.vector_store %arg9[%c19_100, %c0_101], %80 {strides = array<i32>} : memref<328x128xf32, #tpu.memory_space<vmem>>, vector<288x128xf32>,
    %c0_102 = arith.constant 0 : index
    %c0_103 = arith.constant 0 : index
    %84 = vector.load %arg9[%c0_102, %c0_103] : memref<328x128xf32, #tpu.memory_space<vmem>>, vector<288x128xf32>
    %c1_104 = arith.constant 1 : index
    %c0_105 = arith.constant 0 : index
    %85 = vector.load %arg9[%c1_104, %c0_105] : memref<328x128xf32, #tpu.memory_space<vmem>>, vector<288x128xf32>
    %c2_106 = arith.constant 2 : index
    %c0_107 = arith.constant 0 : index
    %86 = vector.load %arg9[%c2_106, %c0_107] : memref<328x128xf32, #tpu.memory_space<vmem>>, vector<288x128xf32>
    %87 = tpu.concatenate %84, %85, %86 in 1 : vector<288x128xf32>, vector<288x128xf32>, vector<288x128xf32> -> vector<288x384xf32>
    %c0_108 = arith.constant 0 : index
    %c0_109 = arith.constant 0 : index
    %c0_110 = arith.constant 0 : index
    %88 = vector.load %arg4[%c0_108, %c0_109, %c0_110] : memref<3x384x128xf32, #tpu.memory_space<vmem>>, vector<1x384x128xf32>
    %89 = vector.shape_cast %88 : vector<1x384x128xf32> to vector<384x128xf32>
    %cst_111 = arith.constant dense<0.000000e+00> : vector<288x128xf32>
    %90 = tpu.matmul %87, %89, %cst_111 {dimension_numbers = #tpu.dot_dimension_numbers<[1], [0], [0], [1], [0, 0, 1, 1], [], []>} : vector<288x384xf32>, vector<384x128xf32>, vector<288x128xf32> -> vector<288x128xf32>
    %c18_112 = arith.constant 18 : index
    %c0_113 = arith.constant 0 : index
    %91 = vector.load %arg9[%c18_112, %c0_113] : memref<328x128xf32, #tpu.memory_space<vmem>>, vector<288x128xf32>
    %c19_114 = arith.constant 19 : index
    %c0_115 = arith.constant 0 : index
    %92 = vector.load %arg9[%c19_114, %c0_115] : memref<328x128xf32, #tpu.memory_space<vmem>>, vector<288x128xf32>
    %c20_116 = arith.constant 20 : index
    %c0_117 = arith.constant 0 : index
    %93 = vector.load %arg9[%c20_116, %c0_117] : memref<328x128xf32, #tpu.memory_space<vmem>>, vector<288x128xf32>
    %94 = tpu.concatenate %91, %92, %93 in 1 : vector<288x128xf32>, vector<288x128xf32>, vector<288x128xf32> -> vector<288x384xf32>
    %c1_118 = arith.constant 1 : index
    %c0_119 = arith.constant 0 : index
    %c0_120 = arith.constant 0 : index
    %95 = vector.load %arg4[%c1_118, %c0_119, %c0_120] : memref<3x384x128xf32, #tpu.memory_space<vmem>>, vector<1x384x128xf32>
    %96 = vector.shape_cast %95 : vector<1x384x128xf32> to vector<384x128xf32>
    %cst_121 = arith.constant dense<0.000000e+00> : vector<288x128xf32>
    %97 = tpu.matmul %94, %96, %cst_121 {dimension_numbers = #tpu.dot_dimension_numbers<[1], [0], [0], [1], [0, 0, 1, 1], [], []>} : vector<288x384xf32>, vector<384x128xf32>, vector<288x128xf32> -> vector<288x128xf32>
    %98 = arith.addf %90, %97 : vector<288x128xf32>
    %c36_122 = arith.constant 36 : index
    %c0_123 = arith.constant 0 : index
    %99 = vector.load %arg9[%c36_122, %c0_123] : memref<328x128xf32, #tpu.memory_space<vmem>>, vector<288x128xf32>
    %c37_124 = arith.constant 37 : index
    %c0_125 = arith.constant 0 : index
    %100 = vector.load %arg9[%c37_124, %c0_125] : memref<328x128xf32, #tpu.memory_space<vmem>>, vector<288x128xf32>
    %c38_126 = arith.constant 38 : index
    %c0_127 = arith.constant 0 : index
    %101 = vector.load %arg9[%c38_126, %c0_127] : memref<328x128xf32, #tpu.memory_space<vmem>>, vector<288x128xf32>
    %102 = tpu.concatenate %99, %100, %101 in 1 : vector<288x128xf32>, vector<288x128xf32>, vector<288x128xf32> -> vector<288x384xf32>
    %c2_128 = arith.constant 2 : index
    %c0_129 = arith.constant 0 : index
    %c0_130 = arith.constant 0 : index
    %103 = vector.load %arg4[%c2_128, %c0_129, %c0_130] : memref<3x384x128xf32, #tpu.memory_space<vmem>>, vector<1x384x128xf32>
    %104 = vector.shape_cast %103 : vector<1x384x128xf32> to vector<384x128xf32>
    %cst_131 = arith.constant dense<0.000000e+00> : vector<288x128xf32>
    %105 = tpu.matmul %102, %104, %cst_131 {dimension_numbers = #tpu.dot_dimension_numbers<[1], [0], [0], [1], [0, 0, 1, 1], [], []>} : vector<288x384xf32>, vector<384x128xf32>, vector<288x128xf32> -> vector<288x128xf32>
    %106 = arith.addf %98, %105 : vector<288x128xf32>
    %c0_132 = arith.constant 0 : index
    %c0_133 = arith.constant 0 : index
    %107 = vector.load %arg5[%c0_132, %c0_133] : memref<1x128xf32, #tpu.memory_space<vmem>>, vector<1x128xf32>
    %108 = vector.broadcast %107 : vector<1x128xf32> to vector<288x128xf32>
    %109 = arith.addf %106, %108 : vector<288x128xf32>
    %c0_134 = arith.constant 0 : index
    %c0_135 = arith.constant 0 : index
    %110 = vector.load %arg8[%c0_134, %c0_135] : memref<328x128xf32, #tpu.memory_space<vmem>>, vector<288x128xf32>
    tpu.vector_store %arg8[%c0_134, %c0_135], %109 {strides = array<i32>} : memref<328x128xf32, #tpu.memory_space<vmem>>, vector<288x128xf32>,
    %c0_136 = arith.constant 0 : index
    %c0_137 = arith.constant 0 : index
    %111 = vector.load %arg8[%c0_136, %c0_137] : memref<328x128xf32, #tpu.memory_space<vmem>>, vector<16x128xf32>
    %c0_138 = arith.constant 0 : index
    %c0_139 = arith.constant 0 : index
    %c0_140 = arith.constant 0 : index
    %c0_141 = arith.constant 0 : index
    %112 = vector.load %arg1[%c0_138, %c0_139, %c0_140, %c0_141] : memref<1x16x16x128xf32, #tpu.memory_space<vmem>>, vector<1x1x16x128xf32>
    %113 = vector.shape_cast %112 : vector<1x1x16x128xf32> to vector<16x128xf32>
    %114 = arith.addf %111, %113 : vector<16x128xf32>
    %cst_142 = arith.constant 0.000000e+00 : f32
    %115 = vector.broadcast %cst_142 : f32 to vector<16x128xf32>
    %116 = arith.maximumf %114, %115 : vector<16x128xf32>
    %c0_143 = arith.constant 0 : index
    %c0_144 = arith.constant 0 : index
    %c0_145 = arith.constant 0 : index
    %c0_146 = arith.constant 0 : index
    %117 = vector.load %arg7[%c0_143, %c0_144, %c0_145, %c0_146] : memref<1x16x16x128xf32, #tpu.memory_space<vmem>>, vector<1x1x16x128xf32>
    %118 = vector.shape_cast %117 : vector<1x1x16x128xf32> to vector<16x128xf32>
    %119 = vector.shape_cast %116 : vector<16x128xf32> to vector<1x1x16x128xf32>
    tpu.vector_store %arg7[%c0_143, %c0_144, %c0_145, %c0_146], %119 {strides = array<i32>} : memref<1x16x16x128xf32, #tpu.memory_space<vmem>>, vector<1x1x16x128xf32>,
    %c18_147 = arith.constant 18 : index
    %c0_148 = arith.constant 0 : index
    %120 = vector.load %arg8[%c18_147, %c0_148] : memref<328x128xf32, #tpu.memory_space<vmem>>, vector<16x128xf32>
    %c0_149 = arith.constant 0 : index
    %c1_150 = arith.constant 1 : index
    %c0_151 = arith.constant 0 : index
    %c0_152 = arith.constant 0 : index
    %121 = vector.load %arg1[%c0_149, %c1_150, %c0_151, %c0_152] : memref<1x16x16x128xf32, #tpu.memory_space<vmem>>, vector<1x1x16x128xf32>
    %122 = vector.shape_cast %121 : vector<1x1x16x128xf32> to vector<16x128xf32>
    %123 = arith.addf %120, %122 : vector<16x128xf32>
    %cst_153 = arith.constant 0.000000e+00 : f32
    %124 = vector.broadcast %cst_153 : f32 to vector<16x128xf32>
    %125 = arith.maximumf %123, %124 : vector<16x128xf32>
    %c0_154 = arith.constant 0 : index
    %c1_155 = arith.constant 1 : index
    %c0_156 = arith.constant 0 : index
    %c0_157 = arith.constant 0 : index
    %126 = vector.load %arg7[%c0_154, %c1_155, %c0_156, %c0_157] : memref<1x16x16x128xf32, #tpu.memory_space<vmem>>, vector<1x1x16x128xf32>
    %127 = vector.shape_cast %126 : vector<1x1x16x128xf32> to vector<16x128xf32>
    %128 = vector.shape_cast %125 : vector<16x128xf32> to vector<1x1x16x128xf32>
    tpu.vector_store %arg7[%c0_154, %c1_155, %c0_156, %c0_157], %128 {strides = array<i32>} : memref<1x16x16x128xf32, #tpu.memory_space<vmem>>, vector<1x1x16x128xf32>,
    %c36_158 = arith.constant 36 : index
    %c0_159 = arith.constant 0 : index
    %129 = vector.load %arg8[%c36_158, %c0_159] : memref<328x128xf32, #tpu.memory_space<vmem>>, vector<16x128xf32>
    %c0_160 = arith.constant 0 : index
    %c2_161 = arith.constant 2 : index
    %c0_162 = arith.constant 0 : index
    %c0_163 = arith.constant 0 : index
    %130 = vector.load %arg1[%c0_160, %c2_161, %c0_162, %c0_163] : memref<1x16x16x128xf32, #tpu.memory_space<vmem>>, vector<1x1x16x128xf32>
    %131 = vector.shape_cast %130 : vector<1x1x16x128xf32> to vector<16x128xf32>
    %132 = arith.addf %129, %131 : vector<16x128xf32>
    %cst_164 = arith.constant 0.000000e+00 : f32
    %133 = vector.broadcast %cst_164 : f32 to vector<16x128xf32>
    %134 = arith.maximumf %132, %133 : vector<16x128xf32>
    %c0_165 = arith.constant 0 : index
    %c2_166 = arith.constant 2 : index
    %c0_167 = arith.constant 0 : index
    %c0_168 = arith.constant 0 : index
    %135 = vector.load %arg7[%c0_165, %c2_166, %c0_167, %c0_168] : memref<1x16x16x128xf32, #tpu.memory_space<vmem>>, vector<1x1x16x128xf32>
    %136 = vector.shape_cast %135 : vector<1x1x16x128xf32> to vector<16x128xf32>
    %137 = vector.shape_cast %134 : vector<16x128xf32> to vector<1x1x16x128xf32>
    tpu.vector_store %arg7[%c0_165, %c2_166, %c0_167, %c0_168], %137 {strides = array<i32>} : memref<1x16x16x128xf32, #tpu.memory_space<vmem>>, vector<1x1x16x128xf32>,
    %c54 = arith.constant 54 : index
    %c0_169 = arith.constant 0 : index
    %138 = vector.load %arg8[%c54, %c0_169] : memref<328x128xf32, #tpu.memory_space<vmem>>, vector<16x128xf32>
    %c0_170 = arith.constant 0 : index
    %c3_171 = arith.constant 3 : index
    %c0_172 = arith.constant 0 : index
    %c0_173 = arith.constant 0 : index
    %139 = vector.load %arg1[%c0_170, %c3_171, %c0_172, %c0_173] : memref<1x16x16x128xf32, #tpu.memory_space<vmem>>, vector<1x1x16x128xf32>
    %140 = vector.shape_cast %139 : vector<1x1x16x128xf32> to vector<16x128xf32>
    %141 = arith.addf %138, %140 : vector<16x128xf32>
    %cst_174 = arith.constant 0.000000e+00 : f32
    %142 = vector.broadcast %cst_174 : f32 to vector<16x128xf32>
    %143 = arith.maximumf %141, %142 : vector<16x128xf32>
    %c0_175 = arith.constant 0 : index
    %c3_176 = arith.constant 3 : index
    %c0_177 = arith.constant 0 : index
    %c0_178 = arith.constant 0 : index
    %144 = vector.load %arg7[%c0_175, %c3_176, %c0_177, %c0_178] : memref<1x16x16x128xf32, #tpu.memory_space<vmem>>, vector<1x1x16x128xf32>
    %145 = vector.shape_cast %144 : vector<1x1x16x128xf32> to vector<16x128xf32>
    %146 = vector.shape_cast %143 : vector<16x128xf32> to vector<1x1x16x128xf32>
    tpu.vector_store %arg7[%c0_175, %c3_176, %c0_177, %c0_178], %146 {strides = array<i32>} : memref<1x16x16x128xf32, #tpu.memory_space<vmem>>, vector<1x1x16x128xf32>,
    %c72 = arith.constant 72 : index
    %c0_179 = arith.constant 0 : index
    %147 = vector.load %arg8[%c72, %c0_179] : memref<328x128xf32, #tpu.memory_space<vmem>>, vector<16x128xf32>
    %c0_180 = arith.constant 0 : index
    %c4_181 = arith.constant 4 : index
    %c0_182 = arith.constant 0 : index
    %c0_183 = arith.constant 0 : index
    %148 = vector.load %arg1[%c0_180, %c4_181, %c0_182, %c0_183] : memref<1x16x16x128xf32, #tpu.memory_space<vmem>>, vector<1x1x16x128xf32>
    %149 = vector.shape_cast %148 : vector<1x1x16x128xf32> to vector<16x128xf32>
    %150 = arith.addf %147, %149 : vector<16x128xf32>
    %cst_184 = arith.constant 0.000000e+00 : f32
    %151 = vector.broadcast %cst_184 : f32 to vector<16x128xf32>
    %152 = arith.maximumf %150, %151 : vector<16x128xf32>
    %c0_185 = arith.constant 0 : index
    %c4_186 = arith.constant 4 : index
    %c0_187 = arith.constant 0 : index
    %c0_188 = arith.constant 0 : index
    %153 = vector.load %arg7[%c0_185, %c4_186, %c0_187, %c0_188] : memref<1x16x16x128xf32, #tpu.memory_space<vmem>>, vector<1x1x16x128xf32>
    %154 = vector.shape_cast %153 : vector<1x1x16x128xf32> to vector<16x128xf32>
    %155 = vector.shape_cast %152 : vector<16x128xf32> to vector<1x1x16x128xf32>
    tpu.vector_store %arg7[%c0_185, %c4_186, %c0_187, %c0_188], %155 {strides = array<i32>} : memref<1x16x16x128xf32, #tpu.memory_space<vmem>>, vector<1x1x16x128xf32>,
    %c90 = arith.constant 90 : index
    %c0_189 = arith.constant 0 : index
    %156 = vector.load %arg8[%c90, %c0_189] : memref<328x128xf32, #tpu.memory_space<vmem>>, vector<16x128xf32>
    %c0_190 = arith.constant 0 : index
    %c5_191 = arith.constant 5 : index
    %c0_192 = arith.constant 0 : index
    %c0_193 = arith.constant 0 : index
    %157 = vector.load %arg1[%c0_190, %c5_191, %c0_192, %c0_193] : memref<1x16x16x128xf32, #tpu.memory_space<vmem>>, vector<1x1x16x128xf32>
    %158 = vector.shape_cast %157 : vector<1x1x16x128xf32> to vector<16x128xf32>
    %159 = arith.addf %156, %158 : vector<16x128xf32>
    %cst_194 = arith.constant 0.000000e+00 : f32
    %160 = vector.broadcast %cst_194 : f32 to vector<16x128xf32>
    %161 = arith.maximumf %159, %160 : vector<16x128xf32>
    %c0_195 = arith.constant 0 : index
    %c5_196 = arith.constant 5 : index
    %c0_197 = arith.constant 0 : index
    %c0_198 = arith.constant 0 : index
    %162 = vector.load %arg7[%c0_195, %c5_196, %c0_197, %c0_198] : memref<1x16x16x128xf32, #tpu.memory_space<vmem>>, vector<1x1x16x128xf32>
    %163 = vector.shape_cast %162 : vector<1x1x16x128xf32> to vector<16x128xf32>
    %164 = vector.shape_cast %161 : vector<16x128xf32> to vector<1x1x16x128xf32>
    tpu.vector_store %arg7[%c0_195, %c5_196, %c0_197, %c0_198], %164 {strides = array<i32>} : memref<1x16x16x128xf32, #tpu.memory_space<vmem>>, vector<1x1x16x128xf32>,
    %c108 = arith.constant 108 : index
    %c0_199 = arith.constant 0 : index
    %165 = vector.load %arg8[%c108, %c0_199] : memref<328x128xf32, #tpu.memory_space<vmem>>, vector<16x128xf32>
    %c0_200 = arith.constant 0 : index
    %c6_201 = arith.constant 6 : index
    %c0_202 = arith.constant 0 : index
    %c0_203 = arith.constant 0 : index
    %166 = vector.load %arg1[%c0_200, %c6_201, %c0_202, %c0_203] : memref<1x16x16x128xf32, #tpu.memory_space<vmem>>, vector<1x1x16x128xf32>
    %167 = vector.shape_cast %166 : vector<1x1x16x128xf32> to vector<16x128xf32>
    %168 = arith.addf %165, %167 : vector<16x128xf32>
    %cst_204 = arith.constant 0.000000e+00 : f32
    %169 = vector.broadcast %cst_204 : f32 to vector<16x128xf32>
    %170 = arith.maximumf %168, %169 : vector<16x128xf32>
    %c0_205 = arith.constant 0 : index
    %c6_206 = arith.constant 6 : index
    %c0_207 = arith.constant 0 : index
    %c0_208 = arith.constant 0 : index
    %171 = vector.load %arg7[%c0_205, %c6_206, %c0_207, %c0_208] : memref<1x16x16x128xf32, #tpu.memory_space<vmem>>, vector<1x1x16x128xf32>
    %172 = vector.shape_cast %171 : vector<1x1x16x128xf32> to vector<16x128xf32>
    %173 = vector.shape_cast %170 : vector<16x128xf32> to vector<1x1x16x128xf32>
    tpu.vector_store %arg7[%c0_205, %c6_206, %c0_207, %c0_208], %173 {strides = array<i32>} : memref<1x16x16x128xf32, #tpu.memory_space<vmem>>, vector<1x1x16x128xf32>,
    %c126 = arith.constant 126 : index
    %c0_209 = arith.constant 0 : index
    %174 = vector.load %arg8[%c126, %c0_209] : memref<328x128xf32, #tpu.memory_space<vmem>>, vector<16x128xf32>
    %c0_210 = arith.constant 0 : index
    %c7_211 = arith.constant 7 : index
    %c0_212 = arith.constant 0 : index
    %c0_213 = arith.constant 0 : index
    %175 = vector.load %arg1[%c0_210, %c7_211, %c0_212, %c0_213] : memref<1x16x16x128xf32, #tpu.memory_space<vmem>>, vector<1x1x16x128xf32>
    %176 = vector.shape_cast %175 : vector<1x1x16x128xf32> to vector<16x128xf32>
    %177 = arith.addf %174, %176 : vector<16x128xf32>
    %cst_214 = arith.constant 0.000000e+00 : f32
    %178 = vector.broadcast %cst_214 : f32 to vector<16x128xf32>
    %179 = arith.maximumf %177, %178 : vector<16x128xf32>
    %c0_215 = arith.constant 0 : index
    %c7_216 = arith.constant 7 : index
    %c0_217 = arith.constant 0 : index
    %c0_218 = arith.constant 0 : index
    %180 = vector.load %arg7[%c0_215, %c7_216, %c0_217, %c0_218] : memref<1x16x16x128xf32, #tpu.memory_space<vmem>>, vector<1x1x16x128xf32>
    %181 = vector.shape_cast %180 : vector<1x1x16x128xf32> to vector<16x128xf32>
    %182 = vector.shape_cast %179 : vector<16x128xf32> to vector<1x1x16x128xf32>
    tpu.vector_store %arg7[%c0_215, %c7_216, %c0_217, %c0_218], %182 {strides = array<i32>} : memref<1x16x16x128xf32, #tpu.memory_space<vmem>>, vector<1x1x16x128xf32>,
    %c144 = arith.constant 144 : index
    %c0_219 = arith.constant 0 : index
    %183 = vector.load %arg8[%c144, %c0_219] : memref<328x128xf32, #tpu.memory_space<vmem>>, vector<16x128xf32>
    %c0_220 = arith.constant 0 : index
    %c8_221 = arith.constant 8 : index
    %c0_222 = arith.constant 0 : index
    %c0_223 = arith.constant 0 : index
    %184 = vector.load %arg1[%c0_220, %c8_221, %c0_222, %c0_223] : memref<1x16x16x128xf32, #tpu.memory_space<vmem>>, vector<1x1x16x128xf32>
    %185 = vector.shape_cast %184 : vector<1x1x16x128xf32> to vector<16x128xf32>
    %186 = arith.addf %183, %185 : vector<16x128xf32>
    %cst_224 = arith.constant 0.000000e+00 : f32
    %187 = vector.broadcast %cst_224 : f32 to vector<16x128xf32>
    %188 = arith.maximumf %186, %187 : vector<16x128xf32>
    %c0_225 = arith.constant 0 : index
    %c8_226 = arith.constant 8 : index
    %c0_227 = arith.constant 0 : index
    %c0_228 = arith.constant 0 : index
    %189 = vector.load %arg7[%c0_225, %c8_226, %c0_227, %c0_228] : memref<1x16x16x128xf32, #tpu.memory_space<vmem>>, vector<1x1x16x128xf32>
    %190 = vector.shape_cast %189 : vector<1x1x16x128xf32> to vector<16x128xf32>
    %191 = vector.shape_cast %188 : vector<16x128xf32> to vector<1x1x16x128xf32>
    tpu.vector_store %arg7[%c0_225, %c8_226, %c0_227, %c0_228], %191 {strides = array<i32>} : memref<1x16x16x128xf32, #tpu.memory_space<vmem>>, vector<1x1x16x128xf32>,
    %c162 = arith.constant 162 : index
    %c0_229 = arith.constant 0 : index
    %192 = vector.load %arg8[%c162, %c0_229] : memref<328x128xf32, #tpu.memory_space<vmem>>, vector<16x128xf32>
    %c0_230 = arith.constant 0 : index
    %c9_231 = arith.constant 9 : index
    %c0_232 = arith.constant 0 : index
    %c0_233 = arith.constant 0 : index
    %193 = vector.load %arg1[%c0_230, %c9_231, %c0_232, %c0_233] : memref<1x16x16x128xf32, #tpu.memory_space<vmem>>, vector<1x1x16x128xf32>
    %194 = vector.shape_cast %193 : vector<1x1x16x128xf32> to vector<16x128xf32>
    %195 = arith.addf %192, %194 : vector<16x128xf32>
    %cst_234 = arith.constant 0.000000e+00 : f32
    %196 = vector.broadcast %cst_234 : f32 to vector<16x128xf32>
    %197 = arith.maximumf %195, %196 : vector<16x128xf32>
    %c0_235 = arith.constant 0 : index
    %c9_236 = arith.constant 9 : index
    %c0_237 = arith.constant 0 : index
    %c0_238 = arith.constant 0 : index
    %198 = vector.load %arg7[%c0_235, %c9_236, %c0_237, %c0_238] : memref<1x16x16x128xf32, #tpu.memory_space<vmem>>, vector<1x1x16x128xf32>
    %199 = vector.shape_cast %198 : vector<1x1x16x128xf32> to vector<16x128xf32>
    %200 = vector.shape_cast %197 : vector<16x128xf32> to vector<1x1x16x128xf32>
    tpu.vector_store %arg7[%c0_235, %c9_236, %c0_237, %c0_238], %200 {strides = array<i32>} : memref<1x16x16x128xf32, #tpu.memory_space<vmem>>, vector<1x1x16x128xf32>,
    %c180 = arith.constant 180 : index
    %c0_239 = arith.constant 0 : index
    %201 = vector.load %arg8[%c180, %c0_239] : memref<328x128xf32, #tpu.memory_space<vmem>>, vector<16x128xf32>
    %c0_240 = arith.constant 0 : index
    %c10_241 = arith.constant 10 : index
    %c0_242 = arith.constant 0 : index
    %c0_243 = arith.constant 0 : index
    %202 = vector.load %arg1[%c0_240, %c10_241, %c0_242, %c0_243] : memref<1x16x16x128xf32, #tpu.memory_space<vmem>>, vector<1x1x16x128xf32>
    %203 = vector.shape_cast %202 : vector<1x1x16x128xf32> to vector<16x128xf32>
    %204 = arith.addf %201, %203 : vector<16x128xf32>
    %cst_244 = arith.constant 0.000000e+00 : f32
    %205 = vector.broadcast %cst_244 : f32 to vector<16x128xf32>
    %206 = arith.maximumf %204, %205 : vector<16x128xf32>
    %c0_245 = arith.constant 0 : index
    %c10_246 = arith.constant 10 : index
    %c0_247 = arith.constant 0 : index
    %c0_248 = arith.constant 0 : index
    %207 = vector.load %arg7[%c0_245, %c10_246, %c0_247, %c0_248] : memref<1x16x16x128xf32, #tpu.memory_space<vmem>>, vector<1x1x16x128xf32>
    %208 = vector.shape_cast %207 : vector<1x1x16x128xf32> to vector<16x128xf32>
    %209 = vector.shape_cast %206 : vector<16x128xf32> to vector<1x1x16x128xf32>
    tpu.vector_store %arg7[%c0_245, %c10_246, %c0_247, %c0_248], %209 {strides = array<i32>} : memref<1x16x16x128xf32, #tpu.memory_space<vmem>>, vector<1x1x16x128xf32>,
    %c198 = arith.constant 198 : index
    %c0_249 = arith.constant 0 : index
    %210 = vector.load %arg8[%c198, %c0_249] : memref<328x128xf32, #tpu.memory_space<vmem>>, vector<16x128xf32>
    %c0_250 = arith.constant 0 : index
    %c11_251 = arith.constant 11 : index
    %c0_252 = arith.constant 0 : index
    %c0_253 = arith.constant 0 : index
    %211 = vector.load %arg1[%c0_250, %c11_251, %c0_252, %c0_253] : memref<1x16x16x128xf32, #tpu.memory_space<vmem>>, vector<1x1x16x128xf32>
    %212 = vector.shape_cast %211 : vector<1x1x16x128xf32> to vector<16x128xf32>
    %213 = arith.addf %210, %212 : vector<16x128xf32>
    %cst_254 = arith.constant 0.000000e+00 : f32
    %214 = vector.broadcast %cst_254 : f32 to vector<16x128xf32>
    %215 = arith.maximumf %213, %214 : vector<16x128xf32>
    %c0_255 = arith.constant 0 : index
    %c11_256 = arith.constant 11 : index
    %c0_257 = arith.constant 0 : index
    %c0_258 = arith.constant 0 : index
    %216 = vector.load %arg7[%c0_255, %c11_256, %c0_257, %c0_258] : memref<1x16x16x128xf32, #tpu.memory_space<vmem>>, vector<1x1x16x128xf32>
    %217 = vector.shape_cast %216 : vector<1x1x16x128xf32> to vector<16x128xf32>
    %218 = vector.shape_cast %215 : vector<16x128xf32> to vector<1x1x16x128xf32>
    tpu.vector_store %arg7[%c0_255, %c11_256, %c0_257, %c0_258], %218 {strides = array<i32>} : memref<1x16x16x128xf32, #tpu.memory_space<vmem>>, vector<1x1x16x128xf32>,
    %c216 = arith.constant 216 : index
    %c0_259 = arith.constant 0 : index
    %219 = vector.load %arg8[%c216, %c0_259] : memref<328x128xf32, #tpu.memory_space<vmem>>, vector<16x128xf32>
    %c0_260 = arith.constant 0 : index
    %c12_261 = arith.constant 12 : index
    %c0_262 = arith.constant 0 : index
    %c0_263 = arith.constant 0 : index
    %220 = vector.load %arg1[%c0_260, %c12_261, %c0_262, %c0_263] : memref<1x16x16x128xf32, #tpu.memory_space<vmem>>, vector<1x1x16x128xf32>
    %221 = vector.shape_cast %220 : vector<1x1x16x128xf32> to vector<16x128xf32>
    %222 = arith.addf %219, %221 : vector<16x128xf32>
    %cst_264 = arith.constant 0.000000e+00 : f32
    %223 = vector.broadcast %cst_264 : f32 to vector<16x128xf32>
    %224 = arith.maximumf %222, %223 : vector<16x128xf32>
    %c0_265 = arith.constant 0 : index
    %c12_266 = arith.constant 12 : index
    %c0_267 = arith.constant 0 : index
    %c0_268 = arith.constant 0 : index
    %225 = vector.load %arg7[%c0_265, %c12_266, %c0_267, %c0_268] : memref<1x16x16x128xf32, #tpu.memory_space<vmem>>, vector<1x1x16x128xf32>
    %226 = vector.shape_cast %225 : vector<1x1x16x128xf32> to vector<16x128xf32>
    %227 = vector.shape_cast %224 : vector<16x128xf32> to vector<1x1x16x128xf32>
    tpu.vector_store %arg7[%c0_265, %c12_266, %c0_267, %c0_268], %227 {strides = array<i32>} : memref<1x16x16x128xf32, #tpu.memory_space<vmem>>, vector<1x1x16x128xf32>,
    %c234 = arith.constant 234 : index
    %c0_269 = arith.constant 0 : index
    %228 = vector.load %arg8[%c234, %c0_269] : memref<328x128xf32, #tpu.memory_space<vmem>>, vector<16x128xf32>
    %c0_270 = arith.constant 0 : index
    %c13_271 = arith.constant 13 : index
    %c0_272 = arith.constant 0 : index
    %c0_273 = arith.constant 0 : index
    %229 = vector.load %arg1[%c0_270, %c13_271, %c0_272, %c0_273] : memref<1x16x16x128xf32, #tpu.memory_space<vmem>>, vector<1x1x16x128xf32>
    %230 = vector.shape_cast %229 : vector<1x1x16x128xf32> to vector<16x128xf32>
    %231 = arith.addf %228, %230 : vector<16x128xf32>
    %cst_274 = arith.constant 0.000000e+00 : f32
    %232 = vector.broadcast %cst_274 : f32 to vector<16x128xf32>
    %233 = arith.maximumf %231, %232 : vector<16x128xf32>
    %c0_275 = arith.constant 0 : index
    %c13_276 = arith.constant 13 : index
    %c0_277 = arith.constant 0 : index
    %c0_278 = arith.constant 0 : index
    %234 = vector.load %arg7[%c0_275, %c13_276, %c0_277, %c0_278] : memref<1x16x16x128xf32, #tpu.memory_space<vmem>>, vector<1x1x16x128xf32>
    %235 = vector.shape_cast %234 : vector<1x1x16x128xf32> to vector<16x128xf32>
    %236 = vector.shape_cast %233 : vector<16x128xf32> to vector<1x1x16x128xf32>
    tpu.vector_store %arg7[%c0_275, %c13_276, %c0_277, %c0_278], %236 {strides = array<i32>} : memref<1x16x16x128xf32, #tpu.memory_space<vmem>>, vector<1x1x16x128xf32>,
    %c252 = arith.constant 252 : index
    %c0_279 = arith.constant 0 : index
    %237 = vector.load %arg8[%c252, %c0_279] : memref<328x128xf32, #tpu.memory_space<vmem>>, vector<16x128xf32>
    %c0_280 = arith.constant 0 : index
    %c14_281 = arith.constant 14 : index
    %c0_282 = arith.constant 0 : index
    %c0_283 = arith.constant 0 : index
    %238 = vector.load %arg1[%c0_280, %c14_281, %c0_282, %c0_283] : memref<1x16x16x128xf32, #tpu.memory_space<vmem>>, vector<1x1x16x128xf32>
    %239 = vector.shape_cast %238 : vector<1x1x16x128xf32> to vector<16x128xf32>
    %240 = arith.addf %237, %239 : vector<16x128xf32>
    %cst_284 = arith.constant 0.000000e+00 : f32
    %241 = vector.broadcast %cst_284 : f32 to vector<16x128xf32>
    %242 = arith.maximumf %240, %241 : vector<16x128xf32>
    %c0_285 = arith.constant 0 : index
    %c14_286 = arith.constant 14 : index
    %c0_287 = arith.constant 0 : index
    %c0_288 = arith.constant 0 : index
    %243 = vector.load %arg7[%c0_285, %c14_286, %c0_287, %c0_288] : memref<1x16x16x128xf32, #tpu.memory_space<vmem>>, vector<1x1x16x128xf32>
    %244 = vector.shape_cast %243 : vector<1x1x16x128xf32> to vector<16x128xf32>
    %245 = vector.shape_cast %242 : vector<16x128xf32> to vector<1x1x16x128xf32>
    tpu.vector_store %arg7[%c0_285, %c14_286, %c0_287, %c0_288], %245 {strides = array<i32>} : memref<1x16x16x128xf32, #tpu.memory_space<vmem>>, vector<1x1x16x128xf32>,
    %c270 = arith.constant 270 : index
    %c0_289 = arith.constant 0 : index
    %246 = vector.load %arg8[%c270, %c0_289] : memref<328x128xf32, #tpu.memory_space<vmem>>, vector<16x128xf32>
    %c0_290 = arith.constant 0 : index
    %c15_291 = arith.constant 15 : index
    %c0_292 = arith.constant 0 : index
    %c0_293 = arith.constant 0 : index
    %247 = vector.load %arg1[%c0_290, %c15_291, %c0_292, %c0_293] : memref<1x16x16x128xf32, #tpu.memory_space<vmem>>, vector<1x1x16x128xf32>
    %248 = vector.shape_cast %247 : vector<1x1x16x128xf32> to vector<16x128xf32>
    %249 = arith.addf %246, %248 : vector<16x128xf32>
    %cst_294 = arith.constant 0.000000e+00 : f32
    %250 = vector.broadcast %cst_294 : f32 to vector<16x128xf32>
    %251 = arith.maximumf %249, %250 : vector<16x128xf32>
    %c0_295 = arith.constant 0 : index
    %c15_296 = arith.constant 15 : index
    %c0_297 = arith.constant 0 : index
    %c0_298 = arith.constant 0 : index
    %252 = vector.load %arg7[%c0_295, %c15_296, %c0_297, %c0_298] : memref<1x16x16x128xf32, #tpu.memory_space<vmem>>, vector<1x1x16x128xf32>
    %253 = vector.shape_cast %252 : vector<1x1x16x128xf32> to vector<16x128xf32>
    %254 = vector.shape_cast %251 : vector<16x128xf32> to vector<1x1x16x128xf32>
    tpu.vector_store %arg7[%c0_295, %c15_296, %c0_297, %c0_298], %254 {strides = array<i32>} : memref<1x16x16x128xf32, #tpu.memory_space<vmem>>, vector<1x1x16x128xf32>,
    return
  }
  func.func @transform_0(%arg0: i32) -> (i32, i32, i32, i32) {
    %c0_i32 = arith.constant 0 : i32
    %c0_i32_0 = arith.constant 0 : i32
    %c0_i32_1 = arith.constant 0 : i32
    %c0_i32_2 = arith.constant 0 : i32
    return %arg0, %c0_i32, %c0_i32_0, %c0_i32_1 : i32, i32, i32, i32
  }
  func.func @transform_1(%arg0: i32) -> (i32, i32, i32) {
    %c0_i32 = arith.constant 0 : i32
    %c0_i32_0 = arith.constant 0 : i32
    %c0_i32_1 = arith.constant 0 : i32
    %c0_i32_2 = arith.constant 0 : i32
    return %c0_i32, %c0_i32_0, %c0_i32_1 : i32, i32, i32
  }
  func.func @transform_2(%arg0: i32) -> (i32, i32) {
    %c0_i32 = arith.constant 0 : i32
    %c0_i32_0 = arith.constant 0 : i32
    %c0_i32_1 = arith.constant 0 : i32
    return %c0_i32, %c0_i32_0 : i32, i32
  }
  func.func @transform_3(%arg0: i32) -> (i32, i32, i32) {
    %c0_i32 = arith.constant 0 : i32
    %c0_i32_0 = arith.constant 0 : i32
    %c0_i32_1 = arith.constant 0 : i32
    %c0_i32_2 = arith.constant 0 : i32
    return %c0_i32, %c0_i32_0, %c0_i32_1 : i32, i32, i32
  }
  func.func @transform_4(%arg0: i32) -> (i32, i32) {
    %c0_i32 = arith.constant 0 : i32
    %c0_i32_0 = arith.constant 0 : i32
    %c0_i32_1 = arith.constant 0 : i32
    return %c0_i32, %c0_i32_0 : i32, i32
  }
  func.func @transform_5(%arg0: i32) -> (i32, i32) {
    %c0_i32 = arith.constant 0 : i32
    %c0_i32_0 = arith.constant 0 : i32
    %c0_i32_1 = arith.constant 0 : i32
    return %c0_i32, %c0_i32_0 : i32, i32
  }
  func.func @transform_6(%arg0: i32) -> (i32, i32, i32, i32) {
    %c0_i32 = arith.constant 0 : i32
    %c0_i32_0 = arith.constant 0 : i32
    %c0_i32_1 = arith.constant 0 : i32
    %c0_i32_2 = arith.constant 0 : i32
    return %arg0, %c0_i32, %c0_i32_0, %c0_i32_1 : i32, i32, i32, i32
  }
}

</mosaic_0001>

<bundles_post_ra>
// kernel: basic_block_forward.1
= control target key start
LH: loop header
LB: loop body
LE: loop exit
PB: predicated region body
PF: predicated region fallthrough
CT: control target
= control target key end

     0   :  { %s6174_s21 = smov 0   ;;  %s8816_s0 = inlined_call_operand.vmem [shape: f32[2,16,16,128], index: 0, kind: input, shape index: {}]   ;;  %s8817_s1 = inlined_call_operand.vmem [shape: f32[3,384,128], index: 1, kind: input, shape index: {}]   ;;  %s8818_s2 = inlined_call_operand.vmem [shape: f32[1,128], index: 2, kind: input, shape index: {}]   ;;  %s8819_s3 = inlined_call_operand.vmem [shape: f32[3,384,128], index: 3, kind: input, shape index: {}]   ;;  %s8820_s4 = inlined_call_operand.vmem [shape: f32[1,128], index: 4, kind: input, shape index: {}]   ;;  %s8821_s5 = inlined_call_operand.vmem [shape: f32[288,1], index: 5, kind: input, shape index: {}]   ;;  %s8822_s6 = inlined_call_operand.vmem [shape: f32[2,16,16,128], index: 6, kind: output, shape index: {}]  }
   0x1 LB: > { %s4973_s22 = sadd.s32 4294967295, %s6135_s21   ;;  %p4977_p0 = scmp.ge.s32.totalorder %s6135_s21, 1  ;;  %s6135_s21 = sphi %s6174_s21, %s16_s21  }
   0x2   : > { %p212_p1 = scmp.lt.s32.totalorder %s6135_s21, 3 }
   0x4   : > { %p213_p2 = pnand %p4977_p0, %p212_p1 }
   0x6   : > { %216 = sbr.rel (%p213_p2) target bundleno = 1094 (0x446), region = 44 }
   0xb   : > { %v6185_v0 = vld [vmem:[%s8817_s1 + $0x2f8] sm:$0xff]  ;;  %v6195_v2 = vld [vmem:[%s8817_s1 + $0x2f0] sm:$0xff]  ;;  %p6199_p3 = scmp.lt.s32.totalorder %s4973_s22, 1  ;;  %v6137_v3 = vmov 0.0   ;;  %v5057_v5 = vld [vmem:[%s8817_s1 + $0x2e8] sm:$0xff] }
   0xc   : > { %v6190_v1 = vld [vmem:[%s8817_s1 + $0x1f8] sm:$0xff]  ;;  %651 = vmatprep.subr.mxu0 %v6137_v3  ;;  %252 = vst [vmem:[#allocation2] sm:$0xff] %v6137_v3  ;;  %253 = vst [vmem:[#allocation2 + $0x8] sm:$0xff] %v6137_v3  ;;  %5582 = vmatprep.subr.mxu1 %v6185_v0  ;;  %v5026_v4 = vld [vmem:[%s8817_s1 + $0x1f0] sm:$0xff] }
   0xd   : > { %254 = vst [vmem:[#allocation2 + $0x10] sm:$0xff] %v6137_v3  ;;  %255 = vst [vmem:[#allocation2 + $0x18] sm:$0xff] %v6137_v3  ;;  %652 = vmatpush1.msra.mxu0 %v6190_v1  ;;  %5583 = vmatpush3.msra.mxu1 %v6185_v0  ;;  %s8867_s22 = smov (!%p6199_p3, %s4973_s22), 1  ;;  %v5025_v6 = vld [vmem:[%s8817_s1 + $0x1e8] sm:$0xff]  ;;  %v5056_v7 = vld [vmem:[%s8817_s1 + $0x2e0] sm:$0xff] }
   0xe   : > { %256 = vst [vmem:[#allocation2 + $0x20] sm:$0xff] %v6137_v3  ;;  %257 = vst [vmem:[#allocation2 + $0x28] sm:$0xff] %v6137_v3  ;;  %653 = vmatprep.subr.mxu0 %v6137_v3  ;;  %5584 = vmatprep.subr.mxu1 %v6195_v2  ;;  %s5268_s14 = sshll.u32 %s8867_s22, 8  ;;  %v5024_v8 = vld [vmem:[%s8817_s1 + $0x1e0] sm:$0xff]  ;;  %v5055_v9 = vld [vmem:[%s8817_s1 + $0x2d8] sm:$0xff] }
   0xf   : > { %258 = vst [vmem:[#allocation2 + $0x30] sm:$0xff] %v6137_v3  ;;  %259 = vst [vmem:[#allocation2 + $0x38] sm:$0xff] %v6137_v3  ;;  %654 = vmatpush1.msra.mxu0 %v5026_v4  ;;  %5585 = vmatpush3.msra.mxu1 %v6195_v2  ;;  %v5023_v10 = vld [vmem:[%s8817_s1 + $0x1d8] sm:$0xff]  ;;  %s6327_s25 = scalar_lea.vmem %s8816_s0, %s5268_s14  ;;  %v5054_v11 = vld [vmem:[%s8817_s1 + $0x2d0] sm:$0xff]  ;;  %s8672_s19 = scalar_lea.vmem %s8822_s6, %s5268_s14 }
  0x10   : > { %260 = vst [vmem:[#allocation2 + $0x40] sm:$0xff] %v6137_v3  ;;  %261 = vst [vmem:[#allocation2 + $0x48] sm:$0xff] %v6137_v3  ;;  %655 = vmatprep.subr.mxu0 %v6137_v3  ;;  %5586 = vmatprep.subr.mxu1 %v5057_v5  ;;  %v5022_v12 = vld [vmem:[%s8817_s1 + $0x1d0] sm:$0xff]  ;;  %v5053_v13 = vld [vmem:[%s8817_s1 + $0x2c8] sm:$0xff] }
  0x11   : > { %262 = vst [vmem:[#allocation2 + $0x50] sm:$0xff] %v6137_v3  ;;  %263 = vst [vmem:[#allocation2 + $0x58] sm:$0xff] %v6137_v3  ;;  %656 = vmatpush1.msra.mxu0 %v5025_v6  ;;  %5587 = vmatpush3.msra.mxu1 %v5057_v5  ;;  %v6340_v14 = vld [vmem:[%s6327_s25] sm:$0xff]  ;;  %v5021_v15 = vld [vmem:[%s8817_s1 + $0x1c8] sm:$0xff] }
  0x12   : > { %264 = vst [vmem:[#allocation2 + $0x60] sm:$0xff] %v6137_v3  ;;  %265 = vst [vmem:[#allocation2 + $0x68] sm:$0xff] %v6137_v3  ;;  %657 = vmatprep.subr.mxu0 %v6137_v3  ;;  %5588 = vmatprep.subr.mxu1 %v5056_v7  ;;  %v6347_v16 = vld [vmem:[%s6327_s25 + $0x8] sm:$0xff]  ;;  %v5052_v17 = vld [vmem:[%s8817_s1 + $0x2c0] sm:$0xff] }
  0x13   : > { %266 = vst [vmem:[#allocation2 + $0x70] sm:$0xff] %v6137_v3  ;;  %267 = vst [vmem:[#allocation2 + $0x78] sm:$0xff] %v6137_v3  ;;  %658 = vmatpush1.msra.mxu0 %v5024_v8  ;;  %5589 = vmatpush3.msra.mxu1 %v5056_v7  ;;  %v4982_v18 = vld [vmem:[%s6327_s25 + $0x10] sm:$0xff]  ;;  %v4983_v19 = vld [vmem:[%s6327_s25 + $0x18] sm:$0xff] }
  0x14   : > { %268 = vst [vmem:[#allocation2 + $0x80] sm:$0xff] %v6137_v3  ;;  %269 = vst [vmem:[#allocation2 + $0x88] sm:$0xff] %v6137_v3  ;;  %659 = vmatprep.subr.mxu0 %v6137_v3  ;;  %5590 = vmatprep.subr.mxu1 %v5055_v9  ;;  %v5020_v20 = vld [vmem:[%s8817_s1 + $0x1c0] sm:$0xff]  ;;  %v4985_v22 = vld [vmem:[%s6327_s25 + $0x28] sm:$0xff] }
  0x15   : > { %270 = vst [vmem:[#allocation2 + $0x90] sm:$0xff] %v6137_v3  ;;  %271 = vst [vmem:[#allocation2 + $0x98] sm:$0xff] %v6137_v3  ;;  %660 = vmatpush1.msra.mxu0 %v5023_v10  ;;  %5591 = vmatpush3.msra.mxu1 %v5055_v9  ;;  %v4984_v21 = vld [vmem:[%s6327_s25 + $0x20] sm:$0xff]  ;;  %v5051_v23 = vld [vmem:[%s8817_s1 + $0x2b8] sm:$0xff] }
  0x16   : > { %272 = vst [vmem:[#allocation2 + $0xa0] sm:$0xff] %v6137_v3  ;;  %273 = vst [vmem:[#allocation2 + $0xa8] sm:$0xff] %v6137_v3  ;;  %661 = vmatprep.subr.mxu0 %v6137_v3  ;;  %5592 = vmatprep.subr.mxu1 %v5054_v11  ;;  %v5019_v24 = vld [vmem:[%s8817_s1 + $0x1b8] sm:$0xff]  ;;  %v6370_v25 = vld [vmem:[%s6327_s25 + $0x30] sm:$0xff] }
  0x17   : > { %274 = vst [vmem:[#allocation2 + $0xb0] sm:$0xff] %v6137_v3  ;;  %275 = vst [vmem:[#allocation2 + $0xb8] sm:$0xff] %v6137_v3  ;;  %662 = vmatpush1.msra.mxu0 %v5022_v12  ;;  %5593 = vmatpush3.msra.mxu1 %v5054_v11  ;;  %v6373_v26 = vld [vmem:[%s6327_s25 + $0x38] sm:$0xff]  ;;  %v5050_v27 = vld [vmem:[%s8817_s1 + $0x2b0] sm:$0xff] }
  0x18   : > { %276 = vst [vmem:[#allocation2 + $0xc0] sm:$0xff] %v6137_v3  ;;  %277 = vst [vmem:[#allocation2 + $0xc8] sm:$0xff] %v6137_v3  ;;  %663 = vmatprep.subr.mxu0 %v6137_v3  ;;  %5594 = vmatprep.subr.mxu1 %v5053_v13  ;;  %v5018_v28 = vld [vmem:[%s8817_s1 + $0x1b0] sm:$0xff]  ;;  %v6385_v29 = vld [vmem:[%s6327_s25 + $0x40] sm:$0xff] }
  0x19   : > { %278 = vst [vmem:[#allocation2 + $0xd0] sm:$0xff] %v6137_v3  ;;  %279 = vst [vmem:[#allocation2 + $0xd8] sm:$0xff] %v6137_v3  ;;  %664 = vmatpush1.msra.mxu0 %v5021_v15  ;;  %5595 = vmatpush3.msra.mxu1 %v5053_v13  ;;  %v6388_v30 = vld [vmem:[%s6327_s25 + $0x48] sm:$0xff]  ;;  %v5048_v33 = vld [vmem:[%s8817_s1 + $0x2a0] sm:$0xff] }
  0x1a   : > { %280 = vst [vmem:[#allocation2 + $0xe0] sm:$0xff] %v6137_v3  ;;  %281 = vst [vmem:[#allocation2 + $0xe8] sm:$0xff] %v6137_v3  ;;  %665 = vmatprep.subr.mxu0 %v6137_v3  ;;  %5596 = vmatprep.subr.mxu1 %v5052_v17  ;;  %v5049_v31 = vld [vmem:[%s8817_s1 + $0x2a8] sm:$0xff]  ;;  %v4990_v34 = vld [vmem:[%s6327_s25 + $0x50] sm:$0xff] }
  0x1b   : > { %282 = vst [vmem:[#allocation2 + $0xf0] sm:$0xff] %v6137_v3  ;;  %283 = vst [vmem:[#allocation2 + $0xf8] sm:$0xff] %v6137_v3  ;;  %666 = vmatpush1.msra.mxu0 %v5020_v20  ;;  %5597 = vmatpush3.msra.mxu1 %v5052_v17  ;;  %v5017_v32 = vld [vmem:[%s8817_s1 + $0x1a8] sm:$0xff]  ;;  %v5016_v35 = vld [vmem:[%s8817_s1 + $0x1a0] sm:$0xff] }
  0x1c   : > { %284 = vst [vmem:[#allocation2 + $0x100] sm:$0xff] %v6137_v3  ;;  %285 = vst [vmem:[#allocation2 + $0x108] sm:$0xff] %v6137_v3  ;;  %667 = vmatprep.subr.mxu0 %v6137_v3  ;;  %5598 = vmatprep.subr.mxu1 %v5051_v23  ;;  %v5047_v36 = vld [vmem:[%s8817_s1 + $0x298] sm:$0xff]  ;;  %v5046_v39 = vld [vmem:[%s8817_s1 + $0x290] sm:$0xff] }
  0x1d   : > { %286 = vst [vmem:[#allocation2 + $0x110] sm:$0xff] %v6137_v3  ;;  %287 = vst [vmem:[#allocation2 + $0x118] sm:$0xff] %v6137_v3  ;;  %668 = vmatpush1.msra.mxu0 %v5019_v24  ;;  %5599 = vmatpush3.msra.mxu1 %v5051_v23  ;;  %v4991_v37 = vld [vmem:[%s6327_s25 + $0x58] sm:$0xff]  ;;  %v4992_v40 = vld [vmem:[%s6327_s25 + $0x60] sm:$0xff] }
  0x1e   : > { %288 = vst [vmem:[#allocation2 + $0x120] sm:$0xff] %v6137_v3  ;;  %289 = vst [vmem:[#allocation2 + $0x128] sm:$0xff] %v6137_v3  ;;  %669 = vmatprep.subr.mxu0 %v6137_v3  ;;  %5600 = vmatprep.subr.mxu1 %v5050_v27  ;;  %v5015_v38 = vld [vmem:[%s8817_s1 + $0x198] sm:$0xff]  ;;  %v5014_v41 = vld [vmem:[%s8817_s1 + $0x190] sm:$0xff] }
  0x1f   : > { %290 = vst [vmem:[#allocation2 + $0x130] sm:$0xff] %v6137_v3  ;;  %291 = vst [vmem:[#allocation2 + $0x138] sm:$0xff] %v6137_v3  ;;  %670 = vmatpush1.msra.mxu0 %v5018_v28  ;;  %5601 = vmatpush3.msra.mxu1 %v5050_v27  ;;  %v5045_v42 = vld [vmem:[%s8817_s1 + $0x288] sm:$0xff]  ;;  %v4994_v45 = vld [vmem:[%s6327_s25 + $0x70] sm:$0xff] }
  0x20   : > { %292 = vst [vmem:[#allocation2 + $0x140] sm:$0xff] %v6137_v3  ;;  %2645 = vst [vmem:[#allocation3] sm:$0xff] %v6137_v3  ;;  %671 = vmatprep.subr.mxu0 %v6137_v3  ;;  %5602 = vmatprep.subr.mxu1 %v5049_v31  ;;  %v4993_v43 = vld [vmem:[%s6327_s25 + $0x68] sm:$0xff]  ;;  %v5044_v46 = vld [vmem:[%s8817_s1 + $0x280] sm:$0xff] }
  0x21   : > { %2646 = vst [vmem:[#allocation3 + $0x8] sm:$0xff] %v6137_v3  ;;  %2647 = vst [vmem:[#allocation3 + $0x10] sm:$0xff] %v6137_v3  ;;  %672 = vmatpush1.msra.mxu0 %v5017_v32  ;;  %5603 = vmatpush3.msra.mxu1 %v5049_v31  ;;  %v5013_v44 = vld [vmem:[%s8817_s1 + $0x188] sm:$0xff]  ;;  %v4995_v47 = vld [vmem:[%s6327_s25 + $0x78] sm:$0xff] }
  0x22   : > { %2648 = vst [vmem:[#allocation3 + $0x18] sm:$0xff] %v6137_v3  ;;  %2649 = vst [vmem:[#allocation3 + $0x20] sm:$0xff] %v6137_v3  ;;  %673 = vmatprep.subr.mxu0 %v6137_v3  ;;  %5604 = vmatprep.subr.mxu1 %v5048_v33  ;;  %v5012_v48 = vld [vmem:[%s8817_s1 + $0x180] sm:$0xff]  ;;  %v5043_v52 = vld [vmem:[%s8817_s1 + $0x278] sm:$0xff] }
  0x23   : > { %2650 = vst [vmem:[#allocation3 + $0x28] sm:$0xff] %v6137_v3  ;;  %2651 = vst [vmem:[#allocation3 + $0x30] sm:$0xff] %v6137_v3  ;;  %674 = vmatpush1.msra.mxu0 %v5016_v35  ;;  %5605 = vmatpush3.msra.mxu1 %v5048_v33  ;;  %v6441_v49 = vld [vmem:[%s6327_s25 + $0x80] sm:$0xff]  ;;  %v6449_v53 = vld [vmem:[%s6327_s25 + $0x88] sm:$0xff] }
  0x24   : > { %2652 = vst [vmem:[#allocation3 + $0x38] sm:$0xff] %v6137_v3  ;;  %2653 = vst [vmem:[#allocation3 + $0x40] sm:$0xff] %v6137_v3  ;;  %675 = vmatprep.subr.mxu0 %v6137_v3  ;;  %5606 = vmatprep.subr.mxu1 %v5047_v36  ;;  %v5042_v55 = vld [vmem:[%s8817_s1 + $0x270] sm:$0xff]  ;;  %v495_v57 = vld [vmem:[%s8817_s1 + $0x78] sm:$0xff] }
  0x25   : > { %2654 = vst [vmem:[#allocation3 + $0x48] sm:$0xff] %v6137_v3  ;;  %2655 = vst [vmem:[#allocation3 + $0x50] sm:$0xff] %v6137_v3  ;;  %676 = vmatpush1.msra.mxu0 %v5015_v38  ;;  %5607 = vmatpush3.msra.mxu1 %v5047_v36  ;;  %v4998_v56 = vld [vmem:[%s6327_s25 + $0x90] sm:$0xff]  ;;  %v4999_v58 = vld [vmem:[%s6327_s25 + $0x98] sm:$0xff] }
  0x26   : > { %2656 = vst [vmem:[#allocation3 + $0x58] sm:$0xff] %v6137_v3  ;;  %2657 = vst [vmem:[#allocation3 + $0x60] sm:$0xff] %v6137_v3  ;;  %677 = vmatprep.subr.mxu0 %v6137_v3  ;;  %5608 = vmatprep.subr.mxu1 %v5046_v39  ;;  %v5041_v60 = vld [vmem:[%s8817_s1 + $0x268] sm:$0xff]  ;;  %v5000_v62 = vld [vmem:[%s6327_s25 + $0xa0] sm:$0xff] }
  0x27   : > { %2658 = vst [vmem:[#allocation3 + $0x68] sm:$0xff] %v6137_v3  ;;  %2659 = vst [vmem:[#allocation3 + $0x70] sm:$0xff] %v6137_v3  ;;  %678 = vmatpush1.msra.mxu0 %v5014_v41  ;;  %5609 = vmatpush3.msra.mxu1 %v5046_v39  ;;  %v5040_v63 = vld [vmem:[%s8817_s1 + $0x260] sm:$0xff]  ;;  %v5001_v0 = vld [vmem:[%s6327_s25 + $0xa8] sm:$0xff] }
  0x28   : > { %2660 = vst [vmem:[#allocation3 + $0x78] sm:$0xff] %v6137_v3  ;;  %2661 = vst [vmem:[#allocation3 + $0x80] sm:$0xff] %v6137_v3  ;;  %679 = vmatprep.subr.mxu0 %v6137_v3  ;;  %5610 = vmatprep.subr.mxu1 %v5045_v42  ;;  %v494_v1 = vld [vmem:[%s8817_s1 + $0x70] sm:$0xff]  ;;  %v5039_v5 = vld [vmem:[%s8817_s1 + $0x258] sm:$0xff] }
  0x29   : > { %2662 = vst [vmem:[#allocation3 + $0x88] sm:$0xff] %v6137_v3  ;;  %2663 = vst [vmem:[#allocation3 + $0x90] sm:$0xff] %v6137_v3  ;;  %680 = vmatpush1.msra.mxu0 %v5013_v44  ;;  %5611 = vmatpush3.msra.mxu1 %v5045_v42  ;;  %v5002_v2 = vld [vmem:[%s6327_s25 + $0xb0] sm:$0xff]  ;;  %v5003_v7 = vld [vmem:[%s6327_s25 + $0xb8] sm:$0xff] }
  0x2a   : > { %2664 = vst [vmem:[#allocation3 + $0x98] sm:$0xff] %v6137_v3  ;;  %2665 = vst [vmem:[#allocation3 + $0xa0] sm:$0xff] %v6137_v3  ;;  %681 = vmatprep.subr.mxu0 %v6137_v3  ;;  %5612 = vmatprep.subr.mxu1 %v5044_v46  ;;  %v5038_v8 = vld [vmem:[%s8817_s1 + $0x250] sm:$0xff]  ;;  %v493_v9 = vld [vmem:[%s8817_s1 + $0x68] sm:$0xff] }
  0x2b   : > { %2666 = vst [vmem:[#allocation3 + $0xa8] sm:$0xff] %v6137_v3  ;;  %2667 = vst [vmem:[#allocation3 + $0xb0] sm:$0xff] %v6137_v3  ;;  %682 = vmatpush1.msra.mxu0 %v5012_v48  ;;  %5613 = vmatpush3.msra.mxu1 %v5044_v46  ;;  %v6490_v10 = vld [vmem:[%s6327_s25 + $0xc0] sm:$0xff]  ;;  %v5037_v12 = vld [vmem:[%s8817_s1 + $0x248] sm:$0xff] }
  0x2c   : > { %2668 = vst [vmem:[#allocation3 + $0xb8] sm:$0xff] %v6137_v3  ;;  %2669 = vst [vmem:[#allocation3 + $0xc0] sm:$0xff] %v6137_v3  ;;  %683 = vmatprep.subr.mxu0 %v6137_v3  ;;  %1141 = vmatprep.subr.mxu1 %v6137_v3  ;;  %v6498_v13 = vld [vmem:[%s6327_s25 + $0xc8] sm:$0xff]  ;;  %v5036_v15 = vld [vmem:[%s8817_s1 + $0x240] sm:$0xff] }
  0x2d   : > { %2670 = vst [vmem:[#allocation3 + $0xc8] sm:$0xff] %v6137_v3  ;;  %2671 = vst [vmem:[#allocation3 + $0xd0] sm:$0xff] %v6137_v3  ;;  %684 = vmatpush2.msra.mxu0 %v5043_v52  ;;  %v491_v23 = vld [vmem:[%s8817_s1 + $0x58] sm:$0xff]  ;;  %v5008_v24 = vld [vmem:[%s6327_s25 + $0xe0] sm:$0xff]  ;;  %715 = vmatprep.mubr.f32.mxu0 %v6340_v14 }
  0x2e   : > { %2672 = vst [vmem:[#allocation3 + $0xd8] sm:$0xff] %v6137_v3  ;;  %2673 = vst [vmem:[#allocation3 + $0xe0] sm:$0xff] %v6137_v3  ;;  %685 = vmatprep.subr.mxu0 %v6137_v3  ;;  %v5009_v27 = vld [vmem:[%s6327_s25 + $0xe8] sm:$0xff]  ;;  %v5034_v28 = vld [vmem:[%s8817_s1 + $0x230] sm:$0xff] }
  0x2f   : > { %2674 = vst [vmem:[#allocation3 + $0xe8] sm:$0xff] %v6137_v3  ;;  %2675 = vst [vmem:[#allocation3 + $0xf0] sm:$0xff] %v6137_v3  ;;  %686 = vmatpush2.msra.mxu0 %v5042_v55  ;;  %v490_v32 = vld [vmem:[%s8817_s1 + $0x50] sm:$0xff]  ;;  %v5011_v35 = vld [vmem:[%s6327_s25 + $0xf8] sm:$0xff] }
  0x30   : > { %2676 = vst [vmem:[#allocation3 + $0xf8] sm:$0xff] %v6137_v3  ;;  %2677 = vst [vmem:[#allocation3 + $0x100] sm:$0xff] %v6137_v3  ;;  %687 = vmatprep.subr.mxu0 %v6137_v3  ;;  %v5010_v33 = vld [vmem:[%s6327_s25 + $0xf0] sm:$0xff]  ;;  %v5033_v36 = vld [vmem:[%s8817_s1 + $0x228] sm:$0xff] }
  0x31   : > { %2678 = vst [vmem:[#allocation3 + $0x108] sm:$0xff] %v6137_v3  ;;  %2679 = vst [vmem:[#allocation3 + $0x110] sm:$0xff] %v6137_v3  ;;  %688 = vmatpush2.msra.mxu0 %v5041_v60  ;;  %v5032_v38 = vld [vmem:[%s8817_s1 + $0x220] sm:$0xff]  ;;  %v5031_v42 = vld [vmem:[%s8817_s1 + $0x218] sm:$0xff] }
  0x32   : > { %2680 = vst [vmem:[#allocation3 + $0x118] sm:$0xff] %v6137_v3  ;;  %2681 = vst [vmem:[#allocation3 + $0x120] sm:$0xff] %v6137_v3  ;;  %689 = vmatprep.subr.mxu0 %v6137_v3  ;;  %v5030_v44 = vld [vmem:[%s8817_s1 + $0x210] sm:$0xff]  ;;  %v5029_v48 = vld [vmem:[%s8817_s1 + $0x208] sm:$0xff] }
  0x33   : > { %2682 = vst [vmem:[#allocation3 + $0x128] sm:$0xff] %v6137_v3  ;;  %2683 = vst [vmem:[#allocation3 + $0x130] sm:$0xff] %v6137_v3  ;;  %690 = vmatpush2.msra.mxu0 %v5040_v63  ;;  %v486_v46 = vld [vmem:[%s8817_s1 + $0x30] sm:$0xff]  ;;  %v481_v63 = vld [vmem:[%s8817_s1 + $0x8] sm:$0xff] }
  0x34   : > { %2684 = vst [vmem:[#allocation3 + $0x138] sm:$0xff] %v6137_v3  ;;  %2685 = vst [vmem:[#allocation3 + $0x140] sm:$0xff] %v6137_v3  ;;  %691 = vmatprep.subr.mxu0 %v6137_v3 }
  0x35   : > { %295 = vst [vmem:[#allocation2 + $0x13] sm:$0xff] %v6340_v14  ;;  %296 = vst [vmem:[#allocation2 + $0x1b] sm:$0xff] %v6347_v16  ;;  %692 = vmatpush2.msra.mxu0 %v5039_v5  ;;  %v482_v14 = vld [vmem:[%s8817_s1 + $0x10] sm:$0xff]  ;;  %v511_v5 = vld [vmem:[%s8817_s1 + $0xf8] sm:$0xff] }
  0x36   : > { %300 = vst [vmem:[#allocation2 + $0x25] sm:$0xff] %v4982_v18  ;;  %301 = vst [vmem:[#allocation2 + $0x2d] sm:$0xff] %v4983_v19  ;;  %693 = vmatprep.subr.mxu0 %v6137_v3  ;;  %v5006_v18 = vld [vmem:[%s6327_s25 + $0xd0] sm:$0xff]  ;;  %v492_v19 = vld [vmem:[%s8817_s1 + $0x60] sm:$0xff] }
  0x37   : > { %305 = vst [vmem:[#allocation2 + $0x37] sm:$0xff] %v4984_v21  ;;  %306 = vst [vmem:[#allocation2 + $0x3f] sm:$0xff] %v4985_v22  ;;  %694 = vmatpush2.msra.mxu0 %v5038_v8  ;;  %v5007_v21 = vld [vmem:[%s6327_s25 + $0xd8] sm:$0xff]  ;;  %v510_v8 = vld [vmem:[%s8817_s1 + $0xf0] sm:$0xff] }
  0x38   : > { %310 = vst [vmem:[#allocation2 + $0x49] sm:$0xff] %v6370_v25  ;;  %311 = vst [vmem:[#allocation2 + $0x51] sm:$0xff] %v6373_v26  ;;  %695 = vmatprep.subr.mxu0 %v6137_v3  ;;  %v5035_v22 = vld [vmem:[%s8817_s1 + $0x238] sm:$0xff] }
  0x39   : > { %315 = vst [vmem:[#allocation2 + $0x5b] sm:$0xff] %v6385_v29  ;;  %316 = vst [vmem:[#allocation2 + $0x63] sm:$0xff] %v6388_v30  ;;  %696 = vmatpush2.msra.mxu0 %v5037_v12 }
  0x3a   : > { %320 = vst [vmem:[#allocation2 + $0x6d] sm:$0xff] %v4990_v34  ;;  %321 = vst [vmem:[#allocation2 + $0x75] sm:$0xff] %v4991_v37  ;;  %697 = vmatprep.subr.mxu0 %v6137_v3  ;;  %v489_v37 = vld [vmem:[%s8817_s1 + $0x48] sm:$0xff] }
  0x3b   : > { %325 = vst [vmem:[#allocation2 + $0x7f] sm:$0xff] %v4992_v40  ;;  %326 = vst [vmem:[#allocation2 + $0x87] sm:$0xff] %v4993_v43  ;;  %698 = vmatpush2.msra.mxu0 %v5036_v15  ;;  %v488_v40 = vld [vmem:[%s8817_s1 + $0x40] sm:$0xff]  ;;  %v487_v43 = vld [vmem:[%s8817_s1 + $0x38] sm:$0xff] }
  0x3c   : > { %330 = vst [vmem:[#allocation2 + $0x91] sm:$0xff] %v4994_v45  ;;  %331 = vst [vmem:[#allocation2 + $0x99] sm:$0xff] %v4995_v47  ;;  %v566_v50 = vld [vmem:[#allocation2 + $0x14] sm:$0xff]  ;;  %v567_v51 = vld [vmem:[#allocation2 + $0x1c] sm:$0xff]  ;;  %699 = vmatprep.subr.mxu0 %v6137_v3 }
  0x3d   : > { %335 = vst [vmem:[#allocation2 + $0xa3] sm:$0xff] %v6441_v49  ;;  %v568_v54 = vld [vmem:[#allocation2 + $0x24] sm:$0xff]  ;;  %336 = vst [vmem:[#allocation2 + $0xab] sm:$0xff] %v6449_v53  ;;  %5614 = vmatprep.mubr.f32.mxu1 %v566_v50  ;;  %v569_v59 = vld [vmem:[#allocation2 + $0x2c] sm:$0xff]  ;;  %700 = vmatpush2.msra.mxu0 %v5035_v22 }
  0x3e   : > { %5615 = vmatmul.mubr.f32.vlgmr.msra.gmra.mxu1 %v567_v51  ;;  %340 = vst [vmem:[#allocation2 + $0xb5] sm:$0xff] %v4998_v56  ;;  %341 = vst [vmem:[#allocation2 + $0xbd] sm:$0xff] %v4999_v58  ;;  %v570_v61 = vld [vmem:[#allocation2 + $0x34] sm:$0xff]  ;;  %v571_v4 = vld [vmem:[#allocation2 + $0x3c] sm:$0xff]  ;;  %701 = vmatprep.subr.mxu0 %v6137_v3 }
  0x3f   : > { %5617 = vmatprep.mubr.f32.mxu1 %v568_v54  ;;  %1142 = vmatpush1.msra.mxu1 %v495_v57  ;;  %345 = vst [vmem:[#allocation2 + $0xc7] sm:$0xff] %v5000_v62  ;;  %346 = vst [vmem:[#allocation2 + $0xcf] sm:$0xff] %v5001_v0  ;;  %v572_v6 = vld [vmem:[#allocation2 + $0x44] sm:$0xff]  ;;  %v573_v11 = vld [vmem:[#allocation2 + $0x4c] sm:$0xff] }
  0x40   : > { %350 = vst [vmem:[#allocation2 + $0xd9] sm:$0xff] %v5002_v2  ;;  %1143 = vmatprep.subr.mxu1 %v6137_v3  ;;  %351 = vst [vmem:[#allocation2 + $0xe1] sm:$0xff] %v5003_v7  ;;  %v574_v17 = vld [vmem:[#allocation2 + $0x54] sm:$0xff]  ;;  %v575_v20 = vld [vmem:[#allocation2 + $0x5c] sm:$0xff]  ;;  %702 = vmatpush2.msra.mxu0 %v5034_v28 }
  0x41   : > { %1144 = vmatpush1.msra.mxu1 %v494_v1  ;;  %355 = vst [vmem:[#allocation2 + $0xeb] sm:$0xff] %v6490_v10  ;;  %356 = vst [vmem:[#allocation2 + $0xf3] sm:$0xff] %v6498_v13  ;;  %v576_v31 = vld [vmem:[#allocation2 + $0x64] sm:$0xff]  ;;  %v577_v34 = vld [vmem:[#allocation2 + $0x6c] sm:$0xff]  ;;  %703 = vmatprep.subr.mxu0 %v6137_v3 }
  0x42   : > { %5618 = vmatmul.mubr.f32.gmra.mxu1 %v569_v59  ;;  %1145 = vmatprep.subr.mxu1 %v6137_v3  ;;  %360 = vst [vmem:[#allocation2 + $0xfd] sm:$0xff] %v5006_v18  ;;  %361 = vst [vmem:[#allocation2 + $0x105] sm:$0xff] %v5007_v21  ;;  %v578_v39 = vld [vmem:[#allocation2 + $0x74] sm:$0xff]  ;;  %v579_v41 = vld [vmem:[#allocation2 + $0x7c] sm:$0xff] }
  0x43   : > { %5620 = vmatprep.mubr.f32.mxu1 %v570_v61  ;;  %1146 = vmatpush1.msra.mxu1 %v493_v9  ;;  %365 = vst [vmem:[#allocation2 + $0x10f] sm:$0xff] %v5008_v24  ;;  %366 = vst [vmem:[#allocation2 + $0x117] sm:$0xff] %v5009_v27  ;;  %v580_v45 = vld [vmem:[#allocation2 + $0x84] sm:$0xff]  ;;  %v581_v47 = vld [vmem:[#allocation2 + $0x8c] sm:$0xff] }
  0x44   : > { %1147 = vmatprep.subr.mxu1 %v6137_v3  ;;  %370 = vst [vmem:[#allocation2 + $0x121] sm:$0xff] %v5010_v33  ;;  %371 = vst [vmem:[#allocation2 + $0x129] sm:$0xff] %v5011_v35  ;;  %704 = vmatpush2.msra.mxu0 %v5033_v36  ;;  %v485_v50 = vld [vmem:[%s8817_s1 + $0x28] sm:$0xff]  ;;  %v5028_v51 = vld [vmem:[%s8817_s1 + $0x200] sm:$0xff] }
  0x45   : > { %1148 = vmatpush1.msra.mxu1 %v492_v19  ;;  %705 = vmatprep.subr.mxu0 %v6137_v3  ;;  %v582_v52 = vld [vmem:[#allocation2 + $0x94] sm:$0xff]  ;;  %v484_v54 = vld [vmem:[%s8817_s1 + $0x20] sm:$0xff]  ;;  %v585_v61 = vld [vmem:[#allocation2 + $0xac] sm:$0xff] }
  0x46   : > { %5621 = vmatmul.mubr.f32.gmra.mxu1 %v571_v4  ;;  %1149 = vmatprep.subr.mxu1 %v6137_v3  ;;  %v446_v55 = vld [vmem:[#allocation2 + $0x12] sm:$0xff]  ;;  %v583_v56 = vld [vmem:[#allocation2 + $0x9c] sm:$0xff]  ;;  %v584_v59 = vld [vmem:[#allocation2 + $0xa4] sm:$0xff] }
  0x47   : > { %5623 = vmatprep.mubr.f32.mxu1 %v572_v6  ;;  %1150 = vmatpush1.msra.mxu1 %v491_v23  ;;  %v527_v57 = vld [vmem:[%s8817_s1 + $0x178] sm:$0xff]  ;;  %v532_v62 = vld [vmem:[#allocation2 + $0x23] sm:$0xff]  ;;  %v526_v1 = vld [vmem:[%s8817_s1 + $0x170] sm:$0xff] }
  0x48   : > { %1151 = vmatprep.subr.mxu1 %v6137_v3  ;;  %706 = vmatpush2.msra.mxu0 %v5032_v38  ;;  %v483_v58 = vld [vmem:[%s8817_s1 + $0x18] sm:$0xff]  ;;  %v6607_v2 = vld [vmem:[#allocation2 + $0x22] sm:$0xff]  ;;  %v533_v6 = vld [vmem:[#allocation2 + $0x2b] sm:$0xff] }
  0x49   : > { %1152 = vmatpush1.msra.mxu1 %v490_v32  ;;  %707 = vmatprep.subr.mxu0 %v6137_v3  ;;  %v6592_v60 = vld [vmem:[#allocation2 + $0x1a] sm:$0xff]  ;;  %v588_v7 = vld [vmem:[#allocation2 + $0xc4] sm:$0xff]  ;;  %v506_v27 = vld [vmem:[%s8817_s1 + $0xd0] sm:$0xff] }
  0x4a   : > { %5624 = vmatmul.mubr.f32.gmra.mxu1 %v573_v11  ;;  %1153 = vmatprep.subr.mxu1 %v6137_v3  ;;  %v586_v0 = vld [vmem:[#allocation2 + $0xb4] sm:$0xff]  ;;  %v587_v4 = vld [vmem:[#allocation2 + $0xbc] sm:$0xff]  ;;  %v6618_v9 = vld [vmem:[#allocation2 + $0x2a] sm:$0xff] }
  0x4b   : > { %5626 = vmatprep.mubr.f32.mxu1 %v574_v17  ;;  %1154 = vmatpush1.msra.mxu1 %v489_v37  ;;  %v589_v11 = vld [vmem:[#allocation2 + $0xcc] sm:$0xff]  ;;  %v590_v17 = vld [vmem:[#allocation2 + $0xd4] sm:$0xff]  ;;  %v508_v19 = vld [vmem:[%s8817_s1 + $0xe0] sm:$0xff] }
  0x4c   : > { %1155 = vmatprep.subr.mxu1 %v6137_v3  ;;  %708 = vmatpush2.msra.mxu0 %v5031_v42  ;;  %v534_v12 = vld [vmem:[#allocation2 + $0x33] sm:$0xff]  ;;  %v509_v15 = vld [vmem:[%s8817_s1 + $0xe8] sm:$0xff]  ;;  %v591_v21 = vld [vmem:[#allocation2 + $0xdc] sm:$0xff] }
  0x4d   : > { %1156 = vmatpush1.msra.mxu1 %v488_v40  ;;  %709 = vmatprep.subr.mxu0 %v6137_v3  ;;  %v525_v18 = vld [vmem:[%s8817_s1 + $0x168] sm:$0xff]  ;;  %v507_v22 = vld [vmem:[%s8817_s1 + $0xd8] sm:$0xff]  ;;  %v524_v35 = vld [vmem:[%s8817_s1 + $0x160] sm:$0xff] }
  0x4e   : > { %5627 = vmatmul.mubr.f32.gmra.mxu1 %v575_v20  ;;  %1157 = vmatprep.subr.mxu1 %v6137_v3  ;;  %v6632_v20 = vld [vmem:[#allocation2 + $0x32] sm:$0xff]  ;;  %v535_v23 = vld [vmem:[#allocation2 + $0x3b] sm:$0xff]  ;;  %v592_v24 = vld [vmem:[#allocation2 + $0xe4] sm:$0xff] }
  0x4f   : > { %5629 = vmatprep.mubr.f32.mxu1 %v576_v31  ;;  %1158 = vmatpush1.msra.mxu1 %v487_v43  ;;  %v6643_v28 = vld [vmem:[#allocation2 + $0x3a] sm:$0xff]  ;;  %v593_v31 = vld [vmem:[#allocation2 + $0xec] sm:$0xff]  ;;  %v536_v32 = vld [vmem:[#allocation2 + $0x43] sm:$0xff] }
  0x50   : > { %1159 = vmatprep.subr.mxu1 %v6137_v3  ;;  %710 = vmatpush2.msra.mxu0 %v5030_v44  ;;  %v505_v33 = vld [vmem:[%s8817_s1 + $0xc8] sm:$0xff]  ;;  %v504_v36 = vld [vmem:[%s8817_s1 + $0xc0] sm:$0xff]  ;;  %v502_v42 = vld [vmem:[%s8817_s1 + $0xb0] sm:$0xff] }
  0x51   : > { %1160 = vmatpush1.msra.mxu1 %v486_v46  ;;  %711 = vmatprep.subr.mxu0 %v6137_v3  ;;  %v6657_v37 = vld [vmem:[#allocation2 + $0x42] sm:$0xff]  ;;  %v537_v40 = vld [vmem:[#allocation2 + $0x4b] sm:$0xff]  ;;  %v538_v46 = vld [vmem:[#allocation2 + $0x53] sm:$0xff] }
  0x52   : > { %5630 = vmatmul.mubr.f32.gmra.mxu1 %v577_v34  ;;  %1161 = vmatprep.subr.mxu1 %v6137_v3  ;;  %v594_v34 = vld [vmem:[#allocation2 + $0xf4] sm:$0xff]  ;;  %v595_v38 = vld [vmem:[#allocation2 + $0xfc] sm:$0xff]  ;;  %v6668_v43 = vld [vmem:[#allocation2 + $0x4a] sm:$0xff] }
  0x53   : > { %5632 = vmatprep.mubr.f32.mxu1 %v578_v39  ;;  %712 = vmatpush2.msra.mxu0 %v5029_v48  ;;  %v503_v39 = vld [vmem:[%s8817_s1 + $0xb8] sm:$0xff]  ;;  %v597_v44 = vld [vmem:[#allocation2 + $0x10c] sm:$0xff]  ;;  %v500_v48 = vld [vmem:[%s8817_s1 + $0xa0] sm:$0xff] }
  0x54   : > { %1162 = vmatpush1.msra.mxu1 %v485_v50  ;;  %713 = vmatprep.subr.mxu0 %v6137_v3  ;;  %v6679_v50 = vld [vmem:[#allocation2 + $0x52] sm:$0xff] }
  0x55   : > { %1163 = vmatprep.subr.mxu1 %v6137_v3  ;;  %714 = vmatpush2.msra.mxu0 %v5028_v51  ;;  %v599_v51 = vld [vmem:[#allocation2 + $0x11c] sm:$0xff] }
  0x56   : > { %5633 = vmatmul.mubr.f32.gmra.mxu1 %v579_v41  ;;  %716 = vmatmul.mubr.f32.vlgmr.msra.gmra.mxu0 %v446_v55  ;;  %v596_v41 = vld [vmem:[#allocation2 + $0x104] sm:$0xff]  ;;  %v523_v55 = vld [vmem:[%s8817_s1 + $0x158] sm:$0xff] }
  0x57   : > { %5635 = vmatprep.mubr.f32.mxu1 %v580_v45  ;;  %1164 = vmatpush1.msra.mxu1 %v484_v54  ;;  %v501_v45 = vld [vmem:[%s8817_s1 + $0xa8] sm:$0xff] }
  0x58   : > { %1165 = vmatprep.subr.mxu1 %v6137_v3  ;;  %5668 = vmatprep.subr.mxu0 %v527_v57  ;;  %v600_v54 = vld [vmem:[#allocation2 + $0x124] sm:$0xff] }
  0x59   : > { %1166 = vmatpush1.msra.mxu1 %v483_v58  ;;  %5669 = vmatpush3.msra.mxu0 %v527_v57  ;;  %v6694_v57 = vld [vmem:[#allocation2 + $0x5a] sm:$0xff]  ;;  %v601_v58 = vld [vmem:[#allocation2 + $0x12c] sm:$0xff] }
  0x5a   : > { %5636 = vmatmul.mubr.f32.gmra.mxu1 %v581_v47  ;;  %1167 = vmatprep.subr.mxu1 %v6137_v3  ;;  %v598_v47 = vld [vmem:[#allocation2 + $0x114] sm:$0xff] }
  0x5b   : > { %5638 = vmatprep.mubr.f32.mxu1 %v582_v52  ;;  %720 = vmatprep.mubr.f32.mxu0 %v6347_v16  ;;  %v480_v16 = vld [vmem:[%s8817_s1] sm:$0xff]  ;;  %v499_v52 = vld [vmem:[%s8817_s1 + $0x98] sm:$0xff] }
  0x5c   : > { %1168 = vmatpush1.msra.mxu1 %v482_v14  ;;  %721 = vmatmul.mubr.f32.gmra.mxu0 %v6592_v60  ;;  %v408_v14 = vld [vmem:[#allocation2 + $0x1] sm:$0xff] }
  0x5d   : > { %1169 = vmatprep.subr.mxu1 %v6137_v3  ;;  %725 = vmatprep.mubr.f32.mxu0 %v532_v62  ;;  %v541_v62 = vld [vmem:[#allocation2 + $0x6b] sm:$0xff] }
  0x5e   : > { %5639 = vmatmul.mubr.f32.gmra.mxu1 %v583_v56  ;;  %5670 = vmatprep.subr.mxu0 %v526_v1  ;;  %v498_v56 = vld [vmem:[%s8817_s1 + $0x90] sm:$0xff] }
  0x5f   : > { %5641 = vmatprep.mubr.f32.mxu1 %v584_v59  ;;  %1170 = vmatpush1.msra.mxu1 %v481_v63  ;;  %v497_v59 = vld [vmem:[%s8817_s1 + $0x88] sm:$0xff] }
  0x60   : > { %1171 = vmatprep.subr.mxu1 %v6137_v3  ;;  %726 = vmatmul.mubr.f32.gmra.mxu0 %v6607_v2  ;;  %v409_v63 = vld [vmem:[#allocation2 + $0x9] sm:$0xff] }
  0x61   : > { %1172 = vmatpush1.msra.mxu1 %v480_v16  ;;  %5671 = vmatpush3.msra.mxu0 %v526_v1  ;;  %v6713_v1 = vld [vmem:[#allocation2] sm:$0xff]  ;;  %v542_v16 = vld [vmem:[#allocation2 + $0x73] sm:$0xff] }
  0x62   : > { %5642 = vmatmul.mubr.f32.gmra.mxu1 %v585_v61  ;;  %1173 = vmatprep.subr.mxu1 %v6137_v3  ;;  %v6705_v61 = vld [vmem:[#allocation2 + $0x62] sm:$0xff] }
  0x63   : > { %5644 = vmatprep.mubr.f32.mxu1 %v586_v0  ;;  %1174 = vmatpush2.msra.mxu1 %v511_v5  ;;  %v522_v0 = vld [vmem:[%s8817_s1 + $0x150] sm:$0xff]  ;;  %v521_v5 = vld [vmem:[%s8817_s1 + $0x148] sm:$0xff] }
  0x64   : > { %1175 = vmatprep.subr.mxu1 %v6137_v3  ;;  %730 = vmatprep.mubr.f32.mxu0 %v533_v6  ;;  %v5074_v6 = vld [vmem:[%s8817_s1 + $0x370] sm:$0xff] }
  0x65   : > { %1176 = vmatpush2.msra.mxu1 %v510_v8  ;;  %731 = vmatmul.mubr.f32.gmra.mxu0 %v6618_v9  ;;  %v374_v8 = vld [vmem:[#allocation2 + $0x10] sm:$0xff] }
  0x66   : > { %5645 = vmatmul.mubr.f32.gmra.mxu1 %v587_v4  ;;  %1177 = vmatprep.subr.mxu1 %v6137_v3  ;;  %v410_v4 = vld [vmem:[#allocation2 + $0x11] sm:$0xff] }
  0x67   : > { %5647 = vmatprep.mubr.f32.mxu1 %v588_v7  ;;  %735 = vmatprep.mubr.f32.mxu0 %v534_v12  ;;  %v6730_v7 = vld [vmem:[#allocation2 + $0x72] sm:$0xff] }
  0x68   : > { %1178 = vmatpush2.msra.mxu1 %v509_v15  ;;  %5672 = vmatprep.subr.mxu0 %v525_v18  ;;  %v411_v12 = vld [vmem:[#allocation2 + $0x19] sm:$0xff] }
  0x69   : > { %1179 = vmatprep.subr.mxu1 %v6137_v3  ;;  %736 = vmatmul.mubr.f32.gmra.mxu0 %v6632_v20  ;;  %v520_v15 = vld [vmem:[%s8817_s1 + $0x140] sm:$0xff] }
  0x6a   : > { %5648 = vmatmul.mubr.f32.gmra.mxu1 %v589_v11  ;;  %740 = vmatprep.mubr.f32.mxu0 %v535_v23  ;;  %v543_v11 = vld [vmem:[#allocation2 + $0x7b] sm:$0xff] }
  0x6b   : > { %5650 = vmatprep.mubr.f32.mxu1 %v590_v17  ;;  %1180 = vmatpush2.msra.mxu1 %v508_v19  ;;  %v5073_v17 = vld [vmem:[%s8817_s1 + $0x368] sm:$0xff]  ;;  %v375_v19 = vld [vmem:[#allocation2 + $0x18] sm:$0xff] }
  0x6c   : > { %1181 = vmatprep.subr.mxu1 %v6137_v3  ;;  %5673 = vmatpush3.msra.mxu0 %v525_v18  ;;  %v6740_v18 = vld [vmem:[#allocation2 + $0x7a] sm:$0xff] }
  0x6d   : > { %1182 = vmatpush2.msra.mxu1 %v507_v22  ;;  %741 = vmatmul.mubr.f32.gmra.mxu0 %v6643_v28  ;;  %v412_v22 = vld [vmem:[#allocation2 + $0x21] sm:$0xff]  ;;  %v519_v23 = vld [vmem:[%s8817_s1 + $0x138] sm:$0xff] }
  0x6e   : > { %5651 = vmatmul.mubr.f32.gmra.mxu1 %v591_v21  ;;  %1183 = vmatprep.subr.mxu1 %v6137_v3  ;;  %v544_v21 = vld [vmem:[#allocation2 + $0x83] sm:$0xff] }
  0x6f   : > { %5653 = vmatprep.mubr.f32.mxu1 %v592_v24  ;;  %1184 = vmatpush2.msra.mxu1 %v506_v27  ;;  %v5072_v24 = vld [vmem:[%s8817_s1 + $0x360] sm:$0xff] }
  0x70   : > { %1185 = vmatprep.subr.mxu1 %v6137_v3  ;;  %745 = vmatprep.mubr.f32.mxu0 %v536_v32  ;;  %v6750_v27 = vld [vmem:[#allocation2 + $0x82] sm:$0xff]  ;;  %v545_v32 = vld [vmem:[#allocation2 + $0x8b] sm:$0xff] }
  0x71   : > { %1186 = vmatpush2.msra.mxu1 %v505_v33  ;;  %5674 = vmatprep.subr.mxu0 %v524_v35  ;;  %v413_v33 = vld [vmem:[#allocation2 + $0x29] sm:$0xff] }
  0x72   : > { %5654 = vmatmul.mubr.f32.gmra.mxu1 %v593_v31  ;;  %1187 = vmatprep.subr.mxu1 %v6137_v3  ;;  %v376_v31 = vld [vmem:[#allocation2 + $0x20] sm:$0xff] }
  0x73   : > { %5656 = vmatprep.mubr.f32.mxu1 %v594_v34  ;;  %1188 = vmatpush2.msra.mxu1 %v504_v36  ;;  %v518_v34 = vld [vmem:[%s8817_s1 + $0x130] sm:$0xff] }
  0x74   : > { %746 = vmatmul.mubr.f32.gmra.mxu0 %v6657_v37  ;;  %1189 = vmatprep.subr.mxu1 %v6137_v3  ;;  %v6760_v36 = vld [vmem:[#allocation2 + $0x8a] sm:$0xff] }
  0x75   : > { %1190 = vmatpush2.msra.mxu1 %v503_v39  ;;  %750 = vmatprep.mubr.f32.mxu0 %v537_v40  ;;  %v546_v39 = vld [vmem:[#allocation2 + $0x93] sm:$0xff] }
  0x76   : > { %5657 = vmatmul.mubr.f32.gmra.mxu1 %v595_v38  ;;  %1191 = vmatprep.subr.mxu1 %v6137_v3  ;;  %v377_v38 = vld [vmem:[#allocation2 + $0x28] sm:$0xff]  ;;  %v414_v40 = vld [vmem:[#allocation2 + $0x31] sm:$0xff] }
  0x77   : > { %5659 = vmatprep.mubr.f32.mxu1 %v596_v41  ;;  %1192 = vmatpush2.msra.mxu1 %v502_v42  ;;  %v517_v41 = vld [vmem:[%s8817_s1 + $0x128] sm:$0xff]  ;;  %v5070_v42 = vld [vmem:[%s8817_s1 + $0x350] sm:$0xff] }
  0x78   : > { %751 = vmatmul.mubr.f32.gmra.mxu0 %v6668_v43  ;;  %1193 = vmatprep.subr.mxu1 %v6137_v3 }
  0x79   : > { %5675 = vmatpush3.msra.mxu0 %v524_v35  ;;  %1194 = vmatpush2.msra.mxu1 %v501_v45  ;;  %v5071_v35 = vld [vmem:[%s8817_s1 + $0x358] sm:$0xff]  ;;  %v378_v45 = vld [vmem:[#allocation2 + $0x30] sm:$0xff] }
  0x7a   : > { %5660 = vmatmul.mubr.f32.gmra.mxu1 %v597_v44  ;;  %1195 = vmatprep.subr.mxu1 %v6137_v3  ;;  %v6770_v44 = vld [vmem:[#allocation2 + $0x92] sm:$0xff] }
  0x7b   : > { %755 = vmatprep.mubr.f32.mxu0 %v538_v46  ;;  %5662 = vmatprep.mubr.f32.mxu1 %v598_v47  ;;  %v547_v46 = vld [vmem:[#allocation2 + $0x9b] sm:$0xff] }
  0x7c   : > { %1196 = vmatpush2.msra.mxu1 %v500_v48  ;;  %756 = vmatmul.mubr.f32.gmra.mxu0 %v6679_v50  ;;  %v415_v47 = vld [vmem:[#allocation2 + $0x39] sm:$0xff] }
  0x7d   : > { %1197 = vmatprep.subr.mxu1 %v6137_v3  ;;  %760 = vmatprep.mubr.f32.mxu0 %v6385_v29  ;;  %v496_v29 = vld [vmem:[%s8817_s1 + $0x80] sm:$0xff] }
  0x7e   : > { %5663 = vmatmul.mubr.f32.gmra.mxu1 %v599_v51  ;;  %5676 = vmatprep.subr.mxu0 %v523_v55  ;;  %v516_v48 = vld [vmem:[%s8817_s1 + $0x120] sm:$0xff]  ;;  %v5069_v51 = vld [vmem:[%s8817_s1 + $0x348] sm:$0xff] }
  0x7f   : > { %1198 = vmatpush2.msra.mxu1 %v499_v52  ;;  %5665 = vmatprep.mubr.f32.mxu1 %v600_v54  ;;  %v6780_v52 = vld [vmem:[#allocation2 + $0x9a] sm:$0xff] }
  0x80   : > { %1199 = vmatprep.subr.mxu1 %v6137_v3  ;;  %761 = vmatmul.mubr.f32.gmra.mxu0 %v6694_v57  ;;  %v379_v54 = vld [vmem:[#allocation2 + $0x38] sm:$0xff] }
  0x81   : > { %1200 = vmatpush2.msra.mxu1 %v498_v56  ;;  %5677 = vmatpush3.msra.mxu0 %v523_v55  ;;  %v416_v55 = vld [vmem:[#allocation2 + $0x41] sm:$0xff]  ;;  %v515_v56 = vld [vmem:[%s8817_s1 + $0x118] sm:$0xff] }
  0x82   : > { %5666 = vmatmul.mubr.f32.gmra.mxu1 %v601_v58  ;;  %1201 = vmatprep.subr.mxu1 %v6137_v3  ;;  %v5068_v58 = vld [vmem:[%s8817_s1 + $0x340] sm:$0xff] }
  0x83   : > { %1202 = vmatpush2.msra.mxu1 %v497_v59  ;;  %765 = vmatprep.mubr.f32.mxu0 %v6388_v30  ;;  %v6719_v30 = vld [vmem:[#allocation2 + $0x6a] sm:$0xff]  ;;  %v6791_v59 = vld [vmem:[#allocation2 + $0xa2] sm:$0xff] }
  0x84   : > { %1203 = vmatprep.subr.mxu1 %v6137_v3  ;;  %1205 = vmatprep.mubr.f32.mxu1 %v408_v14  ;;  %v5075_v3 = vld [vmem:[%s8817_s1 + $0x378] sm:$0xff]  ;;  %v514_v14 = vld [vmem:[%s8817_s1 + $0x110] sm:$0xff] }
  0x85   : > { %1204 = vmatpush2.msra.mxu1 %v496_v29  ;;  %766 = vmatmul.mubr.f32.gmra.mxu0 %v6705_v61  ;;  %v380_v29 = vld [vmem:[#allocation2 + $0x40] sm:$0xff] }
  0x86   : > { %1206 = vmatmul.mubr.f32.vlgmr.msra.gmra.mxu1 %v6713_v1  ;;  %770 = vmatprep.mubr.f32.mxu0 %v541_v62  ;;  %v6803_v62 = vld [vmem:[#allocation2 + $0xaa] sm:$0xff] }
  0x87   : > { %1210 = vmatprep.mubr.f32.mxu1 %v409_v63  ;;  %5678 = vmatprep.subr.mxu0 %v522_v0  ;;  %v381_v63 = vld [vmem:[#allocation2 + $0x48] sm:$0xff] }
  0x88   : > { %1788 = vmatprep.subr.mxu1 %v6713_v1  ;;  %5679 = vmatpush3.msra.mxu0 %v522_v0  ;;  %v550_v0 = vld [vmem:[#allocation2 + $0xb3] sm:$0xff] }
  0x89   : > { %1789 = vmatpush1.msra.mxu1 %v5075_v3  ;;  %771 = vmatmul.mubr.f32.gmra.mxu0 %v6719_v30  ;;  %v513_v3 = vld [vmem:[%s8817_s1 + $0x108] sm:$0xff] }
  0x8a   : > { %1211 = vmatmul.mubr.f32.gmra.mxu1 %v6713_v1  ;;  %775 = vmatprep.mubr.f32.mxu0 %v542_v16  ;;  %v382_v16 = vld [vmem:[#allocation2 + $0x50] sm:$0xff] }
  0x8b   : > { %1215 = vmatprep.mubr.f32.mxu1 %v410_v4  ;;  %5680 = vmatprep.subr.mxu0 %v521_v5  ;;  %v551_v4 = vld [vmem:[#allocation2 + $0xbb] sm:$0xff] }
  0x8c   : > { %1790 = vmatprep.subr.mxu1 %v6713_v1  ;;  %5681 = vmatpush3.msra.mxu0 %v521_v5  ;;  %v419_v5 = vld [vmem:[#allocation2 + $0x59] sm:$0xff] }
  0x8d   : > { %1791 = vmatpush1.msra.mxu1 %v5074_v6  ;;  %776 = vmatmul.mubr.f32.gmra.mxu0 %v6730_v7  ;;  %v512_v6 = vld [vmem:[%s8817_s1 + $0x100] sm:$0xff] }
  0x8e   : > { %1216 = vmatmul.mubr.f32.gmra.mxu1 %v374_v8  ;;  %780 = vmatprep.mubr.f32.mxu0 %v543_v11  ;;  %v6824_v8 = vld [vmem:[#allocation2 + $0xba] sm:$0xff] }
  0x8f   : > { %1220 = vmatprep.mubr.f32.mxu1 %v411_v12  ;;  %5682 = vmatprep.subr.mxu0 %v520_v15  ;;  %v383_v11 = vld [vmem:[#allocation2 + $0x58] sm:$0xff]  ;;  %v552_v12 = vld [vmem:[#allocation2 + $0xc3] sm:$0xff] }
  0x90   : > { %1792 = vmatprep.subr.mxu1 %v6713_v1  ;;  %5683 = vmatpush3.msra.mxu0 %v520_v15  ;;  %v420_v15 = vld [vmem:[#allocation2 + $0x61] sm:$0xff] }
  0x91   : > { %1793 = vmatpush1.msra.mxu1 %v5073_v17  ;;  %781 = vmatmul.mubr.f32.gmra.mxu0 %v6740_v18  ;;  %v6830_v17 = vld [vmem:[%s8817_s1 + $0x478] sm:$0xff] }
  0x92   : > { %1221 = vmatmul.mubr.f32.gmra.mxu1 %v375_v19  ;;  %785 = vmatprep.mubr.f32.mxu0 %v544_v21  ;;  %v5064_v19 = vld [vmem:[%s8817_s1 + $0x320] sm:$0xff] }
  0x93   : > { %1225 = vmatprep.mubr.f32.mxu1 %v412_v22  ;;  %5684 = vmatprep.subr.mxu0 %v519_v23  ;;  %v6836_v21 = vld [vmem:[#allocation2 + $0xc2] sm:$0xff] }
  0x94   : > { %1794 = vmatprep.subr.mxu1 %v6713_v1  ;;  %5685 = vmatpush3.msra.mxu0 %v519_v23  ;;  %v384_v22 = vld [vmem:[#allocation2 + $0x60] sm:$0xff]  ;;  %v553_v23 = vld [vmem:[#allocation2 + $0xcb] sm:$0xff] }
  0x95   : > { %1795 = vmatpush1.msra.mxu1 %v5072_v24  ;;  %786 = vmatmul.mubr.f32.gmra.mxu0 %v6750_v27  ;;  %v421_v24 = vld [vmem:[#allocation2 + $0x69] sm:$0xff] }
  0x96   : > { %1226 = vmatmul.mubr.f32.gmra.mxu1 %v376_v31  ;;  %790 = vmatprep.mubr.f32.mxu0 %v545_v32  ;;  %v5063_v31 = vld [vmem:[%s8817_s1 + $0x318] sm:$0xff]  ;;  %v6844_v32 = vld [vmem:[#allocation2 + $0xca] sm:$0xff] }
  0x97   : > { %1230 = vmatprep.mubr.f32.mxu1 %v413_v33  ;;  %5686 = vmatprep.subr.mxu0 %v518_v34  ;;  %v385_v33 = vld [vmem:[#allocation2 + $0x68] sm:$0xff] }
  0x98   : > { %1796 = vmatprep.subr.mxu1 %v6713_v1  ;;  %5687 = vmatpush3.msra.mxu0 %v518_v34  ;;  %v554_v34 = vld [vmem:[#allocation2 + $0xd3] sm:$0xff] }
  0x99   : > { %1797 = vmatpush1.msra.mxu1 %v5071_v35  ;;  %791 = vmatmul.mubr.f32.gmra.mxu0 %v6760_v36  ;;  %v422_v35 = vld [vmem:[#allocation2 + $0x71] sm:$0xff] }
  0x9a   : > { %1231 = vmatmul.mubr.f32.gmra.mxu1 %v377_v38  ;;  %795 = vmatprep.mubr.f32.mxu0 %v546_v39  ;;  %v5062_v38 = vld [vmem:[%s8817_s1 + $0x310] sm:$0xff] }
  0x9b   : > { %1235 = vmatprep.mubr.f32.mxu1 %v414_v40  ;;  %5688 = vmatprep.subr.mxu0 %v517_v41  ;;  %v6851_v39 = vld [vmem:[#allocation2 + $0xd2] sm:$0xff] }
  0x9c   : > { %1798 = vmatprep.subr.mxu1 %v6713_v1  ;;  %5689 = vmatpush3.msra.mxu0 %v517_v41  ;;  %v386_v40 = vld [vmem:[#allocation2 + $0x70] sm:$0xff]  ;;  %v555_v41 = vld [vmem:[#allocation2 + $0xdb] sm:$0xff] }
  0x9d   : > { %1799 = vmatpush1.msra.mxu1 %v5070_v42  ;;  %796 = vmatmul.mubr.f32.gmra.mxu0 %v6770_v44  ;;  %v423_v42 = vld [vmem:[#allocation2 + $0x79] sm:$0xff] }
  0x9e   : > { %1236 = vmatmul.mubr.f32.gmra.mxu1 %v378_v45  ;;  %800 = vmatprep.mubr.f32.mxu0 %v547_v46  ;;  %v5061_v45 = vld [vmem:[%s8817_s1 + $0x308] sm:$0xff]  ;;  %v6858_v46 = vld [vmem:[#allocation2 + $0xda] sm:$0xff] }
  0x9f   : > { %1240 = vmatprep.mubr.f32.mxu1 %v415_v47  ;;  %5690 = vmatprep.subr.mxu0 %v516_v48  ;;  %v387_v47 = vld [vmem:[#allocation2 + $0x78] sm:$0xff] }
  0xa0   : > { %1800 = vmatprep.subr.mxu1 %v6713_v1  ;;  %5691 = vmatpush3.msra.mxu0 %v516_v48  ;;  %v2393_v48 = vld [vmem:[%s8821_s5] sm:$0xff] }
  0xa1   : > { %1801 = vmatpush1.msra.mxu1 %v5069_v51  ;;  %801 = vmatmul.mubr.f32.gmra.mxu0 %v6780_v52  ;;  %v556_v51 = vld [vmem:[#allocation2 + $0xe3] sm:$0xff] }
  0xa2   : > { %1241 = vmatmul.mubr.f32.gmra.mxu1 %v379_v54  ;;  %805 = vmatprep.mubr.f32.mxu0 %v6441_v49  ;;  %v5067_v49 = vld [vmem:[%s8817_s1 + $0x338] sm:$0xff]  ;;  %v424_v54 = vld [vmem:[#allocation2 + $0x81] sm:$0xff] }
  0xa3   : > { %1245 = vmatprep.mubr.f32.mxu1 %v416_v55  ;;  %1802 = vmatprep.subr.mxu1 %v6713_v1  ;;  %v6138_v55 = vmov 0  }
  0xa4   : > { %5692 = vmatprep.subr.mxu0 %v515_v56  ;;  %1803 = vmatpush1.msra.mxu1 %v5068_v58  ;;  %v6868_v58 = vld [vmem:[#allocation2 + $0xe2] sm:$0xff] }
  0xa5   : > { %5693 = vmatpush3.msra.mxu0 %v515_v56  ;;  %1804 = vmatprep.subr.mxu1 %v6713_v1  ;;  %v5060_v56 = vld [vmem:[%s8817_s1 + $0x300] sm:$0xff] }
  0xa6   : > { %806 = vmatmul.mubr.f32.gmra.mxu0 %v6791_v59  ;;  %1246 = vmatmul.mubr.f32.gmra.mxu1 %v380_v29  ;;  %v388_v29 = vld [vmem:[#allocation2 + $0x80] sm:$0xff] }
  0xa7   : > { %810 = vmatprep.mubr.f32.mxu0 %v6449_v53  ;;  %1250 = vmatprep.mubr.f32.mxu1 %v6370_v25  ;;  %v5066_v25 = vld [vmem:[%s8817_s1 + $0x330] sm:$0xff] }
  0xa8   : > { %5694 = vmatprep.subr.mxu0 %v514_v14  ;;  %1805 = vmatpush1.msra.mxu1 %v5067_v49  ;;  %v6814_v53 = vld [vmem:[#allocation2 + $0xb2] sm:$0xff]  ;;  %v2394_v49 = vld [vmem:[%s8821_s5 + $0x8] sm:$0xff] }
  0xa9   : > { %5695 = vmatpush3.msra.mxu0 %v514_v14  ;;  %1806 = vmatprep.subr.mxu1 %v6713_v1  ;;  %v425_v14 = vld [vmem:[#allocation2 + $0x89] sm:$0xff] }
  0xaa   : > { %811 = vmatmul.mubr.f32.gmra.mxu0 %v6803_v62  ;;  %1251 = vmatmul.mubr.f32.gmra.mxu1 %v381_v63  ;;  %v5091_v63 = vld [vmem:[%s8817_s1 + $0x3f8] sm:$0xff] }
  0xab   : > { %815 = vmatprep.mubr.f32.mxu0 %v550_v0  ;;  %1255 = vmatprep.mubr.f32.mxu1 %v6373_v26  ;;  %v5065_v26 = vld [vmem:[%s8817_s1 + $0x328] sm:$0xff] }
  0xac   : > { %5696 = vmatprep.subr.mxu0 %v513_v3  ;;  %1807 = vmatpush1.msra.mxu1 %v5066_v25  ;;  %v6879_v0 = vld [vmem:[#allocation2 + $0xea] sm:$0xff] }
  0xad   : > { %5697 = vmatpush3.msra.mxu0 %v513_v3  ;;  %1808 = vmatprep.subr.mxu1 %v6713_v1  ;;  %v389_v3 = vld [vmem:[#allocation2 + $0x88] sm:$0xff]  ;;  %v2395_v25 = vld [vmem:[%s8821_s5 + $0x10] sm:$0xff] }
  0xae   : > { %816 = vmatmul.mubr.f32.gmra.mxu0 %v6814_v53  ;;  %1256 = vmatmul.mubr.f32.gmra.mxu1 %v382_v16  ;;  %v2397_v16 = vld [vmem:[%s8821_s5 + $0x20] sm:$0xff] }
  0xaf   : > { %820 = vmatprep.mubr.f32.mxu0 %v551_v4  ;;  %1260 = vmatprep.mubr.f32.mxu1 %v419_v5  ;;  %v6111_v4 = vld [vmem:[#allocation2 + $0x91] sm:$0xff] }
  0xb0   : > { %5698 = vmatprep.subr.mxu0 %v512_v6  ;;  %1809 = vmatpush1.msra.mxu1 %v5065_v26  ;;  %v6893_v5 = vld [vmem:[#allocation2 + $0xf2] sm:$0xff]  ;;  %v559_v26 = vld [vmem:[#allocation2 + $0xfb] sm:$0xff] }
  0xb1   : > { %5699 = vmatpush3.msra.mxu0 %v512_v6  ;;  %1810 = vmatprep.subr.mxu1 %v6713_v1  ;;  %v390_v6 = vld [vmem:[#allocation2 + $0x90] sm:$0xff] }
  0xb2   : > { %821 = vmatmul.mubr.f32.gmra.mxu0 %v6824_v8  ;;  %1261 = vmatmul.mubr.f32.gmra.mxu1 %v383_v11  ;;  %v2396_v11 = vld [vmem:[%s8821_s5 + $0x18] sm:$0xff] }
  0xb3   : > { %825 = vmatprep.mubr.f32.mxu0 %v552_v12  ;;  %1265 = vmatprep.mubr.f32.mxu1 %v420_v15  ;;  %v2399_v12 = vld [vmem:[%s8821_s5 + $0x30] sm:$0xff]  ;;  %v6112_v15 = vld [vmem:[#allocation2 + $0x99] sm:$0xff] }
  0xb4   : > { %5754 = vmatprep.subr.mxu0 %v6830_v17  ;;  %1811 = vmatpush1.msra.mxu1 %v5064_v19  ;;  %v6906_v19 = vld [vmem:[#allocation2 + $0xfa] sm:$0xff] }
  0xb5   : > { %1812 = vmatprep.subr.mxu1 %v6713_v1  ;;  %6108 = vset.pattern.permute.xlu0 %v6138_v55 }
  0xb6   : > { %826 = vmatmul.mubr.f32.gmra.mxu0 %v6836_v21  ;;  %1266 = vmatmul.mubr.f32.gmra.mxu1 %v384_v22  ;;  %v391_v22 = vld [vmem:[#allocation2 + $0x98] sm:$0xff] }
  0xb7   : > { %830 = vmatprep.mubr.f32.mxu0 %v553_v23  ;;  %1270 = vmatprep.mubr.f32.mxu1 %v421_v24  ;;  %v560_v23 = vld [vmem:[#allocation2 + $0x103] sm:$0xff] }
  0xb8   : > { %1813 = vmatpush1.msra.mxu1 %v5063_v31  ;;  %2431 = vperm.xlu0 %6108, %v2393_v48   ;;  %v428_v24 = vld [vmem:[#allocation2 + $0xa1] sm:$0xff]  ;;  %v6932_v48 = vld [vmem:[#allocation2 + $0x10a] sm:$0xff] }
  0xb9   : > { %1814 = vmatprep.subr.mxu1 %v6713_v1  ;;  %6109 = vset.pattern.permute.xlu1 %v6138_v55  ;;  %v2398_v31 = vld [vmem:[%s8821_s5 + $0x28] sm:$0xff]  ;;  %v430_v55 = vld [vmem:[#allocation2 + $0xb1] sm:$0xff] }
  0xba   : > { %831 = vmatmul.mubr.f32.gmra.mxu0 %v6844_v32  ;;  %1271 = vmatmul.mubr.f32.gmra.mxu1 %v385_v33  ;;  %v2401_v33 = vld [vmem:[%s8821_s5 + $0x40] sm:$0xff] }
  0xbb   : > { %835 = vmatprep.mubr.f32.mxu0 %v554_v34  ;;  %1275 = vmatprep.mubr.f32.mxu1 %v422_v35  ;;  %v5088_v34 = vld [vmem:[%s8817_s1 + $0x3e0] sm:$0xff] }
  0xbc   : > { %1815 = vmatpush1.msra.mxu1 %v5062_v38  ;;  %2436 = vperm.xlu0 %6108, %v2394_v49   ;;  %v6919_v35 = vld [vmem:[#allocation2 + $0x102] sm:$0xff]  ;;  %v6945_v49 = vld [vmem:[#allocation2 + $0x112] sm:$0xff] }
  0xbd   : > { %1816 = vmatprep.subr.mxu1 %v6713_v1  ;;  %2441 = vperm.xlu1 %6109, %v2395_v25   ;;  %v392_v38 = vld [vmem:[#allocation2 + $0xa0] sm:$0xff] }
  0xbe   : > { %836 = vmatmul.mubr.f32.gmra.mxu0 %v6851_v39  ;;  %1276 = vmatmul.mubr.f32.gmra.mxu1 %v386_v40  ;;  %v561_v40 = vld [vmem:[#allocation2 + $0x10b] sm:$0xff]  ;;  %v431_v25 = vld [vmem:[#allocation2 + $0xb9] sm:$0xff] }
  0xbf   : > { %840 = vmatprep.mubr.f32.mxu0 %v555_v41  ;;  %1280 = vmatprep.mubr.f32.mxu1 %v423_v42  ;;  %v429_v41 = vld [vmem:[#allocation2 + $0xa9] sm:$0xff]  ;;  %v2400_v42 = vld [vmem:[%s8821_s5 + $0x38] sm:$0xff] }
  0xc0   : > { %1817 = vmatpush1.msra.mxu1 %v5061_v45  ;;  %2451 = vperm.xlu0 %6108, %v2397_v16   ;;  %v2403_v45 = vld [vmem:[%s8821_s5 + $0x50] sm:$0xff]  ;;  %v2404_v16 = vld [vmem:[%s8821_s5 + $0x58] sm:$0xff] }
  0xc1   : > { %1818 = vmatprep.subr.mxu1 %v6713_v1  ;;  %2446 = vperm.xlu1 %6109, %v2396_v11   ;;  %v564_v11 = vld [vmem:[#allocation2 + $0x123] sm:$0xff] }
  0xc2   : > { %841 = vmatmul.mubr.f32.gmra.mxu0 %v6858_v46  ;;  %1281 = vmatmul.mubr.f32.gmra.mxu1 %v387_v47  ;;  %v5087_v47 = vld [vmem:[%s8817_s1 + $0x3d8] sm:$0xff] }
  0xc3   : > { %845 = vmatprep.mubr.f32.mxu0 %v556_v51  ;;  %1285 = vmatprep.mubr.f32.mxu1 %v424_v54  ;;  %v393_v51 = vld [vmem:[#allocation2 + $0xa8] sm:$0xff]  ;;  %v562_v54 = vld [vmem:[#allocation2 + $0x113] sm:$0xff] }
  0xc4   : > { %1819 = vmatpush1.msra.mxu1 %v5060_v56  ;;  %2461 = vperm.xlu0 %6108, %v2399_v12   ;;  %v2402_v56 = vld [vmem:[%s8821_s5 + $0x48] sm:$0xff] }
  0xc5   : > { %1820 = vmatprep.subr.mxu1 %v6713_v1  ;;  %2456 = vperm.xlu1 %6109, %v2398_v31   ;;  %v432_v12 = vld [vmem:[#allocation2 + $0xc1] sm:$0xff]  ;;  %v565_v31 = vld [vmem:[#allocation2 + $0x12b] sm:$0xff] }
  0xc6   : > { %846 = vmatmul.mubr.f32.gmra.mxu0 %v6868_v58  ;;  %1286 = vmatmul.mubr.f32.gmra.mxu1 %v388_v29  ;;  %v2405_v29 = vld [vmem:[%s8821_s5 + $0x60] sm:$0xff] }
  0xc7   : > { %850 = vmatprep.mubr.f32.mxu0 %v6490_v10  ;;  %1290 = vmatprep.mubr.f32.mxu1 %v425_v14  ;;  %v5090_v10 = vld [vmem:[%s8817_s1 + $0x3f0] sm:$0xff] }
  0xc8   : > { %1821 = vmatpush2.msra.mxu1 %v5091_v63  ;;  %2471 = vperm.xlu0 %6108, %v2401_v33   ;;  %v5086_v14 = vld [vmem:[%s8817_s1 + $0x3d0] sm:$0xff] }
  0xc9   : > { %1822 = vmatprep.subr.mxu1 %v6713_v1  ;;  %2466 = vperm.xlu1 %6109, %v2400_v42   ;;  %v394_v63 = vld [vmem:[#allocation2 + $0xb0] sm:$0xff]  ;;  %v397_v42 = vld [vmem:[#allocation2 + $0xc8] sm:$0xff] }
  0xca   : > { %851 = vmatmul.mubr.f32.gmra.mxu0 %v6879_v0  ;;  %1291 = vmatmul.mubr.f32.gmra.mxu1 %v389_v3  ;;  %v563_v3 = vld [vmem:[#allocation2 + $0x11b] sm:$0xff]  ;;  %v433_v33 = vld [vmem:[#allocation2 + $0xc9] sm:$0xff] }
  0xcb   : > { %855 = vmatprep.mubr.f32.mxu0 %v6498_v13  ;;  %1295 = vmatprep.mubr.f32.mxu1 %v6111_v4  ;;  %v5089_v13 = vld [vmem:[%s8817_s1 + $0x3e8] sm:$0xff] }
  0xcc   : > { %1823 = vmatpush2.msra.mxu1 %v5090_v10  ;;  %2481 = vperm.xlu0 %6108, %v2403_v45   ;;  %v2407_v10 = vld [vmem:[%s8821_s5 + $0x70] sm:$0xff]  ;;  %v5085_v4 = vld [vmem:[%s8817_s1 + $0x3c8] sm:$0xff] }
  0xcd   : > { %1824 = vmatprep.subr.mxu1 %v6713_v1  ;;  %2476 = vperm.xlu1 %6109, %v2402_v56   ;;  %v434_v45 = vld [vmem:[#allocation2 + $0xd1] sm:$0xff] }
  0xce   : > { %856 = vmatmul.mubr.f32.gmra.mxu0 %v6893_v5  ;;  %1296 = vmatmul.mubr.f32.gmra.mxu1 %v390_v6  ;;  %v6958_v6 = vld [vmem:[#allocation2 + $0x11a] sm:$0xff]  ;;  %v398_v56 = vld [vmem:[#allocation2 + $0xd0] sm:$0xff] }
  0xcf   : > { %860 = vmatprep.mubr.f32.mxu0 %v559_v26  ;;  %1300 = vmatprep.mubr.f32.mxu1 %v6112_v15  ;;  %v395_v26 = vld [vmem:[#allocation2 + $0xb8] sm:$0xff]  ;;  %v2409_v15 = vld [vmem:[%s8821_s5 + $0x80] sm:$0xff] }
  0xd0   : > { %1825 = vmatpush2.msra.mxu1 %v5089_v13  ;;  %2491 = vperm.xlu0 %6108, %v2405_v29   ;;  %v2406_v13 = vld [vmem:[%s8821_s5 + $0x68] sm:$0xff] }
  0xd1   : > { %1826 = vmatprep.subr.mxu1 %v6713_v1  ;;  %2486 = vperm.xlu1 %6109, %v2404_v16   ;;  %v445_v29 = vld [vmem:[#allocation2 + $0xa] sm:$0xff]  ;;  %v6114_v16 = vld [vmem:[#allocation2 + $0x12] sm:$0xff] }
  0xd2   : > { %861 = vmatmul.mubr.f32.gmra.mxu0 %v6906_v19  ;;  %1301 = vmatmul.mubr.f32.gmra.mxu1 %v391_v22  ;;  %v5084_v22 = vld [vmem:[%s8817_s1 + $0x3c0] sm:$0xff] }
  0xd3   : > { %865 = vmatprep.mubr.f32.mxu0 %v560_v23  ;;  %1305 = vmatprep.mubr.f32.mxu1 %v428_v24  ;;  %v528_v23 = vld [vmem:[#allocation2 + $0x122] sm:$0xff] }
  0xd4   : > { %1827 = vmatpush2.msra.mxu1 %v5088_v34  ;;  %2501 = vperm.xlu0 %6108, %v2407_v10   ;;  %v396_v24 = vld [vmem:[#allocation2 + $0xc0] sm:$0xff]  ;;  %v2408_v34 = vld [vmem:[%s8821_s5 + $0x78] sm:$0xff]  ;;  %v5105_v10 = vld [vmem:[%s8817_s1 + $0x468] sm:$0xff] }
  0xd5   : > { %1828 = vmatprep.subr.mxu1 %v6713_v1  ;;  %2496 = vperm.xlu1 %6109, %v2406_v13  }
  0xd6   : > { %866 = vmatmul.mubr.f32.gmra.mxu0 %v6919_v35  ;;  %1306 = vmatmul.mubr.f32.gmra.mxu1 %v392_v38  ;;  %v2411_v38 = vld [vmem:[%s8821_s5 + $0x90] sm:$0xff] }
  0xd7   : > { %870 = vmatprep.mubr.f32.mxu0 %v561_v40  ;;  %1310 = vmatprep.mubr.f32.mxu1 %v429_v41  ;;  %v5083_v40 = vld [vmem:[%s8817_s1 + $0x3b8] sm:$0xff]  ;;  %v529_v41 = vld [vmem:[#allocation2 + $0x12a] sm:$0xff] }
  0xd8   : > { %1829 = vmatpush2.msra.mxu1 %v5087_v47  ;;  %2511 = vperm.xlu0 %6108, %v2409_v15   ;;  %v444_v47 = vld [vmem:[#allocation2 + $0x2] sm:$0xff] }
  0xd9   : > { %1830 = vmatprep.subr.mxu1 %v6713_v1  ;;  %2506 = vperm.xlu1 %6109, %v2408_v34   ;;  %v5102_v34 = vld [vmem:[%s8817_s1 + $0x450] sm:$0xff] }
  0xda   : > { %871 = vmatmul.mubr.f32.gmra.mxu0 %v6932_v48  ;;  %1311 = vmatmul.mubr.f32.gmra.mxu1 %v393_v51  ;;  %v2410_v51 = vld [vmem:[%s8821_s5 + $0x88] sm:$0xff] }
  0xdb   : > { %875 = vmatprep.mubr.f32.mxu0 %v562_v54  ;;  %1315 = vmatprep.mubr.f32.mxu1 %v430_v55  ;;  %v2413_v54 = vld [vmem:[%s8821_s5 + $0xa0] sm:$0xff]  ;;  %v5082_v55 = vld [vmem:[%s8817_s1 + $0x3b0] sm:$0xff] }
  0xdc   : > { %1831 = vmatpush2.msra.mxu1 %v5086_v14  ;;  %2521 = vperm.xlu0 %6108, %v2411_v38   ;;  %v2412_v14 = vld [vmem:[%s8821_s5 + $0x98] sm:$0xff] }
  0xdd   : > { %1832 = vmatprep.subr.mxu1 %v6713_v1  ;;  %2516 = vperm.xlu1 %6109, %v2410_v51   ;;  %v441_v51 = vld [vmem:[#allocation2 + $0x109] sm:$0xff] }
  0xde   : > { %876 = vmatmul.mubr.f32.gmra.mxu0 %v6945_v49  ;;  %1316 = vmatmul.mubr.f32.gmra.mxu1 %v394_v63  ;;  %v5106_v63 = vld [vmem:[%s8817_s1 + $0x470] sm:$0xff] }
  0xdf   : > { %880 = vmatprep.mubr.f32.mxu0 %v563_v3  ;;  %1320 = vmatprep.mubr.f32.mxu1 %v431_v25  ;;  %v6113_v3 = vld [vmem:[#allocation2 + $0xd9] sm:$0xff] }
  0xe0   : > { %1833 = vmatpush2.msra.mxu1 %v5085_v4  ;;  %2531 = vperm.xlu0 %6108, %v2413_v54   ;;  %v399_v25 = vld [vmem:[#allocation2 + $0xd8] sm:$0xff]  ;;  %v5081_v4 = vld [vmem:[%s8817_s1 + $0x3a8] sm:$0xff] }
  0xe1   : > { %1834 = vmatprep.subr.mxu1 %v6713_v1  ;;  %2526 = vperm.xlu1 %6109, %v2412_v14   ;;  %v442_v14 = vld [vmem:[#allocation2 + $0x111] sm:$0xff] }
  0xe2   : > { %881 = vmatmul.mubr.f32.gmra.mxu0 %v6958_v6  ;;  %1321 = vmatmul.mubr.f32.gmra.mxu1 %v395_v26  ;;  %v400_v26 = vld [vmem:[#allocation2 + $0xe0] sm:$0xff] }
  0xe3   : > { %885 = vmatprep.mubr.f32.mxu0 %v564_v11  ;;  %1325 = vmatprep.mubr.f32.mxu1 %v432_v12  ;;  %v437_v11 = vld [vmem:[#allocation2 + $0xe9] sm:$0xff]  ;;  %v5104_v12 = vld [vmem:[%s8817_s1 + $0x460] sm:$0xff] }
  0xe4   : > { %1835 = vmatpush2.msra.mxu1 %v5084_v22  ;;  %v438_v22 = vld [vmem:[#allocation2 + $0xf1] sm:$0xff] }
  0xe5   : > { %1836 = vmatprep.subr.mxu1 %v6713_v1 }
  0xe6   : > { %886 = vmatmul.mubr.f32.gmra.mxu0 %v528_v23  ;;  %1326 = vmatmul.mubr.f32.gmra.mxu1 %v396_v24  ;;  %v5103_v23 = vld [vmem:[%s8817_s1 + $0x458] sm:$0xff] }
  0xe7   : > { %890 = vmatprep.mubr.f32.mxu0 %v565_v31  ;;  %1330 = vmatprep.mubr.f32.mxu1 %v433_v33  ;;  %v439_v33 = vld [vmem:[#allocation2 + $0xf9] sm:$0xff] }
  0xe8   : > { %1837 = vmatpush2.msra.mxu1 %v5083_v40 }
  0xe9   : > { %1838 = vmatprep.subr.mxu1 %v6713_v1 }
  0xea   : > { %891 = vmatmul.mubr.f32.gmra.mxu0 %v529_v41  ;;  %1331 = vmatmul.mubr.f32.gmra.mxu1 %v397_v42  ;;  %v440_v41 = vld [vmem:[#allocation2 + $0x101] sm:$0xff] }
  0xeb   : > { %1335 = vmatprep.mubr.f32.mxu1 %v434_v45  ;;  %5700 = vmatprep.mubr.f32.mxu0 %v444_v47  ;;  %v5101_v42 = vld [vmem:[%s8817_s1 + $0x448] sm:$0xff] }
  0xec   : > { %1839 = vmatpush2.msra.mxu1 %v5082_v55  ;;  %v5100_v55 = vld [vmem:[%s8817_s1 + $0x440] sm:$0xff] }
  0xed   : > { %1840 = vmatprep.subr.mxu1 %v6713_v1 }
  0xee   : > { %1336 = vmatmul.mubr.f32.gmra.mxu1 %v398_v56  ;;  %5701 = vmatmul.mubr.f32.vlgmr.msra.gmra.mxu0 %v445_v29  ;;  %v405_v56 = vld [vmem:[#allocation2 + $0x108] sm:$0xff] }
  0xef   : > { %5755 = vmatpush3.msra.mxu0 %v6830_v17  ;;  %1340 = vmatprep.mubr.f32.mxu1 %v6113_v3  ;;  %v6115_v17 = vld [vmem:[#allocation2 + $0xe1] sm:$0xff]  ;;  %v406_v3 = vld [vmem:[#allocation2 + $0x110] sm:$0xff] }
  0xf0   : > { %5703 = vmatprep.mubr.f32.mxu0 %v6114_v16  ;;  %5756 = vmatprep.subr.mxu0 %v5106_v63 }
  0xf1   : > { %5757 = vmatpush3.msra.mxu0 %v5106_v63  ;;  %1841 = vmatpush2.msra.mxu1 %v5081_v4  ;;  %v2417_v63 = vld [vmem:[%s8821_s5 + $0xc0] sm:$0xff]  ;;  %v407_v4 = vld [vmem:[#allocation2 + $0x118] sm:$0xff] }
  0xf2   : > { %1341 = vmatmul.mubr.f32.gmra.mxu1 %v399_v25  ;;  %5704 = vmatmul.mubr.f32.gmra.mxu0 %v6592_v60  ;;  %v5080_v60 = vld [vmem:[%s8817_s1 + $0x3a0] sm:$0xff] }
  0xf3   : > { %1345 = vmatprep.mubr.f32.mxu1 %v6115_v17  ;;  %5706 = vmatprep.mubr.f32.mxu0 %v6607_v2  ;;  %v401_v2 = vld [vmem:[#allocation2 + $0xe8] sm:$0xff]  ;;  %v443_v25 = vld [vmem:[#allocation2 + $0x119] sm:$0xff] }
  0xf4   : > { %5758 = vmatprep.subr.mxu0 %v5105_v10  ;;  %1842 = vmatprep.subr.mxu1 %v6713_v1 }
  0xf5   : > { %5759 = vmatpush3.msra.mxu0 %v5105_v10  ;;  %1843 = vmatpush2.msra.mxu1 %v5080_v60  ;;  %v2416_v10 = vld [vmem:[%s8821_s5 + $0xb8] sm:$0xff]  ;;  %v1631_v60 = vld [vmem:[#allocation2 + $0x24] sm:$0xff] }
  0xf6   : > { %1346 = vmatmul.mubr.f32.gmra.mxu1 %v400_v26  ;;  %5707 = vmatmul.mubr.f32.gmra.mxu0 %v6618_v9  ;;  %v5079_v9 = vld [vmem:[%s8817_s1 + $0x398] sm:$0xff]  ;;  %v1667_v26 = vld [vmem:[#allocation2 + $0x25] sm:$0xff] }
  0xf7   : > { %1350 = vmatprep.mubr.f32.mxu1 %v437_v11  ;;  %5709 = vmatprep.mubr.f32.mxu0 %v6632_v20  ;;  %v402_v20 = vld [vmem:[#allocation2 + $0xf0] sm:$0xff] }
  0xf8   : > { %5760 = vmatprep.subr.mxu0 %v5104_v12  ;;  %1844 = vmatprep.subr.mxu1 %v6713_v1 }
  0xf9   : > { %5761 = vmatpush3.msra.mxu0 %v5104_v12  ;;  %1845 = vmatpush2.msra.mxu1 %v5079_v9  ;;  %v2418_v12 = vld [vmem:[%s8821_s5 + $0xc8] sm:$0xff]  ;;  %v2423_v9 = vld [vmem:[%s8821_s5 + $0xf0] sm:$0xff] }
  0xfa   : > { %1351 = vmatmul.mubr.f32.gmra.mxu1 %v401_v2  ;;  %5710 = vmatmul.mubr.f32.gmra.mxu0 %v6643_v28  ;;  %v5078_v28 = vld [vmem:[%s8817_s1 + $0x390] sm:$0xff] }
  0xfb   : > { %1355 = vmatprep.mubr.f32.mxu1 %v438_v22  ;;  %5712 = vmatprep.mubr.f32.mxu0 %v6657_v37  ;;  %v403_v37 = vld [vmem:[#allocation2 + $0xf8] sm:$0xff]  ;;  %v1668_v2 = vld [vmem:[#allocation2 + $0x2d] sm:$0xff] }
  0xfc   : > { %5762 = vmatprep.subr.mxu0 %v5103_v23  ;;  %1846 = vmatprep.subr.mxu1 %v6713_v1 }
  0xfd   : > { %5763 = vmatpush3.msra.mxu0 %v5103_v23  ;;  %1847 = vmatpush2.msra.mxu1 %v5078_v28  ;;  %v5096_v23 = vld [vmem:[%s8817_s1 + $0x420] sm:$0xff] }
  0xfe   : > { %v7011_v13 = vpop.f32.mrf.mxu1  ;;  %1356 = vmatmul.mubr.f32.gmra.mxu1 %v402_v20  ;;  %5713 = vmatmul.mubr.f32.gmra.mxu0 %v6668_v43  ;;  %v5077_v43 = vld [vmem:[%s8817_s1 + $0x388] sm:$0xff] }
  0xff   : > { %1360 = vmatprep.mubr.f32.mxu1 %v439_v33  ;;  %5715 = vmatprep.mubr.f32.mxu0 %v6679_v50  ;;  %v404_v50 = vld [vmem:[#allocation2 + $0x100] sm:$0xff]  ;;  %v1632_v20 = vld [vmem:[#allocation2 + $0x2c] sm:$0xff]  ;;  %v1669_v33 = vld [vmem:[#allocation2 + $0x35] sm:$0xff] }
 0x100   : > { %v7019_v15 = vpop.f32.mrf.mxu1  ;;  %5764 = vmatprep.subr.mxu0 %v5102_v34  ;;  %1848 = vmatprep.subr.mxu1 %v6713_v1 }
 0x101   : > { %5765 = vmatpush3.msra.mxu0 %v5102_v34  ;;  %1849 = vmatpush2.msra.mxu1 %v5077_v43 }
 0x102   : > { %v7024_v24 = vpop.f32.mrf.mxu1  ;;  %1361 = vmatmul.mubr.f32.gmra.mxu1 %v403_v37  ;;  %5716 = vmatmul.mubr.f32.gmra.mxu0 %v6694_v57  ;;  %v5076_v57 = vld [vmem:[%s8817_s1 + $0x380] sm:$0xff]  ;;  %v2422_v37 = vld [vmem:[%s8821_s5 + $0xe8] sm:$0xff] }
 0x103   : > { %1365 = vmatprep.mubr.f32.mxu1 %v440_v41  ;;  %5718 = vmatprep.mubr.f32.mxu0 %v6705_v61  ;;  %v2415_v61 = vld [vmem:[%s8821_s5 + $0xb0] sm:$0xff]  ;;  %v2425_v41 = vld [vmem:[%s8821_s5 + $0x100] sm:$0xff] }
 0x104   : > { %v7032_v31 = vpop.f32.mrf.mxu1  ;;  %5766 = vmatprep.subr.mxu0 %v5101_v42  ;;  %1850 = vmatprep.subr.mxu1 %v6713_v1  ;;  %v5099_v1 = vld [vmem:[%s8817_s1 + $0x438] sm:$0xff] }
 0x105   : > { %5767 = vmatpush3.msra.mxu0 %v5101_v42  ;;  %1851 = vmatpush2.msra.mxu1 %v5076_v57  ;;  %v1633_v42 = vld [vmem:[#allocation2 + $0x34] sm:$0xff] }
 0x106   : > { %v7037_v38 = vpop.f32.mrf.mxu1  ;;  %1366 = vmatmul.mubr.f32.gmra.mxu1 %v404_v50  ;;  %5719 = vmatmul.mubr.f32.gmra.mxu0 %v6719_v30  ;;  %v2414_v30 = vld [vmem:[%s8821_s5 + $0xa8] sm:$0xff]  ;;  %v2427_v57 = vld [vmem:[%s8821_s5 + $0x110] sm:$0xff] }
 0x107   : > { %1370 = vmatprep.mubr.f32.mxu1 %v441_v51  ;;  %5721 = vmatprep.mubr.f32.mxu0 %v6730_v7  ;;  %v1670_v51 = vld [vmem:[#allocation2 + $0x3d] sm:$0xff] }
 0x108   : > { %v7045_v40 = vpop.f32.mrf.mxu1  ;;  %5768 = vmatprep.subr.mxu0 %v5100_v55  ;;  %2541 = vperm.xlu0 %6108, %v2415_v61  }
 0x109   : > { %5769 = vmatpush3.msra.mxu0 %v5100_v55  ;;  %2536 = vperm.xlu1 %6109, %v2414_v30   ;;  %v1671_v30 = vld [vmem:[#allocation2 + $0x45] sm:$0xff] }
 0x10a   : > { %v7050_v45 = vpop.f32.mrf.mxu1  ;;  %1371 = vmatmul.mubr.f32.gmra.mxu1 %v405_v56  ;;  %5722 = vmatmul.mubr.f32.gmra.mxu0 %v6740_v18  ;;  %v5098_v18 = vld [vmem:[%s8817_s1 + $0x430] sm:$0xff]  ;;  %v1634_v56 = vld [vmem:[#allocation2 + $0x3c] sm:$0xff] }
 0x10b   : > { %1375 = vmatprep.mubr.f32.mxu1 %v442_v14  ;;  %5724 = vmatprep.mubr.f32.mxu0 %v6750_v27  ;;  %v2419_v27 = vld [vmem:[%s8821_s5 + $0xd0] sm:$0xff] }
 0x10c   : > { %v7058_v47 = vpop.f32.mrf.mxu1  ;;  %5770 = vmatprep.subr.mxu0 %v5099_v1  ;;  %2551 = vperm.xlu0 %6108, %v2417_v63  }
 0x10d   : > { %5771 = vmatpush3.msra.mxu0 %v5099_v1  ;;  %2546 = vperm.xlu1 %6109, %v2416_v10   ;;  %v1672_v10 = vld [vmem:[#allocation2 + $0x4d] sm:$0xff] }
 0x10e   : > { %v7060_v54 = vpop.f32.mrf.mxu1  ;;  %1376 = vmatmul.mubr.f32.gmra.mxu1 %v406_v3  ;;  %5725 = vmatmul.mubr.f32.gmra.mxu0 %v6760_v36  ;;  %v5097_v36 = vld [vmem:[%s8817_s1 + $0x428] sm:$0xff] }
 0x10f   : > { %1380 = vmatprep.mubr.f32.mxu1 %v443_v25  ;;  %5727 = vmatprep.mubr.f32.mxu0 %v6770_v44  ;;  %v2421_v44 = vld [vmem:[%s8821_s5 + $0xe0] sm:$0xff] }
 0x110   : > { %v7074_v29 = vpop.f32.mrf.mxu1  ;;  %5772 = vmatprep.subr.mxu0 %v5098_v18  ;;  %2561 = vperm.xlu0 %6108, %v2419_v27   ;;  %v1635_v25 = vld [vmem:[#allocation2 + $0x44] sm:$0xff] }
 0x111   : > { %5773 = vmatpush3.msra.mxu0 %v5098_v18  ;;  %2556 = vperm.xlu1 %6109, %v2418_v12   ;;  %v1673_v12 = vld [vmem:[#allocation2 + $0x55] sm:$0xff] }
 0x112   : > { %v7083_v7 = vpop.f32.mrf.mxu1  ;;  %1381 = vmatmul.mubr.f32.gmra.mxu1 %v407_v4  ;;  %5728 = vmatmul.mubr.f32.gmra.mxu0 %v6780_v52  ;;  %v2420_v52 = vld [vmem:[%s8821_s5 + $0xd8] sm:$0xff] }
 0x113   : > { %5730 = vmatprep.mubr.f32.mxu0 %v6791_v59  ;;  %1852 = vmatprep.mubr.f32.mxu1 %v1667_v26  ;;  %v1636_v26 = vld [vmem:[#allocation2 + $0x4c] sm:$0xff] }
 0x114   : > { %v7089_v16 = vpop.f32.mrf.mxu1  ;;  %5774 = vmatprep.subr.mxu0 %v5097_v36  ;;  %2571 = vperm.xlu0 %6108, %v2421_v44  }
 0x115   : > { %5775 = vmatpush3.msra.mxu0 %v5097_v36  ;;  %2566 = vperm.xlu1 %6109, %v2420_v52   ;;  %v7205_v52 = vld [vmem:[#allocation2] sm:$0xff] }
 0x116   : > { %v7102_v17 = vpop.f32.mrf.mxu1  ;;  %5731 = vmatmul.mubr.f32.gmra.mxu0 %v6803_v62  ;;  %1853 = vmatmul.mubr.f32.vlgmr.msra.gmra.mxu1 %v1631_v60  ;;  %v717_v34 = vpop.f32.mrf.mxu0  ;;  %v5095_v62 = vld [vmem:[%s8817_s1 + $0x418] sm:$0xff] }
 0x117   : > { %5733 = vmatprep.mubr.f32.mxu0 %v6814_v53  ;;  %1857 = vmatprep.mubr.f32.mxu1 %v1668_v2  ;;  %v7142_v53 = vadd.f32 %v7019_v15, %v717_v34  ;;  %v2424_v15 = vld [vmem:[%s8821_s5 + $0xf8] sm:$0xff]  ;;  %v1703_v34 = vld [vmem:[#allocation2 + $0x26] sm:$0xff] }
 0x118   : > { %v7104_v11 = vpop.f32.mrf.mxu1  ;;  %5776 = vmatprep.subr.mxu0 %v5096_v23  ;;  %2581 = vperm.xlu0 %6108, %v2423_v9   ;;  %v719_v43 = vpop.f32.mrf.mxu0 }
 0x119   : > { %5777 = vmatpush3.msra.mxu0 %v5096_v23  ;;  %2576 = vperm.xlu1 %6109, %v2422_v37   ;;  %v1674_v23 = vld [vmem:[#allocation2 + $0x5d] sm:$0xff]  ;;  %v1676_v43 = vld [vmem:[#allocation2 + $0x6d] sm:$0xff] }
 0x11a   : > { %v7117_v22 = vpop.f32.mrf.mxu1  ;;  %5734 = vmatmul.mubr.f32.gmra.mxu0 %v6824_v8  ;;  %1858 = vmatmul.mubr.f32.gmra.mxu1 %v1632_v20  ;;  %v5094_v8 = vld [vmem:[%s8817_s1 + $0x410] sm:$0xff] }
 0x11b   : > { %5736 = vmatprep.mubr.f32.mxu0 %v6836_v21  ;;  %1862 = vmatprep.mubr.f32.mxu1 %v1669_v33  ;;  %v1675_v33 = vld [vmem:[#allocation2 + $0x65] sm:$0xff] }
 0x11c   : > { %v7126_v59 = vpop.f32.mrf.mxu1  ;;  %5778 = vmatprep.subr.mxu0 %v5095_v62  ;;  %2591 = vperm.xlu0 %6108, %v2425_v41   ;;  %v722_v21 = vpop.f32.mrf.mxu0  ;;  %v1639_v41 = vld [vmem:[#allocation2 + $0x64] sm:$0xff] }
 0x11d   : > { %5779 = vmatpush3.msra.mxu0 %v5095_v62  ;;  %v7164_v61 = vadd.f32 %v7011_v13, %v722_v21  ;;  %2586 = vperm.xlu1 %6109, %v2424_v15   ;;  %v1640_v21 = vld [vmem:[#allocation2 + $0x6c] sm:$0xff] }
 0x11e   : > { %v7132_v28 = vpop.f32.mrf.mxu1  ;;  %5737 = vmatmul.mubr.f32.gmra.mxu0 %v6844_v32  ;;  %1863 = vmatmul.mubr.f32.gmra.mxu1 %v1633_v42  ;;  %v724_v14 = vpop.f32.mrf.mxu0  ;;  %v5093_v32 = vld [vmem:[%s8817_s1 + $0x408] sm:$0xff] }
 0x11f   : > { %5739 = vmatprep.mubr.f32.mxu0 %v6851_v39  ;;  %1867 = vmatprep.mubr.f32.mxu1 %v1670_v51  ;;  %v2426_v39 = vld [vmem:[%s8821_s5 + $0x108] sm:$0xff]  ;;  %v1705_v51 = vld [vmem:[#allocation2 + $0x36] sm:$0xff] }
 0x120   : > { %v7148_v50 = vpop.f32.mrf.mxu1  ;;  %5780 = vmatprep.subr.mxu0 %v5094_v8  ;;  %2601 = vperm.xlu0 %6108, %v2427_v57   ;;  %v727_v13 = vpop.f32.mrf.mxu0  ;;  %v1706_v57 = vld [vmem:[#allocation2 + $0x3e] sm:$0xff]  ;;  %v1677_v14 = vld [vmem:[#allocation2 + $0x75] sm:$0xff] }
 0x121   : > { %5781 = vmatpush3.msra.mxu0 %v5094_v8  ;;  %v7177_v63 = vadd.f32 %v7032_v31, %v727_v13  ;;  %2596 = vperm.xlu1 %6109, %v2426_v39  }
 0x122   : > { %v7157_v55 = vpop.f32.mrf.mxu1  ;;  %5740 = vmatmul.mubr.f32.gmra.mxu0 %v6858_v46  ;;  %1868 = vmatmul.mubr.f32.gmra.mxu1 %v1634_v56  ;;  %v729_v18 = vpop.f32.mrf.mxu0  ;;  %v5092_v46 = vld [vmem:[%s8817_s1 + $0x400] sm:$0xff] }
 0x123   : > { %5742 = vmatprep.mubr.f32.mxu0 %v6868_v58  ;;  %1872 = vmatprep.mubr.f32.mxu1 %v1671_v30  ;;  %v2428_v58 = vld [vmem:[%s8821_s5 + $0x118] sm:$0xff]  ;;  %v1707_v30 = vld [vmem:[#allocation2 + $0x46] sm:$0xff]  ;;  %v1708_v18 = vld [vmem:[#allocation2 + $0x4e] sm:$0xff] }
 0x124   : > { %v7166_v1 = vpop.f32.mrf.mxu1  ;;  %5782 = vmatprep.subr.mxu0 %v5093_v32 }
 0x125   : > { %5783 = vmatpush3.msra.mxu0 %v5093_v32  ;;  %v732_v31 = vpop.f32.mrf.mxu0  ;;  %2606 = vperm.xlu1 %6109, %v2428_v58  }
 0x126   : > { %v7179_v3 = vpop.f32.mrf.mxu1  ;;  %5743 = vmatmul.mubr.f32.gmra.mxu0 %v6879_v0  ;;  %1873 = vmatmul.mubr.f32.gmra.mxu1 %v1635_v25  ;;  %v7194_v36 = vadd.f32 %v7024_v24, %v732_v31  ;;  %v1641_v25 = vld [vmem:[#allocation2 + $0x74] sm:$0xff] }
 0x127   : > { %5745 = vmatprep.mubr.f32.mxu0 %v6893_v5  ;;  %1877 = vmatprep.mubr.f32.mxu1 %v1672_v10  ;;  %v734_v44 = vpop.f32.mrf.mxu0  ;;  %v1637_v5 = vld [vmem:[#allocation2 + $0x54] sm:$0xff]  ;;  %v1678_v10 = vld [vmem:[#allocation2 + $0x7d] sm:$0xff] }
 0x128   : > { %v7181_v27 = vpop.f32.mrf.mxu1  ;;  %5784 = vmatprep.subr.mxu0 %v5092_v46  ;;  %v1642_v44 = vld [vmem:[#allocation2 + $0x7c] sm:$0xff] }
 0x129   : > { %5785 = vmatpush3.msra.mxu0 %v5092_v46  ;;  %v737_v0 = vpop.f32.mrf.mxu0  ;;  %v1709_v46 = vld [vmem:[#allocation2 + $0x56] sm:$0xff] }
 0x12a   : > { %v7191_v4 = vpop.f32.mrf.mxu1  ;;  %5746 = vmatmul.mubr.f32.gmra.mxu0 %v6906_v19  ;;  %1878 = vmatmul.mubr.f32.gmra.mxu1 %v1636_v26  ;;  %v7201_v2 = vadd.f32 %v7045_v40, %v737_v0  ;;  %v1710_v0 = vld [vmem:[#allocation2 + $0x5e] sm:$0xff] }
 0x12b   : > { %5748 = vmatprep.mubr.f32.mxu0 %v6919_v35  ;;  %1882 = vmatprep.mubr.f32.mxu1 %v1673_v12  ;;  %v739_v9 = vpop.f32.mrf.mxu0  ;;  %v1638_v35 = vld [vmem:[#allocation2 + $0x5c] sm:$0xff] }
 0x12c   : > { %v7196_v60 = vpop.f32.mrf.mxu1  ;;  %3001 = vmatprep.subr.mxu0 %v7205_v52 }
 0x12d   : > { %v742_v20 = vpop.f32.mrf.mxu0 }
 0x12e   : > { %v7203_v24 = vpop.f32.mrf.mxu1  ;;  %5749 = vmatmul.mubr.f32.gmra.mxu0 %v6932_v48  ;;  %1883 = vmatmul.mubr.f32.gmra.mxu1 %v1637_v5  ;;  %v7215_v62 = vadd.f32 %v7037_v38, %v742_v20  ;;  %v1679_v5 = vld [vmem:[#allocation2 + $0x85] sm:$0xff] }
 0x12f   : > { %5751 = vmatprep.mubr.f32.mxu0 %v6945_v49  ;;  %1887 = vmatprep.mubr.f32.mxu1 %v1674_v23  ;;  %v744_v37 = vpop.f32.mrf.mxu0  ;;  %v1704_v49 = vld [vmem:[#allocation2 + $0x2e] sm:$0xff]  ;;  %v1711_v23 = vld [vmem:[#allocation2 + $0x66] sm:$0xff] }
 0x130   : > { %v7209_v19 = vpop.f32.mrf.mxu1  ;;  %v5156_v37 = vld [vmem:[%s8819_s3 + $0x2f8] sm:$0xff] }
 0x131   : > { %5840 = vmatprep.subr.mxu1 %v5156_v37 }
 0x132   : > { %v7212_v40 = vpop.f32.mrf.mxu1  ;;  %5752 = vmatmul.mubr.f32.gmra.mxu0 %v6958_v6  ;;  %1888 = vmatmul.mubr.f32.gmra.mxu1 %v1638_v35 }
 0x133   : > { %1892 = vmatprep.mubr.f32.mxu1 %v1675_v33  ;;  %5786 = vmatprep.mubr.f32.mxu0 %v1703_v34  ;;  %v1643_v33 = vld [vmem:[#allocation2 + $0x84] sm:$0xff]  ;;  %v1712_v34 = vld [vmem:[#allocation2 + $0x6e] sm:$0xff] }
 0x134   : > { %v7218_v48 = vpop.f32.mrf.mxu1  ;;  %v747_v42 = vpop.f32.mrf.mxu0  ;;  %5841 = vmatpush3.msra.mxu1 %v5156_v37  ;;  %v1646_v37 = vld [vmem:[#allocation2 + $0x9c] sm:$0xff] }
 0x135   : > { %v7221_v8 = vadd.f32 %v7058_v47, %v747_v42  ;;  %v1713_v42 = vld [vmem:[#allocation2 + $0x76] sm:$0xff] }
 0x136   : > { %v7223_v15 = vpop.f32.mrf.mxu1  ;;  %1893 = vmatmul.mubr.f32.gmra.mxu1 %v1639_v41  ;;  %5787 = vmatmul.mubr.f32.vlgmr.msra.gmra.mxu0 %v1704_v49  ;;  %v749_v38 = vpop.f32.mrf.mxu0  ;;  %v1680_v49 = vld [vmem:[#allocation2 + $0x8d] sm:$0xff] }
 0x137   : > { %1897 = vmatprep.mubr.f32.mxu1 %v1676_v43  ;;  %5789 = vmatprep.mubr.f32.mxu0 %v1705_v51 }
 0x138   : > { %v7225_v6 = vpop.f32.mrf.mxu1  ;;  %v752_v56 = vpop.f32.mrf.mxu0 }
 0x139   : > { %v7228_v32 = vadd.f32 %v7050_v45, %v752_v56  ;;  %v1714_v56 = vld [vmem:[#allocation2 + $0x7e] sm:$0xff] }
 0x13a   : > { %v7230_v39 = vpop.f32.mrf.mxu1  ;;  %1898 = vmatmul.mubr.f32.gmra.mxu1 %v1640_v21  ;;  %5790 = vmatmul.mubr.f32.gmra.mxu0 %v1706_v57  ;;  %v754_v47 = vpop.f32.mrf.mxu0  ;;  %v1644_v57 = vld [vmem:[#allocation2 + $0x8c] sm:$0xff] }
 0x13b   : > { %1902 = vmatprep.mubr.f32.mxu1 %v1677_v14  ;;  %5792 = vmatprep.mubr.f32.mxu0 %v1707_v30  ;;  %v1681_v47 = vld [vmem:[#allocation2 + $0x95] sm:$0xff] }
 0x13c   : > { %v7232_v13 = vpop.f32.mrf.mxu1  ;;  %v757_v58 = vpop.f32.mrf.mxu0 }
 0x13d   : > { %v7237_v26 = vadd.f32 %v7074_v29, %v757_v58  ;;  %v1645_v58 = vld [vmem:[#allocation2 + $0x94] sm:$0xff] }
 0x13e   : > { %v7234_v31 = vpop.f32.mrf.mxu1  ;;  %1903 = vmatmul.mubr.f32.gmra.mxu1 %v1641_v25  ;;  %5793 = vmatmul.mubr.f32.gmra.mxu0 %v1708_v18  ;;  %v759_v45 = vpop.f32.mrf.mxu0  ;;  %v1715_v25 = vld [vmem:[#allocation2 + $0x86] sm:$0xff]  ;;  %v5123_v18 = vld [vmem:[%s8819_s3 + $0x1f0] sm:$0xff] }
 0x13f   : > { %1907 = vmatprep.mubr.f32.mxu1 %v1678_v10  ;;  %5795 = vmatprep.mubr.f32.mxu0 %v1709_v46  ;;  %v1716_v45 = vld [vmem:[#allocation2 + $0x8e] sm:$0xff] }
 0x140   : > { %v7239_v12 = vpop.f32.mrf.mxu1  ;;  %v762_v9 = vpop.f32.mrf.mxu0 }
 0x141   : > { %v7242_v35 = vadd.f32 %v7060_v54, %v762_v9  ;;  %v5124_v54 = vld [vmem:[%s8819_s3 + $0x1f8] sm:$0xff] }
 0x142   : > { %v7244_v20 = vpop.f32.mrf.mxu1  ;;  %1908 = vmatmul.mubr.f32.gmra.mxu1 %v1642_v44  ;;  %5796 = vmatmul.mubr.f32.gmra.mxu0 %v1710_v0  ;;  %v764_v29 = vpop.f32.mrf.mxu0  ;;  %v5155_v44 = vld [vmem:[%s8819_s3 + $0x2f0] sm:$0xff] }
 0x143   : > { %1912 = vmatprep.mubr.f32.mxu1 %v1679_v5  ;;  %5798 = vmatprep.mubr.f32.mxu0 %v1711_v23  ;;  %v1682_v23 = vld [vmem:[#allocation2 + $0x9d] sm:$0xff] }
 0x144   : > { %v7249_v41 = vpop.f32.mrf.mxu1  ;;  %3002 = vmatpush1.msra.mxu0 %v5124_v54  ;;  %v1717_v9 = vld [vmem:[#allocation2 + $0x96] sm:$0xff]  ;;  %5842 = vmatprep.subr.mxu1 %v5155_v44 }
 0x145   : > { %v767_v43 = vpop.f32.mrf.mxu0  ;;  %3003 = vmatprep.subr.mxu0 %v7205_v52  ;;  %5843 = vmatpush3.msra.mxu1 %v5155_v44 }
 0x146   : > { %v1207_v51 = vpop.f32.mrf.mxu1  ;;  %1913 = vmatmul.mubr.f32.gmra.mxu1 %v1643_v33  ;;  %5799 = vmatmul.mubr.f32.gmra.mxu0 %v1712_v34  ;;  %v7255_v38 = vadd.f32 %v7089_v16, %v767_v43  ;;  %v1683_v43 = vld [vmem:[#allocation2 + $0xa5] sm:$0xff] }
 0x147   : > { %v7258_v21 = vadd.f32 %v1207_v51, %v7142_v53  ;;  %1917 = vmatprep.mubr.f32.mxu1 %v1680_v49  ;;  %5801 = vmatprep.mubr.f32.mxu0 %v1713_v42  ;;  %v769_v14 = vpop.f32.mrf.mxu0  ;;  %v1718_v49 = vld [vmem:[#allocation2 + $0x9e] sm:$0xff]  ;;  %v1719_v51 = vld [vmem:[#allocation2 + $0xa6] sm:$0xff] }
 0x148   : > { %v1209_v30 = vpop.f32.mrf.mxu1  ;;  %3004 = vmatpush1.msra.mxu0 %v5123_v18  ;;  %v1647_v14 = vld [vmem:[#allocation2 + $0xa4] sm:$0xff]  ;;  %v1684_v18 = vld [vmem:[#allocation2 + $0xad] sm:$0xff] }
 0x149   : > { %v772_v16 = vpop.f32.mrf.mxu0  ;;  %3005 = vmatprep.subr.mxu0 %v7205_v52  ;;  %v1720_v30 = vld [vmem:[#allocation2 + $0xae] sm:$0xff] }
 0x14a   : > { %v1212_v10 = vpop.f32.mrf.mxu1  ;;  %1918 = vmatmul.mubr.f32.gmra.mxu1 %v1644_v57  ;;  %5802 = vmatmul.mubr.f32.gmra.mxu0 %v1714_v56  ;;  %v7265_v53 = vadd.f32 %v7083_v7, %v772_v16  ;;  %v5122_v7 = vld [vmem:[%s8819_s3 + $0x1e8] sm:$0xff]  ;;  %v5121_v57 = vld [vmem:[%s8819_s3 + $0x1e0] sm:$0xff]  ;;  %v1721_v16 = vld [vmem:[#allocation2 + $0xb6] sm:$0xff] }
 0x14b   : > { %v7268_v46 = vadd.f32 %v1212_v10, %v7164_v61  ;;  %1922 = vmatprep.mubr.f32.mxu1 %v1681_v47  ;;  %5804 = vmatprep.mubr.f32.mxu0 %v1715_v25  ;;  %v774_v0 = vpop.f32.mrf.mxu0  ;;  %v5120_v10 = vld [vmem:[%s8819_s3 + $0x1d8] sm:$0xff] }
 0x14c   : > { %v1214_v5 = vpop.f32.mrf.mxu1  ;;  %3006 = vmatpush1.msra.mxu0 %v5122_v7 }
 0x14d   : > { %v777_v61 = vpop.f32.mrf.mxu0  ;;  %3007 = vmatprep.subr.mxu0 %v7205_v52  ;;  %v1648_v5 = vld [vmem:[#allocation2 + $0xac] sm:$0xff] }
 0x14e   : > { %v1217_v29 = vpop.f32.mrf.mxu1  ;;  %1923 = vmatmul.mubr.f32.gmra.mxu1 %v1645_v58  ;;  %5805 = vmatmul.mubr.f32.gmra.mxu0 %v1716_v45  ;;  %v7278_v33 = vadd.f32 %v7104_v11, %v777_v61  ;;  %v1685_v61 = vld [vmem:[#allocation2 + $0xb5] sm:$0xff] }
 0x14f   : > { %v7281_v34 = vadd.f32 %v1217_v29, %v7177_v63  ;;  %1927 = vmatprep.mubr.f32.mxu1 %v1682_v23  ;;  %5807 = vmatprep.mubr.f32.mxu0 %v1717_v9  ;;  %v779_v42 = vpop.f32.mrf.mxu0  ;;  %v1722_v23 = vld [vmem:[#allocation2 + $0xbe] sm:$0xff]  ;;  %v1723_v29 = vld [vmem:[#allocation2 + $0xc6] sm:$0xff] }
 0x150   : > { %v1219_v54 = vpop.f32.mrf.mxu1  ;;  %3008 = vmatpush1.msra.mxu0 %v5121_v57  ;;  %v1649_v42 = vld [vmem:[#allocation2 + $0xb4] sm:$0xff]  ;;  %v1686_v57 = vld [vmem:[#allocation2 + $0xbd] sm:$0xff] }
 0x151   : > { %v7287_v11 = vpop.f32.mrf.mxu0  ;;  %3009 = vmatprep.subr.mxu0 %v7205_v52  ;;  %v1724_v54 = vld [vmem:[#allocation2 + $0xce] sm:$0xff] }
 0x152   : > { %v1222_v56 = vpop.f32.mrf.mxu1  ;;  %1928 = vmatmul.mubr.f32.gmra.mxu1 %v1646_v37  ;;  %5808 = vmatmul.mubr.f32.gmra.mxu0 %v1718_v49 }
 0x153   : > { %v7290_v63 = vadd.f32 %v1222_v56, %v7194_v36  ;;  %1932 = vmatprep.mubr.f32.mxu1 %v1683_v43  ;;  %5810 = vmatprep.mubr.f32.mxu0 %v1719_v51  ;;  %v784_v47 = vpop.f32.mrf.mxu0  ;;  %v5154_v36 = vld [vmem:[%s8819_s3 + $0x2e8] sm:$0xff]  ;;  %v1725_v56 = vld [vmem:[#allocation2 + $0xd6] sm:$0xff] }
 0x154   : > { %v1224_v25 = vpop.f32.mrf.mxu1  ;;  %3010 = vmatpush1.msra.mxu0 %v5120_v10  ;;  %5844 = vmatprep.subr.mxu1 %v5154_v36 }
 0x155   : > { %v787_v58 = vpop.f32.mrf.mxu0  ;;  %3011 = vmatprep.subr.mxu0 %v7205_v52  ;;  %5845 = vmatpush3.msra.mxu1 %v5154_v36 }
 0x156   : > { %v1227_v45 = vpop.f32.mrf.mxu1  ;;  %1933 = vmatmul.mubr.f32.gmra.mxu1 %v1647_v14  ;;  %5811 = vmatmul.mubr.f32.gmra.mxu0 %v1720_v30  ;;  %v7300_v44 = vadd.f32 %v7126_v59, %v787_v58  ;;  %v5119_v59 = vld [vmem:[%s8819_s3 + $0x1d0] sm:$0xff]  ;;  %v5118_v14 = vld [vmem:[%s8819_s3 + $0x1c8] sm:$0xff] }
 0x157   : > { %v7303_v0 = vadd.f32 %v1227_v45, %v7201_v2  ;;  %1937 = vmatprep.mubr.f32.mxu1 %v1684_v18  ;;  %5813 = vmatprep.mubr.f32.mxu0 %v1721_v16  ;;  %v789_v9 = vpop.f32.mrf.mxu0  ;;  %v1650_v18 = vld [vmem:[#allocation2 + $0xbc] sm:$0xff]  ;;  %v1687_v58 = vld [vmem:[#allocation2 + $0xc5] sm:$0xff] }
 0x158   : > { %v1229_v7 = vpop.f32.mrf.mxu1  ;;  %3012 = vmatpush1.msra.mxu0 %v5119_v59  ;;  %v1726_v16 = vld [vmem:[#allocation2 + $0xde] sm:$0xff]  ;;  %v1727_v45 = vld [vmem:[#allocation2 + $0xe6] sm:$0xff] }
 0x159   : > { %v7309_v37 = vpop.f32.mrf.mxu0  ;;  %3013 = vmatprep.subr.mxu0 %v7205_v52  ;;  %v1651_v7 = vld [vmem:[#allocation2 + $0xc4] sm:$0xff] }
 0x15a   : > { %v1232_v2 = vpop.f32.mrf.mxu1  ;;  %1938 = vmatmul.mubr.f32.gmra.mxu1 %v1648_v5  ;;  %5814 = vmatmul.mubr.f32.gmra.mxu0 %v1722_v23  ;;  %v5117_v5 = vld [vmem:[%s8819_s3 + $0x1c0] sm:$0xff] }
 0x15b   : > { %v7312_v49 = vadd.f32 %v1232_v2, %v7215_v62  ;;  %1942 = vmatprep.mubr.f32.mxu1 %v1685_v61  ;;  %5816 = vmatprep.mubr.f32.mxu0 %v1723_v29  ;;  %v794_v43 = vpop.f32.mrf.mxu0  ;;  %v5153_v62 = vld [vmem:[%s8819_s3 + $0x2e0] sm:$0xff]  ;;  %v1728_v61 = vld [vmem:[#allocation2 + $0xee] sm:$0xff] }
 0x15c   : > { %v1234_v51 = vpop.f32.mrf.mxu1  ;;  %3014 = vmatpush1.msra.mxu0 %v5118_v14  ;;  %5846 = vmatprep.subr.mxu1 %v5153_v62  ;;  %v1688_v2 = vld [vmem:[#allocation2 + $0xcd] sm:$0xff]  ;;  %v5152_v14 = vld [vmem:[%s8819_s3 + $0x2d8] sm:$0xff] }
 0x15d   : > { %v7321_v30 = vpop.f32.mrf.mxu0  ;;  %3015 = vmatprep.subr.mxu0 %v7205_v52  ;;  %5847 = vmatpush3.msra.mxu1 %v5153_v62 }
 0x15e   : > { %v1237_v47 = vpop.f32.mrf.mxu1  ;;  %1943 = vmatmul.mubr.f32.gmra.mxu1 %v1649_v42  ;;  %5817 = vmatmul.mubr.f32.gmra.mxu0 %v1724_v54  ;;  %v1729_v42 = vld [vmem:[#allocation2 + $0xf6] sm:$0xff] }
 0x15f   : > { %v7324_v25 = vadd.f32 %v1237_v47, %v7221_v8  ;;  %1947 = vmatprep.mubr.f32.mxu1 %v1686_v57  ;;  %5819 = vmatprep.mubr.f32.mxu0 %v1725_v56  ;;  %v799_v10 = vpop.f32.mrf.mxu0  ;;  %v5116_v54 = vld [vmem:[%s8819_s3 + $0x1b8] sm:$0xff]  ;;  %v1652_v57 = vld [vmem:[#allocation2 + $0xcc] sm:$0xff] }
 0x160   : > { %v1239_v36 = vpop.f32.mrf.mxu1  ;;  %3016 = vmatpush1.msra.mxu0 %v5117_v5  ;;  %v1730_v56 = vld [vmem:[#allocation2 + $0xfe] sm:$0xff]  ;;  %5848 = vmatprep.subr.mxu1 %v5152_v14  ;;  %v1732_v5 = vld [vmem:[#allocation2 + $0x10e] sm:$0xff] }
 0x161   : > { %v7330_v23 = vpop.f32.mrf.mxu0  ;;  %3017 = vmatprep.subr.mxu0 %v7205_v52  ;;  %5849 = vmatpush3.msra.mxu1 %v5152_v14 }
 0x162   : > { %v1242_v8 = vpop.f32.mrf.mxu1  ;;  %1948 = vmatmul.mubr.f32.gmra.mxu1 %v1650_v18  ;;  %5820 = vmatmul.mubr.f32.gmra.mxu0 %v1726_v16  ;;  %v1689_v18 = vld [vmem:[#allocation2 + $0xd5] sm:$0xff]  ;;  %v1731_v16 = vld [vmem:[#allocation2 + $0x106] sm:$0xff] }
 0x163   : > { %v7333_v9 = vadd.f32 %v1242_v8, %v7228_v32  ;;  %1952 = vmatprep.mubr.f32.mxu1 %v1687_v58  ;;  %5822 = vmatprep.mubr.f32.mxu0 %v1727_v45  ;;  %v804_v29 = vpop.f32.mrf.mxu0  ;;  %v1653_v45 = vld [vmem:[#allocation2 + $0xd4] sm:$0xff] }
 0x164   : > { %v1244_v59 = vpop.f32.mrf.mxu1  ;;  %3018 = vmatpush1.msra.mxu0 %v5116_v54  ;;  %v1733_v29 = vld [vmem:[#allocation2 + $0x116] sm:$0xff] }
 0x165   : > { %3019 = vmatprep.subr.mxu0 %v7205_v52  ;;  %v5114_v59 = vld [vmem:[%s8819_s3 + $0x1a8] sm:$0xff]  ;;  %v1654_v54 = vld [vmem:[#allocation2 + $0xdc] sm:$0xff] }
 0x166   : > { %v7339_v43 = vpop.f32.mrf.mxu0  ;;  %v1247_v51 = vpop.f32.mrf.mxu1  ;;  %1953 = vmatmul.mubr.f32.gmra.mxu1 %v1651_v7  ;;  %5823 = vmatmul.mubr.f32.gmra.mxu0 %v1728_v61  ;;  %v1690_v61 = vld [vmem:[#allocation2 + $0xdd] sm:$0xff] }
 0x167   : > { %v7342_v32 = vadd.f32 %v1247_v51, %v7237_v26  ;;  %1957 = vmatprep.mubr.f32.mxu1 %v1688_v2  ;;  %5825 = vmatprep.mubr.f32.mxu0 %v1729_v42  ;;  %v5115_v26 = vld [vmem:[%s8819_s3 + $0x1b0] sm:$0xff]  ;;  %v1734_v51 = vld [vmem:[#allocation2 + $0x11e] sm:$0xff] }
 0x168   : > { %v809_v62 = vpop.f32.mrf.mxu0  ;;  %v1249_v47 = vpop.f32.mrf.mxu1  ;;  %3020 = vmatpush1.msra.mxu0 %v5115_v26 }
 0x169   : > { %3021 = vmatprep.subr.mxu0 %v7205_v52  ;;  %v1691_v62 = vld [vmem:[#allocation2 + $0xe5] sm:$0xff] }
 0x16a   : > { %v7351_v10 = vpop.f32.mrf.mxu0  ;;  %v1252_v36 = vpop.f32.mrf.mxu1  ;;  %1958 = vmatmul.mubr.f32.gmra.mxu1 %v1652_v57  ;;  %5826 = vmatmul.mubr.f32.gmra.mxu0 %v1730_v56  ;;  %v5151_v57 = vld [vmem:[%s8819_s3 + $0x2d0] sm:$0xff]  ;;  %v1735_v47 = vld [vmem:[#allocation2 + $0x126] sm:$0xff] }
 0x16b   : > { %v7354_v58 = vadd.f32 %v1252_v36, %v7242_v35  ;;  %1962 = vmatprep.mubr.f32.mxu1 %v1689_v18  ;;  %5828 = vmatprep.mubr.f32.mxu0 %v1731_v16  ;;  %v1655_v36 = vld [vmem:[#allocation2 + $0xe4] sm:$0xff] }
 0x16c   : > { %v814_v8 = vpop.f32.mrf.mxu0  ;;  %v1254_v7 = vpop.f32.mrf.mxu1  ;;  %3022 = vmatpush1.msra.mxu0 %v5114_v59  ;;  %5850 = vmatprep.subr.mxu1 %v5151_v57 }
 0x16d   : > { %3023 = vmatprep.subr.mxu0 %v7205_v52  ;;  %5851 = vmatpush3.msra.mxu1 %v5151_v57  ;;  %v1692_v7 = vld [vmem:[#allocation2 + $0xed] sm:$0xff] }
 0x16e   : > { %v7360_v2 = vpop.f32.mrf.mxu0  ;;  %v1257_v42 = vpop.f32.mrf.mxu1  ;;  %1963 = vmatmul.mubr.f32.gmra.mxu1 %v1653_v45  ;;  %5829 = vmatmul.mubr.f32.gmra.mxu0 %v1732_v5  ;;  %v1736_v45 = vld [vmem:[#allocation2 + $0x12e] sm:$0xff] }
 0x16f   : > { %v7363_v35 = vadd.f32 %v1257_v42, %v7255_v38  ;;  %1967 = vmatprep.mubr.f32.mxu1 %v1690_v61  ;;  %5831 = vmatprep.mubr.f32.mxu0 %v1733_v29  ;;  %v5113_v38 = vld [vmem:[%s8819_s3 + $0x1a0] sm:$0xff]  ;;  %v1737_v61 = vld [vmem:[#allocation2 + $0x136] sm:$0xff] }
 0x170   : > { %v819_v56 = vpop.f32.mrf.mxu0  ;;  %v1259_v14 = vpop.f32.mrf.mxu1  ;;  %3024 = vmatpush1.msra.mxu0 %v5113_v38  ;;  %v5112_v29 = vld [vmem:[%s8819_s3 + $0x198] sm:$0xff] }
 0x171   : > { %3025 = vmatprep.subr.mxu0 %v7205_v52  ;;  %v1693_v14 = vld [vmem:[#allocation2 + $0xf5] sm:$0xff] }
 0x172   : > { %v7372_v18 = vpop.f32.mrf.mxu0  ;;  %v1262_v16 = vpop.f32.mrf.mxu1  ;;  %1968 = vmatmul.mubr.f32.gmra.mxu1 %v1654_v54  ;;  %5832 = vmatmul.mubr.f32.gmra.mxu0 %v1734_v51  ;;  %v1656_v54 = vld [vmem:[#allocation2 + $0xec] sm:$0xff]  ;;  %v1738_v51 = vld [vmem:[#allocation2 + $0x13e] sm:$0xff] }
 0x173   : > { %v7375_v26 = vadd.f32 %v1262_v16, %v7265_v53  ;;  %1972 = vmatprep.mubr.f32.mxu1 %v1691_v62  ;;  %5834 = vmatprep.mubr.f32.mxu0 %v1735_v47  ;;  %v5111_v62 = vld [vmem:[%s8819_s3 + $0x190] sm:$0xff]  ;;  %v1028_v47 = vadd.f32 %v7102_v17, %v7287_v11  ;;  %v5110_v16 = vld [vmem:[%s8819_s3 + $0x188] sm:$0xff] }
 0x174   : > { %v824_v5 = vpop.f32.mrf.mxu0  ;;  %v1264_v8 = vpop.f32.mrf.mxu1  ;;  %3026 = vmatpush1.msra.mxu0 %v5112_v29 }
 0x175   : > { %3027 = vmatprep.subr.mxu0 %v7205_v52  ;;  %v1657_v5 = vld [vmem:[#allocation2 + $0xf4] sm:$0xff]  ;;  %v1694_v8 = vld [vmem:[#allocation2 + $0xfd] sm:$0xff] }
 0x176   : > { %v7381_v59 = vpop.f32.mrf.mxu0  ;;  %v1267_v42 = vpop.f32.mrf.mxu1  ;;  %1973 = vmatmul.mubr.f32.gmra.mxu1 %v1655_v36  ;;  %5835 = vmatmul.mubr.f32.gmra.mxu0 %v1736_v45  ;;  %v5150_v36 = vld [vmem:[%s8819_s3 + $0x2c8] sm:$0xff] }
 0x177   : > { %v7384_v53 = vadd.f32 %v1267_v42, %v7278_v33  ;;  %1977 = vmatprep.mubr.f32.mxu1 %v1692_v7  ;;  %5837 = vmatprep.mubr.f32.mxu0 %v1737_v61  ;;  %v5109_v7 = vld [vmem:[%s8819_s3 + $0x180] sm:$0xff] }
 0x178   : > { %v829_v57 = vpop.f32.mrf.mxu0  ;;  %v1269_v56 = vpop.f32.mrf.mxu1  ;;  %3028 = vmatpush1.msra.mxu0 %v5111_v62  ;;  %5852 = vmatprep.subr.mxu1 %v5150_v36  ;;  %v5149_v61 = vld [vmem:[%s8819_s3 + $0x2c0] sm:$0xff] }
 0x179   : > { %3029 = vmatprep.subr.mxu0 %v7205_v52  ;;  %5853 = vmatpush3.msra.mxu1 %v5150_v36  ;;  %v1658_v57 = vld [vmem:[#allocation2 + $0xfc] sm:$0xff]  ;;  %v1695_v62 = vld [vmem:[#allocation2 + $0x105] sm:$0xff] }
 0x17a   : > { %v7392_v38 = vpop.f32.mrf.mxu0  ;;  %v1272_v33 = vpop.f32.mrf.mxu1  ;;  %1978 = vmatmul.mubr.f32.gmra.mxu1 %v1656_v54  ;;  %5838 = vmatmul.mubr.f32.gmra.mxu0 %v1738_v51  ;;  %v5140_v54 = vld [vmem:[%s8819_s3 + $0x278] sm:$0xff] }
 0x17b   : > { %v7400_v45 = vadd.f32 %v1272_v33, %v1028_v47  ;;  %1982 = vmatprep.mubr.f32.mxu1 %v1693_v14  ;;  %3030 = vmatpush1.msra.mxu0 %v5110_v16  ;;  %v5139_v47 = vld [vmem:[%s8819_s3 + $0x270] sm:$0xff]  ;;  %v1038_v33 = vadd.f32 %v7117_v22, %v7309_v37  ;;  %v1659_v22 = vld [vmem:[#allocation2 + $0x104] sm:$0xff] }
 0x17c   : > { %v834_v17 = vpop.f32.mrf.mxu0  ;;  %v1274_v11 = vpop.f32.mrf.mxu1  ;;  %3031 = vmatprep.subr.mxu0 %v7205_v52  ;;  %5854 = vmatprep.subr.mxu1 %v5149_v61 }
 0x17d   : > { %3032 = vmatpush1.msra.mxu0 %v5109_v7  ;;  %5855 = vmatpush3.msra.mxu1 %v5149_v61  ;;  %v5137_v7 = vld [vmem:[%s8819_s3 + $0x260] sm:$0xff]  ;;  %v1043_v61 = vadd.f32 %v7148_v50, %v7321_v30  ;;  %v1660_v50 = vld [vmem:[#allocation2 + $0x10c] sm:$0xff] }
 0x17e   : > { %v7409_v29 = vpop.f32.mrf.mxu0  ;;  %v1277_v42 = vpop.f32.mrf.mxu1  ;;  %1983 = vmatmul.mubr.f32.gmra.mxu1 %v1657_v5  ;;  %3033 = vmatprep.subr.mxu0 %v7205_v52  ;;  %v5138_v5 = vld [vmem:[%s8819_s3 + $0x268] sm:$0xff] }
 0x17f   : > { %v7416_v51 = vadd.f32 %v1277_v42, %v7300_v44  ;;  %1987 = vmatprep.mubr.f32.mxu1 %v1694_v8  ;;  %3034 = vmatpush2.msra.mxu0 %v5140_v54  ;;  %v5148_v44 = vld [vmem:[%s8819_s3 + $0x2b8] sm:$0xff]  ;;  %v1696_v8 = vld [vmem:[#allocation2 + $0x10d] sm:$0xff] }
 0x180   : > { %v839_v56 = vpop.f32.mrf.mxu0  ;;  %v1279_v14 = vpop.f32.mrf.mxu1  ;;  %3035 = vmatprep.subr.mxu0 %v7205_v52  ;;  %5856 = vmatprep.subr.mxu1 %v5148_v44  ;;  %v5147_v42 = vld [vmem:[%s8819_s3 + $0x2b0] sm:$0xff] }
 0x181   : > { %3036 = vmatpush2.msra.mxu0 %v5139_v47  ;;  %5857 = vmatpush3.msra.mxu1 %v5148_v44  ;;  %v5136_v56 = vld [vmem:[%s8819_s3 + $0x258] sm:$0xff]  ;;  %v1048_v44 = vadd.f32 %v7132_v28, %v7330_v23 }
 0x182   : > { %v7427_v16 = vpop.f32.mrf.mxu0  ;;  %v1282_v36 = vpop.f32.mrf.mxu1  ;;  %1988 = vmatmul.mubr.f32.gmra.mxu1 %v1658_v57  ;;  %3037 = vmatprep.subr.mxu0 %v7205_v52  ;;  %v1697_v47 = vld [vmem:[#allocation2 + $0x115] sm:$0xff] }
 0x183   : > { %v7433_v17 = vadd.f32 %v1282_v36, %v1038_v33  ;;  %1992 = vmatprep.mubr.f32.mxu1 %v1695_v62  ;;  %3038 = vmatpush2.msra.mxu0 %v5138_v5  ;;  %v5135_v33 = vld [vmem:[%s8819_s3 + $0x250] sm:$0xff]  ;;  %v5146_v36 = vld [vmem:[%s8819_s3 + $0x2a8] sm:$0xff] }
 0x184   : > { %v844_v37 = vpop.f32.mrf.mxu0  ;;  %v1284_v11 = vpop.f32.mrf.mxu1  ;;  %3039 = vmatprep.subr.mxu0 %v7205_v52  ;;  %5858 = vmatprep.subr.mxu1 %v5147_v42  ;;  %v1661_v28 = vld [vmem:[#allocation2 + $0x114] sm:$0xff] }
 0x185   : > { %3040 = vmatpush2.msra.mxu0 %v5137_v7  ;;  %5859 = vmatpush3.msra.mxu1 %v5147_v42  ;;  %v5134_v37 = vld [vmem:[%s8819_s3 + $0x248] sm:$0xff]  ;;  %v1698_v7 = vld [vmem:[#allocation2 + $0x11d] sm:$0xff]  ;;  %v1053_v42 = vadd.f32 %v7166_v1, %v7339_v43 }
 0x186   : > { %v7444_v54 = vpop.f32.mrf.mxu0  ;;  %v1287_v57 = vpop.f32.mrf.mxu1  ;;  %1993 = vmatmul.mubr.f32.gmra.mxu1 %v1659_v22  ;;  %3041 = vmatprep.subr.mxu0 %v7205_v52  ;;  %v1662_v1 = vld [vmem:[#allocation2 + $0x11c] sm:$0xff] }
 0x187   : > { %v7450_v14 = vadd.f32 %v1287_v57, %v1043_v61  ;;  %1997 = vmatprep.mubr.f32.mxu1 %v1696_v8  ;;  %3042 = vmatpush2.msra.mxu0 %v5136_v56  ;;  %v5133_v61 = vld [vmem:[%s8819_s3 + $0x240] sm:$0xff] }
 0x188   : > { %v849_v30 = vpop.f32.mrf.mxu0  ;;  %v1289_v62 = vpop.f32.mrf.mxu1  ;;  %3043 = vmatprep.subr.mxu0 %v7205_v52  ;;  %5860 = vmatprep.subr.mxu1 %v5146_v36  ;;  %v5145_v57 = vld [vmem:[%s8819_s3 + $0x2a0] sm:$0xff] }
 0x189   : > { %3044 = vmatpush2.msra.mxu0 %v5135_v33  ;;  %5861 = vmatpush3.msra.mxu1 %v5146_v36  ;;  %v5132_v30 = vld [vmem:[%s8819_s3 + $0x238] sm:$0xff]  ;;  %v1699_v33 = vld [vmem:[#allocation2 + $0x125] sm:$0xff]  ;;  %v1058_v36 = vadd.f32 %v7157_v55, %v7351_v10 }
 0x18a   : > { %v7461_v5 = vpop.f32.mrf.mxu0  ;;  %v1292_v22 = vpop.f32.mrf.mxu1  ;;  %1998 = vmatmul.mubr.f32.gmra.mxu1 %v1660_v50  ;;  %3045 = vmatprep.subr.mxu0 %v7205_v52  ;;  %v1663_v55 = vld [vmem:[#allocation2 + $0x124] sm:$0xff] }
 0x18b   : > { %v7467_v11 = vadd.f32 %v1292_v22, %v1048_v44  ;;  %2002 = vmatprep.mubr.f32.mxu1 %v1697_v47  ;;  %3046 = vmatpush2.msra.mxu0 %v5134_v37  ;;  %v5131_v44 = vld [vmem:[%s8819_s3 + $0x230] sm:$0xff]  ;;  %v5144_v22 = vld [vmem:[%s8819_s3 + $0x298] sm:$0xff] }
 0x18c   : > { %v854_v23 = vpop.f32.mrf.mxu0  ;;  %v1294_v8 = vpop.f32.mrf.mxu1  ;;  %3047 = vmatprep.subr.mxu0 %v7205_v52  ;;  %5862 = vmatprep.subr.mxu1 %v5145_v57 }
 0x18d   : > { %3048 = vmatpush2.msra.mxu0 %v5133_v61  ;;  %5863 = vmatpush3.msra.mxu1 %v5145_v57  ;;  %v5130_v23 = vld [vmem:[%s8819_s3 + $0x228] sm:$0xff]  ;;  %v1063_v57 = vadd.f32 %v7181_v27, %v7360_v2 }
 0x18e   : > { %v7478_v56 = vpop.f32.mrf.mxu0  ;;  %v1297_v50 = vpop.f32.mrf.mxu1  ;;  %2003 = vmatmul.mubr.f32.gmra.mxu1 %v1661_v28  ;;  %3049 = vmatprep.subr.mxu0 %v7205_v52  ;;  %v1700_v61 = vld [vmem:[#allocation2 + $0x12d] sm:$0xff] }
 0x18f   : > { %v7484_v62 = vadd.f32 %v1297_v50, %v1053_v42  ;;  %2007 = vmatprep.mubr.f32.mxu1 %v1698_v7  ;;  %3050 = vmatpush2.msra.mxu0 %v5132_v30  ;;  %v5129_v42 = vld [vmem:[%s8819_s3 + $0x220] sm:$0xff]  ;;  %v5143_v50 = vld [vmem:[%s8819_s3 + $0x290] sm:$0xff] }
 0x190   : > { %v859_v43 = vpop.f32.mrf.mxu0  ;;  %v1299_v47 = vpop.f32.mrf.mxu1  ;;  %3051 = vmatprep.subr.mxu0 %v7205_v52  ;;  %5864 = vmatprep.subr.mxu1 %v5144_v22  ;;  %v1664_v27 = vld [vmem:[#allocation2 + $0x12c] sm:$0xff] }
 0x191   : > { %3052 = vmatpush2.msra.mxu0 %v5131_v44  ;;  %5865 = vmatpush3.msra.mxu1 %v5144_v22  ;;  %v5128_v43 = vld [vmem:[%s8819_s3 + $0x218] sm:$0xff]  ;;  %v1068_v22 = vadd.f32 %v7179_v3, %v7372_v18 }
 0x192   : > { %v7495_v37 = vpop.f32.mrf.mxu0  ;;  %v1302_v28 = vpop.f32.mrf.mxu1  ;;  %2008 = vmatmul.mubr.f32.gmra.mxu1 %v1662_v1  ;;  %3053 = vmatprep.subr.mxu0 %v7205_v52  ;;  %v1701_v44 = vld [vmem:[#allocation2 + $0x135] sm:$0xff] }
 0x193   : > { %v7501_v8 = vadd.f32 %v1302_v28, %v1058_v36  ;;  %2012 = vmatprep.mubr.f32.mxu1 %v1699_v33  ;;  %3054 = vmatpush2.msra.mxu0 %v5130_v23  ;;  %v5127_v36 = vld [vmem:[%s8819_s3 + $0x210] sm:$0xff]  ;;  %v5142_v28 = vld [vmem:[%s8819_s3 + $0x288] sm:$0xff] }
 0x194   : > { %v864_v10 = vpop.f32.mrf.mxu0  ;;  %v1304_v7 = vpop.f32.mrf.mxu1  ;;  %3055 = vmatprep.subr.mxu0 %v7205_v52  ;;  %5866 = vmatprep.subr.mxu1 %v5143_v50  ;;  %v1665_v3 = vld [vmem:[#allocation2 + $0x134] sm:$0xff] }
 0x195   : > { %3056 = vmatpush2.msra.mxu0 %v5129_v42  ;;  %5867 = vmatpush3.msra.mxu1 %v5143_v50  ;;  %v5126_v10 = vld [vmem:[%s8819_s3 + $0x208] sm:$0xff]  ;;  %v1702_v42 = vld [vmem:[#allocation2 + $0x13d] sm:$0xff]  ;;  %v1073_v50 = vadd.f32 %v7196_v60, %v7381_v59 }
 0x196   : > { %v7512_v30 = vpop.f32.mrf.mxu0  ;;  %v1307_v1 = vpop.f32.mrf.mxu1  ;;  %2013 = vmatmul.mubr.f32.gmra.mxu1 %v1663_v55  ;;  %3057 = vmatprep.subr.mxu0 %v7205_v52  ;;  %v1666_v60 = vld [vmem:[#allocation2 + $0x13c] sm:$0xff] }
 0x197   : > { %v7518_v47 = vadd.f32 %v1307_v1, %v1063_v57  ;;  %2017 = vmatprep.mubr.f32.mxu1 %v1700_v61  ;;  %3058 = vmatpush2.msra.mxu0 %v5128_v43  ;;  %v5125_v57 = vld [vmem:[%s8819_s3 + $0x200] sm:$0xff]  ;;  %v7546_v1 = vld [vmem:[%s8819_s3 + $0x178] sm:$0xff] }
 0x198   : > { %v869_v2 = vpop.f32.mrf.mxu0  ;;  %v1309_v33 = vpop.f32.mrf.mxu1  ;;  %3059 = vmatprep.subr.mxu0 %v7205_v52  ;;  %5868 = vmatprep.subr.mxu1 %v5142_v28  ;;  %v5141_v43 = vld [vmem:[%s8819_s3 + $0x280] sm:$0xff] }
 0x199   : > { %3060 = vmatpush2.msra.mxu0 %v5127_v36  ;;  %5869 = vmatpush3.msra.mxu1 %v5142_v28  ;;  %v1078_v36 = vadd.f32 %v7191_v4, %v7392_v38 }
 0x19a   : > { %v7529_v23 = vpop.f32.mrf.mxu0  ;;  %v1312_v55 = vpop.f32.mrf.mxu1  ;;  %2018 = vmatmul.mubr.f32.gmra.mxu1 %v1664_v27  ;;  %3061 = vmatprep.subr.mxu0 %v7205_v52 }
 0x19b   : > { %v7535_v7 = vadd.f32 %v1312_v55, %v1068_v22  ;;  %2022 = vmatprep.mubr.f32.mxu1 %v1701_v44  ;;  %3062 = vmatpush2.msra.mxu0 %v5126_v10 }
 0x19c   : > { %v874_v18 = vpop.f32.mrf.mxu0  ;;  %v1314_v61 = vpop.f32.mrf.mxu1  ;;  %3063 = vmatprep.subr.mxu0 %v7205_v52  ;;  %5870 = vmatprep.subr.mxu1 %v5141_v43 }
 0x19d   : > { %3064 = vmatpush2.msra.mxu0 %v5125_v57  ;;  %5871 = vmatpush3.msra.mxu1 %v5141_v43  ;;  %v1083_v18 = vadd.f32 %v7209_v19, %v7409_v29  ;;  %v1093_v19 = vadd.f32 %v7218_v48, %v7444_v54 }
 0x19e   : > { %v7551_v27 = vpop.f32.mrf.mxu0  ;;  %v1317_v2 = vpop.f32.mrf.mxu1  ;;  %2023 = vmatmul.mubr.f32.gmra.mxu1 %v1665_v3  ;;  %5926 = vmatprep.subr.mxu0 %v7546_v1 }
 0x19f   : > { %v7554_v33 = vadd.f32 %v1317_v2, %v1073_v50  ;;  %2027 = vmatprep.mubr.f32.mxu1 %v1702_v42  ;;  %3491 = vmatprep.subr.mxu1 %v7205_v52  ;;  %v1088_v50 = vadd.f32 %v7203_v24, %v7427_v16  ;;  %v1098_v24 = vadd.f32 %v7212_v40, %v7461_v5 }
 0x1a0   : > { %v879_v59 = vpop.f32.mrf.mxu0  ;;  %v1319_v44 = vpop.f32.mrf.mxu1 }
 0x1a1   : > { %8824 = vst [vmem:[#allocation4_spill] sm:$0xff] %v7554_v33 }
 0x1a2   : > { %v7559_v22 = vpop.f32.mrf.mxu0  ;;  %v1322_v28 = vpop.f32.mrf.mxu1  ;;  %2028 = vmatmul.mubr.f32.gmra.mxu1 %v1666_v60 }
 0x1a3   : > { %v7562_v55 = vadd.f32 %v1322_v28, %v1078_v36 }
 0x1a4   : > { %v884_v10 = vpop.f32.mrf.mxu0  ;;  %v1324_v3 = vpop.f32.mrf.mxu1 }
 0x1a6   : > { %v7566_v61 = vpop.f32.mrf.mxu0  ;;  %v1327_v42 = vpop.f32.mrf.mxu1 }
 0x1a7   : > { %v7568_v57 = vadd.f32 %v1327_v42, %v1083_v18 }
 0x1a8   : > { %v889_v4 = vpop.f32.mrf.mxu0  ;;  %v1329_v38 = vpop.f32.mrf.mxu1 }
 0x1a9   : > { %8825 = vst [vmem:[#allocation5_spill] sm:$0xff] %v7568_v57 }
 0x1aa   : > { %v7572_v43 = vpop.f32.mrf.mxu0  ;;  %v1332_v52 = vpop.f32.mrf.mxu1 }
 0x1ab   : > { %v7574_v2 = vadd.f32 %v1332_v52, %v1088_v50 }
 0x1ac   : > { %v894_v60 = vpop.f32.mrf.mxu0  ;;  %v1334_v59 = vpop.f32.mrf.mxu1 }
 0x1ae   : > { %v1337_v29 = vpop.f32.mrf.mxu1  ;;  %v5702_v44 = vpop.f32.mrf.mxu0 }
 0x1af   : > { %v7578_v36 = vadd.f32 %v1337_v29, %v1093_v19  ;;  %v7581_v28 = vadd.f32 %v5702_v44, %v7268_v46  ;;  %v1103_v46 = vadd.f32 %v7225_v6, %v7478_v56 }
 0x1b0   : > { %v1339_v10 = vpop.f32.mrf.mxu1  ;;  %v7583_v3 = vpop.f32.mrf.mxu0 }
 0x1b1   : > { %8826 = vst [vmem:[#allocation6_spill] sm:$0xff] %v7578_v36 }
 0x1b2   : > { %v1342_v16 = vpop.f32.mrf.mxu1  ;;  %v5705_v18 = vpop.f32.mrf.mxu0 }
 0x1b3   : > { %v7587_v42 = vadd.f32 %v1342_v16, %v1098_v24  ;;  %v7590_v4 = vadd.f32 %v5705_v18, %v7290_v63  ;;  %v1108_v63 = vadd.f32 %v7223_v15, %v7495_v37 }
 0x1b4   : > { %v1344_v48 = vpop.f32.mrf.mxu1  ;;  %v7592_v54 = vpop.f32.mrf.mxu0 }
 0x1b6   : > { %v1347_v38 = vpop.f32.mrf.mxu1  ;;  %v5708_v50 = vpop.f32.mrf.mxu0 }
 0x1b7   : > { %v7596_v52 = vadd.f32 %v1347_v38, %v1103_v46  ;;  %v7599_v60 = vadd.f32 %v5708_v50, %v7312_v49  ;;  %v1113_v49 = vadd.f32 %v7232_v13, %v7512_v30 }
 0x1b8   : > { %v1349_v40 = vpop.f32.mrf.mxu1  ;;  %v7601_v5 = vpop.f32.mrf.mxu0 }
 0x1b9   : > { %8827 = vst [vmem:[#allocation7_spill] sm:$0xff] %v7596_v52  ;;  %v1123_v40 = vadd.f32 %v7239_v12, %v7551_v27 }
 0x1ba   : > { %v1352_v59 = vpop.f32.mrf.mxu1  ;;  %v5711_v19 = vpop.f32.mrf.mxu0 }
 0x1bb   : > { %v7605_v29 = vadd.f32 %v1352_v59, %v1108_v63  ;;  %v7608_v44 = vadd.f32 %v5711_v19, %v7333_v9  ;;  %v1118_v9 = vadd.f32 %v7230_v39, %v7529_v23 }
 0x1bc   : > { %v1354_v6 = vpop.f32.mrf.mxu1  ;;  %v7610_v56 = vpop.f32.mrf.mxu0 }
 0x1be   : > { %v1357_v10 = vpop.f32.mrf.mxu1  ;;  %v5714_v24 = vpop.f32.mrf.mxu0 }
 0x1bf   : > { %v7614_v16 = vadd.f32 %v1357_v10, %v1113_v49  ;;  %v7617_v18 = vadd.f32 %v5714_v24, %v7354_v58 }
 0x1c0   : > { %v1359_v15 = vpop.f32.mrf.mxu1  ;;  %v7619_v37 = vpop.f32.mrf.mxu0 }
 0x1c1   : > { %8828 = vst [vmem:[#allocation8_spill] sm:$0xff] %v7614_v16  ;;  %v1133_v15 = vadd.f32 %v7249_v41, %v7566_v61 }
 0x1c2   : > { %v1362_v48 = vpop.f32.mrf.mxu1  ;;  %v5717_v46 = vpop.f32.mrf.mxu0 }
 0x1c3   : > { %v1363_v38 = vadd.f32 %v1362_v48, %v1118_v9  ;;  %v7624_v50 = vadd.f32 %v5717_v46, %v7375_v26  ;;  %v1128_v26 = vadd.f32 %v7234_v31, %v7559_v22 }
 0x1c4   : > { %v1364_v13 = vpop.f32.mrf.mxu1  ;;  %v7626_v30 = vpop.f32.mrf.mxu0 }
 0x1c6   : > { %v1367_v58 = vpop.f32.mrf.mxu1  ;;  %v5720_v63 = vpop.f32.mrf.mxu0 }
 0x1c7   : > { %v7630_v59 = vadd.f32 %v1367_v58, %v1123_v40  ;;  %v7633_v19 = vadd.f32 %v5720_v63, %v7400_v45 }
 0x1c8   : > { %v1369_v39 = vpop.f32.mrf.mxu1  ;;  %v7635_v23 = vpop.f32.mrf.mxu0 }
 0x1c9   : > { %8829 = vst [vmem:[#allocation9_spill] sm:$0xff] %v7630_v59 }
 0x1ca   : > { %v1372_v6 = vpop.f32.mrf.mxu1  ;;  %v5723_v49 = vpop.f32.mrf.mxu0 }
 0x1cb   : > { %v1373_v10 = vadd.f32 %v1372_v6, %v1128_v26  ;;  %v7640_v24 = vadd.f32 %v5723_v49, %v7433_v17  ;;  %v1138_v17 = vadd.f32 %v7244_v20, %v7572_v43 }
 0x1cc   : > { %v1374_v12 = vpop.f32.mrf.mxu1  ;;  %v7642_v27 = vpop.f32.mrf.mxu0 }
 0x1ce   : > { %v1377_v45 = vpop.f32.mrf.mxu1  ;;  %v5726_v9 = vpop.f32.mrf.mxu0 }
 0x1cf   : > { %v7646_v48 = vadd.f32 %v1377_v45, %v1133_v15  ;;  %v7649_v46 = vadd.f32 %v5726_v9, %v7467_v11 }
 0x1d0   : > { %v1379_v31 = vpop.f32.mrf.mxu1  ;;  %v7651_v22 = vpop.f32.mrf.mxu0 }
 0x1d1   : > { %8830 = vst [vmem:[#allocation10_spill] sm:$0xff] %v7646_v48 }
 0x1d2   : > { %v1382_v13 = vpop.f32.mrf.mxu1  ;;  %v5729_v40 = vpop.f32.mrf.mxu0 }
 0x1d3   : > { %v1383_v58 = vadd.f32 %v1382_v13, %v1138_v17  ;;  %v7656_v63 = vadd.f32 %v5729_v40, %v7501_v8 }
 0x1d4   : > { %v1384_v41 = vpop.f32.mrf.mxu1  ;;  %v7658_v61 = vpop.f32.mrf.mxu0 }
 0x1d6   : > { %v5732_v39 = vpop.f32.mrf.mxu0  ;;  %v1854_v26 = vpop.f32.mrf.mxu1 }
 0x1d7   : > { %v7661_v11 = vadd.f32 %v5732_v39, %v7535_v7 }
 0x1d8   : > { %v7663_v6 = vpop.f32.mrf.mxu0  ;;  %v1856_v49 = vpop.f32.mrf.mxu1 }
 0x1da   : > { %v5735_v12 = vpop.f32.mrf.mxu0  ;;  %v1859_v15 = vpop.f32.mrf.mxu1 }
 0x1db   : > { %v7666_v20 = vadd.f32 %v5735_v12, %v7562_v55 }
 0x1dc   : > { %v7668_v43 = vpop.f32.mrf.mxu0  ;;  %v1861_v8 = vpop.f32.mrf.mxu1 }
 0x1dd   : > { %8831 = vst [vmem:[#allocation11_spill] sm:$0xff] %v7666_v20  ;;  %8832 = vst [vmem:[#allocation12_spill] sm:$0xff] %v7668_v43 }
 0x1de   : > { %v5738_v45 = vpop.f32.mrf.mxu0  ;;  %v1864_v9 = vpop.f32.mrf.mxu1 }
 0x1df   : > { %v7671_v31 = vadd.f32 %v5738_v45, %v7574_v2 }
 0x1e0   : > { %v7673_v17 = vpop.f32.mrf.mxu0  ;;  %v1866_v7 = vpop.f32.mrf.mxu1 }
 0x1e1   : > { %8833 = vst [vmem:[#allocation13_spill] sm:$0xff] %v7671_v31  ;;  %8834 = vst [vmem:[#allocation14_spill] sm:$0xff] %v7673_v17 }
 0x1e2   : > { %v5741_v13 = vpop.f32.mrf.mxu0  ;;  %v1869_v40 = vpop.f32.mrf.mxu1 }
 0x1e3   : > { %v7676_v41 = vadd.f32 %v5741_v13, %v7587_v42 }
 0x1e4   : > { %v7678_v39 = vpop.f32.mrf.mxu0  ;;  %v1871_v55 = vpop.f32.mrf.mxu1 }
 0x1e5   : > { %8835 = vst [vmem:[#allocation15_spill] sm:$0xff] %v7676_v41  ;;  %8836 = vst [vmem:[#allocation16_spill] sm:$0xff] %v7678_v39  ;;  %v2432_v41 = vpop.permute.xlu0 %2431 }
 0x1e6   : > { %v5744_v49 = vpop.f32.mrf.mxu0  ;;  %v1874_v12 = vpop.f32.mrf.mxu1 }
 0x1e7   : > { %v7681_v8 = vadd.f32 %v5744_v49, %v7605_v29  ;;  %v2442_v49 = vpop.permute.xlu1 %2441 }
 0x1e8   : > { %v7683_v48 = vpop.f32.mrf.mxu0  ;;  %v1876_v2 = vpop.f32.mrf.mxu1 }
 0x1e9   : > { %8837 = vst [vmem:[#allocation17_spill] sm:$0xff] %v7681_v8  ;;  %8838 = vst [vmem:[#allocation18_spill] sm:$0xff] %v7683_v48 }
 0x1ea   : > { %v5747_v45 = vpop.f32.mrf.mxu0  ;;  %v1879_v59 = vpop.f32.mrf.mxu1 }
 0x1eb   : > { %v7685_v16 = vadd.f32 %v5747_v45, %v1363_v38  ;;  %v2437_v45 = vpop.permute.xlu0 %2436 }
 0x1ec   : > { %v7687_v7 = vpop.f32.mrf.mxu0  ;;  %v1881_v52 = vpop.f32.mrf.mxu1 }
 0x1ed   : > { %8839 = vst [vmem:[#allocation19_spill] sm:$0xff] %v7685_v16  ;;  %8840 = vst [vmem:[#allocation20_spill] sm:$0xff] %v7687_v7  ;;  %v2447_v7 = vpop.permute.xlu1 %2446 }
 0x1ee   : > { %v5750_v42 = vpop.f32.mrf.mxu0  ;;  %v7689_v13 = vpop.f32.mrf.mxu1 }
 0x1ef   : > { %v7691_v55 = vadd.f32 %v5750_v42, %v1373_v10  ;;  %v7704_v10 = vld [vmem:[%s8818_s2] ss:$0 sm:$0xff] }
 0x1f0   : > { %v7693_v39 = vpop.f32.mrf.mxu0  ;;  %v1886_v29 = vpop.f32.mrf.mxu1 }
 0x1f1   : > { %8841 = vst [vmem:[#allocation21_spill] sm:$0xff] %v7691_v55  ;;  %8842 = vst [vmem:[#allocation22_spill] sm:$0xff] %v7693_v39  ;;  %v2452_v55 = vpop.permute.xlu0 %2451 }
 0x1f2   : > { %v5753_v8 = vpop.f32.mrf.mxu0  ;;  %v1889_v48 = vpop.f32.mrf.mxu1 }
 0x1f3   : > { %v7695_v2 = vadd.f32 %v5753_v8, %v1383_v58  ;;  %v1453_v58 = vadd.f32 %v7583_v3, %v7258_v21 }
 0x1f4   : > { %v7697_v36 = vpop.f32.mrf.mxu0  ;;  %v1891_v38 = vpop.f32.mrf.mxu1 }
 0x1f5   : > { %8843 = vst [vmem:[#allocation23_spill] sm:$0xff] %v7695_v2  ;;  %8844 = vst [vmem:[#allocation24_spill] sm:$0xff] %v7697_v36 }
 0x1f6   : > { %v7699_v16 = vpop.f32.mrf.mxu1  ;;  %v5788_v52 = vpop.f32.mrf.mxu0 }
 0x1f7   : > { %v2105_v31 = vadd.f32 %v5788_v52, %v1859_v15  ;;  %v1463_v52 = vadd.f32 %v7592_v54, %v7281_v34  ;;  %v1473_v34 = vadd.f32 %v7601_v5, %v7303_v0 }
 0x1f8   : > { %v1896_v42 = vpop.f32.mrf.mxu1  ;;  %v2099_v29 = vpop.f32.mrf.mxu0 }
 0x1f9   : > { %v2279_v8 = vadd.f32 %v2105_v31, %v7581_v28  ;;  %v2100_v2 = vadd.f32 %v2099_v29, %v1854_v26  ;;  %v2457_v42 = vpop.permute.xlu1 %2456 }
 0x1fa   : > { %v1899_v38 = vpop.f32.mrf.mxu1  ;;  %v5791_v36 = vpop.f32.mrf.mxu0 }
 0x1fb   : > { %v2322_v39 = vadd.f32 %v7704_v10, %v2279_v8  ;;  %v2278_v17 = vadd.f32 %v2100_v2, %v1453_v58  ;;  %v2115_v15 = vadd.f32 %v5791_v36, %v1869_v40  ;;  %v7721_v2 = vpop.permute.xlu0 %2461 }
 0x1fc   : > { %v1901_v57 = vpop.f32.mrf.mxu1  ;;  %v2109_v20 = vpop.f32.mrf.mxu0 }
 0x1fd   : > { %v2358_v43 = vmax.f32 %v2322_v39, 0.0  ;;  %v2321_v33 = vadd.f32 %v7704_v10, %v2278_v17  ;;  %v2281_v21 = vadd.f32 %v2115_v15, %v7590_v4  ;;  %v2110_v28 = vadd.f32 %v2109_v20, %v1864_v9  ;;  %v2467_v58 = vpop.permute.xlu1 %2466 }
 0x1fe   : > { %v7714_v3 = vpop.f32.mrf.mxu1  ;;  %v5794_v26 = vpop.f32.mrf.mxu0  ;;  %v1483_v15 = vadd.f32 %v7610_v56, %v7324_v25 }
 0x1ff   : > { %v7716_v31 = vmul.f32 %v2437_v45, %v2358_v43  ;;  %v2357_v29 = vmax.f32 %v2321_v33, 0.0  ;;  %v2324_v36 = vadd.f32 %v7704_v10, %v2281_v21  ;;  %v2280_v40 = vadd.f32 %v2110_v28, %v1463_v52 }
 0x200   : > { %v2125_v57 = vadd.f32 %v5794_v26, %v1879_v59  ;;  %v1906_v54 = vpop.f32.mrf.mxu1  ;;  %v2119_v39 = vpop.f32.mrf.mxu0 }
 0x201   : > { %2687 = vst [vmem:[#allocation3 + $0x1b] sm:$0xff] %v7716_v31  ;;  %v2609_v4 = vmul.f32 %v2432_v41, %v2357_v29  ;;  %v2360_v20 = vmax.f32 %v2324_v36, 0.0  ;;  %v2323_v9 = vadd.f32 %v7704_v10, %v2280_v40  ;;  %v2120_v43 = vadd.f32 %v2119_v39, %v1874_v12  ;;  %v7739_v36 = vpop.permute.xlu0 %2471 }
 0x202   : > { %v2283_v33 = vadd.f32 %v2125_v57, %v7599_v60  ;;  %v1909_v17 = vpop.f32.mrf.mxu1  ;;  %v5797_v45 = vpop.f32.mrf.mxu0 }
 0x203   : > { %2686 = vst [vmem:[#allocation3 + $0x13] sm:$0xff] %v2609_v4  ;;  %v7726_v8 = vmul.f32 %v2447_v7, %v2360_v20  ;;  %v2359_v0 = vmax.f32 %v2323_v9, 0.0  ;;  %v2282_v5 = vadd.f32 %v2120_v43, %v1473_v34  ;;  %v2135_v59 = vadd.f32 %v5797_v45, %v1889_v48  ;;  %3065 = vmatprep.mubr.f32.mxu0 %v2609_v4 }
 0x204   : > { %v2326_v41 = vadd.f32 %v7704_v10, %v2283_v33  ;;  %v1911_v52 = vpop.f32.mrf.mxu1  ;;  %v2129_v21 = vpop.f32.mrf.mxu0  ;;  %v1493_v9 = vadd.f32 %v7619_v37, %v7342_v32 }
 0x205   : > { %2689 = vst [vmem:[#allocation3 + $0x2b] sm:$0xff] %v7726_v8  ;;  %v7732_v60 = vmul.f32 %v2442_v49, %v2359_v0  ;;  %v2325_v12 = vadd.f32 %v7704_v10, %v2282_v5  ;;  %v2285_v7 = vadd.f32 %v2135_v59, %v7608_v44  ;;  %v2130_v28 = vadd.f32 %v2129_v21, %v7689_v13  ;;  %v2477_v44 = vpop.permute.xlu1 %2476 }
 0x206   : > { %v2362_v26 = vmax.f32 %v2326_v41, 0.0  ;;  %v7737_v48 = vpop.f32.mrf.mxu1  ;;  %v5800_v29 = vpop.f32.mrf.mxu0 }
 0x207   : > { %2688 = vst [vmem:[#allocation3 + $0x23] sm:$0xff] %v7732_v60  ;;  %v2361_v25 = vmax.f32 %v2325_v12, 0.0  ;;  %v2328_v56 = vadd.f32 %v7704_v10, %v2285_v7  ;;  %v2284_v40 = vadd.f32 %v2130_v28, %v1483_v15  ;;  %v2145_v49 = vadd.f32 %v5800_v29, %v1899_v38  ;;  %v2482_v41 = vpop.permute.xlu0 %2481 }
 0x208   : > { %v7743_v34 = vmul.f32 %v2457_v42, %v2362_v26  ;;  %v1916_v57 = vpop.f32.mrf.mxu1  ;;  %v2139_v54 = vpop.f32.mrf.mxu0 }
 0x209   : > { %v7745_v39 = vmul.f32 %v2452_v55, %v2361_v25  ;;  %v2364_v13 = vmax.f32 %v2328_v56, 0.0  ;;  %v2327_v4 = vadd.f32 %v7704_v10, %v2284_v40  ;;  %v2287_v20 = vadd.f32 %v2145_v49, %v7617_v18  ;;  %v2876_v55 = vld [vmem:[%s8819_s3 + $0x170] sm:$0xff]  ;;  %v2487_v28 = vpop.permute.xlu1 %2486  ;;  %v2845_v25 = vld [vmem:[%s8819_s3 + $0x78] sm:$0xff] }
 0x20a   : > { %2691 = vst [vmem:[#allocation3 + $0x3b] sm:$0xff] %v7743_v34  ;;  %v2140_v43 = vadd.f32 %v2139_v54, %v7699_v16  ;;  %v1919_v38 = vpop.f32.mrf.mxu1  ;;  %v5803_v42 = vpop.f32.mrf.mxu0  ;;  %v2916_v33 = vld [vmem:[#allocation3 + $0x14] sm:$0xff]  ;;  %v1503_v16 = vadd.f32 %v7626_v30, %v7363_v35  ;;  %v1513_v56 = vadd.f32 %v7635_v23, %v7384_v53 }
 0x20b   : > { %v2796_v45 = vld [vmem:[#allocation3 + $0x12] sm:$0xff]  ;;  %2690 = vst [vmem:[#allocation3 + $0x33] sm:$0xff] %v7745_v39  ;;  %v7757_v0 = vmul.f32 %v2467_v58, %v2364_v13  ;;  %v2363_v18 = vmax.f32 %v2327_v4, 0.0  ;;  %v2330_v5 = vadd.f32 %v7704_v10, %v2287_v20  ;;  %v2155_v32 = vadd.f32 %v5803_v42, %v1909_v17  ;;  %5872 = vmatprep.mubr.f32.mxu1 %v2916_v33  ;;  %v2797_v29 = vld [vmem:[#allocation3 + $0x1a] sm:$0xff]  ;;  %v2492_v42 = vpop.permute.xlu0 %2491 }
 0x20c   : > { %3066 = vmatmul.mubr.f32.vlgmr.msra.gmra.mxu0 %v2796_v45  ;;  %v2286_v37 = vadd.f32 %v2140_v43, %v1493_v9  ;;  %v1921_v59 = vpop.f32.mrf.mxu1  ;;  %v2149_v15 = vpop.f32.mrf.mxu0  ;;  %v2874_v54 = vld [vmem:[%s8819_s3 + $0x160] sm:$0xff] }
 0x20d   : > { %3070 = vmatprep.mubr.f32.mxu0 %v7716_v31  ;;  %5927 = vmatpush3.msra.mxu0 %v7546_v1  ;;  %2693 = vst [vmem:[#allocation3 + $0x4b] sm:$0xff] %v7757_v0  ;;  %v7766_v58 = vmul.f32 %v7721_v2, %v2363_v18  ;;  %v2366_v52 = vmax.f32 %v2330_v5, 0.0  ;;  %v2289_v17 = vadd.f32 %v2155_v32, %v7624_v50  ;;  %v2875_v1 = vld [vmem:[%s8819_s3 + $0x168] sm:$0xff] }
 0x20e   : > { %v2150_v21 = vadd.f32 %v2149_v15, %v7714_v3  ;;  %5928 = vmatprep.subr.mxu0 %v2876_v55  ;;  %v2329_v35 = vadd.f32 %v7704_v10, %v2286_v37  ;;  %v1924_v30 = vpop.f32.mrf.mxu1  ;;  %v5806_v12 = vpop.f32.mrf.mxu0  ;;  %v2917_v7 = vld [vmem:[#allocation3 + $0x1c] sm:$0xff]  ;;  %v2918_v31 = vld [vmem:[#allocation3 + $0x24] sm:$0xff] }
 0x20f   : > { %5929 = vmatpush3.msra.mxu0 %v2876_v55  ;;  %2692 = vst [vmem:[#allocation3 + $0x43] sm:$0xff] %v7766_v58  ;;  %v7775_v2 = vmul.f32 %v2477_v44, %v2366_v52  ;;  %v2332_v50 = vadd.f32 %v7704_v10, %v2289_v17  ;;  %v2165_v26 = vadd.f32 %v5806_v12, %v1919_v38  ;;  %v2872_v12 = vld [vmem:[%s8819_s3 + $0x150] sm:$0xff] }
 0x210   : > { %v2288_v3 = vadd.f32 %v2150_v21, %v1503_v16  ;;  %5873 = vmatmul.mubr.f32.vlgmr.msra.gmra.mxu1 %v2917_v7  ;;  %v2365_v40 = vmax.f32 %v2329_v35, 0.0  ;;  %v1926_v49 = vpop.f32.mrf.mxu1  ;;  %v2159_v57 = vpop.f32.mrf.mxu0  ;;  %3071 = vmatmul.mubr.f32.gmra.mxu0 %v2797_v29 }
 0x211   : > { %5875 = vmatprep.mubr.f32.mxu1 %v2918_v31  ;;  %2695 = vst [vmem:[#allocation3 + $0x5b] sm:$0xff] %v7775_v2  ;;  %v2368_v44 = vmax.f32 %v2332_v50, 0.0  ;;  %v2291_v4 = vadd.f32 %v2165_v26, %v7633_v19  ;;  %v2160_v20 = vadd.f32 %v2159_v57, %v7737_v48  ;;  %3075 = vmatprep.mubr.f32.mxu0 %v7732_v60  ;;  %v2798_v48 = vld [vmem:[#allocation3 + $0x22] sm:$0xff]  ;;  %v2873_v60 = vld [vmem:[%s8819_s3 + $0x158] sm:$0xff]  ;;  %v2497_v16 = vpop.permute.xlu1 %2496  ;;  %v2502_v29 = vpop.permute.xlu0 %2501 }
 0x212   : > { %v2331_v13 = vadd.f32 %v7704_v10, %v2288_v3  ;;  %5930 = vmatprep.subr.mxu0 %v2875_v1  ;;  %v7792_v53 = vmul.f32 %v7739_v36, %v2365_v40  ;;  %v1929_v23 = vpop.f32.mrf.mxu1  ;;  %v5809_v9 = vpop.f32.mrf.mxu0  ;;  %v2919_v43 = vld [vmem:[#allocation3 + $0x2c] sm:$0xff]  ;;  %v2920_v38 = vld [vmem:[#allocation3 + $0x34] sm:$0xff]  ;;  %3492 = vmatpush1.msra.mxu1 %v2845_v25  ;;  %v1523_v36 = vadd.f32 %v7642_v27, %v7416_v51  ;;  %v2871_v26 = vld [vmem:[%s8819_s3 + $0x148] sm:$0xff] }
 0x213   : > { %5931 = vmatpush3.msra.mxu0 %v2875_v1  ;;  %v7794_v33 = vmul.f32 %v2487_v28, %v2368_v44  ;;  %v2334_v19 = vadd.f32 %v7704_v10, %v2291_v4  ;;  %v2290_v55 = vadd.f32 %v2160_v20, %v1513_v56  ;;  %v2175_v18 = vadd.f32 %v5809_v9, %v1929_v23  ;;  %v2844_v31 = vld [vmem:[%s8819_s3 + $0x70] sm:$0xff]  ;;  %v2843_v57 = vld [vmem:[%s8819_s3 + $0x68] sm:$0xff]  ;;  %v2800_v23 = vld [vmem:[#allocation3 + $0x32] sm:$0xff] }
 0x214   : > { %v2367_v45 = vmax.f32 %v2331_v13, 0.0  ;;  %5876 = vmatmul.mubr.f32.gmra.mxu1 %v2919_v43  ;;  %5932 = vmatprep.subr.mxu0 %v2874_v54  ;;  %2694 = vst [vmem:[#allocation3 + $0x53] sm:$0xff] %v7792_v53  ;;  %v1931_v5 = vpop.f32.mrf.mxu1  ;;  %v2169_v32 = vpop.f32.mrf.mxu0  ;;  %v1533_v1 = vadd.f32 %v7651_v22, %v7450_v14 }
 0x215   : > { %3076 = vmatmul.mubr.f32.gmra.mxu0 %v2798_v48  ;;  %5878 = vmatprep.mubr.f32.mxu1 %v2920_v38  ;;  %2697 = vst [vmem:[#allocation3 + $0x6b] sm:$0xff] %v7794_v33  ;;  %v2370_v59 = vmax.f32 %v2334_v19, 0.0  ;;  %v2333_v15 = vadd.f32 %v7704_v10, %v2290_v55  ;;  %v2170_v52 = vadd.f32 %v2169_v32, %v1924_v30  ;;  %v2512_v5 = vpop.permute.xlu0 %2511 }
 0x216   : > { %v7804_v37 = vmul.f32 %v2482_v41, %v2367_v45  ;;  %3080 = vmatprep.mubr.f32.mxu0 %v7726_v8  ;;  %5933 = vmatpush3.msra.mxu0 %v2874_v54  ;;  %v2293_v51 = vadd.f32 %v2175_v18, %v7640_v24  ;;  %v1934_v27 = vpop.f32.mrf.mxu1  ;;  %v5812_v17 = vpop.f32.mrf.mxu0  ;;  %v2921_v21 = vld [vmem:[#allocation3 + $0x3c] sm:$0xff]  ;;  %v2922_v35 = vld [vmem:[#allocation3 + $0x44] sm:$0xff]  ;;  %v1543_v18 = vadd.f32 %v7658_v61, %v7484_v62  ;;  %v2869_v62 = vld [vmem:[%s8819_s3 + $0x138] sm:$0xff] }
 0x217   : > { %5934 = vmatprep.subr.mxu0 %v2873_v60  ;;  %v7812_v41 = vld [vmem:[#allocation2] sm:$0xff]  ;;  %v7816_v30 = vmul.f32 %v2497_v16, %v2370_v59  ;;  %v2369_v8 = vmax.f32 %v2333_v15, 0.0  ;;  %v2292_v7 = vadd.f32 %v2170_v52, %v1523_v36  ;;  %v2799_v24 = vld [vmem:[#allocation3 + $0x2a] sm:$0xff]  ;;  %v2507_v54 = vpop.permute.xlu1 %2506 }
 0x218   : > { %3493 = vmatprep.subr.mxu1 %v7812_v41  ;;  %2696 = vst [vmem:[#allocation3 + $0x63] sm:$0xff] %v7804_v37  ;;  %5879 = vmatmul.mubr.f32.gmra.mxu1 %v2921_v21  ;;  %v2336_v28 = vadd.f32 %v7704_v10, %v2293_v51  ;;  %v1936_v50 = vpop.f32.mrf.mxu1  ;;  %v2179_v3 = vpop.f32.mrf.mxu0  ;;  %v2801_v59 = vld [vmem:[#allocation3 + $0x3a] sm:$0xff] }
 0x219   : > { %5935 = vmatpush3.msra.mxu0 %v2873_v60  ;;  %5881 = vmatprep.mubr.f32.mxu1 %v2922_v35  ;;  %2699 = vst [vmem:[#allocation3 + $0x7b] sm:$0xff] %v7816_v30  ;;  %v7828_v25 = vmul.f32 %v2492_v42, %v2369_v8  ;;  %v2335_v56 = vadd.f32 %v7704_v10, %v2292_v7  ;;  %v2870_v42 = vld [vmem:[%s8819_s3 + $0x140] sm:$0xff]  ;;  %v2868_v50 = vld [vmem:[%s8819_s3 + $0x130] sm:$0xff] }
 0x21a   : > { %3081 = vmatmul.mubr.f32.gmra.mxu0 %v2799_v24  ;;  %v2180_v40 = vadd.f32 %v2179_v3, %v1934_v27  ;;  %5936 = vmatprep.subr.mxu0 %v2872_v12  ;;  %v2372_v14 = vmax.f32 %v2336_v28, 0.0  ;;  %v1939_v22 = vpop.f32.mrf.mxu1  ;;  %v5815_v49 = vpop.f32.mrf.mxu0 }
 0x21b   : > { %3085 = vmatprep.mubr.f32.mxu0 %v7745_v39  ;;  %5937 = vmatpush3.msra.mxu0 %v2872_v12  ;;  %2698 = vst [vmem:[#allocation3 + $0x73] sm:$0xff] %v7828_v25  ;;  %v2371_v44 = vmax.f32 %v2335_v56, 0.0  ;;  %v2185_v4 = vadd.f32 %v5812_v17, %v1939_v22  ;;  %v2923_v20 = vld [vmem:[#allocation3 + $0x4c] sm:$0xff]  ;;  %v2924_v9 = vld [vmem:[#allocation3 + $0x54] sm:$0xff]  ;;  %v2517_v17 = vpop.permute.xlu1 %2516  ;;  %v2522_v56 = vpop.permute.xlu0 %2521 }
 0x21c   : > { %3494 = vmatpush1.msra.mxu1 %v2844_v31  ;;  %v2294_v13 = vadd.f32 %v2180_v40, %v1533_v1  ;;  %5938 = vmatprep.subr.mxu0 %v2871_v26  ;;  %v7837_v39 = vmul.f32 %v2507_v54, %v2372_v14  ;;  %v1941_v43 = vpop.f32.mrf.mxu1  ;;  %v2189_v38 = vpop.f32.mrf.mxu0  ;;  %v2802_v31 = vld [vmem:[#allocation3 + $0x42] sm:$0xff] }
 0x21d   : > { %3495 = vmatprep.subr.mxu1 %v7812_v41  ;;  %5882 = vmatmul.mubr.f32.gmra.mxu1 %v2923_v20  ;;  %v7842_v45 = vmul.f32 %v2502_v29, %v2371_v44  ;;  %v2295_v55 = vadd.f32 %v2185_v4, %v7649_v46  ;;  %v1553_v29 = vadd.f32 %v7663_v6, %v7518_v47  ;;  %v2803_v44 = vld [vmem:[#allocation3 + $0x4a] sm:$0xff] }
 0x21e   : > { %3086 = vmatmul.mubr.f32.gmra.mxu0 %v2800_v23  ;;  %v2337_v19 = vadd.f32 %v7704_v10, %v2294_v13  ;;  %5884 = vmatprep.mubr.f32.mxu1 %v2924_v9  ;;  %2701 = vst [vmem:[#allocation3 + $0x8b] sm:$0xff] %v7837_v39  ;;  %v1944_v48 = vpop.f32.mrf.mxu1  ;;  %v5818_v52 = vpop.f32.mrf.mxu0 }
 0x21f   : > { %3090 = vmatprep.mubr.f32.mxu0 %v7743_v34  ;;  %v2925_v60 = vld [vmem:[#allocation3 + $0x5c] sm:$0xff]  ;;  %v2926_v36 = vld [vmem:[#allocation3 + $0x64] sm:$0xff]  ;;  %3496 = vmatpush1.msra.mxu1 %v2843_v57  ;;  %2700 = vst [vmem:[#allocation3 + $0x83] sm:$0xff] %v7842_v45  ;;  %v2338_v16 = vadd.f32 %v7704_v10, %v2295_v55  ;;  %v2190_v46 = vadd.f32 %v2189_v38, %v1944_v48  ;;  %v2527_v20 = vpop.permute.xlu1 %2526 }
 0x220   : > { %5939 = vmatpush3.msra.mxu0 %v2871_v26  ;;  %v2373_v32 = vmax.f32 %v2337_v19, 0.0  ;;  %3497 = vmatprep.subr.mxu1 %v7812_v41  ;;  %v2842_v34 = vld [vmem:[%s8819_s3 + $0x60] sm:$0xff]  ;;  %v1946_v15 = vpop.f32.mrf.mxu1  ;;  %v2199_v28 = vpop.f32.mrf.mxu0  ;;  %v2839_v55 = vld [vmem:[%s8819_s3 + $0x48] sm:$0xff] }
 0x221   : > { %5940 = vmatprep.subr.mxu0 %v2870_v42  ;;  %5885 = vmatmul.mubr.f32.gmra.mxu1 %v2925_v60  ;;  %v2374_v51 = vmax.f32 %v2338_v16, 0.0  ;;  %v2296_v27 = vadd.f32 %v2190_v46, %v1543_v18  ;;  %v2804_v19 = vld [vmem:[#allocation3 + $0x52] sm:$0xff]  ;;  %v8845_v16 = vld [vmem:[#allocation4_spill] sm:$0xff] }
 0x222   : > { %3091 = vmatmul.mubr.f32.gmra.mxu0 %v2801_v59  ;;  %v7859_v61 = vmul.f32 %v2512_v5, %v2373_v32  ;;  %5887 = vmatprep.mubr.f32.mxu1 %v2926_v36  ;;  %v1949_v21 = vpop.f32.mrf.mxu1  ;;  %v2927_v35 = vld [vmem:[#allocation3 + $0x6c] sm:$0xff]  ;;  %v2928_v12 = vld [vmem:[#allocation3 + $0x74] sm:$0xff]  ;;  %v5821_v6 = vpop.f32.mrf.mxu0 }
 0x223   : > { %3095 = vmatprep.mubr.f32.mxu0 %v7766_v58  ;;  %3498 = vmatpush1.msra.mxu1 %v2842_v34  ;;  %v7863_v8 = vmul.f32 %v2517_v17, %v2374_v51  ;;  %v2339_v7 = vadd.f32 %v7704_v10, %v2296_v27  ;;  %v2195_v24 = vadd.f32 %v5815_v49, %v1949_v21  ;;  %v2841_v58 = vld [vmem:[%s8819_s3 + $0x58] sm:$0xff]  ;;  %v2866_v36 = vld [vmem:[%s8819_s3 + $0x120] sm:$0xff]  ;;  %v8846_v46 = vld [vmem:[#allocation12_spill] sm:$0xff]  ;;  %v2532_v34 = vpop.permute.xlu0 %2531 }
 0x224   : > { %5941 = vmatpush3.msra.mxu0 %v2870_v42  ;;  %2702 = vst [vmem:[#allocation3 + $0x93] sm:$0xff] %v7859_v61  ;;  %3499 = vmatprep.subr.mxu1 %v7812_v41  ;;  %v1951_v1 = vpop.f32.mrf.mxu1  ;;  %v2209_v60 = vpop.f32.mrf.mxu0  ;;  %v2838_v32 = vld [vmem:[%s8819_s3 + $0x40] sm:$0xff]  ;;  %v1563_v59 = vadd.f32 %v8846_v46, %v8845_v16  ;;  %v2837_v21 = vld [vmem:[%s8819_s3 + $0x38] sm:$0xff] }
 0x225   : > { %5942 = vmatprep.subr.mxu0 %v2869_v62  ;;  %5888 = vmatmul.mubr.f32.gmra.mxu1 %v2927_v35  ;;  %2703 = vst [vmem:[#allocation3 + $0x9b] sm:$0xff] %v7863_v8  ;;  %v2375_v3 = vmax.f32 %v2339_v7, 0.0  ;;  %v2297_v26 = vadd.f32 %v2195_v24, %v7656_v63  ;;  %v2840_v63 = vld [vmem:[%s8819_s3 + $0x50] sm:$0xff]  ;;  %v2865_v35 = vld [vmem:[%s8819_s3 + $0x118] sm:$0xff]  ;;  %v2537_v24 = vpop.permute.xlu1 %2536 }
 0x226   : > { %3096 = vmatmul.mubr.f32.gmra.mxu0 %v2802_v31  ;;  %5890 = vmatprep.mubr.f32.mxu1 %v2928_v12  ;;  %v1954_v40 = vpop.f32.mrf.mxu1  ;;  %v2929_v14 = vld [vmem:[#allocation3 + $0x7c] sm:$0xff]  ;;  %v2930_v22 = vld [vmem:[#allocation3 + $0x84] sm:$0xff]  ;;  %v5824_v17 = vpop.f32.mrf.mxu0 }
 0x227   : > { %3100 = vmatprep.mubr.f32.mxu0 %v7757_v0  ;;  %3500 = vmatpush1.msra.mxu1 %v2841_v58  ;;  %v7878_v49 = vmul.f32 %v2522_v56, %v2375_v3  ;;  %v2340_v57 = vadd.f32 %v7704_v10, %v2297_v26  ;;  %v2200_v54 = vadd.f32 %v2199_v28, %v1954_v40  ;;  %v2867_v0 = vld [vmem:[%s8819_s3 + $0x128] sm:$0xff]  ;;  %v2836_v3 = vld [vmem:[%s8819_s3 + $0x30] sm:$0xff] }
 0x228   : > { %5943 = vmatpush3.msra.mxu0 %v2869_v62  ;;  %3501 = vmatprep.subr.mxu1 %v7812_v41  ;;  %v1956_v47 = vpop.f32.mrf.mxu1  ;;  %v2864_v56 = vld [vmem:[%s8819_s3 + $0x110] sm:$0xff] }
 0x229   : > { %5944 = vmatprep.subr.mxu0 %v2868_v50  ;;  %5891 = vmatmul.mubr.f32.gmra.mxu1 %v2929_v14  ;;  %2704 = vst [vmem:[#allocation3 + $0xa3] sm:$0xff] %v7878_v49  ;;  %v2376_v13 = vmax.f32 %v2340_v57, 0.0  ;;  %v2298_v4 = vadd.f32 %v2200_v54, %v1553_v29  ;;  %v2219_v29 = vpop.f32.mrf.mxu0  ;;  %v8847_v14 = vld [vmem:[#allocation11_spill] sm:$0xff]  ;;  %v8848_v54 = vld [vmem:[#allocation5_spill] sm:$0xff]  ;;  %v2542_v47 = vpop.permute.xlu0 %2541 }
 0x22a   : > { %3101 = vmatmul.mubr.f32.gmra.mxu0 %v2803_v44  ;;  %5893 = vmatprep.mubr.f32.mxu1 %v2930_v22  ;;  %v1959_v23 = vpop.f32.mrf.mxu1  ;;  %v2835_v57 = vld [vmem:[%s8819_s3 + $0x28] sm:$0xff]  ;;  %v8849_v44 = vld [vmem:[#allocation14_spill] sm:$0xff] }
 0x22b   : > { %3105 = vmatprep.mubr.f32.mxu0 %v7792_v53  ;;  %v2931_v9 = vld [vmem:[#allocation3 + $0x8c] sm:$0xff]  ;;  %3502 = vmatpush1.msra.mxu1 %v2840_v63  ;;  %v7890_v43 = vmul.f32 %v2527_v20, %v2376_v13  ;;  %v2341_v38 = vadd.f32 %v7704_v10, %v2298_v4  ;;  %v2205_v42 = vadd.f32 %v5818_v52, %v1959_v23 }
 0x22c   : > { %5945 = vmatpush3.msra.mxu0 %v2868_v50  ;;  %3503 = vmatprep.subr.mxu1 %v7812_v41  ;;  %v1961_v53 = vpop.f32.mrf.mxu1  ;;  %v2932_v48 = vld [vmem:[#allocation3 + $0x94] sm:$0xff]  ;;  %v7927_v50 = vld [vmem:[#allocation3 + $0x62] sm:$0xff]  ;;  %v1573_v63 = vadd.f32 %v8849_v44, %v8848_v54  ;;  %v7948_v20 = vld [vmem:[#allocation3 + $0x6a] sm:$0xff] }
 0x22d   : > { %5946 = vmatprep.subr.mxu0 %v2867_v0  ;;  %5894 = vmatmul.mubr.f32.gmra.mxu1 %v2931_v9  ;;  %2705 = vst [vmem:[#allocation3 + $0xab] sm:$0xff] %v7890_v43  ;;  %v2377_v18 = vmax.f32 %v2341_v38, 0.0  ;;  %v2299_v5 = vadd.f32 %v2205_v42, %v7661_v11  ;;  %v7911_v11 = vld [vmem:[#allocation3 + $0x5a] sm:$0xff]  ;;  %v5827_v9 = vpop.f32.mrf.mxu0  ;;  %v2547_v53 = vpop.permute.xlu1 %2546 }
 0x22e   : > { %3106 = vmatmul.mubr.f32.gmra.mxu0 %v2804_v19  ;;  %5896 = vmatprep.mubr.f32.mxu1 %v2932_v48  ;;  %v1964_v15 = vpop.f32.mrf.mxu1  ;;  %v2834_v38 = vld [vmem:[%s8819_s3 + $0x20] sm:$0xff]  ;;  %v2863_v42 = vld [vmem:[%s8819_s3 + $0x108] sm:$0xff] }
 0x22f   : > { %3110 = vmatprep.mubr.f32.mxu0 %v7775_v2  ;;  %3504 = vmatpush1.msra.mxu1 %v2839_v55  ;;  %v7908_v52 = vmul.f32 %v2532_v34, %v2377_v18  ;;  %v2342_v62 = vadd.f32 %v7704_v10, %v2299_v5  ;;  %v2210_v51 = vadd.f32 %v2209_v60, %v1964_v15  ;;  %v7964_v5 = vld [vmem:[#allocation3 + $0x72] sm:$0xff]  ;;  %v2229_v46 = vpop.f32.mrf.mxu0 }
 0x230   : > { %5947 = vmatpush3.msra.mxu0 %v2867_v0  ;;  %3505 = vmatprep.subr.mxu1 %v7812_v41  ;;  %v1966_v2 = vpop.f32.mrf.mxu1  ;;  %v2933_v27 = vld [vmem:[#allocation3 + $0x9c] sm:$0xff]  ;;  %v8850_v15 = vld [vmem:[#allocation13_spill] sm:$0xff] }
 0x231   : > { %5948 = vmatprep.subr.mxu0 %v2866_v36  ;;  %3506 = vmatpush1.msra.mxu1 %v2838_v32  ;;  %2706 = vst [vmem:[#allocation3 + $0xb3] sm:$0xff] %v7908_v52  ;;  %v2378_v12 = vmax.f32 %v2342_v62, 0.0  ;;  %v2300_v7 = vadd.f32 %v2210_v51, %v1563_v59  ;;  %v2833_v32 = vld [vmem:[%s8819_s3 + $0x18] sm:$0xff]  ;;  %v2862_v59 = vld [vmem:[%s8819_s3 + $0x100] sm:$0xff]  ;;  %v2832_v51 = vld [vmem:[%s8819_s3 + $0x10] sm:$0xff] }
 0x232   : > { %3111 = vmatmul.mubr.f32.gmra.mxu0 %v7911_v11  ;;  %5897 = vmatmul.mubr.f32.gmra.mxu1 %v2933_v27  ;;  %v1969_v31 = vpop.f32.mrf.mxu1  ;;  %v8851_v2 = vld [vmem:[#allocation6_spill] sm:$0xff]  ;;  %v8852_v27 = vld [vmem:[#allocation16_spill] sm:$0xff] }
 0x233   : > { %3115 = vmatprep.mubr.f32.mxu0 %v7804_v37  ;;  %3507 = vmatprep.subr.mxu1 %v7812_v41  ;;  %v7924_v58 = vmul.f32 %v2537_v24, %v2378_v12  ;;  %v2343_v1 = vadd.f32 %v7704_v10, %v2300_v7  ;;  %v2215_v28 = vadd.f32 %v5821_v6, %v1969_v31  ;;  %v7985_v31 = vld [vmem:[#allocation3 + $0x7a] sm:$0xff] }
 0x234   : > { %5949 = vmatpush3.msra.mxu0 %v2866_v36  ;;  %3508 = vmatpush1.msra.mxu1 %v2837_v21  ;;  %v1971_v37 = vpop.f32.mrf.mxu1  ;;  %v2934_v26 = vld [vmem:[#allocation3 + $0xa4] sm:$0xff]  ;;  %v2552_v21 = vpop.permute.xlu0 %2551  ;;  %v2830_v54 = vld [vmem:[%s8819_s3] sm:$0xff] }
 0x235   : > { %5950 = vmatprep.subr.mxu0 %v2865_v35  ;;  %3509 = vmatprep.subr.mxu1 %v7812_v41  ;;  %2707 = vst [vmem:[#allocation3 + $0xbb] sm:$0xff] %v7924_v58  ;;  %v2379_v40 = vmax.f32 %v2343_v1, 0.0  ;;  %v2301_v22 = vadd.f32 %v2215_v28, %v8847_v14  ;;  %v5830_v28 = vpop.f32.mrf.mxu0 }
 0x236   : > { %3116 = vmatmul.mubr.f32.gmra.mxu0 %v7927_v50  ;;  %5899 = vmatprep.mubr.f32.mxu1 %v2934_v26  ;;  %v1974_v6 = vpop.f32.mrf.mxu1 }
 0x237   : > { %3120 = vmatprep.mubr.f32.mxu0 %v7794_v33  ;;  %3510 = vmatpush1.msra.mxu1 %v2836_v3  ;;  %v7945_v0 = vmul.f32 %v2542_v47, %v2379_v40  ;;  %v2344_v13 = vadd.f32 %v7704_v10, %v2301_v22  ;;  %v2220_v4 = vadd.f32 %v2219_v29, %v1974_v6  ;;  %v2831_v3 = vld [vmem:[%s8819_s3 + $0x8] sm:$0xff]  ;;  %v2557_v29 = vpop.permute.xlu1 %2556 }
 0x238   : > { %5951 = vmatpush3.msra.mxu0 %v2865_v35  ;;  %3511 = vmatprep.subr.mxu1 %v7812_v41  ;;  %v1976_v33 = vpop.f32.mrf.mxu1  ;;  %v2935_v23 = vld [vmem:[#allocation3 + $0xac] sm:$0xff]  ;;  %v8853_v6 = vld [vmem:[#allocation15_spill] sm:$0xff] }
 0x239   : > { %5952 = vmatprep.subr.mxu0 %v2864_v56  ;;  %3512 = vmatpush1.msra.mxu1 %v2835_v57  ;;  %2708 = vst [vmem:[#allocation3 + $0xc3] sm:$0xff] %v7945_v0  ;;  %v2380_v19 = vmax.f32 %v2344_v13, 0.0  ;;  %v2302_v55 = vadd.f32 %v2220_v4, %v1573_v63  ;;  %v7998_v57 = vld [vmem:[#allocation3 + $0x82] sm:$0xff]  ;;  %v2239_v63 = vpop.f32.mrf.mxu0  ;;  %v2861_v4 = vld [vmem:[%s8819_s3 + $0xf8] sm:$0xff]  ;;  %v2562_v33 = vpop.permute.xlu0 %2561 }
 0x23a   : > { %3121 = vmatmul.mubr.f32.gmra.mxu0 %v7948_v20  ;;  %5900 = vmatmul.mubr.f32.gmra.mxu1 %v2935_v23  ;;  %v1979_v48 = vpop.f32.mrf.mxu1 }
 0x23b   : > { %3125 = vmatprep.mubr.f32.mxu0 %v7828_v25  ;;  %3513 = vmatprep.subr.mxu1 %v7812_v41  ;;  %v7961_v60 = vmul.f32 %v2547_v53, %v2380_v19  ;;  %v2345_v36 = vadd.f32 %v7704_v10, %v2302_v55  ;;  %v2225_v18 = vadd.f32 %v5824_v17, %v1979_v48  ;;  %v8017_v48 = vld [vmem:[#allocation3 + $0x8a] sm:$0xff] }
 0x23c   : > { %5953 = vmatpush3.msra.mxu0 %v2864_v56  ;;  %3514 = vmatpush1.msra.mxu1 %v2834_v38  ;;  %v1981_v25 = vpop.f32.mrf.mxu1  ;;  %v2936_v16 = vld [vmem:[#allocation3 + $0xb4] sm:$0xff]  ;;  %v1583_v17 = vadd.f32 %v8852_v27, %v8851_v2  ;;  %v2859_v2 = vld [vmem:[%s8819_s3 + $0xe8] sm:$0xff] }
 0x23d   : > { %5954 = vmatprep.subr.mxu0 %v2863_v42  ;;  %3515 = vmatprep.subr.mxu1 %v7812_v41  ;;  %2709 = vst [vmem:[#allocation3 + $0xcb] sm:$0xff] %v7961_v60  ;;  %v2381_v34 = vmax.f32 %v2345_v36, 0.0  ;;  %v2303_v62 = vadd.f32 %v2225_v18, %v8850_v15  ;;  %v8855_v38 = vld [vmem:[#allocation18_spill] sm:$0xff]  ;;  %v5833_v18 = vpop.f32.mrf.mxu0 }
 0x23e   : > { %3126 = vmatmul.mubr.f32.gmra.mxu0 %v7964_v5  ;;  %5902 = vmatprep.mubr.f32.mxu1 %v2936_v16  ;;  %v1984_v35 = vpop.f32.mrf.mxu1 }
 0x23f   : > { %3130 = vmatprep.mubr.f32.mxu0 %v7816_v30  ;;  %3516 = vmatpush1.msra.mxu1 %v2833_v32  ;;  %v7982_v12 = vmul.f32 %v2552_v21, %v2381_v34  ;;  %v2346_v7 = vadd.f32 %v7704_v10, %v2303_v62  ;;  %v2230_v24 = vadd.f32 %v2229_v46, %v1984_v35  ;;  %v2860_v32 = vld [vmem:[%s8819_s3 + $0xf0] sm:$0xff]  ;;  %v2567_v46 = vpop.permute.xlu1 %2566  ;;  %v8856_v35 = vld [vmem:[#allocation17_spill] sm:$0xff] }
 0x240   : > { %5955 = vmatpush3.msra.mxu0 %v2863_v42  ;;  %3517 = vmatprep.subr.mxu1 %v7812_v41  ;;  %v1986_v30 = vpop.f32.mrf.mxu1  ;;  %v2937_v1 = vld [vmem:[#allocation3 + $0xbc] sm:$0xff] }
 0x241   : > { %5956 = vmatprep.subr.mxu0 %v2862_v59  ;;  %3518 = vmatpush1.msra.mxu1 %v2832_v51  ;;  %2710 = vst [vmem:[#allocation3 + $0xd3] sm:$0xff] %v7982_v12  ;;  %v2382_v37 = vmax.f32 %v2346_v7, 0.0  ;;  %v2304_v26 = vadd.f32 %v2230_v24, %v1583_v17  ;;  %v8030_v51 = vld [vmem:[#allocation3 + $0x92] sm:$0xff]  ;;  %v2249_v17 = vpop.f32.mrf.mxu0  ;;  %v2572_v30 = vpop.permute.xlu0 %2571 }
 0x242   : > { %3131 = vmatmul.mubr.f32.gmra.mxu0 %v7985_v31  ;;  %5903 = vmatmul.mubr.f32.gmra.mxu1 %v2937_v1  ;;  %v1989_v56 = vpop.f32.mrf.mxu1  ;;  %v2858_v24 = vld [vmem:[%s8819_s3 + $0xe0] sm:$0xff] }
 0x243   : > { %3135 = vmatprep.mubr.f32.mxu0 %v7842_v45  ;;  %3519 = vmatprep.subr.mxu1 %v7812_v41  ;;  %v7995_v40 = vmul.f32 %v2557_v29, %v2382_v37  ;;  %v2347_v14 = vadd.f32 %v7704_v10, %v2304_v26  ;;  %v2235_v22 = vadd.f32 %v5827_v9, %v1989_v56  ;;  %v8854_v9 = vld [vmem:[#allocation7_spill] sm:$0xff] }
 0x244   : > { %5957 = vmatpush3.msra.mxu0 %v2862_v59  ;;  %3520 = vmatpush1.msra.mxu1 %v2831_v3  ;;  %v1991_v45 = vpop.f32.mrf.mxu1  ;;  %v2938_v44 = vld [vmem:[#allocation3 + $0xc4] sm:$0xff]  ;;  %v1593_v42 = vadd.f32 %v8855_v38, %v8854_v9 }
 0x245   : > { %4138 = vmatprep.subr.mxu0 %v7812_v41  ;;  %3521 = vmatprep.subr.mxu1 %v7812_v41  ;;  %2711 = vst [vmem:[#allocation3 + $0xdb] sm:$0xff] %v7995_v40  ;;  %v2383_v47 = vmax.f32 %v2347_v14, 0.0  ;;  %v2305_v13 = vadd.f32 %v2235_v22, %v8853_v6  ;;  %v8858_v3 = vld [vmem:[#allocation20_spill] sm:$0xff]  ;;  %v8048_v14 = vld [vmem:[#allocation3 + $0x9a] sm:$0xff]  ;;  %v2857_v45 = vld [vmem:[%s8819_s3 + $0xd8] sm:$0xff] }
 0x246   : > { %3136 = vmatmul.mubr.f32.gmra.mxu0 %v7998_v57  ;;  %5905 = vmatprep.mubr.f32.mxu1 %v2938_v44  ;;  %v1994_v23 = vpop.f32.mrf.mxu1 }
 0x247   : > { %3140 = vmatprep.mubr.f32.mxu0 %v7837_v39  ;;  %3522 = vmatpush1.msra.mxu1 %v2830_v54  ;;  %v8014_v19 = vmul.f32 %v2562_v33, %v2383_v47  ;;  %v2348_v55 = vadd.f32 %v7704_v10, %v2305_v13  ;;  %v2240_v53 = vadd.f32 %v2239_v63, %v1994_v23  ;;  %v5836_v54 = vpop.f32.mrf.mxu0  ;;  %v8063_v13 = vld [vmem:[%s8818_s2] ss:$0 sm:$0xff]  ;;  %v8066_v23 = vld [vmem:[#allocation3 + $0xa2] sm:$0xff] }
 0x248   : > { %3523 = vmatprep.subr.mxu1 %v7812_v41  ;;  %v1996_v39 = vpop.f32.mrf.mxu1  ;;  %v2939_v36 = vld [vmem:[#allocation3 + $0xcc] sm:$0xff] }
 0x249   : > { %3524 = vmatpush2.msra.mxu1 %v2861_v4  ;;  %2712 = vst [vmem:[#allocation3 + $0xe3] sm:$0xff] %v8014_v19  ;;  %v2384_v25 = vmax.f32 %v2348_v55, 0.0  ;;  %v2306_v16 = vadd.f32 %v2240_v53, %v1593_v42  ;;  %v2259_v42 = vpop.f32.mrf.mxu0  ;;  %v8859_v53 = vld [vmem:[#allocation19_spill] sm:$0xff] }
 0x24a   : > { %3141 = vmatmul.mubr.f32.gmra.mxu0 %v8017_v48  ;;  %5906 = vmatmul.mubr.f32.gmra.mxu1 %v2939_v36  ;;  %v1999_v59 = vpop.f32.mrf.mxu1  ;;  %v2855_v36 = vld [vmem:[%s8819_s3 + $0xc8] sm:$0xff] }
 0x24b   : > { %3145 = vmatprep.mubr.f32.mxu0 %v7859_v61  ;;  %3525 = vmatprep.subr.mxu1 %v7812_v41  ;;  %v8027_v34 = vmul.f32 %v2567_v46, %v2384_v25  ;;  %v2349_v15 = vadd.f32 %v7704_v10, %v2306_v16  ;;  %v2245_v62 = vadd.f32 %v5830_v28, %v1999_v59  ;;  %v8857_v28 = vld [vmem:[#allocation8_spill] sm:$0xff]  ;;  %v8860_v25 = vld [vmem:[#allocation9_spill] sm:$0xff]  ;;  %v8861_v16 = vld [vmem:[#allocation22_spill] sm:$0xff] }
 0x24c   : > { %3526 = vmatpush2.msra.mxu1 %v2860_v32  ;;  %v2001_v27 = vpop.f32.mrf.mxu1  ;;  %v2940_v61 = vld [vmem:[#allocation3 + $0xd4] sm:$0xff]  ;;  %v1603_v37 = vadd.f32 %v8858_v3, %v8857_v28  ;;  %v1613_v46 = vadd.f32 %v8861_v16, %v8860_v25 }
 0x24d   : > { %3527 = vmatprep.subr.mxu1 %v7812_v41  ;;  %2713 = vst [vmem:[#allocation3 + $0xeb] sm:$0xff] %v8027_v34  ;;  %v2385_v21 = vmax.f32 %v2349_v15, 0.0  ;;  %v2307_v7 = vadd.f32 %v2245_v62, %v8856_v35  ;;  %5908 = vmatprep.mubr.f32.mxu1 %v2940_v61  ;;  %v5839_v61 = vpop.f32.mrf.mxu0  ;;  %v8097_v3 = vld [vmem:[#allocation3 + $0xb2] sm:$0xff] }
 0x24e   : > { %3146 = vmatmul.mubr.f32.gmra.mxu0 %v8030_v51  ;;  %v2004_v1 = vpop.f32.mrf.mxu1  ;;  %3528 = vmatpush2.msra.mxu1 %v2859_v2  ;;  %v8084_v2 = vld [vmem:[#allocation3 + $0xaa] sm:$0xff] }
 0x24f   : > { %3150 = vmatprep.mubr.f32.mxu0 %v7863_v8  ;;  %v8045_v26 = vmul.f32 %v2572_v30, %v2385_v21  ;;  %v2350_v29 = vadd.f32 %v7704_v10, %v2307_v7  ;;  %v2250_v56 = vadd.f32 %v2249_v17, %v2004_v1  ;;  %3529 = vmatprep.subr.mxu1 %v7812_v41  ;;  %v2577_v10 = vpop.permute.xlu1 %2576  ;;  %v2854_v17 = vld [vmem:[%s8819_s3 + $0xc0] sm:$0xff] }
 0x250   : > { %v2006_v8 = vpop.f32.mrf.mxu1  ;;  %v2941_v22 = vld [vmem:[#allocation3 + $0xdc] sm:$0xff]  ;;  %3530 = vmatpush2.msra.mxu1 %v2858_v24 }
 0x251   : > { %2714 = vst [vmem:[#allocation3 + $0xf3] sm:$0xff] %v8045_v26  ;;  %v2386_v44 = vmax.f32 %v2350_v29, 0.0  ;;  %v2308_v63 = vadd.f32 %v2250_v56, %v1603_v37  ;;  %5909 = vmatmul.mubr.f32.gmra.mxu1 %v2941_v22  ;;  %3531 = vmatprep.subr.mxu1 %v7812_v41  ;;  %v2853_v37 = vld [vmem:[%s8819_s3 + $0xb8] sm:$0xff]  ;;  %v2269_v56 = vpop.f32.mrf.mxu0 }
 0x252   : > { %3151 = vmatmul.mubr.f32.gmra.mxu0 %v8048_v14  ;;  %v2009_v47 = vpop.f32.mrf.mxu1  ;;  %3532 = vmatpush2.msra.mxu1 %v2857_v45  ;;  %v8862_v22 = vld [vmem:[#allocation21_spill] sm:$0xff] }
 0x253   : > { %3155 = vmatprep.mubr.f32.mxu0 %v7878_v49  ;;  %v8058_v6 = vmul.f32 %v2577_v10, %v2386_v44  ;;  %v2351_v4 = vadd.f32 %v8063_v13, %v2308_v63  ;;  %v2255_v33 = vadd.f32 %v5833_v18, %v2009_v47  ;;  %v2856_v49 = vld [vmem:[%s8819_s3 + $0xd0] sm:$0xff]  ;;  %3533 = vmatprep.subr.mxu1 %v7812_v41  ;;  %v2582_v18 = vpop.permute.xlu0 %2581  ;;  %v2587_v7 = vpop.permute.xlu1 %2586  ;;  %v8863_v10 = vld [vmem:[#allocation10_spill] sm:$0xff] }
 0x254   : > { %v2011_v9 = vpop.f32.mrf.mxu1  ;;  %v2942_v38 = vld [vmem:[#allocation3 + $0xe4] sm:$0xff]  ;;  %3534 = vmatpush2.msra.mxu1 %v2856_v49 }
 0x255   : > { %2715 = vst [vmem:[#allocation3 + $0xfb] sm:$0xff] %v8058_v6  ;;  %v2387_v55 = vmax.f32 %v2351_v4, 0.0  ;;  %v2309_v39 = vadd.f32 %v2255_v33, %v8859_v53  ;;  %5911 = vmatprep.mubr.f32.mxu1 %v2942_v38  ;;  %3535 = vmatprep.subr.mxu1 %v7812_v41  ;;  %v8864_v47 = vld [vmem:[#allocation24_spill] sm:$0xff]  ;;  %v8115_v38 = vld [vmem:[#allocation3 + $0xba] sm:$0xff] }
 0x256   : > { %3156 = vmatmul.mubr.f32.gmra.mxu0 %v8066_v23  ;;  %v2014_v32 = vpop.f32.mrf.mxu1  ;;  %3536 = vmatpush2.msra.mxu1 %v2855_v36  ;;  %v1623_v4 = vadd.f32 %v8864_v47, %v8863_v10  ;;  %v8180_v10 = vld [vmem:[#allocation3 + $0xea] sm:$0xff] }
 0x257   : > { %3160 = vmatprep.mubr.f32.mxu0 %v7890_v43  ;;  %v8081_v59 = vmul.f32 %v2582_v18, %v2387_v55  ;;  %v2352_v15 = vadd.f32 %v8063_v13, %v2309_v39  ;;  %v2260_v62 = vadd.f32 %v2259_v42, %v2014_v32  ;;  %3537 = vmatprep.subr.mxu1 %v7812_v41  ;;  %v2592_v44 = vpop.permute.xlu0 %2591  ;;  %v2851_v55 = vld [vmem:[%s8819_s3 + $0xa8] sm:$0xff]  ;;  %v2597_v36 = vpop.permute.xlu1 %2596  ;;  %v2759_v47 = vld [vmem:[#allocation3 + $0x9] sm:$0xff] }
 0x258   : > { %v2016_v43 = vpop.f32.mrf.mxu1  ;;  %v2943_v27 = vld [vmem:[#allocation3 + $0xec] sm:$0xff]  ;;  %3538 = vmatpush2.msra.mxu1 %v2854_v17 }
 0x259   : > { %2716 = vst [vmem:[#allocation3 + $0x103] sm:$0xff] %v8081_v59  ;;  %v2388_v21 = vmax.f32 %v2352_v15, 0.0  ;;  %v2310_v35 = vadd.f32 %v2260_v62, %v1613_v46  ;;  %5912 = vmatmul.mubr.f32.gmra.mxu1 %v2943_v27  ;;  %3539 = vmatprep.subr.mxu1 %v7812_v41  ;;  %v8128_v46 = vld [vmem:[#allocation3 + $0xc2] sm:$0xff]  ;;  %v2850_v15 = vld [vmem:[%s8819_s3 + $0xa0] sm:$0xff] }
 0x25a   : > { %3161 = vmatmul.mubr.f32.gmra.mxu0 %v8084_v2  ;;  %v2019_v24 = vpop.f32.mrf.mxu1  ;;  %3540 = vmatpush2.msra.mxu1 %v2853_v37  ;;  %v8865_v27 = vld [vmem:[#allocation23_spill] sm:$0xff] }
 0x25b   : > { %3165 = vmatprep.mubr.f32.mxu0 %v7908_v52  ;;  %v8094_v30 = vmul.f32 %v2587_v7, %v2388_v21  ;;  %v2353_v1 = vadd.f32 %v8063_v13, %v2310_v35  ;;  %v2265_v28 = vadd.f32 %v5836_v54, %v2019_v24  ;;  %v2852_v54 = vld [vmem:[%s8819_s3 + $0xb0] sm:$0xff]  ;;  %3541 = vmatprep.subr.mxu1 %v7812_v41  ;;  %v2602_v21 = vpop.permute.xlu0 %2601  ;;  %v2607_v37 = vpop.permute.xlu1 %2606 }
 0x25c   : > { %v2021_v29 = vpop.f32.mrf.mxu1  ;;  %v2944_v52 = vld [vmem:[#allocation3 + $0xf4] sm:$0xff]  ;;  %3542 = vmatpush2.msra.mxu1 %v2852_v54  ;;  %v8144_v24 = vld [vmem:[#allocation3 + $0xca] sm:$0xff] }
 0x25d   : > { %2717 = vst [vmem:[#allocation3 + $0x10b] sm:$0xff] %v8094_v30  ;;  %v2389_v8 = vmax.f32 %v2353_v1, 0.0  ;;  %v2311_v45 = vadd.f32 %v2265_v28, %v8862_v22  ;;  %5914 = vmatprep.mubr.f32.mxu1 %v2944_v52  ;;  %3543 = vmatprep.subr.mxu1 %v7812_v41  ;;  %v8156_v29 = vld [vmem:[#allocation3 + $0xd2] sm:$0xff]  ;;  %v2847_v52 = vld [vmem:[%s8819_s3 + $0x88] sm:$0xff] }
 0x25e   : > { %3166 = vmatmul.mubr.f32.gmra.mxu0 %v8097_v3  ;;  %v2024_v63 = vpop.f32.mrf.mxu1  ;;  %3544 = vmatpush2.msra.mxu1 %v2851_v55  ;;  %v5204_v22 = vld [vmem:[%s8819_s3 + $0x478] sm:$0xff] }
 0x25f   : > { %3170 = vmatprep.mubr.f32.mxu0 %v7924_v58  ;;  %v8112_v33 = vmul.f32 %v2592_v44, %v2389_v8  ;;  %v2354_v49 = vadd.f32 %v8063_v13, %v2311_v45  ;;  %v2270_v9 = vadd.f32 %v2269_v56, %v2024_v63  ;;  %3545 = vmatprep.subr.mxu1 %v7812_v41  ;;  %v8168_v8 = vld [vmem:[#allocation3 + $0xda] sm:$0xff] }
 0x260   : > { %v2026_v58 = vpop.f32.mrf.mxu1  ;;  %v2945_v42 = vld [vmem:[#allocation3 + $0xfc] sm:$0xff]  ;;  %3546 = vmatpush2.msra.mxu1 %v2850_v15  ;;  %v2763_v15 = vld [vmem:[#allocation3 + $0x29] sm:$0xff] }
 0x261   : > { %2718 = vst [vmem:[#allocation3 + $0x113] sm:$0xff] %v8112_v33  ;;  %v2390_v53 = vmax.f32 %v2354_v49, 0.0  ;;  %v2312_v39 = vadd.f32 %v2270_v9, %v1623_v4  ;;  %5915 = vmatmul.mubr.f32.gmra.mxu1 %v2945_v42  ;;  %3547 = vmatprep.subr.mxu1 %v7812_v41  ;;  %v2758_v63 = vld [vmem:[#allocation3 + $0x1] sm:$0xff]  ;;  %v8188_v4 = vld [vmem:[#allocation3 + $0xf2] sm:$0xff] }
 0x262   : > { %3171 = vmatmul.mubr.f32.gmra.mxu0 %v8115_v38  ;;  %v2029_v18 = vpop.f32.mrf.mxu1  ;;  %v2760_v49 = vld [vmem:[#allocation3 + $0x11] sm:$0xff]  ;;  %v8199_v9 = vld [vmem:[#allocation3 + $0xfa] sm:$0xff]  ;;  %v8209_v55 = vld [vmem:[#allocation3 + $0x102] sm:$0xff] }
 0x263   : > { %3175 = vmatprep.mubr.f32.mxu0 %v7945_v0  ;;  %v8125_v32 = vmul.f32 %v2597_v36, %v2390_v53  ;;  %v2355_v25 = vadd.f32 %v8063_v13, %v2312_v39  ;;  %v2275_v16 = vadd.f32 %v5839_v61, %v2029_v18  ;;  %v2849_v61 = vld [vmem:[%s8819_s3 + $0x98] sm:$0xff]  ;;  %v2761_v42 = vld [vmem:[#allocation3 + $0x19] sm:$0xff]  ;;  %v2762_v36 = vld [vmem:[#allocation3 + $0x21] sm:$0xff] }
 0x264   : > { %v2946_v0 = vld [vmem:[#allocation3 + $0x104] sm:$0xff]  ;;  %v2031_v62 = vpop.f32.mrf.mxu1  ;;  %3548 = vmatpush2.msra.mxu1 %v2849_v61  ;;  %v5200_v58 = vld [vmem:[%s8819_s3 + $0x458] sm:$0xff]  ;;  %v5197_v39 = vld [vmem:[%s8819_s3 + $0x440] sm:$0xff] }
 0x265   : > { %2719 = vst [vmem:[#allocation3 + $0x11b] sm:$0xff] %v8125_v32  ;;  %v2391_v43 = vmax.f32 %v2355_v25, 0.0  ;;  %v2313_v17 = vadd.f32 %v2275_v16, %v8865_v27  ;;  %5917 = vmatprep.mubr.f32.mxu1 %v2946_v0  ;;  %3549 = vmatprep.subr.mxu1 %v7812_v41  ;;  %v5198_v53 = vld [vmem:[%s8819_s3 + $0x448] sm:$0xff]  ;;  %v8219_v18 = vld [vmem:[#allocation3 + $0x10a] sm:$0xff] }
 0x266   : > { %3176 = vmatmul.mubr.f32.gmra.mxu0 %v8128_v46  ;;  %v5196_v25 = vld [vmem:[%s8819_s3 + $0x438] sm:$0xff]  ;;  %v5195_v16 = vld [vmem:[%s8819_s3 + $0x430] sm:$0xff]  ;;  %v5194_v62 = vld [vmem:[%s8819_s3 + $0x428] sm:$0xff] }
 0x267   : > { %3180 = vmatprep.mubr.f32.mxu0 %v7961_v60  ;;  %v8141_v35 = vmul.f32 %v2602_v21, %v2391_v43  ;;  %v2356_v7 = vadd.f32 %v8063_v13, %v2313_v17  ;;  %v2848_v60 = vld [vmem:[%s8819_s3 + $0x90] sm:$0xff]  ;;  %v5193_v43 = vld [vmem:[%s8819_s3 + $0x420] sm:$0xff]  ;;  %v5192_v61 = vld [vmem:[%s8819_s3 + $0x418] sm:$0xff] }
 0x268   : > { %v2947_v1 = vld [vmem:[#allocation3 + $0x10c] sm:$0xff]  ;;  %3550 = vmatpush2.msra.mxu1 %v2848_v60  ;;  %v5190_v60 = vld [vmem:[%s8819_s3 + $0x408] sm:$0xff] }
 0x269   : > { %2720 = vst [vmem:[#allocation3 + $0x123] sm:$0xff] %v8141_v35  ;;  %v2392_v28 = vmax.f32 %v2356_v7, 0.0  ;;  %5918 = vmatmul.mubr.f32.gmra.mxu1 %v2947_v1  ;;  %3551 = vmatprep.subr.mxu1 %v7812_v41  ;;  %v8229_v0 = vld [vmem:[#allocation3 + $0x112] sm:$0xff]  ;;  %v5191_v21 = vld [vmem:[%s8819_s3 + $0x410] sm:$0xff] }
 0x26a   : > { %3181 = vmatmul.mubr.f32.gmra.mxu0 %v8144_v24  ;;  %3552 = vmatpush2.msra.mxu1 %v2847_v52  ;;  %v2764_v27 = vld [vmem:[#allocation3 + $0x31] sm:$0xff]  ;;  %v2765_v7 = vld [vmem:[#allocation3 + $0x39] sm:$0xff]  ;;  %v2794_v52 = vld [vmem:[#allocation3 + $0x2] sm:$0xff] }
 0x26b   : > { %3185 = vmatprep.mubr.f32.mxu0 %v7982_v12  ;;  %v8154_v13 = vmul.f32 %v2607_v37, %v2392_v28  ;;  %v2846_v12 = vld [vmem:[%s8819_s3 + $0x80] sm:$0xff]  ;;  %3553 = vmatprep.subr.mxu1 %v7812_v41  ;;  %v2766_v37 = vld [vmem:[#allocation3 + $0x41] sm:$0xff] }
 0x26c   : > { %v2948_v56 = vld [vmem:[#allocation3 + $0x114] sm:$0xff]  ;;  %3554 = vmatpush2.msra.mxu1 %v2846_v12  ;;  %v2730_v12 = vld [vmem:[#allocation3 + $0x40] sm:$0xff] }
 0x26d   : > { %2721 = vst [vmem:[#allocation3 + $0x12b] sm:$0xff] %v8154_v13  ;;  %5920 = vmatprep.mubr.f32.mxu1 %v2948_v56  ;;  %6012 = vmatprep.subr.mxu1 %v5204_v22  ;;  %v8239_v17 = vld [vmem:[#allocation3 + $0x11a] sm:$0xff] }
 0x26e   : > { %3186 = vmatmul.mubr.f32.gmra.mxu0 %v8156_v29  ;;  %v5189_v28 = vld [vmem:[%s8819_s3 + $0x400] sm:$0xff] }
 0x26f   : > { %3190 = vmatprep.mubr.f32.mxu0 %v7995_v40  ;;  %v8176_v40 = vld [vmem:[#allocation3 + $0xe2] sm:$0xff] }
 0x270   : > { %v2949_v45 = vld [vmem:[#allocation3 + $0x11c] sm:$0xff] }
 0x271   : > { %5921 = vmatmul.mubr.f32.gmra.mxu1 %v2949_v45  ;;  %v2878_v1 = vld [vmem:[#allocation3 + $0x122] sm:$0xff]  ;;  %v5172_v45 = vld [vmem:[%s8819_s3 + $0x378] sm:$0xff] }
 0x272   : > { %3191 = vmatmul.mubr.f32.gmra.mxu0 %v8168_v8 }
 0x273   : > { %3195 = vmatprep.mubr.f32.mxu0 %v8014_v19  ;;  %v5203_v19 = vld [vmem:[%s8819_s3 + $0x470] sm:$0xff] }
 0x274   : > { %v2950_v54 = vld [vmem:[#allocation3 + $0x124] sm:$0xff]  ;;  %v2951_v44 = vld [vmem:[#allocation3 + $0x12c] sm:$0xff] }
 0x275   : > { %5923 = vmatprep.mubr.f32.mxu1 %v2950_v54  ;;  %v2879_v56 = vld [vmem:[#allocation3 + $0x12a] sm:$0xff] }
 0x276   : > { %3196 = vmatmul.mubr.f32.gmra.mxu0 %v8176_v40  ;;  %5924 = vmatmul.mubr.f32.gmra.mxu1 %v2951_v44  ;;  %v5171_v54 = vld [vmem:[%s8819_s3 + $0x370] sm:$0xff]  ;;  %v6119_v44 = vld [vmem:[#allocation3 + $0x12] sm:$0xff] }
 0x277   : > { %3200 = vmatprep.mubr.f32.mxu0 %v8027_v34  ;;  %3555 = vmatprep.mubr.f32.mxu1 %v2758_v63  ;;  %v5202_v34 = vld [vmem:[%s8819_s3 + $0x468] sm:$0xff]  ;;  %v2731_v63 = vld [vmem:[#allocation3 + $0x48] sm:$0xff] }
 0x27a   : > { %3201 = vmatmul.mubr.f32.gmra.mxu0 %v8180_v10  ;;  %3556 = vmatmul.mubr.f32.vlgmr.msra.gmra.mxu1 %v7812_v41 }
 0x27b   : > { %3205 = vmatprep.mubr.f32.mxu0 %v8045_v26  ;;  %3560 = vmatprep.mubr.f32.mxu1 %v2759_v47  ;;  %v5201_v26 = vld [vmem:[%s8819_s3 + $0x460] sm:$0xff] }
 0x27c   : > { %6013 = vmatpush3.msra.mxu1 %v5204_v22  ;;  %v2795_v22 = vld [vmem:[#allocation3 + $0xa] sm:$0xff] }
 0x27d   : > { %6014 = vmatprep.subr.mxu1 %v5203_v19  ;;  %v2768_v47 = vld [vmem:[#allocation3 + $0x51] sm:$0xff] }
 0x27e   : > { %3206 = vmatmul.mubr.f32.gmra.mxu0 %v8188_v4  ;;  %6015 = vmatpush3.msra.mxu1 %v5203_v19  ;;  %v8262_v19 = vld [vmem:[#allocation2] sm:$0xff] }
 0x27f   : > { %3210 = vmatprep.mubr.f32.mxu0 %v8058_v6  ;;  %3561 = vmatmul.mubr.f32.gmra.mxu1 %v7812_v41  ;;  %v2724_v6 = vld [vmem:[#allocation3 + $0x10] sm:$0xff]  ;;  %v5199_v41 = vld [vmem:[%s8819_s3 + $0x450] sm:$0xff] }
 0x280   : > { %6016 = vmatprep.subr.mxu1 %v5202_v34  ;;  %3565 = vmatprep.mubr.f32.mxu1 %v2760_v49  ;;  %v5169_v49 = vld [vmem:[%s8819_s3 + $0x360] sm:$0xff] }
 0x281   : > { %6017 = vmatpush3.msra.mxu1 %v5202_v34  ;;  %v5170_v34 = vld [vmem:[%s8819_s3 + $0x368] sm:$0xff] }
 0x282   : > { %3211 = vmatmul.mubr.f32.gmra.mxu0 %v8199_v9  ;;  %6018 = vmatprep.subr.mxu1 %v5201_v26 }
 0x283   : > { %3215 = vmatprep.mubr.f32.mxu0 %v8081_v59  ;;  %6019 = vmatpush3.msra.mxu1 %v5201_v26  ;;  %v2725_v59 = vld [vmem:[#allocation3 + $0x18] sm:$0xff] }
 0x284   : > { %3566 = vmatmul.mubr.f32.gmra.mxu1 %v2724_v6  ;;  %6020 = vmatprep.subr.mxu1 %v5200_v58  ;;  %v6121_v26 = vld [vmem:[#allocation3 + $0x1a] sm:$0xff]  ;;  %v2732_v6 = vld [vmem:[#allocation3 + $0x50] sm:$0xff] }
 0x285   : > { %3570 = vmatprep.mubr.f32.mxu1 %v2761_v42  ;;  %6021 = vmatpush3.msra.mxu1 %v5200_v58  ;;  %v6122_v58 = vld [vmem:[#allocation3 + $0x22] sm:$0xff]  ;;  %v5168_v42 = vld [vmem:[%s8819_s3 + $0x358] sm:$0xff] }
 0x286   : > { %3216 = vmatmul.mubr.f32.gmra.mxu0 %v8209_v55  ;;  %6022 = vmatprep.subr.mxu1 %v5199_v41 }
 0x287   : > { %3220 = vmatprep.mubr.f32.mxu0 %v8094_v30  ;;  %6023 = vmatpush3.msra.mxu1 %v5199_v41  ;;  %v2726_v30 = vld [vmem:[#allocation3 + $0x20] sm:$0xff] }
 0x288   : > { %3571 = vmatmul.mubr.f32.gmra.mxu1 %v2725_v59  ;;  %6024 = vmatprep.subr.mxu1 %v5198_v53  ;;  %v2769_v41 = vld [vmem:[#allocation3 + $0x59] sm:$0xff]  ;;  %v5167_v59 = vld [vmem:[%s8819_s3 + $0x350] sm:$0xff] }
 0x289   : > { %3575 = vmatprep.mubr.f32.mxu1 %v2762_v36  ;;  %6025 = vmatpush3.msra.mxu1 %v5198_v53  ;;  %v6123_v53 = vld [vmem:[#allocation3 + $0x2a] sm:$0xff]  ;;  %v2733_v36 = vld [vmem:[#allocation3 + $0x58] sm:$0xff] }
 0x28a   : > { %3221 = vmatmul.mubr.f32.gmra.mxu0 %v8219_v18  ;;  %6026 = vmatprep.subr.mxu1 %v5197_v39 }
 0x28b   : > { %3225 = vmatprep.mubr.f32.mxu0 %v8112_v33  ;;  %6027 = vmatpush3.msra.mxu1 %v5197_v39  ;;  %v2727_v33 = vld [vmem:[#allocation3 + $0x28] sm:$0xff]  ;;  %v6124_v39 = vld [vmem:[#allocation3 + $0x32] sm:$0xff] }
 0x28c   : > { %3576 = vmatmul.mubr.f32.gmra.mxu1 %v2726_v30  ;;  %6028 = vmatprep.subr.mxu1 %v5196_v25  ;;  %v5166_v30 = vld [vmem:[%s8819_s3 + $0x348] sm:$0xff] }
 0x28d   : > { %3580 = vmatprep.mubr.f32.mxu1 %v2763_v15  ;;  %6029 = vmatpush3.msra.mxu1 %v5196_v25  ;;  %v2770_v25 = vld [vmem:[#allocation3 + $0x61] sm:$0xff]  ;;  %v5165_v15 = vld [vmem:[%s8819_s3 + $0x340] sm:$0xff] }
 0x28e   : > { %3226 = vmatmul.mubr.f32.gmra.mxu0 %v8229_v0  ;;  %6030 = vmatprep.subr.mxu1 %v5195_v16 }
 0x28f   : > { %3230 = vmatprep.mubr.f32.mxu0 %v8125_v32  ;;  %6031 = vmatpush3.msra.mxu1 %v5195_v16  ;;  %v2728_v32 = vld [vmem:[#allocation3 + $0x30] sm:$0xff]  ;;  %v6125_v16 = vld [vmem:[#allocation3 + $0x3a] sm:$0xff] }
 0x290   : > { %3581 = vmatmul.mubr.f32.gmra.mxu1 %v2727_v33  ;;  %6032 = vmatprep.subr.mxu1 %v5194_v62  ;;  %v2734_v33 = vld [vmem:[#allocation3 + $0x60] sm:$0xff] }
 0x291   : > { %3585 = vmatprep.mubr.f32.mxu1 %v2764_v27  ;;  %6033 = vmatpush3.msra.mxu1 %v5194_v62  ;;  %v6126_v62 = vld [vmem:[#allocation3 + $0x42] sm:$0xff]  ;;  %v5164_v27 = vld [vmem:[%s8819_s3 + $0x338] sm:$0xff] }
 0x292   : > { %3231 = vmatmul.mubr.f32.gmra.mxu0 %v8239_v17  ;;  %6034 = vmatprep.subr.mxu1 %v5193_v43 }
 0x293   : > { %3235 = vmatprep.mubr.f32.mxu0 %v8141_v35  ;;  %6035 = vmatpush3.msra.mxu1 %v5193_v43  ;;  %v2729_v35 = vld [vmem:[#allocation3 + $0x38] sm:$0xff]  ;;  %v2771_v43 = vld [vmem:[#allocation3 + $0x69] sm:$0xff] }
 0x294   : > { %3586 = vmatmul.mubr.f32.gmra.mxu1 %v2728_v32  ;;  %6036 = vmatprep.subr.mxu1 %v5192_v61  ;;  %v5163_v32 = vld [vmem:[%s8819_s3 + $0x330] sm:$0xff] }
 0x295   : > { %3590 = vmatprep.mubr.f32.mxu1 %v2765_v7  ;;  %6037 = vmatpush3.msra.mxu1 %v5192_v61  ;;  %v6127_v61 = vld [vmem:[#allocation3 + $0x4a] sm:$0xff] }
 0x296   : > { %3236 = vmatmul.mubr.f32.gmra.mxu0 %v2878_v1  ;;  %6038 = vmatprep.subr.mxu1 %v5191_v21  ;;  %v2735_v7 = vld [vmem:[#allocation3 + $0x68] sm:$0xff]  ;;  %v2772_v1 = vld [vmem:[#allocation3 + $0x71] sm:$0xff] }
 0x297   : > { %3240 = vmatprep.mubr.f32.mxu0 %v8154_v13  ;;  %6039 = vmatpush3.msra.mxu1 %v5191_v21  ;;  %v2767_v13 = vld [vmem:[#allocation3 + $0x49] sm:$0xff]  ;;  %v6128_v21 = vld [vmem:[#allocation3 + $0x52] sm:$0xff] }
 0x298   : > { %3591 = vmatmul.mubr.f32.gmra.mxu1 %v2729_v35  ;;  %6040 = vmatprep.subr.mxu1 %v5190_v60  ;;  %v5161_v35 = vld [vmem:[%s8819_s3 + $0x320] sm:$0xff] }
 0x299   : > { %3595 = vmatprep.mubr.f32.mxu1 %v2766_v37  ;;  %6041 = vmatpush3.msra.mxu1 %v5190_v60  ;;  %v5162_v60 = vld [vmem:[%s8819_s3 + $0x328] sm:$0xff] }
 0x29a   : > { %3241 = vmatmul.mubr.f32.gmra.mxu0 %v2879_v56  ;;  %6042 = vmatprep.subr.mxu1 %v5189_v28  ;;  %v2773_v37 = vld [vmem:[#allocation3 + $0x79] sm:$0xff]  ;;  %v2774_v56 = vld [vmem:[#allocation3 + $0x81] sm:$0xff] }
 0x29b   : > { %5958 = vmatprep.mubr.f32.mxu0 %v2794_v52  ;;  %6043 = vmatpush3.msra.mxu1 %v5189_v28  ;;  %v2736_v28 = vld [vmem:[#allocation3 + $0x70] sm:$0xff] }
 0x29c   : > { %3596 = vmatmul.mubr.f32.gmra.mxu1 %v2730_v12  ;;  %v5160_v52 = vld [vmem:[%s8819_s3 + $0x318] sm:$0xff]  ;;  %v5158_v12 = vld [vmem:[%s8819_s3 + $0x308] sm:$0xff] }
 0x29d   : > { %3600 = vmatprep.mubr.f32.mxu1 %v2767_v13  ;;  %v5188_v13 = vld [vmem:[%s8819_s3 + $0x3f8] sm:$0xff] }
 0x29e   : > { %5959 = vmatmul.mubr.f32.vlgmr.msra.gmra.mxu0 %v2795_v22  ;;  %v2775_v22 = vld [vmem:[#allocation3 + $0x89] sm:$0xff] }
 0x29f   : > { %5961 = vmatprep.mubr.f32.mxu0 %v6119_v44  ;;  %4139 = vmatpush1.msra.mxu0 %v5172_v45  ;;  %v2776_v45 = vld [vmem:[#allocation3 + $0x91] sm:$0xff]  ;;  %v2777_v44 = vld [vmem:[#allocation3 + $0x99] sm:$0xff] }
 0x2a0   : > { %3601 = vmatmul.mubr.f32.gmra.mxu1 %v2731_v63  ;;  %4140 = vmatprep.subr.mxu0 %v8262_v19  ;;  %v5184_v63 = vld [vmem:[%s8819_s3 + $0x3d8] sm:$0xff] }
 0x2a1   : > { %3605 = vmatprep.mubr.f32.mxu1 %v2768_v47  ;;  %4141 = vmatpush1.msra.mxu0 %v5171_v54  ;;  %v5186_v54 = vld [vmem:[%s8819_s3 + $0x3e8] sm:$0xff] }
 0x2a2   : > { %5962 = vmatmul.mubr.f32.gmra.mxu0 %v6121_v26  ;;  %4142 = vmatprep.subr.mxu0 %v8262_v19  ;;  %v2778_v47 = vld [vmem:[#allocation3 + $0xa1] sm:$0xff]  ;;  %v2779_v26 = vld [vmem:[#allocation3 + $0xa9] sm:$0xff] }
 0x2a3   : > { %5964 = vmatprep.mubr.f32.mxu0 %v6122_v58  ;;  %4143 = vmatpush1.msra.mxu0 %v5170_v34  ;;  %v5182_v34 = vld [vmem:[%s8819_s3 + $0x3c8] sm:$0xff] }
 0x2a4   : > { %3606 = vmatmul.mubr.f32.gmra.mxu1 %v2732_v6  ;;  %4144 = vmatprep.subr.mxu0 %v8262_v19  ;;  %v2743_v6 = vld [vmem:[#allocation3 + $0xa8] sm:$0xff] }
 0x2a5   : > { %3610 = vmatprep.mubr.f32.mxu1 %v2769_v41  ;;  %4145 = vmatpush1.msra.mxu0 %v5169_v49  ;;  %v5180_v49 = vld [vmem:[%s8819_s3 + $0x3b8] sm:$0xff] }
 0x2a6   : > { %5965 = vmatmul.mubr.f32.gmra.mxu0 %v6123_v53  ;;  %4146 = vmatprep.subr.mxu0 %v8262_v19  ;;  %v2780_v41 = vld [vmem:[#allocation3 + $0xb1] sm:$0xff] }
 0x2a7   : > { %5967 = vmatprep.mubr.f32.mxu0 %v6124_v39  ;;  %4147 = vmatpush1.msra.mxu0 %v5168_v42  ;;  %v5178_v42 = vld [vmem:[%s8819_s3 + $0x3a8] sm:$0xff] }
 0x2a8   : > { %3611 = vmatmul.mubr.f32.gmra.mxu1 %v2733_v36  ;;  %4148 = vmatprep.subr.mxu0 %v8262_v19  ;;  %v2744_v36 = vld [vmem:[#allocation3 + $0xb0] sm:$0xff] }
 0x2a9   : > { %3615 = vmatprep.mubr.f32.mxu1 %v2770_v25  ;;  %4149 = vmatpush1.msra.mxu0 %v5167_v59 }
 0x2aa   : > { %5968 = vmatmul.mubr.f32.gmra.mxu0 %v6125_v16  ;;  %4150 = vmatprep.subr.mxu0 %v8262_v19  ;;  %v2781_v16 = vld [vmem:[#allocation3 + $0xb9] sm:$0xff] }
 0x2ab   : > { %5970 = vmatprep.mubr.f32.mxu0 %v6126_v62  ;;  %4151 = vmatpush1.msra.mxu0 %v5166_v30 }
 0x2ac   : > { %3616 = vmatmul.mubr.f32.gmra.mxu1 %v2734_v33  ;;  %4152 = vmatprep.subr.mxu0 %v8262_v19 }
 0x2ad   : > { %3620 = vmatprep.mubr.f32.mxu1 %v2771_v43  ;;  %4153 = vmatpush1.msra.mxu0 %v5165_v15  ;;  %v2745_v43 = vld [vmem:[#allocation3 + $0xb8] sm:$0xff] }
 0x2ae   : > { %5971 = vmatmul.mubr.f32.gmra.mxu0 %v6127_v61  ;;  %4154 = vmatprep.subr.mxu0 %v8262_v19 }
 0x2af   : > { %5973 = vmatprep.mubr.f32.mxu0 %v6128_v21  ;;  %4155 = vmatpush1.msra.mxu0 %v5164_v27 }
 0x2b0   : > { %3621 = vmatmul.mubr.f32.gmra.mxu1 %v2735_v7  ;;  %4156 = vmatprep.subr.mxu0 %v8262_v19 }
 0x2b1   : > { %3625 = vmatprep.mubr.f32.mxu1 %v2772_v1  ;;  %4157 = vmatpush1.msra.mxu0 %v5163_v32  ;;  %v2782_v32 = vld [vmem:[#allocation3 + $0xc1] sm:$0xff] }
 0x2b2   : > { %5974 = vmatmul.mubr.f32.gmra.mxu0 %v7911_v11  ;;  %4158 = vmatprep.subr.mxu0 %v8262_v19  ;;  %v5159_v11 = vld [vmem:[%s8819_s3 + $0x310] sm:$0xff] }
 0x2b3   : > { %5976 = vmatprep.mubr.f32.mxu0 %v7927_v50  ;;  %4159 = vmatpush1.msra.mxu0 %v5162_v60  ;;  %v2737_v50 = vld [vmem:[#allocation3 + $0x78] sm:$0xff] }
 0x2b4   : > { %3626 = vmatmul.mubr.f32.gmra.mxu1 %v2736_v28  ;;  %4160 = vmatprep.subr.mxu0 %v8262_v19 }
 0x2b5   : > { %3630 = vmatprep.mubr.f32.mxu1 %v2773_v37  ;;  %4161 = vmatpush1.msra.mxu0 %v5161_v35  ;;  %v2746_v35 = vld [vmem:[#allocation3 + $0xc0] sm:$0xff]  ;;  %v2783_v37 = vld [vmem:[#allocation3 + $0xc9] sm:$0xff] }
 0x2b6   : > { %5977 = vmatmul.mubr.f32.gmra.mxu0 %v7948_v20  ;;  %4162 = vmatprep.subr.mxu0 %v8262_v19  ;;  %v5157_v20 = vld [vmem:[%s8819_s3 + $0x300] sm:$0xff] }
 0x2b7   : > { %5979 = vmatprep.mubr.f32.mxu0 %v7964_v5  ;;  %4163 = vmatpush1.msra.mxu0 %v5160_v52  ;;  %v2738_v5 = vld [vmem:[#allocation3 + $0x80] sm:$0xff] }
 0x2b8   : > { %3631 = vmatmul.mubr.f32.gmra.mxu1 %v2737_v50  ;;  %4164 = vmatprep.subr.mxu0 %v8262_v19  ;;  %v2747_v50 = vld [vmem:[#allocation3 + $0xc8] sm:$0xff] }
 0x2b9   : > { %3635 = vmatprep.mubr.f32.mxu1 %v2774_v56  ;;  %4165 = vmatpush1.msra.mxu0 %v5159_v11 }
 0x2ba   : > { %5980 = vmatmul.mubr.f32.gmra.mxu0 %v7985_v31  ;;  %4166 = vmatprep.subr.mxu0 %v8262_v19  ;;  %v5187_v31 = vld [vmem:[%s8819_s3 + $0x3f0] sm:$0xff] }
 0x2bb   : > { %5982 = vmatprep.mubr.f32.mxu0 %v7998_v57  ;;  %4167 = vmatpush1.msra.mxu0 %v5158_v12  ;;  %v2739_v57 = vld [vmem:[#allocation3 + $0x88] sm:$0xff] }
 0x2bc   : > { %3636 = vmatmul.mubr.f32.gmra.mxu1 %v2738_v5  ;;  %4168 = vmatprep.subr.mxu0 %v8262_v19 }
 0x2bd   : > { %3640 = vmatprep.mubr.f32.mxu1 %v2775_v22  ;;  %4169 = vmatpush1.msra.mxu0 %v5157_v20  ;;  %v2748_v22 = vld [vmem:[#allocation3 + $0xd0] sm:$0xff] }
 0x2be   : > { %5983 = vmatmul.mubr.f32.gmra.mxu0 %v8017_v48  ;;  %4170 = vmatprep.subr.mxu0 %v8262_v19  ;;  %v5185_v48 = vld [vmem:[%s8819_s3 + $0x3e0] sm:$0xff] }
 0x2bf   : > { %5985 = vmatprep.mubr.f32.mxu0 %v8030_v51  ;;  %4171 = vmatpush2.msra.mxu0 %v5188_v13  ;;  %v2740_v51 = vld [vmem:[#allocation3 + $0x90] sm:$0xff] }
 0x2c0   : > { %3641 = vmatmul.mubr.f32.gmra.mxu1 %v2739_v57  ;;  %4172 = vmatprep.subr.mxu0 %v8262_v19 }
 0x2c1   : > { %3645 = vmatprep.mubr.f32.mxu1 %v2776_v45  ;;  %4173 = vmatpush2.msra.mxu0 %v5187_v31  ;;  %v4018_v45 = vld [vmem:[#allocation3 + $0x2d] sm:$0xff] }
 0x2c2   : > { %5986 = vmatmul.mubr.f32.gmra.mxu0 %v8048_v14  ;;  %4174 = vmatprep.subr.mxu0 %v8262_v19  ;;  %v5183_v14 = vld [vmem:[%s8819_s3 + $0x3d0] sm:$0xff] }
 0x2c3   : > { %5988 = vmatprep.mubr.f32.mxu0 %v8066_v23  ;;  %4175 = vmatpush2.msra.mxu0 %v5186_v54  ;;  %v2741_v23 = vld [vmem:[#allocation3 + $0x98] sm:$0xff] }
 0x2c4   : > { %3646 = vmatmul.mubr.f32.gmra.mxu1 %v2740_v51  ;;  %4176 = vmatprep.subr.mxu0 %v8262_v19 }
 0x2c5   : > { %3650 = vmatprep.mubr.f32.mxu1 %v2777_v44  ;;  %4177 = vmatpush2.msra.mxu0 %v5185_v48  ;;  %v2749_v48 = vld [vmem:[#allocation3 + $0xd8] sm:$0xff] }
 0x2c6   : > { %5989 = vmatmul.mubr.f32.gmra.mxu0 %v8084_v2  ;;  %4178 = vmatprep.subr.mxu0 %v8262_v19  ;;  %v5181_v2 = vld [vmem:[%s8819_s3 + $0x3c0] sm:$0xff] }
 0x2c7   : > { %5991 = vmatprep.mubr.f32.mxu0 %v8097_v3  ;;  %4179 = vmatpush2.msra.mxu0 %v5184_v63  ;;  %v2742_v3 = vld [vmem:[#allocation3 + $0xa0] sm:$0xff]  ;;  %v3982_v63 = vld [vmem:[#allocation3 + $0x2c] sm:$0xff] }
 0x2c8   : > { %3651 = vmatmul.mubr.f32.gmra.mxu1 %v2741_v23  ;;  %4180 = vmatprep.subr.mxu0 %v8262_v19  ;;  %v4019_v23 = vld [vmem:[#allocation3 + $0x35] sm:$0xff] }
 0x2c9   : > { %3655 = vmatprep.mubr.f32.mxu1 %v2778_v47  ;;  %4181 = vmatpush2.msra.mxu0 %v5183_v14 }
 0x2ca   : > { %5992 = vmatmul.mubr.f32.gmra.mxu0 %v8115_v38  ;;  %4182 = vmatprep.subr.mxu0 %v8262_v19 }
 0x2cb   : > { %5994 = vmatprep.mubr.f32.mxu0 %v8128_v46  ;;  %4183 = vmatpush2.msra.mxu0 %v5182_v34  ;;  %v5179_v46 = vld [vmem:[%s8819_s3 + $0x3b0] sm:$0xff]  ;;  %v2750_v34 = vld [vmem:[#allocation3 + $0xe0] sm:$0xff] }
 0x2cc   : > { %3656 = vmatmul.mubr.f32.gmra.mxu1 %v2742_v3  ;;  %4184 = vmatprep.subr.mxu0 %v8262_v19  ;;  %v3067_v38 = vpop.f32.mrf.mxu0  ;;  %v2787_v3 = vld [vmem:[#allocation3 + $0xe9] sm:$0xff] }
 0x2cd   : > { %3660 = vmatprep.mubr.f32.mxu1 %v2779_v26  ;;  %4185 = vmatpush2.msra.mxu0 %v5181_v2 }
 0x2ce   : > { %5995 = vmatmul.mubr.f32.gmra.mxu0 %v8144_v24  ;;  %4186 = vmatprep.subr.mxu0 %v8262_v19  ;;  %v3069_v58 = vpop.f32.mrf.mxu0 }
 0x2cf   : > { %5997 = vmatprep.mubr.f32.mxu0 %v8156_v29  ;;  %4187 = vmatpush2.msra.mxu0 %v5180_v49  ;;  %v5177_v29 = vld [vmem:[%s8819_s3 + $0x3a0] sm:$0xff] }
 0x2d0   : > { %3661 = vmatmul.mubr.f32.gmra.mxu1 %v2743_v6  ;;  %4188 = vmatprep.subr.mxu0 %v8262_v19  ;;  %v5874_v24 = vpop.f32.mrf.mxu1  ;;  %v3072_v53 = vpop.f32.mrf.mxu0  ;;  %v3983_v49 = vld [vmem:[#allocation3 + $0x34] sm:$0xff]  ;;  %v2751_v6 = vld [vmem:[#allocation3 + $0xe8] sm:$0xff] }
 0x2d1   : > { %3665 = vmatprep.mubr.f32.mxu1 %v2780_v41  ;;  %4189 = vmatpush2.msra.mxu0 %v5179_v46  ;;  %v8385_v59 = vadd.f32 %v5874_v24, %v3072_v53  ;;  %v4020_v46 = vld [vmem:[#allocation3 + $0x3d] sm:$0xff] }
 0x2d2   : > { %5998 = vmatmul.mubr.f32.gmra.mxu0 %v8168_v8  ;;  %4190 = vmatprep.subr.mxu0 %v8262_v19  ;;  %v3312_v39 = vpop.f32.mrf.mxu1  ;;  %v3074_v30 = vpop.f32.mrf.mxu0  ;;  %v5176_v8 = vld [vmem:[%s8819_s3 + $0x398] sm:$0xff]  ;;  %v3984_v53 = vld [vmem:[#allocation3 + $0x3c] sm:$0xff] }
 0x2d3   : > { %6000 = vmatprep.mubr.f32.mxu0 %v8176_v40  ;;  %4191 = vmatpush2.msra.mxu0 %v5178_v42  ;;  %v8388_v25 = vadd.f32 %v3312_v39, %v3067_v38  ;;  %v5175_v40 = vld [vmem:[%s8819_s3 + $0x390] sm:$0xff]  ;;  %v2788_v42 = vld [vmem:[#allocation3 + $0xf1] sm:$0xff] }
 0x2d4   : > { %3666 = vmatmul.mubr.f32.gmra.mxu1 %v2744_v36  ;;  %4192 = vmatprep.subr.mxu0 %v8262_v19  ;;  %v5877_v15 = vpop.f32.mrf.mxu1  ;;  %v4021_v39 = vld [vmem:[#allocation3 + $0x45] sm:$0xff]  ;;  %v2752_v30 = vld [vmem:[#allocation3 + $0xf0] sm:$0xff] }
 0x2d5   : > { %3670 = vmatprep.mubr.f32.mxu1 %v2781_v16  ;;  %4193 = vmatpush2.msra.mxu0 %v5177_v29  ;;  %v3077_v62 = vpop.f32.mrf.mxu0 }
 0x2d6   : > { %6001 = vmatmul.mubr.f32.gmra.mxu0 %v8180_v10  ;;  %4194 = vmatprep.subr.mxu0 %v8262_v19  ;;  %v3322_v33 = vpop.f32.mrf.mxu1  ;;  %v5174_v10 = vld [vmem:[%s8819_s3 + $0x388] sm:$0xff] }
 0x2d7   : > { %6003 = vmatprep.mubr.f32.mxu0 %v8188_v4  ;;  %4195 = vmatpush2.msra.mxu0 %v5176_v8  ;;  %v8400_v27 = vadd.f32 %v3322_v33, %v3077_v62  ;;  %v3079_v61 = vpop.f32.mrf.mxu0  ;;  %v5173_v4 = vld [vmem:[%s8819_s3 + $0x380] sm:$0xff]  ;;  %v3985_v62 = vld [vmem:[#allocation3 + $0x44] sm:$0xff]  ;;  %v4022_v33 = vld [vmem:[#allocation3 + $0x4d] sm:$0xff] }
 0x2d8   : > { %3671 = vmatmul.mubr.f32.gmra.mxu1 %v2745_v43  ;;  %4196 = vmatprep.subr.mxu0 %v8262_v19  ;;  %v5880_v21 = vpop.f32.mrf.mxu1  ;;  %v2789_v8 = vld [vmem:[#allocation3 + $0xf9] sm:$0xff] }
 0x2d9   : > { %3675 = vmatprep.mubr.f32.mxu1 %v2782_v32  ;;  %4197 = vmatpush2.msra.mxu0 %v5175_v40  ;;  %v2753_v61 = vld [vmem:[#allocation3 + $0xf8] sm:$0xff] }
 0x2da   : > { %v3082_v7 = vpop.f32.mrf.mxu0  ;;  %6004 = vmatmul.mubr.f32.gmra.mxu0 %v8199_v9  ;;  %4198 = vmatprep.subr.mxu0 %v8262_v19  ;;  %v3332_v60 = vpop.f32.mrf.mxu1 }
 0x2db   : > { %v8411_v1 = vadd.f32 %v5877_v15, %v3082_v7  ;;  %6006 = vmatprep.mubr.f32.mxu0 %v8209_v55  ;;  %4199 = vmatpush2.msra.mxu0 %v5174_v10  ;;  %v2784_v55 = vld [vmem:[#allocation3 + $0xd1] sm:$0xff]  ;;  %v2790_v10 = vld [vmem:[#allocation3 + $0x101] sm:$0xff] }
 0x2dc   : > { %v3084_v28 = vpop.f32.mrf.mxu0  ;;  %3676 = vmatmul.mubr.f32.gmra.mxu1 %v2746_v35  ;;  %4200 = vmatprep.subr.mxu0 %v8262_v19  ;;  %v4017_v19 = vld [vmem:[#allocation3 + $0x25] sm:$0xff] }
 0x2dd   : > { %3680 = vmatprep.mubr.f32.mxu1 %v2783_v37  ;;  %4201 = vmatpush2.msra.mxu0 %v5173_v4  ;;  %v5883_v9 = vpop.f32.mrf.mxu1  ;;  %v3986_v7 = vld [vmem:[#allocation3 + $0x4c] sm:$0xff]  ;;  %v2754_v28 = vld [vmem:[#allocation3 + $0x100] sm:$0xff] }
 0x2de   : > { %v3087_v52 = vpop.f32.mrf.mxu0  ;;  %6007 = vmatmul.mubr.f32.gmra.mxu0 %v8219_v18  ;;  %v2785_v18 = vld [vmem:[#allocation3 + $0xd9] sm:$0xff] }
 0x2df   : > { %v8416_v11 = vadd.f32 %v3332_v60, %v3087_v52  ;;  %6009 = vmatprep.mubr.f32.mxu0 %v8229_v0  ;;  %v3342_v12 = vpop.f32.mrf.mxu1  ;;  %v3981_v0 = vld [vmem:[#allocation3 + $0x24] sm:$0xff]  ;;  %v4023_v60 = vld [vmem:[#allocation3 + $0x55] sm:$0xff] }
 0x2e0   : > { %v3089_v56 = vpop.f32.mrf.mxu0  ;;  %3681 = vmatmul.mubr.f32.gmra.mxu1 %v2747_v50  ;;  %v3987_v50 = vld [vmem:[#allocation3 + $0x54] sm:$0xff] }
 0x2e1   : > { %3685 = vmatprep.mubr.f32.mxu1 %v2784_v55  ;;  %v5886_v31 = vpop.f32.mrf.mxu1  ;;  %v4024_v55 = vld [vmem:[#allocation3 + $0x5d] sm:$0xff] }
 0x2e2   : > { %v3092_v20 = vpop.f32.mrf.mxu0  ;;  %6010 = vmatmul.mubr.f32.gmra.mxu0 %v8239_v17  ;;  %v2786_v17 = vld [vmem:[#allocation3 + $0xe1] sm:$0xff] }
 0x2e3   : > { %v8420_v5 = vadd.f32 %v5880_v21, %v3092_v20  ;;  %4202 = vmatprep.mubr.f32.mxu0 %v4017_v19  ;;  %v3352_v44 = vpop.f32.mrf.mxu1  ;;  %v2755_v20 = vld [vmem:[#allocation3 + $0x108] sm:$0xff] }
 0x2e4   : > { %v3094_v13 = vpop.f32.mrf.mxu0  ;;  %3686 = vmatmul.mubr.f32.gmra.mxu1 %v2748_v22  ;;  %v2792_v22 = vld [vmem:[#allocation3 + $0x111] sm:$0xff] }
 0x2e5   : > { %3690 = vmatprep.mubr.f32.mxu1 %v2785_v18  ;;  %v5889_v26 = vpop.f32.mrf.mxu1  ;;  %v3988_v18 = vld [vmem:[#allocation3 + $0x5c] sm:$0xff] }
 0x2e6   : > { %v3097_v57 = vpop.f32.mrf.mxu0  ;;  %4203 = vmatmul.mubr.f32.vlgmr.msra.gmra.mxu0 %v3981_v0  ;;  %v4025_v0 = vld [vmem:[#allocation3 + $0x65] sm:$0xff] }
 0x2e7   : > { %v8422_v54 = vadd.f32 %v3342_v12, %v3097_v57  ;;  %4207 = vmatprep.mubr.f32.mxu0 %v4018_v45  ;;  %v3362_v24 = vpop.f32.mrf.mxu1 }
 0x2e8   : > { %v3099_v51 = vpop.f32.mrf.mxu0  ;;  %3691 = vmatmul.mubr.f32.gmra.mxu1 %v2749_v48  ;;  %v2756_v48 = vld [vmem:[#allocation3 + $0x110] sm:$0xff] }
 0x2e9   : > { %3695 = vmatprep.mubr.f32.mxu1 %v2786_v17  ;;  %v5892_v15 = vpop.f32.mrf.mxu1  ;;  %v2793_v17 = vld [vmem:[#allocation3 + $0x119] sm:$0xff] }
 0x2ea   : > { %v3102_v14 = vpop.f32.mrf.mxu0  ;;  %4208 = vmatmul.mubr.f32.gmra.mxu0 %v3982_v63 }
 0x2eb   : > { %v8424_v47 = vadd.f32 %v5883_v9, %v3102_v14  ;;  %4212 = vmatprep.mubr.f32.mxu0 %v4019_v23  ;;  %v3372_v21 = vpop.f32.mrf.mxu1  ;;  %v2791_v9 = vld [vmem:[#allocation3 + $0x109] sm:$0xff] }
 0x2ec   : > { %v3104_v2 = vpop.f32.mrf.mxu0  ;;  %3696 = vmatmul.mubr.f32.gmra.mxu1 %v2750_v34  ;;  %v4026_v14 = vld [vmem:[#allocation3 + $0x6d] sm:$0xff] }
 0x2ed   : > { %3700 = vmatprep.mubr.f32.mxu1 %v2787_v3  ;;  %v5895_v52 = vpop.f32.mrf.mxu1  ;;  %v2757_v2 = vld [vmem:[#allocation3 + $0x118] sm:$0xff] }
 0x2ee   : > { %v3107_v38 = vpop.f32.mrf.mxu0  ;;  %4213 = vmatmul.mubr.f32.gmra.mxu0 %v3983_v49 }
 0x2ef   : > { %v8426_v58 = vadd.f32 %v3352_v44, %v3107_v38  ;;  %4217 = vmatprep.mubr.f32.mxu0 %v4020_v46  ;;  %v3382_v13 = vpop.f32.mrf.mxu1  ;;  %v3989_v44 = vld [vmem:[#allocation3 + $0x64] sm:$0xff]  ;;  %v3990_v38 = vld [vmem:[#allocation3 + $0x6c] sm:$0xff] }
 0x2f0   : > { %v3109_v41 = vpop.f32.mrf.mxu0  ;;  %3701 = vmatmul.mubr.f32.gmra.mxu1 %v2751_v6  ;;  %v4027_v6 = vld [vmem:[#allocation3 + $0x75] sm:$0xff] }
 0x2f1   : > { %3705 = vmatprep.mubr.f32.mxu1 %v2788_v42  ;;  %v4054_v42 = vld [vmem:[#allocation3 + $0x2e] sm:$0xff] }
 0x2f2   : > { %v3112_v29 = vpop.f32.mrf.mxu0  ;;  %4218 = vmatmul.mubr.f32.gmra.mxu0 %v3984_v53  ;;  %v5898_v57 = vpop.f32.mrf.mxu1  ;;  %v4055_v53 = vld [vmem:[#allocation3 + $0x36] sm:$0xff] }
 0x2f3   : > { %v8428_v36 = vadd.f32 %v5886_v31, %v3112_v29  ;;  %4222 = vmatprep.mubr.f32.mxu0 %v4021_v39  ;;  %v3991_v39 = vld [vmem:[#allocation3 + $0x74] sm:$0xff] }
 0x2f4   : > { %v3114_v16 = vpop.f32.mrf.mxu0  ;;  %3706 = vmatmul.mubr.f32.gmra.mxu1 %v2752_v30  ;;  %v3392_v23 = vpop.f32.mrf.mxu1 }
 0x2f5   : > { %3710 = vmatprep.mubr.f32.mxu1 %v2789_v8  ;;  %v4028_v16 = vld [vmem:[#allocation3 + $0x7d] sm:$0xff] }
 0x2f6   : > { %v3117_v40 = vpop.f32.mrf.mxu0  ;;  %4223 = vmatmul.mubr.f32.gmra.mxu0 %v3985_v62  ;;  %v4056_v62 = vld [vmem:[#allocation3 + $0x3e] sm:$0xff] }
 0x2f7   : > { %v8430_v43 = vadd.f32 %v3362_v24, %v3117_v40  ;;  %4227 = vmatprep.mubr.f32.mxu0 %v4022_v33  ;;  %v4057_v33 = vld [vmem:[#allocation3 + $0x46] sm:$0xff] }
 0x2f8   : > { %v3119_v32 = vpop.f32.mrf.mxu0  ;;  %3711 = vmatmul.mubr.f32.gmra.mxu1 %v2753_v61  ;;  %v3992_v61 = vld [vmem:[#allocation3 + $0x7c] sm:$0xff] }
 0x2f9   : > { %3715 = vmatprep.mubr.f32.mxu1 %v2790_v10  ;;  %v4029_v10 = vld [vmem:[#allocation3 + $0x85] sm:$0xff] }
 0x2fa   : > { %v3122_v4 = vpop.f32.mrf.mxu0  ;;  %4228 = vmatmul.mubr.f32.gmra.mxu0 %v3986_v7  ;;  %v5901_v49 = vpop.f32.mrf.mxu1 }
 0x2fb   : > { %v8432_v35 = vadd.f32 %v5889_v26, %v3122_v4  ;;  %4232 = vmatprep.mubr.f32.mxu0 %v4023_v60  ;;  %v4053_v26 = vld [vmem:[#allocation3 + $0x26] sm:$0xff]  ;;  %v4058_v4 = vld [vmem:[#allocation3 + $0x4e] sm:$0xff] }
 0x2fc   : > { %v3124_v37 = vpop.f32.mrf.mxu0  ;;  %3716 = vmatmul.mubr.f32.gmra.mxu1 %v2754_v28  ;;  %v3402_v29 = vpop.f32.mrf.mxu1  ;;  %v4059_v28 = vld [vmem:[#allocation3 + $0x56] sm:$0xff] }
 0x2fd   : > { %3720 = vmatprep.mubr.f32.mxu1 %v2791_v9  ;;  %v3993_v9 = vld [vmem:[#allocation3 + $0x84] sm:$0xff] }
 0x2fe   : > { %v3127_v56 = vpop.f32.mrf.mxu0  ;;  %4233 = vmatmul.mubr.f32.gmra.mxu0 %v3987_v50  ;;  %v4030_v50 = vld [vmem:[#allocation3 + $0x8d] sm:$0xff] }
 0x2ff   : > { %v8434_v12 = vadd.f32 %v3372_v21, %v3127_v56  ;;  %4237 = vmatprep.mubr.f32.mxu0 %v4024_v55  ;;  %v4060_v55 = vld [vmem:[#allocation3 + $0x5e] sm:$0xff] }
 0x300   : > { %v3129_v19 = vpop.f32.mrf.mxu0  ;;  %3721 = vmatmul.mubr.f32.gmra.mxu1 %v2755_v20 }
 0x301   : > { %3725 = vmatprep.mubr.f32.mxu1 %v2792_v22  ;;  %v4061_v19 = vld [vmem:[#allocation3 + $0x66] sm:$0xff] }
 0x302   : > { %v3132_v31 = vpop.f32.mrf.mxu0  ;;  %4238 = vmatmul.mubr.f32.gmra.mxu0 %v3988_v18  ;;  %v5904_v8 = vpop.f32.mrf.mxu1 }
 0x303   : > { %v8436_v45 = vadd.f32 %v5892_v15, %v3132_v31  ;;  %4242 = vmatprep.mubr.f32.mxu0 %v4025_v0  ;;  %v4031_v31 = vld [vmem:[#allocation3 + $0x95] sm:$0xff] }
 0x304   : > { %v3134_v51 = vpop.f32.mrf.mxu0  ;;  %3726 = vmatmul.mubr.f32.gmra.mxu1 %v2756_v48  ;;  %v3412_v21 = vpop.f32.mrf.mxu1  ;;  %v4062_v48 = vld [vmem:[#allocation3 + $0x6e] sm:$0xff] }
 0x305   : > { %3730 = vmatprep.mubr.f32.mxu1 %v2793_v17  ;;  %v4063_v17 = vld [vmem:[#allocation3 + $0x76] sm:$0xff] }
 0x306   : > { %v3137_v63 = vpop.f32.mrf.mxu0  ;;  %4243 = vmatmul.mubr.f32.gmra.mxu0 %v3989_v44  ;;  %v3995_v44 = vld [vmem:[#allocation3 + $0x94] sm:$0xff] }
 0x307   : > { %v8438_v34 = vadd.f32 %v3382_v13, %v3137_v63  ;;  %4247 = vmatprep.mubr.f32.mxu0 %v4026_v14  ;;  %v3994_v13 = vld [vmem:[#allocation3 + $0x8c] sm:$0xff]  ;;  %v4032_v14 = vld [vmem:[#allocation3 + $0x9d] sm:$0xff] }
 0x308   : > { %v3139_v3 = vpop.f32.mrf.mxu0  ;;  %3731 = vmatmul.mubr.f32.gmra.mxu1 %v2757_v2 }
 0x309   : > { %6044 = vmatprep.mubr.f32.mxu1 %v4053_v26  ;;  %v4064_v3 = vld [vmem:[#allocation3 + $0x7e] sm:$0xff] }
 0x30a   : > { %v3142_v46 = vpop.f32.mrf.mxu0  ;;  %4248 = vmatmul.mubr.f32.gmra.mxu0 %v3990_v38  ;;  %v8446_v37 = vpop.f32.mrf.mxu1  ;;  %v4065_v38 = vld [vmem:[#allocation3 + $0x86] sm:$0xff] }
 0x30b   : > { %v8440_v41 = vadd.f32 %v5895_v52, %v3142_v46  ;;  %4252 = vmatprep.mubr.f32.mxu0 %v4027_v6  ;;  %v3996_v46 = vld [vmem:[#allocation3 + $0x9c] sm:$0xff] }
 0x30c   : > { %v3144_v24 = vpop.f32.mrf.mxu0  ;;  %6045 = vmatmul.mubr.f32.vlgmr.msra.gmra.mxu1 %v4054_v42  ;;  %v3422_v22 = vpop.f32.mrf.mxu1  ;;  %v4033_v42 = vld [vmem:[#allocation3 + $0xa5] sm:$0xff] }
 0x30d   : > { %6047 = vmatprep.mubr.f32.mxu1 %v4055_v53  ;;  %v4066_v53 = vld [vmem:[#allocation3 + $0x8e] sm:$0xff] }
 0x30e   : > { %v3147_v30 = vpop.f32.mrf.mxu0  ;;  %4253 = vmatmul.mubr.f32.gmra.mxu0 %v3991_v39  ;;  %v4067_v39 = vld [vmem:[#allocation3 + $0x96] sm:$0xff] }
 0x30f   : > { %v8442_v15 = vadd.f32 %v3392_v23, %v3147_v30  ;;  %4257 = vmatprep.mubr.f32.mxu0 %v4028_v16  ;;  %v3997_v16 = vld [vmem:[#allocation3 + $0xa4] sm:$0xff] }
 0x310   : > { %v3149_v40 = vpop.f32.mrf.mxu0  ;;  %6048 = vmatmul.mubr.f32.gmra.mxu1 %v4056_v62 }
 0x311   : > { %6050 = vmatprep.mubr.f32.mxu1 %v4057_v33  ;;  %v8450_v0 = vpop.f32.mrf.mxu1  ;;  %v4034_v40 = vld [vmem:[#allocation3 + $0xad] sm:$0xff] }
 0x312   : > { %v3152_v32 = vpop.f32.mrf.mxu0  ;;  %4258 = vmatmul.mubr.f32.gmra.mxu0 %v3992_v61 }
 0x313   : > { %v8444_v7 = vadd.f32 %v5898_v57, %v3152_v32  ;;  %4262 = vmatprep.mubr.f32.mxu0 %v4029_v10  ;;  %v3432_v23 = vpop.f32.mrf.mxu1  ;;  %v4068_v32 = vld [vmem:[#allocation3 + $0x9e] sm:$0xff] }
 0x314   : > { %v3154_v60 = vpop.f32.mrf.mxu0  ;;  %6051 = vmatmul.mubr.f32.gmra.mxu1 %v4058_v4 }
 0x315   : > { %6053 = vmatprep.mubr.f32.mxu1 %v4059_v28  ;;  %v4035_v60 = vld [vmem:[#allocation3 + $0xb5] sm:$0xff] }
 0x316   : > { %v3157_v52 = vpop.f32.mrf.mxu0  ;;  %4263 = vmatmul.mubr.f32.gmra.mxu0 %v3993_v9 }
 0x317   : > { %v8448_v56 = vadd.f32 %v3402_v29, %v3157_v52  ;;  %4267 = vmatprep.mubr.f32.mxu0 %v4030_v50  ;;  %v4070_v52 = vld [vmem:[#allocation3 + $0xae] sm:$0xff] }
 0x318   : > { %v3159_v20 = vpop.f32.mrf.mxu0  ;;  %6054 = vmatmul.mubr.f32.gmra.mxu1 %v4060_v55  ;;  %v4071_v55 = vld [vmem:[#allocation3 + $0xb6] sm:$0xff] }
 0x319   : > { %6056 = vmatprep.mubr.f32.mxu1 %v4061_v19  ;;  %v3999_v19 = vld [vmem:[#allocation3 + $0xb4] sm:$0xff] }
 0x31a   : > { %v3162_v18 = vpop.f32.mrf.mxu0  ;;  %4268 = vmatmul.mubr.f32.gmra.mxu0 %v3994_v13  ;;  %v4036_v13 = vld [vmem:[#allocation3 + $0xbd] sm:$0xff] }
 0x31b   : > { %v8452_v57 = vadd.f32 %v5901_v49, %v3162_v18  ;;  %4272 = vmatprep.mubr.f32.mxu0 %v4031_v31  ;;  %v8456_v49 = vpop.f32.mrf.mxu1  ;;  %v4072_v31 = vld [vmem:[#allocation3 + $0xbe] sm:$0xff] }
 0x31c   : > { %v3164_v51 = vpop.f32.mrf.mxu0  ;;  %6057 = vmatmul.mubr.f32.gmra.mxu1 %v4062_v48 }
 0x31d   : > { %6059 = vmatprep.mubr.f32.mxu1 %v4063_v17  ;;  %v3442_v30 = vpop.f32.mrf.mxu1  ;;  %v4000_v17 = vld [vmem:[#allocation3 + $0xbc] sm:$0xff] }
 0x31e   : > { %v3167_v63 = vpop.f32.mrf.mxu0  ;;  %4273 = vmatmul.mubr.f32.gmra.mxu0 %v3995_v44 }
 0x31f   : > { %v8454_v2 = vadd.f32 %v3412_v21, %v3167_v63  ;;  %4277 = vmatprep.mubr.f32.mxu0 %v4032_v14  ;;  %v3998_v21 = vld [vmem:[#allocation3 + $0xac] sm:$0xff] }
 0x320   : > { %v3169_v26 = vpop.f32.mrf.mxu0  ;;  %6060 = vmatmul.mubr.f32.gmra.mxu1 %v4064_v3  ;;  %v4037_v63 = vld [vmem:[#allocation3 + $0xc5] sm:$0xff] }
 0x321   : > { %6062 = vmatprep.mubr.f32.mxu1 %v4065_v38  ;;  %v8460_v33 = vpop.f32.mrf.mxu1  ;;  %v4075_v38 = vld [vmem:[#allocation3 + $0xd6] sm:$0xff] }
 0x322   : > { %v3172_v6 = vpop.f32.mrf.mxu0  ;;  %4278 = vmatmul.mubr.f32.gmra.mxu0 %v3996_v46 }
 0x323   : > { %v8458_v24 = vadd.f32 %v5904_v8, %v3172_v6  ;;  %4282 = vmatprep.mubr.f32.mxu0 %v4033_v42  ;;  %v4069_v8 = vld [vmem:[#allocation3 + $0xa6] sm:$0xff]  ;;  %v8464_v28 = vpop.f32.mrf.mxu1 }
 0x324   : > { %v3174_v29 = vpop.f32.mrf.mxu0  ;;  %6063 = vmatmul.mubr.f32.gmra.mxu1 %v4066_v53  ;;  %v4001_v6 = vld [vmem:[#allocation3 + $0xc4] sm:$0xff]  ;;  %v4038_v53 = vld [vmem:[#allocation3 + $0xcd] sm:$0xff] }
 0x325   : > { %6065 = vmatprep.mubr.f32.mxu1 %v4067_v39  ;;  %v4076_v39 = vld [vmem:[#allocation3 + $0xde] sm:$0xff] }
 0x326   : > { %v3177_v62 = vpop.f32.mrf.mxu0  ;;  %4283 = vmatmul.mubr.f32.gmra.mxu0 %v3997_v16 }
 0x327   : > { %v8462_v61 = vadd.f32 %v3422_v22, %v3177_v62  ;;  %4287 = vmatprep.mubr.f32.mxu0 %v4034_v40  ;;  %v4077_v62 = vld [vmem:[#allocation3 + $0xe6] sm:$0xff] }
 0x328   : > { %v3179_v10 = vpop.f32.mrf.mxu0  ;;  %6066 = vmatmul.mubr.f32.gmra.mxu1 %v4068_v32  ;;  %v4002_v40 = vld [vmem:[#allocation3 + $0xcc] sm:$0xff] }
 0x329   : > { %6068 = vmatprep.mubr.f32.mxu1 %v4069_v8  ;;  %v8469_v20 = vpop.f32.mrf.mxu1  ;;  %v4039_v8 = vld [vmem:[#allocation3 + $0xd5] sm:$0xff] }
 0x32a   : > { %v3182_v4 = vpop.f32.mrf.mxu0  ;;  %4288 = vmatmul.mubr.f32.gmra.mxu0 %v3998_v21 }
 0x32b   : > { %v8467_v9 = vadd.f32 %v8446_v37, %v3182_v4  ;;  %4292 = vmatprep.mubr.f32.mxu0 %v4035_v60  ;;  %v4073_v37 = vld [vmem:[#allocation3 + $0xc6] sm:$0xff]  ;;  %v8473_v51 = vpop.f32.mrf.mxu1 }
 0x32c   : > { %v3184_v50 = vpop.f32.mrf.mxu0  ;;  %6069 = vmatmul.mubr.f32.gmra.mxu1 %v4070_v52  ;;  %v4079_v52 = vld [vmem:[#allocation3 + $0xf6] sm:$0xff] }
 0x32d   : > { %6071 = vmatprep.mubr.f32.mxu1 %v4071_v55  ;;  %v4003_v55 = vld [vmem:[#allocation3 + $0xd4] sm:$0xff] }
 0x32e   : > { %v3187_v22 = vpop.f32.mrf.mxu0  ;;  %4293 = vmatmul.mubr.f32.gmra.mxu0 %v3999_v19 }
 0x32f   : > { %v8471_v18 = vadd.f32 %v3432_v23, %v3187_v22  ;;  %4297 = vmatprep.mubr.f32.mxu0 %v4036_v13  ;;  %v4074_v23 = vld [vmem:[#allocation3 + $0xce] sm:$0xff]  ;;  %v4040_v13 = vld [vmem:[#allocation3 + $0xdd] sm:$0xff] }
 0x330   : > { %v3189_v48 = vpop.f32.mrf.mxu0  ;;  %6072 = vmatmul.mubr.f32.gmra.mxu1 %v4072_v31 }
 0x331   : > { %6074 = vmatprep.mubr.f32.mxu1 %v4073_v37  ;;  %v8478_v3 = vpop.f32.mrf.mxu1 }
 0x332   : > { %v3192_v44 = vpop.f32.mrf.mxu0  ;;  %4298 = vmatmul.mubr.f32.gmra.mxu0 %v4000_v17  ;;  %v4081_v17 = vld [vmem:[#allocation3 + $0x106] sm:$0xff] }
 0x333   : > { %v8476_v14 = vadd.f32 %v8450_v0, %v3192_v44  ;;  %4302 = vmatprep.mubr.f32.mxu0 %v4037_v63  ;;  %v8480_v46 = vpop.f32.mrf.mxu1 }
 0x334   : > { %v3194_v26 = vpop.f32.mrf.mxu0  ;;  %6075 = vmatmul.mubr.f32.gmra.mxu1 %v4074_v23 }
 0x335   : > { %6077 = vmatprep.mubr.f32.mxu1 %v4075_v38  ;;  %v4041_v26 = vld [vmem:[#allocation3 + $0xe5] sm:$0xff] }
 0x336   : > { %v3197_v42 = vpop.f32.mrf.mxu0  ;;  %4303 = vmatmul.mubr.f32.gmra.mxu0 %v4001_v6  ;;  %v8484_v16 = vpop.f32.mrf.mxu1 }
 0x337   : > { %v8482_v29 = vadd.f32 %v3442_v30, %v3197_v42  ;;  %4307 = vmatprep.mubr.f32.mxu0 %v4038_v53  ;;  %v4078_v30 = vld [vmem:[#allocation3 + $0xee] sm:$0xff]  ;;  %v4083_v53 = vld [vmem:[#allocation3 + $0x116] sm:$0xff] }
 0x338   : > { %v3199_v0 = vpop.f32.mrf.mxu0  ;;  %6078 = vmatmul.mubr.f32.gmra.mxu1 %v4076_v39  ;;  %v8486_v10 = vpop.f32.mrf.mxu1 }
 0x339   : > { %6080 = vmatprep.mubr.f32.mxu1 %v4077_v62 }
 0x33a   : > { %v3202_v32 = vpop.f32.mrf.mxu0  ;;  %4308 = vmatmul.mubr.f32.gmra.mxu0 %v4002_v40  ;;  %v3557_v60 = vpop.f32.mrf.mxu1  ;;  %v4042_v40 = vld [vmem:[#allocation3 + $0xed] sm:$0xff] }
 0x33b   : > { %v8489_v21 = vadd.f32 %v8456_v49, %v3202_v32  ;;  %4312 = vmatprep.mubr.f32.mxu0 %v4039_v8  ;;  %v8492_v50 = vadd.f32 %v3557_v60, %v8388_v25  ;;  %v4080_v49 = vld [vmem:[#allocation3 + $0xfe] sm:$0xff] }
 0x33c   : > { %v3204_v4 = vpop.f32.mrf.mxu0  ;;  %6081 = vmatmul.mubr.f32.gmra.mxu1 %v4078_v30  ;;  %v3559_v22 = vpop.f32.mrf.mxu1  ;;  %v4004_v25 = vld [vmem:[#allocation3 + $0xdc] sm:$0xff] }
 0x33d   : > { %6083 = vmatprep.mubr.f32.mxu1 %v4079_v52  ;;  %v4085_v4 = vld [vmem:[#allocation3 + $0x126] sm:$0xff]  ;;  %v4087_v22 = vld [vmem:[#allocation3 + $0x136] sm:$0xff] }
 0x33e   : > { %v3207_v19 = vpop.f32.mrf.mxu0  ;;  %4313 = vmatmul.mubr.f32.gmra.mxu0 %v4003_v55 }
 0x33f   : > { %v8495_v31 = vadd.f32 %v8464_v28, %v3207_v19  ;;  %4317 = vmatprep.mubr.f32.mxu0 %v4040_v13  ;;  %v3562_v37 = vpop.f32.mrf.mxu1  ;;  %v4082_v28 = vld [vmem:[#allocation3 + $0x10e] sm:$0xff] }
 0x340   : > { %v3209_v48 = vpop.f32.mrf.mxu0  ;;  %6084 = vmatmul.mubr.f32.gmra.mxu1 %v4080_v49  ;;  %v8498_v44 = vadd.f32 %v3562_v37, %v8385_v59  ;;  %v4005_v59 = vld [vmem:[#allocation3 + $0xe4] sm:$0xff]  ;;  %v4043_v19 = vld [vmem:[#allocation3 + $0xf5] sm:$0xff] }
 0x341   : > { %6086 = vmatprep.mubr.f32.mxu1 %v4081_v17  ;;  %v3564_v23 = vpop.f32.mrf.mxu1  ;;  %v4088_v17 = vld [vmem:[#allocation3 + $0x13e] sm:$0xff] }
 0x342   : > { %v3212_v63 = vpop.f32.mrf.mxu0  ;;  %4318 = vmatmul.mubr.f32.gmra.mxu0 %v4004_v25  ;;  %v4044_v23 = vld [vmem:[#allocation3 + $0xfd] sm:$0xff] }
 0x343   : > { %v8501_v38 = vadd.f32 %v8460_v33, %v3212_v63  ;;  %4322 = vmatprep.mubr.f32.mxu0 %v4041_v26  ;;  %v4084_v33 = vld [vmem:[#allocation3 + $0x11e] sm:$0xff] }
 0x344   : > { %v3214_v6 = vpop.f32.mrf.mxu0  ;;  %v3567_v42 = vpop.f32.mrf.mxu1  ;;  %6087 = vmatmul.mubr.f32.gmra.mxu1 %v4082_v28 }
 0x345   : > { %v8504_v39 = vadd.f32 %v3567_v42, %v8400_v27  ;;  %6089 = vmatprep.mubr.f32.mxu1 %v4083_v53  ;;  %v4006_v27 = vld [vmem:[#allocation3 + $0xec] sm:$0xff]  ;;  %v4008_v42 = vld [vmem:[#allocation3 + $0xfc] sm:$0xff] }
 0x346   : > { %v3217_v0 = vpop.f32.mrf.mxu0  ;;  %v3569_v62 = vpop.f32.mrf.mxu1  ;;  %4323 = vmatmul.mubr.f32.gmra.mxu0 %v4005_v59  ;;  %v4045_v59 = vld [vmem:[#allocation3 + $0x105] sm:$0xff] }
 0x347   : > { %v8507_v32 = vadd.f32 %v8473_v51, %v3217_v0  ;;  %4327 = vmatprep.mubr.f32.mxu0 %v4042_v40  ;;  %v4086_v51 = vld [vmem:[#allocation3 + $0x12e] sm:$0xff] }
 0x348   : > { %v3219_v8 = vpop.f32.mrf.mxu0  ;;  %v3572_v30 = vpop.f32.mrf.mxu1  ;;  %6090 = vmatmul.mubr.f32.gmra.mxu1 %v4084_v33  ;;  %v4009_v33 = vld [vmem:[#allocation3 + $0x104] sm:$0xff] }
 0x349   : > { %v8510_v60 = vadd.f32 %v3572_v30, %v8411_v1  ;;  %6092 = vmatprep.mubr.f32.mxu1 %v4085_v4  ;;  %v4007_v1 = vld [vmem:[#allocation3 + $0xf4] sm:$0xff] }
 0x34a   : > { %v3222_v52 = vpop.f32.mrf.mxu0  ;;  %v3574_v55 = vpop.f32.mrf.mxu1  ;;  %4328 = vmatmul.mubr.f32.gmra.mxu0 %v4006_v27  ;;  %v4046_v4 = vld [vmem:[#allocation3 + $0x10d] sm:$0xff] }
 0x34b   : > { %v8513_v13 = vadd.f32 %v8469_v20, %v3222_v52  ;;  %4332 = vmatprep.mubr.f32.mxu0 %v4043_v19  ;;  %v4010_v55 = vld [vmem:[#allocation3 + $0x10c] sm:$0xff] }
 0x34c   : > { %v3224_v49 = vpop.f32.mrf.mxu0  ;;  %v3577_v48 = vpop.f32.mrf.mxu1  ;;  %6093 = vmatmul.mubr.f32.gmra.mxu1 %v4086_v51  ;;  %v4047_v51 = vld [vmem:[#allocation3 + $0x115] sm:$0xff] }
 0x34d   : > { %v8516_v37 = vadd.f32 %v3577_v48, %v8416_v11  ;;  %6095 = vmatprep.mubr.f32.mxu1 %v4087_v22 }
 0x34e   : > { %v3227_v25 = vpop.f32.mrf.mxu0  ;;  %v3579_v63 = vpop.f32.mrf.mxu1  ;;  %4333 = vmatmul.mubr.f32.gmra.mxu0 %v4007_v1 }
 0x34f   : > { %v8519_v26 = vadd.f32 %v8480_v46, %v3227_v25  ;;  %4337 = vmatprep.mubr.f32.mxu0 %v4044_v23  ;;  %v4048_v63 = vld [vmem:[#allocation3 + $0x11d] sm:$0xff] }
 0x350   : > { %v3229_v20 = vpop.f32.mrf.mxu0  ;;  %v3582_v28 = vpop.f32.mrf.mxu1  ;;  %6096 = vmatmul.mubr.f32.gmra.mxu1 %v4088_v17 }
 0x351   : > { %v3583_v6 = vadd.f32 %v3582_v28, %v8420_v5 }
 0x352   : > { %v3232_v53 = vpop.f32.mrf.mxu0  ;;  %v3584_v11 = vpop.f32.mrf.mxu1  ;;  %4338 = vmatmul.mubr.f32.gmra.mxu0 %v4008_v42  ;;  %v4012_v42 = vld [vmem:[#allocation3 + $0x11c] sm:$0xff] }
 0x353   : > { %v8523_v0 = vadd.f32 %v8478_v3, %v3232_v53  ;;  %4342 = vmatprep.mubr.f32.mxu0 %v4045_v59 }
 0x354   : > { %v3234_v62 = vpop.f32.mrf.mxu0  ;;  %v3587_v40 = vpop.f32.mrf.mxu1 }
 0x355   : > { %v8526_v46 = vadd.f32 %v3587_v40, %v8422_v54 }
 0x356   : > { %v3237_v8 = vpop.f32.mrf.mxu0  ;;  %v3589_v30 = vpop.f32.mrf.mxu1  ;;  %4343 = vmatmul.mubr.f32.gmra.mxu0 %v4009_v33 }
 0x357   : > { %v8529_v5 = vadd.f32 %v8486_v10, %v3237_v8  ;;  %4347 = vmatprep.mubr.f32.mxu0 %v4046_v4  ;;  %v4011_v10 = vld [vmem:[#allocation3 + $0x114] sm:$0xff] }
 0x358   : > { %v3239_v27 = vpop.f32.mrf.mxu0  ;;  %v3592_v52 = vpop.f32.mrf.mxu1  ;;  %v4050_v30 = vld [vmem:[#allocation3 + $0x12d] sm:$0xff] }
 0x359   : > { %v3593_v3 = vadd.f32 %v3592_v52, %v8424_v47 }
 0x35a   : > { %v3242_v19 = vpop.f32.mrf.mxu0  ;;  %v3594_v22 = vpop.f32.mrf.mxu1  ;;  %4348 = vmatmul.mubr.f32.gmra.mxu0 %v4010_v55 }
 0x35b   : > { %v8533_v54 = vadd.f32 %v8484_v16, %v3242_v19  ;;  %4352 = vmatprep.mubr.f32.mxu0 %v4047_v51 }
 0x35c   : > { %v3244_v49 = vpop.f32.mrf.mxu0  ;;  %v3597_v48 = vpop.f32.mrf.mxu1 }
 0x35d   : > { %v3598_v1 = vadd.f32 %v3597_v48, %v8426_v58  ;;  %v4049_v58 = vld [vmem:[#allocation3 + $0x125] sm:$0xff]  ;;  %v4015_v49 = vld [vmem:[#allocation3 + $0x134] sm:$0xff] }
 0x35e   : > { %v3599_v17 = vpop.f32.mrf.mxu1  ;;  %v5960_v25 = vpop.f32.mrf.mxu0  ;;  %4353 = vmatmul.mubr.f32.gmra.mxu0 %v4011_v10  ;;  %v4052_v10 = vld [vmem:[#allocation3 + $0x13d] sm:$0xff] }
 0x35f   : > { %v8537_v47 = vadd.f32 %v5960_v25, %v8498_v44  ;;  %4357 = vmatprep.mubr.f32.mxu0 %v4048_v63 }
 0x360   : > { %v3602_v23 = vpop.f32.mrf.mxu1  ;;  %v3802_v20 = vpop.f32.mrf.mxu0 }
 0x361   : > { %v3603_v28 = vadd.f32 %v3602_v23, %v8428_v36  ;;  %v8541_v16 = vadd.f32 %v3802_v20, %v8492_v50  ;;  %v4013_v36 = vld [vmem:[#allocation3 + $0x124] sm:$0xff]  ;;  %v4016_v23 = vld [vmem:[#allocation3 + $0x13c] sm:$0xff] }
 0x362   : > { %v3604_v53 = vpop.f32.mrf.mxu1  ;;  %v5963_v11 = vpop.f32.mrf.mxu0  ;;  %4358 = vmatmul.mubr.f32.gmra.mxu0 %v4012_v42 }
 0x363   : > { %v8544_v59 = vadd.f32 %v5963_v11, %v8510_v60  ;;  %4362 = vmatprep.mubr.f32.mxu0 %v4049_v58  ;;  %v4051_v60 = vld [vmem:[#allocation3 + $0x135] sm:$0xff] }
 0x364   : > { %v3607_v62 = vpop.f32.mrf.mxu1  ;;  %v3812_v44 = vpop.f32.mrf.mxu0 }
 0x365   : > { %v3608_v40 = vadd.f32 %v3607_v62, %v8430_v43  ;;  %v8548_v33 = vadd.f32 %v3812_v44, %v8504_v39  ;;  %v4014_v43 = vld [vmem:[#allocation3 + $0x12c] sm:$0xff] }
 0x366   : > { %v3609_v8 = vpop.f32.mrf.mxu1  ;;  %v5966_v50 = vpop.f32.mrf.mxu0  ;;  %4363 = vmatmul.mubr.f32.gmra.mxu0 %v4013_v36 }
 0x367   : > { %v8550_v4 = vadd.f32 %v5966_v50, %v3583_v6  ;;  %4367 = vmatprep.mubr.f32.mxu0 %v4050_v30 }
 0x368   : > { %v3612_v27 = vpop.f32.mrf.mxu1  ;;  %v3822_v52 = vpop.f32.mrf.mxu0 }
 0x369   : > { %v3613_v55 = vadd.f32 %v3612_v27, %v8432_v35  ;;  %v8554_v19 = vadd.f32 %v3822_v52, %v8516_v37 }
 0x36a   : > { %v3614_v22 = vpop.f32.mrf.mxu1  ;;  %v5969_v39 = vpop.f32.mrf.mxu0  ;;  %4368 = vmatmul.mubr.f32.gmra.mxu0 %v4014_v43 }
 0x36b   : > { %v8556_v51 = vadd.f32 %v5969_v39, %v3593_v3  ;;  %4372 = vmatprep.mubr.f32.mxu0 %v4051_v60 }
 0x36c   : > { %v3617_v48 = vpop.f32.mrf.mxu1  ;;  %v3832_v6 = vpop.f32.mrf.mxu0 }
 0x36d   : > { %v3618_v17 = vadd.f32 %v3617_v48, %v8434_v12  ;;  %v8560_v25 = vadd.f32 %v3832_v6, %v8526_v46 }
 0x36e   : > { %v3619_v35 = vpop.f32.mrf.mxu1  ;;  %v5972_v63 = vpop.f32.mrf.mxu0  ;;  %4373 = vmatmul.mubr.f32.gmra.mxu0 %v4015_v49 }
 0x36f   : > { %v8562_v37 = vadd.f32 %v5972_v63, %v3603_v28  ;;  %4377 = vmatprep.mubr.f32.mxu0 %v4052_v10 }
 0x370   : > { %v3622_v20 = vpop.f32.mrf.mxu1  ;;  %v3842_v3 = vpop.f32.mrf.mxu0 }
 0x371   : > { %v3623_v42 = vadd.f32 %v3622_v20, %v8436_v45  ;;  %v8565_v53 = vadd.f32 %v3842_v3, %v3598_v1 }
 0x372   : > { %v3624_v11 = vpop.f32.mrf.mxu1  ;;  %v5975_v58 = vpop.f32.mrf.mxu0  ;;  %4378 = vmatmul.mubr.f32.gmra.mxu0 %v4016_v23 }
 0x373   : > { %v8567_v12 = vadd.f32 %v5975_v58, %v3613_v55 }
 0x374   : > { %v3627_v46 = vpop.f32.mrf.mxu1  ;;  %v3852_v62 = vpop.f32.mrf.mxu0 }
 0x375   : > { %v3628_v44 = vadd.f32 %v3627_v46, %v8438_v34  ;;  %v8570_v36 = vadd.f32 %v3852_v62, %v3608_v40 }
 0x376   : > { %v3629_v28 = vpop.f32.mrf.mxu1  ;;  %v5978_v8 = vpop.f32.mrf.mxu0 }
 0x377   : > { %v8572_v50 = vadd.f32 %v5978_v8, %v3623_v42 }
 0x378   : > { %v3632_v30 = vpop.f32.mrf.mxu1  ;;  %v3862_v27 = vpop.f32.mrf.mxu0 }
 0x379   : > { %v3633_v45 = vadd.f32 %v3632_v30, %v8440_v41  ;;  %v8575_v1 = vadd.f32 %v3862_v27, %v3618_v17 }
 0x37a   : > { %v3634_v52 = vpop.f32.mrf.mxu1  ;;  %v5981_v60 = vpop.f32.mrf.mxu0 }
 0x37b   : > { %v8577_v55 = vadd.f32 %v5981_v60, %v3633_v45 }
 0x37c   : > { %v3637_v43 = vpop.f32.mrf.mxu1  ;;  %v3872_v22 = vpop.f32.mrf.mxu0 }
 0x37d   : > { %v3638_v34 = vadd.f32 %v3637_v43, %v8442_v15  ;;  %v8580_v40 = vadd.f32 %v3872_v22, %v3628_v44 }
 0x37e   : > { %v3639_v39 = vpop.f32.mrf.mxu1  ;;  %v5984_v49 = vpop.f32.mrf.mxu0 }
 0x380   : > { %v3642_v48 = vpop.f32.mrf.mxu1  ;;  %v3882_v6 = vpop.f32.mrf.mxu0 }
 0x381   : > { %v3643_v10 = vadd.f32 %v3642_v48, %v8444_v7  ;;  %v8583_v35 = vadd.f32 %v3882_v6, %v3638_v34 }
 0x382   : > { %v3644_v41 = vpop.f32.mrf.mxu1  ;;  %v5987_v17 = vpop.f32.mrf.mxu0 }
 0x383   : > { %v8585_v63 = vadd.f32 %v5984_v49, %v3643_v10 }
 0x384   : > { %v3647_v23 = vpop.f32.mrf.mxu1  ;;  %v3892_v20 = vpop.f32.mrf.mxu0 }
 0x385   : > { %v3648_v3 = vadd.f32 %v3647_v23, %v8448_v56 }
 0x386   : > { %v3649_v42 = vpop.f32.mrf.mxu1  ;;  %v5990_v15 = vpop.f32.mrf.mxu0 }
 0x387   : > { %v8588_v11 = vadd.f32 %v3892_v20, %v3648_v3 }
 0x388   : > { %v3652_v58 = vpop.f32.mrf.mxu1  ;;  %v3902_v46 = vpop.f32.mrf.mxu0 }
 0x389   : > { %v3653_v62 = vadd.f32 %v3652_v58, %v8452_v57 }
 0x38a   : > { %v3654_v44 = vpop.f32.mrf.mxu1  ;;  %v5993_v7 = vpop.f32.mrf.mxu0 }
 0x38b   : > { %v8591_v28 = vadd.f32 %v5987_v17, %v3653_v62 }
 0x38c   : > { %v3657_v8 = vpop.f32.mrf.mxu1  ;;  %v3912_v30 = vpop.f32.mrf.mxu0 }
 0x38d   : > { %v3658_v27 = vadd.f32 %v3657_v8, %v8454_v2 }
 0x38e   : > { %v3659_v45 = vpop.f32.mrf.mxu1  ;;  %v5996_v52 = vpop.f32.mrf.mxu0 }
 0x38f   : > { %v8594_v60 = vadd.f32 %v3902_v46, %v3658_v27 }
 0x390   : > { %v3662_v56 = vpop.f32.mrf.mxu1  ;;  %v3922_v43 = vpop.f32.mrf.mxu0 }
 0x391   : > { %v3663_v22 = vadd.f32 %v3662_v56, %v8458_v24 }
 0x392   : > { %v3664_v34 = vpop.f32.mrf.mxu1  ;;  %v5999_v39 = vpop.f32.mrf.mxu0 }
 0x393   : > { %v8597_v49 = vadd.f32 %v5990_v15, %v3663_v22 }
 0x394   : > { %v3667_v57 = vpop.f32.mrf.mxu1  ;;  %v3932_v48 = vpop.f32.mrf.mxu0 }
 0x395   : > { %v3668_v6 = vadd.f32 %v3667_v57, %v8462_v61 }
 0x396   : > { %v3669_v10 = vpop.f32.mrf.mxu1  ;;  %v6002_v41 = vpop.f32.mrf.mxu0 }
 0x397   : > { %v8600_v17 = vadd.f32 %v3912_v30, %v3668_v6 }
 0x398   : > { %v3672_v2 = vpop.f32.mrf.mxu1  ;;  %v3942_v23 = vpop.f32.mrf.mxu0 }
 0x399   : > { %v3673_v20 = vadd.f32 %v3672_v2, %v8467_v9 }
 0x39a   : > { %v3674_v3 = vpop.f32.mrf.mxu1  ;;  %v6005_v42 = vpop.f32.mrf.mxu0 }
 0x39b   : > { %v8603_v58 = vadd.f32 %v5993_v7, %v3673_v20 }
 0x39c   : > { %v3677_v24 = vpop.f32.mrf.mxu1  ;;  %v3952_v46 = vpop.f32.mrf.mxu0 }
 0x39d   : > { %v3678_v15 = vadd.f32 %v3677_v24, %v8471_v18 }
 0x39e   : > { %v3679_v62 = vpop.f32.mrf.mxu1  ;;  %v6008_v44 = vpop.f32.mrf.mxu0 }
 0x39f   : > { %v8606_v8 = vadd.f32 %v3922_v43, %v3678_v15 }
 0x3a0   : > { %v3682_v61 = vpop.f32.mrf.mxu1  ;;  %v3962_v27 = vpop.f32.mrf.mxu0 }
 0x3a1   : > { %v3683_v30 = vadd.f32 %v3682_v61, %v8476_v14 }
 0x3a2   : > { %v3684_v45 = vpop.f32.mrf.mxu1  ;;  %v6011_v56 = vpop.f32.mrf.mxu0 }
 0x3a3   : > { %v8609_v22 = vadd.f32 %v5996_v52, %v3683_v30 }
 0x3a4   : > { %v3687_v9 = vpop.f32.mrf.mxu1  ;;  %v3972_v34 = vpop.f32.mrf.mxu0 }
 0x3a5   : > { %v3688_v7 = vadd.f32 %v3687_v9, %v8482_v29 }
 0x3a6   : > { %v3689_v57 = vpop.f32.mrf.mxu1  ;;  %v8612_v6 = vpop.f32.mrf.mxu0 }
 0x3a7   : > { %v8614_v18 = vadd.f32 %v3932_v48, %v3688_v7 }
 0x3a8   : > { %v3692_v10 = vpop.f32.mrf.mxu1  ;;  %v4206_v43 = vpop.f32.mrf.mxu0 }
 0x3a9   : > { %v3693_v2 = vadd.f32 %v3692_v10, %v8489_v21 }
 0x3aa   : > { %v3694_v20 = vpop.f32.mrf.mxu1  ;;  %v4209_v3 = vpop.f32.mrf.mxu0 }
 0x3ab   : > { %v8617_v14 = vadd.f32 %v5999_v39, %v3693_v2 }
 0x3ac   : > { %v3697_v24 = vpop.f32.mrf.mxu1  ;;  %v4211_v52 = vpop.f32.mrf.mxu0 }
 0x3ad   : > { %v3698_v15 = vadd.f32 %v3697_v24, %v8495_v31 }
 0x3ae   : > { %v3699_v62 = vpop.f32.mrf.mxu1  ;;  %v8620_v61 = vpop.f32.mrf.mxu0 }
 0x3af   : > { %v8622_v29 = vadd.f32 %v3942_v23, %v3698_v15 }
 0x3b0   : > { %v3702_v30 = vpop.f32.mrf.mxu1  ;;  %v4216_v48 = vpop.f32.mrf.mxu0 }
 0x3b1   : > { %v3703_v45 = vadd.f32 %v3702_v30, %v8501_v38 }
 0x3b2   : > { %v3704_v9 = vpop.f32.mrf.mxu1  ;;  %v4219_v7 = vpop.f32.mrf.mxu0 }
 0x3b3   : > { %v8625_v21 = vadd.f32 %v6002_v41, %v3703_v45 }
 0x3b4   : > { %v3707_v57 = vpop.f32.mrf.mxu1  ;;  %v4221_v39 = vpop.f32.mrf.mxu0 }
 0x3b5   : > { %v3708_v10 = vadd.f32 %v3707_v57, %v8507_v32 }
 0x3b6   : > { %v3709_v43 = vpop.f32.mrf.mxu1  ;;  %v8628_v2 = vpop.f32.mrf.mxu0 }
 0x3b7   : > { %v8630_v31 = vadd.f32 %v3952_v46, %v3708_v10 }
 0x3b8   : > { %v3712_v20 = vpop.f32.mrf.mxu1  ;;  %v4226_v23 = vpop.f32.mrf.mxu0 }
 0x3b9   : > { %v3713_v24 = vadd.f32 %v3712_v20, %v8513_v13 }
 0x3ba   : > { %v3714_v52 = vpop.f32.mrf.mxu1  ;;  %v4229_v15 = vpop.f32.mrf.mxu0 }
 0x3bb   : > { %v8633_v38 = vadd.f32 %v6005_v42, %v3713_v24 }
 0x3bc   : > { %v3717_v62 = vpop.f32.mrf.mxu1  ;;  %v4231_v41 = vpop.f32.mrf.mxu0 }
 0x3bd   : > { %v3718_v30 = vadd.f32 %v3717_v62, %v8519_v26 }
 0x3be   : > { %v3719_v48 = vpop.f32.mrf.mxu1  ;;  %v8636_v45 = vpop.f32.mrf.mxu0 }
 0x3bf   : > { %v8638_v32 = vadd.f32 %v3962_v27, %v3718_v30 }
 0x3c0   : > { %v3722_v9 = vpop.f32.mrf.mxu1  ;;  %v4236_v46 = vpop.f32.mrf.mxu0 }
 0x3c1   : > { %v3723_v57 = vadd.f32 %v3722_v9, %v8523_v0 }
 0x3c2   : > { %v3724_v39 = vpop.f32.mrf.mxu1  ;;  %v4239_v10 = vpop.f32.mrf.mxu0 }
 0x3c3   : > { %v8641_v13 = vadd.f32 %v6008_v44, %v3723_v57  ;;  %v4746_v39 = vld [vmem:[%s6327_s25 + $0x8] sm:$0xff] }
 0x3c4   : > { %v3727_v43 = vpop.f32.mrf.mxu1  ;;  %v4241_v42 = vpop.f32.mrf.mxu0 }
 0x3c5   : > { %v3728_v20 = vadd.f32 %v3727_v43, %v8529_v5  ;;  %v8654_v5 = vld [vmem:[%s8820_s4] ss:$0 sm:$0xff] }
 0x3c6   : > { %v3729_v23 = vpop.f32.mrf.mxu1  ;;  %v8644_v24 = vpop.f32.mrf.mxu0 }
 0x3c7   : > { %v8646_v26 = vadd.f32 %v3972_v34, %v3728_v20  ;;  %v4745_v23 = vld [vmem:[%s6327_s25] sm:$0xff] }
 0x3c8   : > { %v3732_v27 = vpop.f32.mrf.mxu1  ;;  %v4246_v52 = vpop.f32.mrf.mxu0 }
 0x3c9   : > { %v3733_v62 = vadd.f32 %v3732_v27, %v8533_v54 }
 0x3ca   : > { %v3734_v41 = vpop.f32.mrf.mxu1  ;;  %v4249_v0 = vpop.f32.mrf.mxu0 }
 0x3cb   : > { %v8649_v30 = vadd.f32 %v6011_v56, %v3733_v62 }
 0x3cc   : > { %v4251_v44 = vpop.f32.mrf.mxu0  ;;  %v6046_v48 = vpop.f32.mrf.mxu1 }
 0x3cd   : > { %v4455_v9 = vadd.f32 %v6046_v48, %v4209_v3 }
 0x3ce   : > { %v8656_v46 = vpop.f32.mrf.mxu0  ;;  %v4449_v34 = vpop.f32.mrf.mxu1 }
 0x3cf   : > { %v4629_v57 = vadd.f32 %v4455_v9, %v8537_v47  ;;  %v4450_v54 = vadd.f32 %v4449_v34, %v8612_v6 }
 0x3d0   : > { %v4256_v43 = vpop.f32.mrf.mxu0  ;;  %v6049_v56 = vpop.f32.mrf.mxu1 }
 0x3d1   : > { %v4672_v42 = vadd.f32 %v8654_v5, %v4629_v57  ;;  %v4628_v3 = vadd.f32 %v4450_v54, %v8541_v16  ;;  %v4465_v20 = vadd.f32 %v6049_v56, %v4219_v7 }
 0x3d2   : > { %v4259_v27 = vpop.f32.mrf.mxu0  ;;  %v4459_v52 = vpop.f32.mrf.mxu1 }
 0x3d3   : > { %4708 = vst [vmem:[#allocation2 + $0x8] sm:$0xff] %v4672_v42  ;;  %v4748_v62 = vadd.f32 %v4746_v39, %v4672_v42  ;;  %v4671_v41 = vadd.f32 %v8654_v5, %v4628_v3  ;;  %v4631_v47 = vadd.f32 %v4465_v20, %v8544_v59  ;;  %v4460_v44 = vadd.f32 %v4459_v52, %v8620_v61 }
 0x3d4   : > { %v4261_v16 = vpop.f32.mrf.mxu0  ;;  %v6052_v6 = vpop.f32.mrf.mxu1 }
 0x3d5   : > { %v4750_v7 = vmax.f32 %v4748_v62, 0.0  ;;  %4707 = vst [vmem:[#allocation2] sm:$0xff] %v4671_v41  ;;  %v4747_v48 = vadd.f32 %v4745_v23, %v4671_v41  ;;  %v4674_v9 = vadd.f32 %v8654_v5, %v4631_v47  ;;  %v4630_v34 = vadd.f32 %v4460_v44, %v8548_v33  ;;  %v5206_v16 = vld [vmem:[%s6327_s25 + $0x10] sm:$0xff] }
 0x3d6   : > { %v4475_v59 = vadd.f32 %v6052_v6, %v4229_v15  ;;  %v8676_v57 = vpop.f32.mrf.mxu0  ;;  %v4469_v61 = vpop.f32.mrf.mxu1 }
 0x3d7   : > { %4752 = vst [vmem:[%s8672_s19 + $0x8] sm:$0xff] %v4750_v7  ;;  %v4749_v54 = vmax.f32 %v4747_v48, 0.0  ;;  %4710 = vst [vmem:[#allocation2 + $0x18] sm:$0xff] %v4674_v9  ;;  %v4673_v39 = vadd.f32 %v8654_v5, %v4630_v34  ;;  %v4470_v43 = vadd.f32 %v4469_v61, %v8628_v2  ;;  %v5218_v34 = vld [vmem:[%s6327_s25 + $0x40] sm:$0xff] }
 0x3d8   : > { %v4633_v56 = vadd.f32 %v4475_v59, %v8550_v4  ;;  %v4266_v42 = vpop.f32.mrf.mxu0  ;;  %v6055_v3 = vpop.f32.mrf.mxu1 }
 0x3d9   : > { %4751 = vst [vmem:[%s8672_s19] sm:$0xff] %v4749_v54  ;;  %4709 = vst [vmem:[#allocation2 + $0x10] sm:$0xff] %v4673_v39  ;;  %v4632_v33 = vadd.f32 %v4470_v43, %v8554_v19  ;;  %v4485_v15 = vadd.f32 %v6055_v3, %v4239_v10  ;;  %v5207_v43 = vld [vmem:[%s6327_s25 + $0x18] sm:$0xff] }
 0x3da   : > { %v4676_v20 = vadd.f32 %v8654_v5, %v4633_v56  ;;  %v4269_v23 = vpop.f32.mrf.mxu0  ;;  %v4479_v52 = vpop.f32.mrf.mxu1  ;;  %v5210_v56 = vld [vmem:[%s6327_s25 + $0x20] sm:$0xff] }
 0x3db   : > { %v4675_v62 = vadd.f32 %v8654_v5, %v4632_v33  ;;  %v4635_v41 = vadd.f32 %v4485_v15, %v8556_v51  ;;  %v4480_v2 = vadd.f32 %v4479_v52, %v8636_v45 }
 0x3dc   : > { %4712 = vst [vmem:[#allocation2 + $0x28] sm:$0xff] %v4676_v20  ;;  %v4271_v4 = vpop.f32.mrf.mxu0  ;;  %v6058_v47 = vpop.f32.mrf.mxu1 }
 0x3dd   : > { %4711 = vst [vmem:[#allocation2 + $0x20] sm:$0xff] %v4675_v62  ;;  %v4678_v44 = vadd.f32 %v8654_v5, %v4635_v41  ;;  %v4634_v19 = vadd.f32 %v4480_v2, %v8560_v25  ;;  %v4495_v10 = vadd.f32 %v6058_v47, %v4249_v0 }
 0x3de   : > { %v8691_v6 = vpop.f32.mrf.mxu0  ;;  %v4489_v7 = vpop.f32.mrf.mxu1 }
 0x3df   : > { %4714 = vst [vmem:[#allocation2 + $0x38] sm:$0xff] %v4678_v44  ;;  %v4677_v51 = vadd.f32 %v8654_v5, %v4634_v19  ;;  %v4637_v45 = vadd.f32 %v4495_v10, %v8562_v37  ;;  %v4490_v48 = vadd.f32 %v4489_v7, %v8644_v24  ;;  %v5211_v44 = vld [vmem:[%s6327_s25 + $0x28] sm:$0xff]  ;;  %v5214_v19 = vld [vmem:[%s6327_s25 + $0x30] sm:$0xff] }
 0x3e0   : > { %v4753_v9 = vld [vmem:[#allocation2 + $0x12] sm:$0xff]  ;;  %v4276_v59 = vpop.f32.mrf.mxu0  ;;  %v6061_v61 = vpop.f32.mrf.mxu1 }
 0x3e1   : > { %v4757_v54 = vadd.f32 %v5206_v16, %v4753_v9  ;;  %4713 = vst [vmem:[#allocation2 + $0x30] sm:$0xff] %v4677_v51  ;;  %v4680_v25 = vadd.f32 %v8654_v5, %v4637_v45  ;;  %v4636_v0 = vadd.f32 %v4490_v48, %v8565_v53  ;;  %v4505_v39 = vadd.f32 %v6061_v61, %v4259_v27  ;;  %v5219_v45 = vld [vmem:[%s6327_s25 + $0x48] sm:$0xff] }
 0x3e2   : > { %v4279_v42 = vpop.f32.mrf.mxu0  ;;  %v4499_v3 = vpop.f32.mrf.mxu1 }
 0x3e3   : > { %v4759_v33 = vmax.f32 %v4757_v54, 0.0  ;;  %4716 = vst [vmem:[#allocation2 + $0x48] sm:$0xff] %v4680_v25  ;;  %v4790_v37 = vadd.f32 %v5218_v34, %v4680_v25  ;;  %v4679_v24 = vadd.f32 %v8654_v5, %v4636_v0  ;;  %v4639_v15 = vadd.f32 %v4505_v39, %v8567_v12 }
 0x3e4   : > { %v4754_v20 = vld [vmem:[#allocation2 + $0x1a] sm:$0xff]  ;;  %v4764_v52 = vld [vmem:[#allocation2 + $0x24] sm:$0xff]  ;;  %v4500_v62 = vadd.f32 %v4499_v3, %v8656_v46  ;;  %v4281_v53 = vpop.f32.mrf.mxu0  ;;  %v6064_v27 = vpop.f32.mrf.mxu1 }
 0x3e5   : > { %5208 = vst [vmem:[%s8672_s19 + $0x10] sm:$0xff] %v4759_v33  ;;  %v4758_v41 = vadd.f32 %v5207_v43, %v4754_v20  ;;  %v4768_v2 = vadd.f32 %v5210_v56, %v4764_v52  ;;  %v4792_v4 = vmax.f32 %v4790_v37, 0.0  ;;  %4715 = vst [vmem:[#allocation2 + $0x40] sm:$0xff] %v4679_v24  ;;  %v4682_v47 = vadd.f32 %v8654_v5, %v4639_v15  ;;  %v5215_v43 = vld [vmem:[%s6327_s25 + $0x38] sm:$0xff] }
 0x3e6   : > { %v4638_v10 = vadd.f32 %v4500_v62, %v8570_v36  ;;  %v4515_v12 = vadd.f32 %v6064_v27, %v4269_v23  ;;  %v4284_v16 = vpop.f32.mrf.mxu0  ;;  %v4509_v46 = vpop.f32.mrf.mxu1 }
 0x3e7   : > { %v4760_v7 = vmax.f32 %v4758_v41, 0.0  ;;  %v4770_v51 = vmax.f32 %v4768_v2, 0.0  ;;  %5220 = vst [vmem:[%s8672_s19 + $0x40] sm:$0xff] %v4792_v4  ;;  %4718 = vst [vmem:[#allocation2 + $0x58] sm:$0xff] %v4682_v47  ;;  %v4510_v48 = vadd.f32 %v4509_v46, %v8676_v57 }
 0x3e8   : > { %v4765_v9 = vld [vmem:[#allocation2 + $0x2c] sm:$0xff]  ;;  %v4775_v34 = vld [vmem:[#allocation2 + $0x36] sm:$0xff]  ;;  %v4681_v59 = vadd.f32 %v8654_v5, %v4638_v10  ;;  %v4641_v61 = vadd.f32 %v4515_v12, %v8572_v50  ;;  %v4286_v36 = vpop.f32.mrf.mxu0  ;;  %v6067_v54 = vpop.f32.mrf.mxu1 }
 0x3e9   : > { %5209 = vst [vmem:[%s8672_s19 + $0x18] sm:$0xff] %v4760_v7  ;;  %5212 = vst [vmem:[%s8672_s19 + $0x20] sm:$0xff] %v4770_v51  ;;  %v4769_v23 = vadd.f32 %v5211_v44, %v4765_v9  ;;  %v4779_v25 = vadd.f32 %v5214_v19, %v4775_v34  ;;  %v4640_v0 = vadd.f32 %v4510_v48, %v8575_v1  ;;  %v5222_v51 = vld [vmem:[%s6327_s25 + $0x50] sm:$0xff] }
 0x3ea   : > { %v4525_v39 = vadd.f32 %v6067_v54, %v4279_v42  ;;  %4717 = vst [vmem:[#allocation2 + $0x50] sm:$0xff] %v4681_v59  ;;  %v4791_v57 = vadd.f32 %v5219_v45, %v4681_v59  ;;  %v4684_v56 = vadd.f32 %v8654_v5, %v4641_v61  ;;  %v4289_v3 = vpop.f32.mrf.mxu0  ;;  %v4519_v33 = vpop.f32.mrf.mxu1  ;;  %v5223_v45 = vld [vmem:[%s6327_s25 + $0x58] sm:$0xff] }
 0x3eb   : > { %v4771_v37 = vmax.f32 %v4769_v23, 0.0  ;;  %v4781_v50 = vmax.f32 %v4779_v25, 0.0  ;;  %v4683_v24 = vadd.f32 %v8654_v5, %v4640_v0  ;;  %v4520_v1 = vadd.f32 %v4519_v33, %v8691_v6  ;;  %v5235_v0 = vld [vmem:[%s6327_s25 + $0x88] sm:$0xff]  ;;  %v5226_v33 = vld [vmem:[%s6327_s25 + $0x60] sm:$0xff] }
 0x3ec   : > { %v4643_v15 = vadd.f32 %v4525_v39, %v8577_v55  ;;  %v4776_v20 = vld [vmem:[#allocation2 + $0x3e] sm:$0xff]  ;;  %v4793_v52 = vmax.f32 %v4791_v57, 0.0  ;;  %4720 = vst [vmem:[#allocation2 + $0x68] sm:$0xff] %v4684_v56  ;;  %v4291_v42 = vpop.f32.mrf.mxu0  ;;  %v6070_v62 = vpop.f32.mrf.mxu1 }
 0x3ed   : > { %5213 = vst [vmem:[%s8672_s19 + $0x28] sm:$0xff] %v4771_v37  ;;  %5216 = vst [vmem:[%s8672_s19 + $0x30] sm:$0xff] %v4781_v50  ;;  %v4780_v53 = vadd.f32 %v5215_v43, %v4776_v20  ;;  %v4535_v41 = vadd.f32 %v6070_v62, %v4289_v3  ;;  %v4642_v55 = vadd.f32 %v4520_v1, %v8580_v40  ;;  %v5234_v39 = vld [vmem:[%s6327_s25 + $0x80] sm:$0xff]  ;;  %v5227_v37 = vld [vmem:[%s6327_s25 + $0x68] sm:$0xff] }
 0x3ee   : > { %4719 = vst [vmem:[#allocation2 + $0x60] sm:$0xff] %v4683_v24  ;;  %v4686_v27 = vadd.f32 %v8654_v5, %v4643_v15  ;;  %5221 = vst [vmem:[%s8672_s19 + $0x48] sm:$0xff] %v4793_v52  ;;  %v4294_v2 = vpop.f32.mrf.mxu0  ;;  %v4529_v4 = vpop.f32.mrf.mxu1 }
 0x3ef   : > { %v4782_v47 = vmax.f32 %v4780_v53, 0.0  ;;  %v4645_v6 = vadd.f32 %v4535_v41, %v8585_v63  ;;  %v4530_v44 = vadd.f32 %v4529_v4, %v4284_v16  ;;  %v4685_v19 = vadd.f32 %v8654_v5, %v4642_v55  ;;  %v5230_v53 = vld [vmem:[%s6327_s25 + $0x70] sm:$0xff] }
 0x3f0   : > { %4722 = vst [vmem:[#allocation2 + $0x78] sm:$0xff] %v4686_v27  ;;  %v4296_v10 = vpop.f32.mrf.mxu0  ;;  %v6073_v12 = vpop.f32.mrf.mxu1  ;;  %v5231_v27 = vld [vmem:[%s6327_s25 + $0x78] sm:$0xff] }
 0x3f1   : > { %5217 = vst [vmem:[%s8672_s19 + $0x38] sm:$0xff] %v4782_v47  ;;  %v4688_v46 = vadd.f32 %v8654_v5, %v4645_v6  ;;  %v4644_v7 = vadd.f32 %v4530_v44, %v8583_v35  ;;  %4721 = vst [vmem:[#allocation2 + $0x70] sm:$0xff] %v4685_v19 }
 0x3f2   : > { %v4299_v40 = vpop.f32.mrf.mxu0  ;;  %v4539_v48 = vpop.f32.mrf.mxu1 }
 0x3f3   : > { %4724 = vst [vmem:[#allocation2 + $0x88] sm:$0xff] %v4688_v46  ;;  %v4687_v63 = vadd.f32 %v8654_v5, %v4644_v7  ;;  %v4545_v16 = vadd.f32 %v6073_v12, %v4299_v40  ;;  %v4540_v9 = vadd.f32 %v4539_v48, %v4294_v2 }
 0x3f4   : > { %v4301_v61 = vpop.f32.mrf.mxu0  ;;  %v6076_v36 = vpop.f32.mrf.mxu1 }
 0x3f5   : > { %v4797_v34 = vld [vmem:[#allocation2 + $0x5a] sm:$0xff]  ;;  %v4798_v59 = vld [vmem:[#allocation2 + $0x62] sm:$0xff]  ;;  %4723 = vst [vmem:[#allocation2 + $0x80] sm:$0xff] %v4687_v63  ;;  %v4647_v23 = vadd.f32 %v4545_v16, %v8591_v28  ;;  %v4646_v25 = vadd.f32 %v4540_v9, %v8588_v11 }
 0x3f6   : > { %v4801_v54 = vadd.f32 %v5222_v51, %v4797_v34  ;;  %v4802_v35 = vadd.f32 %v5223_v45, %v4798_v59  ;;  %v4304_v43 = vpop.f32.mrf.mxu0  ;;  %v4549_v57 = vpop.f32.mrf.mxu1 }
 0x3f7   : > { %v4690_v50 = vadd.f32 %v8654_v5, %v4647_v23  ;;  %v4689_v24 = vadd.f32 %v8654_v5, %v4646_v25  ;;  %v4550_v15 = vadd.f32 %v4549_v57, %v4304_v43 }
 0x3f8   : > { %v4803_v56 = vmax.f32 %v4801_v54, 0.0  ;;  %v4804_v3 = vmax.f32 %v4802_v35, 0.0  ;;  %v4306_v20 = vpop.f32.mrf.mxu0  ;;  %v4808_v28 = vld [vmem:[#allocation2 + $0x6c] sm:$0xff]  ;;  %v4809_v11 = vld [vmem:[#allocation2 + $0x74] sm:$0xff]  ;;  %v6079_v55 = vpop.f32.mrf.mxu1 }
 0x3f9   : > { %4726 = vst [vmem:[#allocation2 + $0x98] sm:$0xff] %v4690_v50  ;;  %v4835_v52 = vadd.f32 %v5235_v0, %v4690_v50  ;;  %4725 = vst [vmem:[#allocation2 + $0x90] sm:$0xff] %v4689_v24  ;;  %v4834_v1 = vadd.f32 %v5234_v39, %v4689_v24  ;;  %v4812_v42 = vadd.f32 %v5226_v33, %v4808_v28  ;;  %v5238_v0 = vld [vmem:[%s6327_s25 + $0x90] sm:$0xff]  ;;  %v5239_v50 = vld [vmem:[%s6327_s25 + $0x98] sm:$0xff] }
 0x3fa   : > { %5224 = vst [vmem:[%s8672_s19 + $0x50] sm:$0xff] %v4803_v56  ;;  %5225 = vst [vmem:[%s8672_s19 + $0x58] sm:$0xff] %v4804_v3  ;;  %v4813_v62 = vadd.f32 %v5227_v37, %v4809_v11  ;;  %v4648_v41 = vadd.f32 %v4550_v15, %v8594_v60  ;;  %v4309_v2 = vpop.f32.mrf.mxu0  ;;  %v4559_v40 = vpop.f32.mrf.mxu1 }
 0x3fb   : > { %v4837_v4 = vmax.f32 %v4835_v52, 0.0  ;;  %v4836_v47 = vmax.f32 %v4834_v1, 0.0  ;;  %v4555_v6 = vadd.f32 %v6076_v36, %v4309_v2  ;;  %v4814_v44 = vmax.f32 %v4812_v42, 0.0 }
 0x3fc   : > { %v4815_v19 = vmax.f32 %v4813_v62, 0.0  ;;  %v4819_v10 = vld [vmem:[#allocation2 + $0x7e] sm:$0xff]  ;;  %v4820_v12 = vld [vmem:[#allocation2 + $0x86] sm:$0xff]  ;;  %v4691_v46 = vadd.f32 %v8654_v5, %v4648_v41  ;;  %v4311_v7 = vpop.f32.mrf.mxu0  ;;  %v6082_v36 = vpop.f32.mrf.mxu1 }
 0x3fd   : > { %v4823_v51 = vadd.f32 %v5230_v53, %v4819_v10  ;;  %v4824_v45 = vadd.f32 %v5231_v27, %v4820_v12  ;;  %5237 = vst [vmem:[%s8672_s19 + $0x88] sm:$0xff] %v4837_v4  ;;  %5236 = vst [vmem:[%s8672_s19 + $0x80] sm:$0xff] %v4836_v47  ;;  %v4649_v60 = vadd.f32 %v4555_v6, %v8597_v49  ;;  %v5242_v62 = vld [vmem:[%s6327_s25 + $0xa0] sm:$0xff] }
 0x3fe   : > { %5228 = vst [vmem:[%s8672_s19 + $0x60] sm:$0xff] %v4814_v44  ;;  %5229 = vst [vmem:[%s8672_s19 + $0x68] sm:$0xff] %v4815_v19  ;;  %v4314_v48 = vpop.f32.mrf.mxu0  ;;  %v4569_v39 = vpop.f32.mrf.mxu1  ;;  %v5243_v19 = vld [vmem:[%s6327_s25 + $0xa8] sm:$0xff] }
 0x3ff   : > { %4727 = vst [vmem:[#allocation2 + $0xa0] sm:$0xff] %v4691_v46  ;;  %v4825_v63 = vmax.f32 %v4823_v51, 0.0  ;;  %v4826_v16 = vmax.f32 %v4824_v45, 0.0  ;;  %v4692_v9 = vadd.f32 %v8654_v5, %v4649_v60  ;;  %v4560_v34 = vadd.f32 %v4559_v40, %v4314_v48  ;;  %v5246_v48 = vld [vmem:[%s6327_s25 + $0xb0] sm:$0xff] }
 0x400   : > { %v4316_v59 = vpop.f32.mrf.mxu0  ;;  %v6085_v24 = vpop.f32.mrf.mxu1 }
 0x401   : > { %5232 = vst [vmem:[%s8672_s19 + $0x70] sm:$0xff] %v4825_v63  ;;  %5233 = vst [vmem:[%s8672_s19 + $0x78] sm:$0xff] %v4826_v16  ;;  %v4650_v61 = vadd.f32 %v4560_v34, %v8600_v17 }
 0x402   : > { %4728 = vst [vmem:[#allocation2 + $0xa8] sm:$0xff] %v4692_v9  ;;  %v4319_v54 = vpop.f32.mrf.mxu0  ;;  %v4579_v53 = vpop.f32.mrf.mxu1 }
 0x403   : > { %v4693_v49 = vadd.f32 %v8654_v5, %v4650_v61  ;;  %v4565_v35 = vadd.f32 %v6079_v55, %v4319_v54 }
 0x404   : > { %v4321_v23 = vpop.f32.mrf.mxu0  ;;  %v6088_v44 = vpop.f32.mrf.mxu1 }
 0x405   : > { %4729 = vst [vmem:[#allocation2 + $0xb0] sm:$0xff] %v4693_v49  ;;  %v4651_v25 = vadd.f32 %v4565_v35, %v8603_v58  ;;  %v5247_v35 = vld [vmem:[%s6327_s25 + $0xb8] sm:$0xff]  ;;  %v5251_v23 = vld [vmem:[%s6327_s25 + $0xc8] sm:$0xff] }
 0x406   : > { %v4324_v43 = vpop.f32.mrf.mxu0  ;;  %v4589_v40 = vpop.f32.mrf.mxu1 }
 0x407   : > { %v4694_v57 = vadd.f32 %v8654_v5, %v4651_v25  ;;  %v4570_v56 = vadd.f32 %v4569_v39, %v4324_v43 }
 0x408   : > { %v4326_v33 = vpop.f32.mrf.mxu0  ;;  %v6091_v49 = vpop.f32.mrf.mxu1 }
 0x409   : > { %v4841_v3 = vld [vmem:[#allocation2 + $0xa2] sm:$0xff]  ;;  %4730 = vst [vmem:[#allocation2 + $0xb8] sm:$0xff] %v4694_v57  ;;  %v4652_v37 = vadd.f32 %v4570_v56, %v8606_v8 }
 0x40a   : > { %v4845_v17 = vadd.f32 %v5238_v0, %v4841_v3  ;;  %v4329_v15 = vpop.f32.mrf.mxu0 }
 0x40b   : > { %v4695_v58 = vadd.f32 %v8654_v5, %v4652_v37  ;;  %v4575_v28 = vadd.f32 %v6082_v36, %v4329_v15  ;;  %v4599_v37 = vpop.f32.mrf.mxu1 }
 0x40c   : > { %v4847_v20 = vmax.f32 %v4845_v17, 0.0  ;;  %v4842_v11 = vld [vmem:[#allocation2 + $0xaa] sm:$0xff]  ;;  %v4331_v52 = vpop.f32.mrf.mxu0 }
 0x40d   : > { %v4846_v1 = vadd.f32 %v5239_v50, %v4842_v11  ;;  %4731 = vst [vmem:[#allocation2 + $0xc0] sm:$0xff] %v4695_v58  ;;  %v4653_v42 = vadd.f32 %v4575_v28, %v8609_v22  ;;  %v6094_v52 = vpop.f32.mrf.mxu1 }
 0x40e   : > { %5240 = vst [vmem:[%s8672_s19 + $0x90] sm:$0xff] %v4847_v20  ;;  %v4334_v27 = vpop.f32.mrf.mxu0 }
 0x40f   : > { %v4848_v8 = vmax.f32 %v4846_v1, 0.0  ;;  %v4696_v41 = vadd.f32 %v8654_v5, %v4653_v42  ;;  %v4580_v55 = vadd.f32 %v4579_v53, %v4334_v27  ;;  %v4609_v27 = vpop.f32.mrf.mxu1 }
 0x410   : > { %v4852_v2 = vld [vmem:[#allocation2 + $0xb4] sm:$0xff]  ;;  %v4336_v4 = vpop.f32.mrf.mxu0 }
 0x411   : > { %5241 = vst [vmem:[%s8672_s19 + $0x98] sm:$0xff] %v4848_v8  ;;  %v4856_v47 = vadd.f32 %v5242_v62, %v4852_v2  ;;  %4732 = vst [vmem:[#allocation2 + $0xc8] sm:$0xff] %v4696_v41  ;;  %v4654_v6 = vadd.f32 %v4580_v55, %v8614_v18  ;;  %v5250_v18 = vld [vmem:[%s6327_s25 + $0xc0] sm:$0xff]  ;;  %v6097_v4 = vpop.f32.mrf.mxu1 }
 0x412   : > { %v4339_v22 = vpop.f32.mrf.mxu0 }
 0x413   : > { %v4858_v10 = vmax.f32 %v4856_v47, 0.0  ;;  %v4697_v12 = vadd.f32 %v8654_v5, %v4654_v6  ;;  %v4585_v46 = vadd.f32 %v6085_v24, %v4339_v22  ;;  %v5254_v47 = vld [vmem:[%s6327_s25 + $0xd0] sm:$0xff] }
 0x414   : > { %v4853_v7 = vld [vmem:[#allocation2 + $0xbc] sm:$0xff]  ;;  %v4341_v51 = vpop.f32.mrf.mxu0 }
 0x415   : > { %5244 = vst [vmem:[%s8672_s19 + $0xa0] sm:$0xff] %v4858_v10  ;;  %v4857_v45 = vadd.f32 %v5243_v19, %v4853_v7  ;;  %4733 = vst [vmem:[#allocation2 + $0xd0] sm:$0xff] %v4697_v12  ;;  %v4655_v60 = vadd.f32 %v4585_v46, %v8617_v14  ;;  %v5255_v7 = vld [vmem:[%s6327_s25 + $0xd8] sm:$0xff] }
 0x416   : > { %v4344_v63 = vpop.f32.mrf.mxu0 }
 0x417   : > { %v4859_v16 = vmax.f32 %v4857_v45, 0.0  ;;  %v4698_v9 = vadd.f32 %v8654_v5, %v4655_v60  ;;  %v4590_v34 = vadd.f32 %v4589_v40, %v4344_v63 }
 0x418   : > { %v4863_v59 = vld [vmem:[#allocation2 + $0xc6] sm:$0xff]  ;;  %v4346_v61 = vpop.f32.mrf.mxu0 }
 0x419   : > { %5245 = vst [vmem:[%s8672_s19 + $0xa8] sm:$0xff] %v4859_v16  ;;  %v4867_v36 = vadd.f32 %v5246_v48, %v4863_v59  ;;  %4734 = vst [vmem:[#allocation2 + $0xd8] sm:$0xff] %v4698_v9  ;;  %v4878_v54 = vadd.f32 %v5250_v18, %v4698_v9  ;;  %v4656_v14 = vadd.f32 %v4590_v34, %v8622_v29  ;;  %v5258_v16 = vld [vmem:[%s6327_s25 + $0xe0] sm:$0xff] }
 0x41a   : > { %v4349_v25 = vpop.f32.mrf.mxu0 }
 0x41b   : > { %v4869_v0 = vmax.f32 %v4867_v36, 0.0  ;;  %v4880_v39 = vmax.f32 %v4878_v54, 0.0  ;;  %v4699_v43 = vadd.f32 %v8654_v5, %v4656_v14  ;;  %v4595_v57 = vadd.f32 %v6088_v44, %v4349_v25 }
 0x41c   : > { %v4864_v56 = vld [vmem:[#allocation2 + $0xce] sm:$0xff]  ;;  %v4351_v3 = vpop.f32.mrf.mxu0 }
 0x41d   : > { %5248 = vst [vmem:[%s8672_s19 + $0xb0] sm:$0xff] %v4869_v0  ;;  %v4868_v33 = vadd.f32 %v5247_v35, %v4864_v56  ;;  %5252 = vst [vmem:[%s8672_s19 + $0xc0] sm:$0xff] %v4880_v39  ;;  %v4879_v17 = vadd.f32 %v5251_v23, %v4699_v43  ;;  %v4657_v29 = vadd.f32 %v4595_v57, %v8625_v21  ;;  %v5262_v0 = vld [vmem:[%s6327_s25 + $0xf0] sm:$0xff]  ;;  %v5263_v56 = vld [vmem:[%s6327_s25 + $0xf8] sm:$0xff] }
 0x41e   : > { %4735 = vst [vmem:[#allocation2 + $0xe0] sm:$0xff] %v4699_v43  ;;  %v4354_v50 = vpop.f32.mrf.mxu0 }
 0x41f   : > { %v4870_v24 = vmax.f32 %v4868_v33, 0.0  ;;  %v4881_v15 = vmax.f32 %v4879_v17, 0.0  ;;  %v4700_v20 = vadd.f32 %v8654_v5, %v4657_v29  ;;  %v4600_v58 = vadd.f32 %v4599_v37, %v4354_v50 }
 0x420   : > { %v4356_v28 = vpop.f32.mrf.mxu0 }
 0x421   : > { %5249 = vst [vmem:[%s8672_s19 + $0xb8] sm:$0xff] %v4870_v24  ;;  %5253 = vst [vmem:[%s8672_s19 + $0xc8] sm:$0xff] %v4881_v15  ;;  %v4658_v11 = vadd.f32 %v4600_v58, %v8630_v31 }
 0x422   : > { %4736 = vst [vmem:[#allocation2 + $0xe8] sm:$0xff] %v4700_v20  ;;  %v4359_v1 = vpop.f32.mrf.mxu0 }
 0x423   : > { %v4701_v42 = vadd.f32 %v8654_v5, %v4658_v11  ;;  %v4605_v62 = vadd.f32 %v6091_v49, %v4359_v1  ;;  %v5259_v49 = vld [vmem:[%s6327_s25 + $0xe8] sm:$0xff] }
 0x424   : > { %v4361_v21 = vpop.f32.mrf.mxu0 }
 0x425   : > { %4737 = vst [vmem:[#allocation2 + $0xf0] sm:$0xff] %v4701_v42  ;;  %v4659_v53 = vadd.f32 %v4605_v62, %v8633_v38  ;;  %v4619_v38 = vpop.f32.mrf.mxu1 }
 0x426   : > { %v4364_v8 = vpop.f32.mrf.mxu0 }
 0x427   : > { %v4702_v41 = vadd.f32 %v8654_v5, %v4659_v53  ;;  %v4610_v55 = vadd.f32 %v4609_v27, %v4364_v8 }
 0x428   : > { %v4366_v2 = vpop.f32.mrf.mxu0 }
 0x429   : > { %4738 = vst [vmem:[#allocation2 + $0xf8] sm:$0xff] %v4702_v41  ;;  %v4660_v31 = vadd.f32 %v4610_v55, %v8638_v32 }
 0x42a   : > { %v4369_v6 = vpop.f32.mrf.mxu0 }
 0x42b   : > { %v4703_v44 = vadd.f32 %v8654_v5, %v4660_v31  ;;  %v4615_v19 = vadd.f32 %v6094_v52, %v4369_v6 }
 0x42c   : > { %v4885_v22 = vld [vmem:[#allocation2 + $0xea] sm:$0xff]  ;;  %v4371_v10 = vpop.f32.mrf.mxu0 }
 0x42d   : > { %v4889_v12 = vadd.f32 %v5254_v47, %v4885_v22  ;;  %4739 = vst [vmem:[#allocation2 + $0x100] sm:$0xff] %v4703_v44  ;;  %v4661_v46 = vadd.f32 %v4615_v19, %v8641_v13 }
 0x42e   : > { %v4374_v51 = vpop.f32.mrf.mxu0 }
 0x42f   : > { %v4891_v45 = vmax.f32 %v4889_v12, 0.0  ;;  %v4704_v32 = vadd.f32 %v8654_v5, %v4661_v46  ;;  %v4620_v60 = vadd.f32 %v4619_v38, %v4374_v51 }
 0x430   : > { %v4886_v40 = vld [vmem:[#allocation2 + $0xf2] sm:$0xff]  ;;  %v4376_v48 = vpop.f32.mrf.mxu0 }
 0x431   : > { %5256 = vst [vmem:[%s8672_s19 + $0xd0] sm:$0xff] %v4891_v45  ;;  %v4890_v18 = vadd.f32 %v5255_v7, %v4886_v40  ;;  %4740 = vst [vmem:[#allocation2 + $0x108] sm:$0xff] %v4704_v32  ;;  %v4662_v63 = vadd.f32 %v4620_v60, %v8646_v26 }
 0x432   : > { %v4379_v9 = vpop.f32.mrf.mxu0 }
 0x433   : > { %v4892_v34 = vmax.f32 %v4890_v18, 0.0  ;;  %v4705_v13 = vadd.f32 %v8654_v5, %v4662_v63  ;;  %v4625_v59 = vadd.f32 %v6097_v4, %v4379_v9 }
 0x434   : > { %v4896_v61 = vld [vmem:[#allocation2 + $0xfc] sm:$0xff]  ;;  %v4381_v36 = vpop.f32.mrf.mxu0 }
 0x435   : > { %5257 = vst [vmem:[%s8672_s19 + $0xd8] sm:$0xff] %v4892_v34  ;;  %v4900_v54 = vadd.f32 %v5258_v16, %v4896_v61  ;;  %4741 = vst [vmem:[#allocation2 + $0x110] sm:$0xff] %v4705_v13  ;;  %v4663_v14 = vadd.f32 %v4625_v59, %v8649_v30 }
 0x437   : > { %v4902_v26 = vmax.f32 %v4900_v54, 0.0  ;;  %v4706_v35 = vadd.f32 %v8654_v5, %v4663_v14 }
 0x438   : > { %v4897_v23 = vld [vmem:[#allocation2 + $0x104] sm:$0xff] }
 0x439   : > { %5260 = vst [vmem:[%s8672_s19 + $0xe0] sm:$0xff] %v4902_v26  ;;  %v4901_v25 = vadd.f32 %v5259_v49, %v4897_v23  ;;  %4742 = vst [vmem:[#allocation2 + $0x118] sm:$0xff] %v4706_v35 }
 0x43b   : > { %v4903_v39 = vmax.f32 %v4901_v25, 0.0 }
 0x43c   : > { %v4907_v43 = vld [vmem:[#allocation2 + $0x10e] sm:$0xff] }
 0x43d   : > { %5261 = vst [vmem:[%s8672_s19 + $0xe8] sm:$0xff] %v4903_v39  ;;  %v4911_v57 = vadd.f32 %v5262_v0, %v4907_v43 }
 0x43f   : > { %v4913_v3 = vmax.f32 %v4911_v57, 0.0 }
 0x440   : > { %v4908_v33 = vld [vmem:[#allocation2 + $0x116] sm:$0xff] }
 0x441   : > { %5264 = vst [vmem:[%s8672_s19 + $0xf0] sm:$0xff] %v4913_v3  ;;  %v4912_v30 = vadd.f32 %v5263_v56, %v4908_v33 }
 0x443   : > { %v4914_v17 = vmax.f32 %v4912_v30, 0.0 }
 0x445   : > { %5265 = vst [vmem:[%s8672_s19 + $0xf8] sm:$0xff] %v4914_v17 }
 0x446 PF: > { %s16_s21 = sadd.s32 1, %s6135_s21  }
 0x447   : > { %p13_p4 = scmp.ge.s32.totalorder %s16_s21, 4  }
 0x449   :  { %15 = sbr.rel (!%p13_p4) target bundleno = 1 (0x1), region = 108 }

</bundles_post_ra>
